<compile_context>
chip_gen: v7x
topology: tpu7x:2x2x1
jax: 0.10.0
libtpu: 0.0.40
codegen_flags: <defaults>
</compile_context>

<pallas_src>
import functools

import jax
import jax.numpy as jnp
from jax.experimental import pallas as pl
from jax.experimental.pallas import tpu as pltpu

EPS = 1e-5
CP = 128          # lane-dense padded channel width (128 lanes per vreg)


# ------------------------------ kernel helpers ------------------------------ #

def _bn_train(y, gamma, beta):
    """Training-mode BatchNorm over rows, single-pass (sum + sum-of-squares).

    Padded (zero) channels have gamma = beta = 0, so they stay exactly zero.
    """
    inv_m = 1.0 / y.shape[0]
    s = jnp.sum(y, axis=0, keepdims=True)
    ss = jnp.sum(y * y, axis=0, keepdims=True)
    mean = s * inv_m
    var = ss * inv_m - mean * mean
    scale = jax.lax.rsqrt(var + EPS) * gamma
    return y * scale + (beta - mean * scale)


# ------------------------- fused per-time-step kernels ----------------------- #

def _corblock_first_kernel(xph_ref, w1in_ref, wskin_ref, w2_ref, w3_ref,
                           g1_ref, b1_ref, g2_ref, b2_ref, g3_ref, b3_ref,
                           gsk_ref, bsk_ref,
                           o_ref, pad0, pad1, pad2, pad3, cols_ref,
                           *, n, hq, wq):
    """t == 0 (stride-2) step, fully fused, conv_input folded in.

    xph_ref holds the 4 spatial polyphase components of the (channel-padded,
    bf16) input, so every 3x3/stride-2 tap below is a contiguous slice of a
    one-side zero-padded bf16 VMEM buffer.
    """
    cp = w1in_ref.shape[1]
    mq = n * hq * wq
    pads = [pad0, pad1, pad2, pad3]

    # conv1 (conv_input folded in) on each polyphase component.
    xph = [xph_ref[p] for p in range(4)]
    z = [jnp.dot(xp, w1in_ref[...], preferred_element_type=jnp.float32)
         for xp in xph]

    # BN1: single-pass global stats over all 4 phases (= all N*H*W positions).
    inv_total = 1.0 / (4.0 * mq)
    s = sum(jnp.sum(zp, axis=0, keepdims=True) for zp in z)
    ss = sum(jnp.sum(zp * zp, axis=0, keepdims=True) for zp in z)
    m1 = s * inv_total
    v1 = ss * inv_total - m1 * m1
    scale1 = jax.lax.rsqrt(v1 + EPS) * g1_ref[...]
    bias1 = b1_ref[...] - m1 * scale1

    # Normalize + ReLU each phase; write bf16 into its one-side zero-padded
    # buffer (halo-only zeroing: first pad row + first pad column).
    for p in range(4):
        pads[p][:, 0:1, :, :] = jnp.zeros((n, 1, wq + 1, cp), jnp.bfloat16)
        pads[p][:, :, 0:1, :] = jnp.zeros((n, hq + 1, 1, cp), jnp.bfloat16)
        yp = jnp.maximum(z[p] * scale1 + bias1, 0.0)
        pads[p][:, 1:hq + 1, 1:wq + 1, :] = (
            yp.reshape(n, hq, wq, cp).astype(jnp.bfloat16))

    # conv2: 3x3, stride 2, padding 1 -- single im2col matmul with K = 9*cp.
    # Tap (dh, dw) reads input rows 2*ho + dh - 1 / cols 2*wo + dw - 1, which
    # live entirely inside one polyphase buffer at a contiguous offset.
    k = 0
    for dh in range(3):
        for dw in range(3):
            pr = 0 if dh == 1 else 1          # row parity of the tap
            pc = 0 if dw == 1 else 1          # col parity of the tap
            sh = 0 if dh == 0 else 1          # start row in the padded buffer
            sw = 0 if dw == 0 else 1          # start col in the padded buffer
            tap = pads[2 * pr + pc][:, sh:sh + hq, sw:sw + wq, :]
            cols_ref[:, k * cp:(k + 1) * cp] = tap.reshape(mq, cp)
            k += 1
    y2 = jnp.dot(cols_ref[...], w2_ref[...],
                 preferred_element_type=jnp.float32)
    y2 = jnp.maximum(_bn_train(y2, g2_ref[...], b2_ref[...]), 0.0)

    # conv3 (1x1) + BN3.
    y3 = _bn_train(jnp.dot(y2.astype(jnp.bfloat16), w3_ref[...],
                           preferred_element_type=jnp.float32),
                   g3_ref[...], b3_ref[...])

    # skip branch: stride-2 1x1 conv (conv_input folded in) == matmul on the
    # even/even polyphase component, then norm_skip (no ReLU before the add).
    skip = _bn_train(jnp.dot(xph[0], wskin_ref[...],
                             preferred_element_type=jnp.float32),
                     gsk_ref[...], bsk_ref[...])

    o_ref[...] = jnp.maximum(y3 + skip, 0.0)


def _corblock_step_kernel(x0_ref, w1_ref, w2_ref, w3_ref,
                          g1_ref, b1_ref, g2_ref, b2_ref, g3_ref, b3_ref,
                          o_ref, state_ref, ypad_ref, cols_ref, *, n, h, w):
    """t >= 1 (stride-1) steps, time-fused over grid axis 0; skip = state."""
    cp = w1_ref.shape[1]
    m = n * h * w
    t = pl.program_id(0)

    @pl.when(t == 0)
    def _():
        # Loop-carried block state lives in VMEM scratch across the time axis.
        state_ref[...] = x0_ref[...]
        # Halo-only zeroing of the padded conv2 input buffer, once.
        ypad_ref[:, 0:1, :, :] = jnp.zeros((n, 1, w + 2, cp), jnp.bfloat16)
        ypad_ref[:, h + 1:h + 2, :, :] = jnp.zeros((n, 1, w + 2, cp),
                                                   jnp.bfloat16)
        ypad_ref[:, :, 0:1, :] = jnp.zeros((n, h + 2, 1, cp), jnp.bfloat16)
        ypad_ref[:, :, w + 1:w + 2, :] = jnp.zeros((n, h + 2, 1, cp),
                                                   jnp.bfloat16)

    x = state_ref[...]                              # (m, cp) f32, skip branch

    # conv1 (1x1) + BN1 + ReLU.
    y1 = jnp.dot(x.astype(jnp.bfloat16), w1_ref[...],
                 preferred_element_type=jnp.float32)
    y1 = jnp.maximum(_bn_train(y1, g1_ref[0], b1_ref[0]), 0.0)

    # bf16 interior of the padded buffer (halo already zero).
    ypad_ref[:, 1:h + 1, 1:w + 1, :] = (
        y1.reshape(n, h, w, cp).astype(jnp.bfloat16))

    # conv2: 3x3, stride 1, padding 1 -- single im2col matmul with K = 9*cp.
    k = 0
    for dh in range(3):
        for dw in range(3):
            tap = ypad_ref[:, dh:dh + h, dw:dw + w, :]
            cols_ref[:, k * cp:(k + 1) * cp] = tap.reshape(m, cp)
            k += 1
    y2 = jnp.dot(cols_ref[...], w2_ref[...],
                 preferred_element_type=jnp.float32)
    y2 = jnp.maximum(_bn_train(y2, g2_ref[0], b2_ref[0]), 0.0)

    # conv3 (1x1) + BN3 + residual add + ReLU.
    y3 = _bn_train(jnp.dot(y2.astype(jnp.bfloat16), w3_ref[...],
                           preferred_element_type=jnp.float32),
                   g3_ref[0], b3_ref[0])
    state_ref[...] = jnp.maximum(y3 + x, 0.0)

    # Output block index is constant across the axis -> write back once.
    @pl.when(t == pl.num_programs(0) - 1)
    def _():
        o_ref[...] = state_ref[...]


# ------------------------------ pallas_call glue ---------------------------- #

def _full_spec(shape):
    # Whole array as a single resident block (BN needs full-batch statistics
    # and the fused time step fits comfortably in VMEM at these shapes).
    return pl.BlockSpec(shape, lambda i: (0,) * len(shape))


def _corblock_first_call(xph, params, n, hq, wq):
    cp = params['conv1_in'].shape[1]
    mq = n * hq * wq
    args = (xph, params['conv1_in'], params['skip_in'], params['conv2'],
            params['conv3'],
            params['norm1_0_g'], params['norm1_0_b'],
            params['norm2_0_g'], params['norm2_0_b'],
            params['norm3_0_g'], params['norm3_0_b'],
            params['norm_skip_g'], params['norm_skip_b'])
    return pl.pallas_call(
        functools.partial(_corblock_first_kernel, n=n, hq=hq, wq=wq),
        out_shape=jax.ShapeDtypeStruct((mq, cp), jnp.float32),
        grid=(1,),
        in_specs=[_full_spec(a.shape) for a in args],
        out_specs=_full_spec((mq, cp)),
        scratch_shapes=(
            [pltpu.VMEM((n, hq + 1, wq + 1, cp), jnp.bfloat16)
             for _ in range(4)]
            + [pltpu.VMEM((mq, 9 * cp), jnp.bfloat16)]),
        compiler_params=pltpu.CompilerParams(
            dimension_semantics=("arbitrary",)),
    )(*args)


def _corblock_steps_call(x2d, params, times, n, h, w):
    cp = params['conv1'].shape[1]
    m = n * h * w
    nt = times - 1

    def const_spec(shape):
        return pl.BlockSpec(shape, lambda t: (0,) * len(shape))

    # Per-time-step BN affine params selected via the index_map.
    tspec = pl.BlockSpec((1, 1, cp), lambda t: (t, 0, 0))

    args = (x2d, params['conv1'], params['conv2'], params['conv3'],
            params['norm1_g'], params['norm1_b'],
            params['norm2_g'], params['norm2_b'],
            params['norm3_g'], params['norm3_b'])
    in_specs = [const_spec(x2d.shape),
                const_spec(params['conv1'].shape),
                const_spec(params['conv2'].shape),
                const_spec(params['conv3'].shape),
                tspec, tspec, tspec, tspec, tspec, tspec]
    return pl.pallas_call(
        functools.partial(_corblock_step_kernel, n=n, h=h, w=w),
        out_shape=jax.ShapeDtypeStruct((m, cp), jnp.float32),
        grid=(nt,),
        in_specs=in_specs,
        out_specs=const_spec((m, cp)),
        scratch_shapes=[pltpu.VMEM((m, cp), jnp.float32),
                        pltpu.VMEM((n, h + 2, w + 2, cp), jnp.bfloat16),
                        pltpu.VMEM((m, 9 * cp), jnp.bfloat16)],
        compiler_params=pltpu.CompilerParams(
            dimension_semantics=("arbitrary",)),
    )(*args)


# ------------------------------ CORblock_S forward -------------------------- #

def corblock_s_forward(inp_nchw, params, *, times, out_channels):
    assert times >= 1
    x = jnp.transpose(inp_nchw, (0, 2, 3, 1)).astype(jnp.float32)  # NCHW->NHWC
    n, h, w, cin = x.shape
    assert h % 2 == 0 and w % 2 == 0
    hq, wq = h // 2, w // 2
    mq = n * hq * wq
    cp = params['conv1'].shape[1]

    # Lane-dense channel pad + spatial polyphase split (bf16) feeding the
    # stride-2 t==0 kernel, so all its 3x3 taps are contiguous slices.
    xp = jnp.pad(x, ((0, 0), (0, 0), (0, 0), (0, cp - cin)))
    xph = jnp.stack([xp[:, pr::2, pc::2, :].reshape(mq, cp)
                     for pr in (0, 1) for pc in (0, 1)]).astype(jnp.bfloat16)

    x2d = _corblock_first_call(xph, params, n, hq, wq)            # t == 0
    if times > 1:
        x2d = _corblock_steps_call(x2d, params, times, n, hq, wq)  # t >= 1

    out = x2d[:, :out_channels].reshape(n, hq, wq, out_channels)
    return jnp.transpose(out, (0, 3, 1, 2))                        # NHWC->NCHW


# ----------------------------------- main ----------------------------------- #

if __name__ == "__main__":
    key = jax.random.PRNGKey(0)
    in_channels, out_channels, times = 4, 8, 2
    scale = 4
    C4 = out_channels * scale
    N, H, W = 2, 16, 16

    keys = jax.random.split(key, 20)

    def conv_w(k, cout, cin, kh, kw):
        # deterministic kaiming-ish init; PyTorch layout (Cout, Cin, kh, kw)
        fan_in = cin * kh * kw
        return jax.random.normal(k, (cout, cin, kh, kw),
                                 jnp.float32) * (2.0 / fan_in) ** 0.5

    def pad_mat(m, rows, cols):
        return jnp.zeros((rows, cols), m.dtype).at[:m.shape[0],
                                                   :m.shape[1]].set(m)

    w_conv_input = conv_w(keys[0], out_channels, in_channels, 1, 1)
    w_skip = conv_w(keys[1], out_channels, out_channels, 1, 1)
    w_conv1 = conv_w(keys[2], C4, out_channels, 1, 1)
    w_conv2 = conv_w(keys[3], C4, C4, 3, 3)
    w_conv3 = conv_w(keys[4], out_channels, C4, 1, 1)

    # 1x1 conv weights as (Cin, Cout) matmul matrices.
    win_mat = w_conv_input[:, :, 0, 0].T        # (Cin, Cout)
    wskip_mat = w_skip[:, :, 0, 0].T            # (Cout, Cout)
    w1_mat = w_conv1[:, :, 0, 0].T              # (Cout, C4)
    w3_mat = w_conv3[:, :, 0, 0].T              # (C4, Cout)
    # 3x3 conv weight as 9 per-tap (Cin, Cout) matrices, tap index = 3*dh + dw,
    # embedded lane-dense into a (9*CP, CP) im2col weight.
    w2_taps = jnp.transpose(w_conv2, (2, 3, 1, 0)).reshape(9, C4, C4)
    w2_pad = jnp.zeros((9, CP, CP), jnp.float32).at[:, :C4, :C4].set(w2_taps)

    params = {
        # conv_input folded into the t==0 conv1 / skip weights (exact: all 1x1,
        # bias-free, no nonlinearity in between).  Fold in f32, store bf16,
        # zero-padded to CP=128 lanes on both axes.
        'conv1_in': pad_mat(win_mat @ w1_mat, CP, CP).astype(jnp.bfloat16),
        'skip_in': pad_mat(win_mat @ wskip_mat, CP, CP).astype(jnp.bfloat16),
        'conv1': pad_mat(w1_mat, CP, CP).astype(jnp.bfloat16),
        'conv2': w2_pad.reshape(9 * CP, CP).astype(jnp.bfloat16),
        'conv3': pad_mat(w3_mat, CP, CP).astype(jnp.bfloat16),
        # BatchNorm affine params stay f32; padded channels get gamma=beta=0.
        'norm_skip_g': pad_mat((1.0 + 0.1 * jax.random.normal(
            keys[5], (1, out_channels))).astype(jnp.float32), 1, CP),
        'norm_skip_b': pad_mat((0.1 * jax.random.normal(
            keys[6], (1, out_channels))).astype(jnp.float32), 1, CP),
    }

    norm = {}
    for t in range(times):
        norm[f'n1g_{t}'] = pad_mat((1.0 + 0.1 * jax.random.normal(
            keys[7 + t], (1, C4))).astype(jnp.float32), 1, CP)
        norm[f'n1b_{t}'] = pad_mat((0.1 * jax.random.normal(
            keys[9 + t], (1, C4))).astype(jnp.float32), 1, CP)
        norm[f'n2g_{t}'] = pad_mat((1.0 + 0.1 * jax.random.normal(
            keys[11 + t], (1, C4))).astype(jnp.float32), 1, CP)
        norm[f'n2b_{t}'] = pad_mat((0.1 * jax.random.normal(
            keys[13 + t], (1, C4))).astype(jnp.float32), 1, CP)
        norm[f'n3g_{t}'] = pad_mat((1.0 + 0.1 * jax.random.normal(
            keys[15 + t], (1, out_channels))).astype(jnp.float32), 1, CP)
        norm[f'n3b_{t}'] = pad_mat((0.1 * jax.random.normal(
            keys[17 + t], (1, out_channels))).astype(jnp.float32), 1, CP)

    # t == 0 params (used by the stride-2 first kernel).
    params['norm1_0_g'], params['norm1_0_b'] = norm['n1g_0'], norm['n1b_0']
    params['norm2_0_g'], params['norm2_0_b'] = norm['n2g_0'], norm['n2b_0']
    params['norm3_0_g'], params['norm3_0_b'] = norm['n3g_0'], norm['n3b_0']

    # t >= 1 params, stacked along the fused time axis.
    if times > 1:
        params['norm1_g'] = jnp.stack([norm[f'n1g_{t}'] for t in range(1, times)])
        params['norm1_b'] = jnp.stack([norm[f'n1b_{t}'] for t in range(1, times)])
        params['norm2_g'] = jnp.stack([norm[f'n2g_{t}'] for t in range(1, times)])
        params['norm2_b'] = jnp.stack([norm[f'n2b_{t}'] for t in range(1, times)])
        params['norm3_g'] = jnp.stack([norm[f'n3g_{t}'] for t in range(1, times)])
        params['norm3_b'] = jnp.stack([norm[f'n3b_{t}'] for t in range(1, times)])

    x_nchw = jax.random.normal(keys[19], (N, in_channels, H, W), jnp.float32)

    fwd = jax.jit(functools.partial(corblock_s_forward, times=times,
                                    out_channels=out_channels))
    out = fwd(x_nchw, params)
    out = jax.block_until_ready(out)

    assert out.shape == (N, out_channels, H // 2, W // 2), out.shape
    assert bool(jnp.all(jnp.isfinite(out)))
    print("KERNEL_OK")
</pallas_src>

<mosaic_0001>
module attributes {stable_mosaic.version = 11 : i64} {
  func.func @_corblock_first_kernel(%arg0: i32, %arg1: memref<4x128x128xbf16, #tpu.memory_space<vmem>>, %arg2: memref<128x128xbf16, #tpu.memory_space<vmem>>, %arg3: memref<128x128xbf16, #tpu.memory_space<vmem>>, %arg4: memref<1152x128xbf16, #tpu.memory_space<vmem>>, %arg5: memref<128x128xbf16, #tpu.memory_space<vmem>>, %arg6: memref<1x128xf32, #tpu.memory_space<vmem>>, %arg7: memref<1x128xf32, #tpu.memory_space<vmem>>, %arg8: memref<1x128xf32, #tpu.memory_space<vmem>>, %arg9: memref<1x128xf32, #tpu.memory_space<vmem>>, %arg10: memref<1x128xf32, #tpu.memory_space<vmem>>, %arg11: memref<1x128xf32, #tpu.memory_space<vmem>>, %arg12: memref<1x128xf32, #tpu.memory_space<vmem>>, %arg13: memref<1x128xf32, #tpu.memory_space<vmem>>, %arg14: memref<128x128xf32, #tpu.memory_space<vmem>>, %arg15: memref<2x9x9x128xbf16, #tpu.memory_space<vmem>>, %arg16: memref<2x9x9x128xbf16, #tpu.memory_space<vmem>>, %arg17: memref<2x9x9x128xbf16, #tpu.memory_space<vmem>>, %arg18: memref<2x9x9x128xbf16, #tpu.memory_space<vmem>>, %arg19: memref<128x1152xbf16, #tpu.memory_space<vmem>>) attributes {dimension_semantics = [#tpu.dimension_semantics<arbitrary>], iteration_bounds = array<i64: 1>, scalar_prefetch = 0 : i64, scratch_operands = 5 : i64, tpu.core_type = #tpu.core_type<tc>, window_params = [{pipeline_mode = #tpu.pipeline_mode<synchronous>, transform_indices = @transform_0, window_bounds = array<i64: 4, 128, 128>}, {pipeline_mode = #tpu.pipeline_mode<synchronous>, transform_indices = @transform_1, window_bounds = array<i64: 128, 128>}, {pipeline_mode = #tpu.pipeline_mode<synchronous>, transform_indices = @transform_2, window_bounds = array<i64: 128, 128>}, {pipeline_mode = #tpu.pipeline_mode<synchronous>, transform_indices = @transform_3, window_bounds = array<i64: 1152, 128>}, {pipeline_mode = #tpu.pipeline_mode<synchronous>, transform_indices = @transform_4, window_bounds = array<i64: 128, 128>}, {pipeline_mode = #tpu.pipeline_mode<synchronous>, transform_indices = @transform_5, window_bounds = array<i64: 1, 128>}, {pipeline_mode = #tpu.pipeline_mode<synchronous>, transform_indices = @transform_6, window_bounds = array<i64: 1, 128>}, {pipeline_mode = #tpu.pipeline_mode<synchronous>, transform_indices = @transform_7, window_bounds = array<i64: 1, 128>}, {pipeline_mode = #tpu.pipeline_mode<synchronous>, transform_indices = @transform_8, window_bounds = array<i64: 1, 128>}, {pipeline_mode = #tpu.pipeline_mode<synchronous>, transform_indices = @transform_9, window_bounds = array<i64: 1, 128>}, {pipeline_mode = #tpu.pipeline_mode<synchronous>, transform_indices = @transform_10, window_bounds = array<i64: 1, 128>}, {pipeline_mode = #tpu.pipeline_mode<synchronous>, transform_indices = @transform_11, window_bounds = array<i64: 1, 128>}, {pipeline_mode = #tpu.pipeline_mode<synchronous>, transform_indices = @transform_12, window_bounds = array<i64: 1, 128>}, {pipeline_mode = #tpu.pipeline_mode<synchronous>, transform_indices = @transform_13, window_bounds = array<i64: 128, 128>}]} {
    %c0 = arith.constant 0 : index
    %c0_0 = arith.constant 0 : index
    %c0_1 = arith.constant 0 : index
    %0 = vector.load %arg1[%c0, %c0_0, %c0_1] : memref<4x128x128xbf16, #tpu.memory_space<vmem>>, vector<1x128x128xbf16>
    %1 = vector.shape_cast %0 : vector<1x128x128xbf16> to vector<128x128xbf16>
    %c1 = arith.constant 1 : index
    %c0_2 = arith.constant 0 : index
    %c0_3 = arith.constant 0 : index
    %2 = vector.load %arg1[%c1, %c0_2, %c0_3] : memref<4x128x128xbf16, #tpu.memory_space<vmem>>, vector<1x128x128xbf16>
    %3 = vector.shape_cast %2 : vector<1x128x128xbf16> to vector<128x128xbf16>
    %c2 = arith.constant 2 : index
    %c0_4 = arith.constant 0 : index
    %c0_5 = arith.constant 0 : index
    %4 = vector.load %arg1[%c2, %c0_4, %c0_5] : memref<4x128x128xbf16, #tpu.memory_space<vmem>>, vector<1x128x128xbf16>
    %5 = vector.shape_cast %4 : vector<1x128x128xbf16> to vector<128x128xbf16>
    %c3 = arith.constant 3 : index
    %c0_6 = arith.constant 0 : index
    %c0_7 = arith.constant 0 : index
    %6 = vector.load %arg1[%c3, %c0_6, %c0_7] : memref<4x128x128xbf16, #tpu.memory_space<vmem>>, vector<1x128x128xbf16>
    %7 = vector.shape_cast %6 : vector<1x128x128xbf16> to vector<128x128xbf16>
    %c0_8 = arith.constant 0 : index
    %c0_9 = arith.constant 0 : index
    %8 = vector.load %arg2[%c0_8, %c0_9] : memref<128x128xbf16, #tpu.memory_space<vmem>>, vector<128x128xbf16>
    %cst = arith.constant dense<0.000000e+00> : vector<128x128xf32>
    %9 = tpu.matmul %1, %8, %cst {dimension_numbers = #tpu.dot_dimension_numbers<[1], [0], [0], [1], [0, 0, 1, 1], [], []>} : vector<128x128xbf16>, vector<128x128xbf16>, vector<128x128xf32> -> vector<128x128xf32>
    %c0_10 = arith.constant 0 : index
    %c0_11 = arith.constant 0 : index
    %10 = vector.load %arg2[%c0_10, %c0_11] : memref<128x128xbf16, #tpu.memory_space<vmem>>, vector<128x128xbf16>
    %cst_12 = arith.constant dense<0.000000e+00> : vector<128x128xf32>
    %11 = tpu.matmul %3, %10, %cst_12 {dimension_numbers = #tpu.dot_dimension_numbers<[1], [0], [0], [1], [0, 0, 1, 1], [], []>} : vector<128x128xbf16>, vector<128x128xbf16>, vector<128x128xf32> -> vector<128x128xf32>
    %c0_13 = arith.constant 0 : index
    %c0_14 = arith.constant 0 : index
    %12 = vector.load %arg2[%c0_13, %c0_14] : memref<128x128xbf16, #tpu.memory_space<vmem>>, vector<128x128xbf16>
    %cst_15 = arith.constant dense<0.000000e+00> : vector<128x128xf32>
    %13 = tpu.matmul %5, %12, %cst_15 {dimension_numbers = #tpu.dot_dimension_numbers<[1], [0], [0], [1], [0, 0, 1, 1], [], []>} : vector<128x128xbf16>, vector<128x128xbf16>, vector<128x128xf32> -> vector<128x128xf32>
    %c0_16 = arith.constant 0 : index
    %c0_17 = arith.constant 0 : index
    %14 = vector.load %arg2[%c0_16, %c0_17] : memref<128x128xbf16, #tpu.memory_space<vmem>>, vector<128x128xbf16>
    %cst_18 = arith.constant dense<0.000000e+00> : vector<128x128xf32>
    %15 = tpu.matmul %7, %14, %cst_18 {dimension_numbers = #tpu.dot_dimension_numbers<[1], [0], [0], [1], [0, 0, 1, 1], [], []>} : vector<128x128xbf16>, vector<128x128xbf16>, vector<128x128xf32> -> vector<128x128xf32>
    %cst_19 = arith.constant dense<0.000000e+00> : vector<128xf32>
    %16 = vector.multi_reduction <add>, %9, %cst_19 [0] : vector<128x128xf32> to vector<128xf32>
    %17 = vector.shape_cast %16 : vector<128xf32> to vector<1x128xf32>
    %cst_20 = arith.constant 0.000000e+00 : f32
    %18 = vector.broadcast %cst_20 : f32 to vector<1x128xf32>
    %19 = arith.addf %18, %17 : vector<1x128xf32>
    %cst_21 = arith.constant dense<0.000000e+00> : vector<128xf32>
    %20 = vector.multi_reduction <add>, %11, %cst_21 [0] : vector<128x128xf32> to vector<128xf32>
    %21 = vector.shape_cast %20 : vector<128xf32> to vector<1x128xf32>
    %22 = arith.addf %19, %21 : vector<1x128xf32>
    %cst_22 = arith.constant dense<0.000000e+00> : vector<128xf32>
    %23 = vector.multi_reduction <add>, %13, %cst_22 [0] : vector<128x128xf32> to vector<128xf32>
    %24 = vector.shape_cast %23 : vector<128xf32> to vector<1x128xf32>
    %25 = arith.addf %22, %24 : vector<1x128xf32>
    %cst_23 = arith.constant dense<0.000000e+00> : vector<128xf32>
    %26 = vector.multi_reduction <add>, %15, %cst_23 [0] : vector<128x128xf32> to vector<128xf32>
    %27 = vector.shape_cast %26 : vector<128xf32> to vector<1x128xf32>
    %28 = arith.addf %25, %27 : vector<1x128xf32>
    %29 = arith.mulf %9, %9 : vector<128x128xf32>
    %cst_24 = arith.constant dense<0.000000e+00> : vector<128xf32>
    %30 = vector.multi_reduction <add>, %29, %cst_24 [0] : vector<128x128xf32> to vector<128xf32>
    %31 = vector.shape_cast %30 : vector<128xf32> to vector<1x128xf32>
    %cst_25 = arith.constant 0.000000e+00 : f32
    %32 = vector.broadcast %cst_25 : f32 to vector<1x128xf32>
    %33 = arith.addf %32, %31 : vector<1x128xf32>
    %34 = arith.mulf %11, %11 : vector<128x128xf32>
    %cst_26 = arith.constant dense<0.000000e+00> : vector<128xf32>
    %35 = vector.multi_reduction <add>, %34, %cst_26 [0] : vector<128x128xf32> to vector<128xf32>
    %36 = vector.shape_cast %35 : vector<128xf32> to vector<1x128xf32>
    %37 = arith.addf %33, %36 : vector<1x128xf32>
    %38 = arith.mulf %13, %13 : vector<128x128xf32>
    %cst_27 = arith.constant dense<0.000000e+00> : vector<128xf32>
    %39 = vector.multi_reduction <add>, %38, %cst_27 [0] : vector<128x128xf32> to vector<128xf32>
    %40 = vector.shape_cast %39 : vector<128xf32> to vector<1x128xf32>
    %41 = arith.addf %37, %40 : vector<1x128xf32>
    %42 = arith.mulf %15, %15 : vector<128x128xf32>
    %cst_28 = arith.constant dense<0.000000e+00> : vector<128xf32>
    %43 = vector.multi_reduction <add>, %42, %cst_28 [0] : vector<128x128xf32> to vector<128xf32>
    %44 = vector.shape_cast %43 : vector<128xf32> to vector<1x128xf32>
    %45 = arith.addf %41, %44 : vector<1x128xf32>
    %cst_29 = arith.constant 0.001953125 : f32
    %46 = vector.broadcast %cst_29 : f32 to vector<1x128xf32>
    %47 = arith.mulf %28, %46 : vector<1x128xf32>
    %cst_30 = arith.constant 0.001953125 : f32
    %48 = vector.broadcast %cst_30 : f32 to vector<1x128xf32>
    %49 = arith.mulf %45, %48 : vector<1x128xf32>
    %50 = arith.mulf %47, %47 : vector<1x128xf32>
    %51 = arith.subf %49, %50 : vector<1x128xf32>
    %cst_31 = arith.constant 9.99999974E-6 : f32
    %52 = vector.broadcast %cst_31 : f32 to vector<1x128xf32>
    %53 = arith.addf %51, %52 : vector<1x128xf32>
    %54 = math.rsqrt %53 : vector<1x128xf32>
    %c0_32 = arith.constant 0 : index
    %c0_33 = arith.constant 0 : index
    %55 = vector.load %arg6[%c0_32, %c0_33] : memref<1x128xf32, #tpu.memory_space<vmem>>, vector<1x128xf32>
    %56 = arith.mulf %54, %55 : vector<1x128xf32>
    %c0_34 = arith.constant 0 : index
    %c0_35 = arith.constant 0 : index
    %57 = vector.load %arg7[%c0_34, %c0_35] : memref<1x128xf32, #tpu.memory_space<vmem>>, vector<1x128xf32>
    %58 = arith.mulf %47, %56 : vector<1x128xf32>
    %59 = arith.subf %57, %58 : vector<1x128xf32>
    %cst_36 = arith.constant 0.000000e+00 : bf16
    %60 = vector.broadcast %cst_36 : bf16 to vector<2x1x9x128xbf16>
    %c0_37 = arith.constant 0 : index
    %c0_38 = arith.constant 0 : index
    %c0_39 = arith.constant 0 : index
    %c0_40 = arith.constant 0 : index
    %61 = vector.load %arg15[%c0_37, %c0_38, %c0_39, %c0_40] : memref<2x9x9x128xbf16, #tpu.memory_space<vmem>>, vector<2x1x9x128xbf16>
    tpu.vector_store %arg15[%c0_37, %c0_38, %c0_39, %c0_40], %60 {strides = array<i32>} : memref<2x9x9x128xbf16, #tpu.memory_space<vmem>>, vector<2x1x9x128xbf16>,
    %cst_41 = arith.constant 0.000000e+00 : bf16
    %62 = vector.broadcast %cst_41 : bf16 to vector<2x9x1x128xbf16>
    %c0_42 = arith.constant 0 : index
    %c0_43 = arith.constant 0 : index
    %c0_44 = arith.constant 0 : index
    %c0_45 = arith.constant 0 : index
    %63 = vector.load %arg15[%c0_42, %c0_43, %c0_44, %c0_45] : memref<2x9x9x128xbf16, #tpu.memory_space<vmem>>, vector<2x9x1x128xbf16>
    tpu.vector_store %arg15[%c0_42, %c0_43, %c0_44, %c0_45], %62 {strides = array<i32>} : memref<2x9x9x128xbf16, #tpu.memory_space<vmem>>, vector<2x9x1x128xbf16>,
    %64 = vector.broadcast %56 : vector<1x128xf32> to vector<128x128xf32>
    %65 = arith.mulf %9, %64 : vector<128x128xf32>
    %66 = vector.broadcast %59 : vector<1x128xf32> to vector<128x128xf32>
    %67 = arith.addf %65, %66 : vector<128x128xf32>
    %cst_46 = arith.constant 0.000000e+00 : f32
    %68 = vector.broadcast %cst_46 : f32 to vector<128x128xf32>
    %69 = arith.maximumf %67, %68 : vector<128x128xf32>
    %70 = vector.shape_cast %69 : vector<128x128xf32> to vector<2x8x8x128xf32>
    %71 = arith.truncf %70 : vector<2x8x8x128xf32> to vector<2x8x8x128xbf16>
    %c0_47 = arith.constant 0 : index
    %c1_48 = arith.constant 1 : index
    %c1_49 = arith.constant 1 : index
    %c0_50 = arith.constant 0 : index
    %72 = vector.load %arg15[%c0_47, %c1_48, %c1_49, %c0_50] : memref<2x9x9x128xbf16, #tpu.memory_space<vmem>>, vector<2x8x8x128xbf16>
    tpu.vector_store %arg15[%c0_47, %c1_48, %c1_49, %c0_50], %71 {strides = array<i32>} : memref<2x9x9x128xbf16, #tpu.memory_space<vmem>>, vector<2x8x8x128xbf16>,
    %cst_51 = arith.constant 0.000000e+00 : bf16
    %73 = vector.broadcast %cst_51 : bf16 to vector<2x1x9x128xbf16>
    %c0_52 = arith.constant 0 : index
    %c0_53 = arith.constant 0 : index
    %c0_54 = arith.constant 0 : index
    %c0_55 = arith.constant 0 : index
    %74 = vector.load %arg16[%c0_52, %c0_53, %c0_54, %c0_55] : memref<2x9x9x128xbf16, #tpu.memory_space<vmem>>, vector<2x1x9x128xbf16>
    tpu.vector_store %arg16[%c0_52, %c0_53, %c0_54, %c0_55], %73 {strides = array<i32>} : memref<2x9x9x128xbf16, #tpu.memory_space<vmem>>, vector<2x1x9x128xbf16>,
    %cst_56 = arith.constant 0.000000e+00 : bf16
    %75 = vector.broadcast %cst_56 : bf16 to vector<2x9x1x128xbf16>
    %c0_57 = arith.constant 0 : index
    %c0_58 = arith.constant 0 : index
    %c0_59 = arith.constant 0 : index
    %c0_60 = arith.constant 0 : index
    %76 = vector.load %arg16[%c0_57, %c0_58, %c0_59, %c0_60] : memref<2x9x9x128xbf16, #tpu.memory_space<vmem>>, vector<2x9x1x128xbf16>
    tpu.vector_store %arg16[%c0_57, %c0_58, %c0_59, %c0_60], %75 {strides = array<i32>} : memref<2x9x9x128xbf16, #tpu.memory_space<vmem>>, vector<2x9x1x128xbf16>,
    %77 = vector.broadcast %56 : vector<1x128xf32> to vector<128x128xf32>
    %78 = arith.mulf %11, %77 : vector<128x128xf32>
    %79 = vector.broadcast %59 : vector<1x128xf32> to vector<128x128xf32>
    %80 = arith.addf %78, %79 : vector<128x128xf32>
    %cst_61 = arith.constant 0.000000e+00 : f32
    %81 = vector.broadcast %cst_61 : f32 to vector<128x128xf32>
    %82 = arith.maximumf %80, %81 : vector<128x128xf32>
    %83 = vector.shape_cast %82 : vector<128x128xf32> to vector<2x8x8x128xf32>
    %84 = arith.truncf %83 : vector<2x8x8x128xf32> to vector<2x8x8x128xbf16>
    %c0_62 = arith.constant 0 : index
    %c1_63 = arith.constant 1 : index
    %c1_64 = arith.constant 1 : index
    %c0_65 = arith.constant 0 : index
    %85 = vector.load %arg16[%c0_62, %c1_63, %c1_64, %c0_65] : memref<2x9x9x128xbf16, #tpu.memory_space<vmem>>, vector<2x8x8x128xbf16>
    tpu.vector_store %arg16[%c0_62, %c1_63, %c1_64, %c0_65], %84 {strides = array<i32>} : memref<2x9x9x128xbf16, #tpu.memory_space<vmem>>, vector<2x8x8x128xbf16>,
    %cst_66 = arith.constant 0.000000e+00 : bf16
    %86 = vector.broadcast %cst_66 : bf16 to vector<2x1x9x128xbf16>
    %c0_67 = arith.constant 0 : index
    %c0_68 = arith.constant 0 : index
    %c0_69 = arith.constant 0 : index
    %c0_70 = arith.constant 0 : index
    %87 = vector.load %arg17[%c0_67, %c0_68, %c0_69, %c0_70] : memref<2x9x9x128xbf16, #tpu.memory_space<vmem>>, vector<2x1x9x128xbf16>
    tpu.vector_store %arg17[%c0_67, %c0_68, %c0_69, %c0_70], %86 {strides = array<i32>} : memref<2x9x9x128xbf16, #tpu.memory_space<vmem>>, vector<2x1x9x128xbf16>,
    %cst_71 = arith.constant 0.000000e+00 : bf16
    %88 = vector.broadcast %cst_71 : bf16 to vector<2x9x1x128xbf16>
    %c0_72 = arith.constant 0 : index
    %c0_73 = arith.constant 0 : index
    %c0_74 = arith.constant 0 : index
    %c0_75 = arith.constant 0 : index
    %89 = vector.load %arg17[%c0_72, %c0_73, %c0_74, %c0_75] : memref<2x9x9x128xbf16, #tpu.memory_space<vmem>>, vector<2x9x1x128xbf16>
    tpu.vector_store %arg17[%c0_72, %c0_73, %c0_74, %c0_75], %88 {strides = array<i32>} : memref<2x9x9x128xbf16, #tpu.memory_space<vmem>>, vector<2x9x1x128xbf16>,
    %90 = vector.broadcast %56 : vector<1x128xf32> to vector<128x128xf32>
    %91 = arith.mulf %13, %90 : vector<128x128xf32>
    %92 = vector.broadcast %59 : vector<1x128xf32> to vector<128x128xf32>
    %93 = arith.addf %91, %92 : vector<128x128xf32>
    %cst_76 = arith.constant 0.000000e+00 : f32
    %94 = vector.broadcast %cst_76 : f32 to vector<128x128xf32>
    %95 = arith.maximumf %93, %94 : vector<128x128xf32>
    %96 = vector.shape_cast %95 : vector<128x128xf32> to vector<2x8x8x128xf32>
    %97 = arith.truncf %96 : vector<2x8x8x128xf32> to vector<2x8x8x128xbf16>
    %c0_77 = arith.constant 0 : index
    %c1_78 = arith.constant 1 : index
    %c1_79 = arith.constant 1 : index
    %c0_80 = arith.constant 0 : index
    %98 = vector.load %arg17[%c0_77, %c1_78, %c1_79, %c0_80] : memref<2x9x9x128xbf16, #tpu.memory_space<vmem>>, vector<2x8x8x128xbf16>
    tpu.vector_store %arg17[%c0_77, %c1_78, %c1_79, %c0_80], %97 {strides = array<i32>} : memref<2x9x9x128xbf16, #tpu.memory_space<vmem>>, vector<2x8x8x128xbf16>,
    %cst_81 = arith.constant 0.000000e+00 : bf16
    %99 = vector.broadcast %cst_81 : bf16 to vector<2x1x9x128xbf16>
    %c0_82 = arith.constant 0 : index
    %c0_83 = arith.constant 0 : index
    %c0_84 = arith.constant 0 : index
    %c0_85 = arith.constant 0 : index
    %100 = vector.load %arg18[%c0_82, %c0_83, %c0_84, %c0_85] : memref<2x9x9x128xbf16, #tpu.memory_space<vmem>>, vector<2x1x9x128xbf16>
    tpu.vector_store %arg18[%c0_82, %c0_83, %c0_84, %c0_85], %99 {strides = array<i32>} : memref<2x9x9x128xbf16, #tpu.memory_space<vmem>>, vector<2x1x9x128xbf16>,
    %cst_86 = arith.constant 0.000000e+00 : bf16
    %101 = vector.broadcast %cst_86 : bf16 to vector<2x9x1x128xbf16>
    %c0_87 = arith.constant 0 : index
    %c0_88 = arith.constant 0 : index
    %c0_89 = arith.constant 0 : index
    %c0_90 = arith.constant 0 : index
    %102 = vector.load %arg18[%c0_87, %c0_88, %c0_89, %c0_90] : memref<2x9x9x128xbf16, #tpu.memory_space<vmem>>, vector<2x9x1x128xbf16>
    tpu.vector_store %arg18[%c0_87, %c0_88, %c0_89, %c0_90], %101 {strides = array<i32>} : memref<2x9x9x128xbf16, #tpu.memory_space<vmem>>, vector<2x9x1x128xbf16>,
    %103 = vector.broadcast %56 : vector<1x128xf32> to vector<128x128xf32>
    %104 = arith.mulf %15, %103 : vector<128x128xf32>
    %105 = vector.broadcast %59 : vector<1x128xf32> to vector<128x128xf32>
    %106 = arith.addf %104, %105 : vector<128x128xf32>
    %cst_91 = arith.constant 0.000000e+00 : f32
    %107 = vector.broadcast %cst_91 : f32 to vector<128x128xf32>
    %108 = arith.maximumf %106, %107 : vector<128x128xf32>
    %109 = vector.shape_cast %108 : vector<128x128xf32> to vector<2x8x8x128xf32>
    %110 = arith.truncf %109 : vector<2x8x8x128xf32> to vector<2x8x8x128xbf16>
    %c0_92 = arith.constant 0 : index
    %c1_93 = arith.constant 1 : index
    %c1_94 = arith.constant 1 : index
    %c0_95 = arith.constant 0 : index
    %111 = vector.load %arg18[%c0_92, %c1_93, %c1_94, %c0_95] : memref<2x9x9x128xbf16, #tpu.memory_space<vmem>>, vector<2x8x8x128xbf16>
    tpu.vector_store %arg18[%c0_92, %c1_93, %c1_94, %c0_95], %110 {strides = array<i32>} : memref<2x9x9x128xbf16, #tpu.memory_space<vmem>>, vector<2x8x8x128xbf16>,
    %c0_96 = arith.constant 0 : index
    %c0_97 = arith.constant 0 : index
    %c0_98 = arith.constant 0 : index
    %c0_99 = arith.constant 0 : index
    %112 = vector.load %arg18[%c0_96, %c0_97, %c0_98, %c0_99] : memref<2x9x9x128xbf16, #tpu.memory_space<vmem>>, vector<2x8x8x128xbf16>
    %113 = vector.shape_cast %112 : vector<2x8x8x128xbf16> to vector<128x128xbf16>
    %c0_100 = arith.constant 0 : index
    %c0_101 = arith.constant 0 : index
    %114 = vector.load %arg19[%c0_100, %c0_101] : memref<128x1152xbf16, #tpu.memory_space<vmem>>, vector<128x128xbf16>
    tpu.vector_store %arg19[%c0_100, %c0_101], %113 {strides = array<i32>} : memref<128x1152xbf16, #tpu.memory_space<vmem>>, vector<128x128xbf16>,
    %c0_102 = arith.constant 0 : index
    %c0_103 = arith.constant 0 : index
    %c1_104 = arith.constant 1 : index
    %c0_105 = arith.constant 0 : index
    %115 = vector.load %arg17[%c0_102, %c0_103, %c1_104, %c0_105] : memref<2x9x9x128xbf16, #tpu.memory_space<vmem>>, vector<2x8x8x128xbf16>
    %116 = vector.shape_cast %115 : vector<2x8x8x128xbf16> to vector<128x128xbf16>
    %c0_106 = arith.constant 0 : index
    %c128 = arith.constant 128 : index
    %117 = vector.load %arg19[%c0_106, %c128] : memref<128x1152xbf16, #tpu.memory_space<vmem>>, vector<128x128xbf16>
    tpu.vector_store %arg19[%c0_106, %c128], %116 {strides = array<i32>} : memref<128x1152xbf16, #tpu.memory_space<vmem>>, vector<128x128xbf16>,
    %c0_107 = arith.constant 0 : index
    %c0_108 = arith.constant 0 : index
    %c1_109 = arith.constant 1 : index
    %c0_110 = arith.constant 0 : index
    %118 = vector.load %arg18[%c0_107, %c0_108, %c1_109, %c0_110] : memref<2x9x9x128xbf16, #tpu.memory_space<vmem>>, vector<2x8x8x128xbf16>
    %119 = vector.shape_cast %118 : vector<2x8x8x128xbf16> to vector<128x128xbf16>
    %c0_111 = arith.constant 0 : index
    %c256 = arith.constant 256 : index
    %120 = vector.load %arg19[%c0_111, %c256] : memref<128x1152xbf16, #tpu.memory_space<vmem>>, vector<128x128xbf16>
    tpu.vector_store %arg19[%c0_111, %c256], %119 {strides = array<i32>} : memref<128x1152xbf16, #tpu.memory_space<vmem>>, vector<128x128xbf16>,
    %c0_112 = arith.constant 0 : index
    %c1_113 = arith.constant 1 : index
    %c0_114 = arith.constant 0 : index
    %c0_115 = arith.constant 0 : index
    %121 = vector.load %arg16[%c0_112, %c1_113, %c0_114, %c0_115] : memref<2x9x9x128xbf16, #tpu.memory_space<vmem>>, vector<2x8x8x128xbf16>
    %122 = vector.shape_cast %121 : vector<2x8x8x128xbf16> to vector<128x128xbf16>
    %c0_116 = arith.constant 0 : index
    %c384 = arith.constant 384 : index
    %123 = vector.load %arg19[%c0_116, %c384] : memref<128x1152xbf16, #tpu.memory_space<vmem>>, vector<128x128xbf16>
    tpu.vector_store %arg19[%c0_116, %c384], %122 {strides = array<i32>} : memref<128x1152xbf16, #tpu.memory_space<vmem>>, vector<128x128xbf16>,
    %c0_117 = arith.constant 0 : index
    %c1_118 = arith.constant 1 : index
    %c1_119 = arith.constant 1 : index
    %c0_120 = arith.constant 0 : index
    %124 = vector.load %arg15[%c0_117, %c1_118, %c1_119, %c0_120] : memref<2x9x9x128xbf16, #tpu.memory_space<vmem>>, vector<2x8x8x128xbf16>
    %125 = vector.shape_cast %124 : vector<2x8x8x128xbf16> to vector<128x128xbf16>
    %c0_121 = arith.constant 0 : index
    %c512 = arith.constant 512 : index
    %126 = vector.load %arg19[%c0_121, %c512] : memref<128x1152xbf16, #tpu.memory_space<vmem>>, vector<128x128xbf16>
    tpu.vector_store %arg19[%c0_121, %c512], %125 {strides = array<i32>} : memref<128x1152xbf16, #tpu.memory_space<vmem>>, vector<128x128xbf16>,
    %c0_122 = arith.constant 0 : index
    %c1_123 = arith.constant 1 : index
    %c1_124 = arith.constant 1 : index
    %c0_125 = arith.constant 0 : index
    %127 = vector.load %arg16[%c0_122, %c1_123, %c1_124, %c0_125] : memref<2x9x9x128xbf16, #tpu.memory_space<vmem>>, vector<2x8x8x128xbf16>
    %128 = vector.shape_cast %127 : vector<2x8x8x128xbf16> to vector<128x128xbf16>
    %c0_126 = arith.constant 0 : index
    %c640 = arith.constant 640 : index
    %129 = vector.load %arg19[%c0_126, %c640] : memref<128x1152xbf16, #tpu.memory_space<vmem>>, vector<128x128xbf16>
    tpu.vector_store %arg19[%c0_126, %c640], %128 {strides = array<i32>} : memref<128x1152xbf16, #tpu.memory_space<vmem>>, vector<128x128xbf16>,
    %c0_127 = arith.constant 0 : index
    %c1_128 = arith.constant 1 : index
    %c0_129 = arith.constant 0 : index
    %c0_130 = arith.constant 0 : index
    %130 = vector.load %arg18[%c0_127, %c1_128, %c0_129, %c0_130] : memref<2x9x9x128xbf16, #tpu.memory_space<vmem>>, vector<2x8x8x128xbf16>
    %131 = vector.shape_cast %130 : vector<2x8x8x128xbf16> to vector<128x128xbf16>
    %c0_131 = arith.constant 0 : index
    %c768 = arith.constant 768 : index
    %132 = vector.load %arg19[%c0_131, %c768] : memref<128x1152xbf16, #tpu.memory_space<vmem>>, vector<128x128xbf16>
    tpu.vector_store %arg19[%c0_131, %c768], %131 {strides = array<i32>} : memref<128x1152xbf16, #tpu.memory_space<vmem>>, vector<128x128xbf16>,
    %c0_132 = arith.constant 0 : index
    %c1_133 = arith.constant 1 : index
    %c1_134 = arith.constant 1 : index
    %c0_135 = arith.constant 0 : index
    %133 = vector.load %arg17[%c0_132, %c1_133, %c1_134, %c0_135] : memref<2x9x9x128xbf16, #tpu.memory_space<vmem>>, vector<2x8x8x128xbf16>
    %134 = vector.shape_cast %133 : vector<2x8x8x128xbf16> to vector<128x128xbf16>
    %c0_136 = arith.constant 0 : index
    %c896 = arith.constant 896 : index
    %135 = vector.load %arg19[%c0_136, %c896] : memref<128x1152xbf16, #tpu.memory_space<vmem>>, vector<128x128xbf16>
    tpu.vector_store %arg19[%c0_136, %c896], %134 {strides = array<i32>} : memref<128x1152xbf16, #tpu.memory_space<vmem>>, vector<128x128xbf16>,
    %c0_137 = arith.constant 0 : index
    %c1_138 = arith.constant 1 : index
    %c1_139 = arith.constant 1 : index
    %c0_140 = arith.constant 0 : index
    %136 = vector.load %arg18[%c0_137, %c1_138, %c1_139, %c0_140] : memref<2x9x9x128xbf16, #tpu.memory_space<vmem>>, vector<2x8x8x128xbf16>
    %137 = vector.shape_cast %136 : vector<2x8x8x128xbf16> to vector<128x128xbf16>
    %c0_141 = arith.constant 0 : index
    %c1024 = arith.constant 1024 : index
    %138 = vector.load %arg19[%c0_141, %c1024] : memref<128x1152xbf16, #tpu.memory_space<vmem>>, vector<128x128xbf16>
    tpu.vector_store %arg19[%c0_141, %c1024], %137 {strides = array<i32>} : memref<128x1152xbf16, #tpu.memory_space<vmem>>, vector<128x128xbf16>,
    %c0_142 = arith.constant 0 : index
    %c0_143 = arith.constant 0 : index
    %139 = vector.load %arg19[%c0_142, %c0_143] : memref<128x1152xbf16, #tpu.memory_space<vmem>>, vector<128x1152xbf16>
    %c0_144 = arith.constant 0 : index
    %c0_145 = arith.constant 0 : index
    %140 = vector.load %arg4[%c0_144, %c0_145] : memref<1152x128xbf16, #tpu.memory_space<vmem>>, vector<1152x128xbf16>
    %cst_146 = arith.constant dense<0.000000e+00> : vector<128x128xf32>
    %141 = tpu.matmul %139, %140, %cst_146 {dimension_numbers = #tpu.dot_dimension_numbers<[1], [0], [0], [1], [0, 0, 1, 1], [], []>} : vector<128x1152xbf16>, vector<1152x128xbf16>, vector<128x128xf32> -> vector<128x128xf32>
    %c0_147 = arith.constant 0 : index
    %c0_148 = arith.constant 0 : index
    %142 = vector.load %arg8[%c0_147, %c0_148] : memref<1x128xf32, #tpu.memory_space<vmem>>, vector<1x128xf32>
    %c0_149 = arith.constant 0 : index
    %c0_150 = arith.constant 0 : index
    %143 = vector.load %arg9[%c0_149, %c0_150] : memref<1x128xf32, #tpu.memory_space<vmem>>, vector<1x128xf32>
    %cst_151 = arith.constant dense<0.000000e+00> : vector<128xf32>
    %144 = vector.multi_reduction <add>, %141, %cst_151 [0] : vector<128x128xf32> to vector<128xf32>
    %145 = vector.shape_cast %144 : vector<128xf32> to vector<1x128xf32>
    %146 = arith.mulf %141, %141 : vector<128x128xf32>
    %cst_152 = arith.constant dense<0.000000e+00> : vector<128xf32>
    %147 = vector.multi_reduction <add>, %146, %cst_152 [0] : vector<128x128xf32> to vector<128xf32>
    %148 = vector.shape_cast %147 : vector<128xf32> to vector<1x128xf32>
    %cst_153 = arith.constant 7.812500e-03 : f32
    %149 = vector.broadcast %cst_153 : f32 to vector<1x128xf32>
    %150 = arith.mulf %145, %149 : vector<1x128xf32>
    %cst_154 = arith.constant 7.812500e-03 : f32
    %151 = vector.broadcast %cst_154 : f32 to vector<1x128xf32>
    %152 = arith.mulf %148, %151 : vector<1x128xf32>
    %153 = arith.mulf %150, %150 : vector<1x128xf32>
    %154 = arith.subf %152, %153 : vector<1x128xf32>
    %cst_155 = arith.constant 9.99999974E-6 : f32
    %155 = vector.broadcast %cst_155 : f32 to vector<1x128xf32>
    %156 = arith.addf %154, %155 : vector<1x128xf32>
    %157 = math.rsqrt %156 : vector<1x128xf32>
    %158 = arith.mulf %157, %142 : vector<1x128xf32>
    %159 = vector.broadcast %158 : vector<1x128xf32> to vector<128x128xf32>
    %160 = arith.mulf %141, %159 : vector<128x128xf32>
    %161 = arith.mulf %150, %158 : vector<1x128xf32>
    %162 = arith.subf %143, %161 : vector<1x128xf32>
    %163 = vector.broadcast %162 : vector<1x128xf32> to vector<128x128xf32>
    %164 = arith.addf %160, %163 : vector<128x128xf32>
    %cst_156 = arith.constant 0.000000e+00 : f32
    %165 = vector.broadcast %cst_156 : f32 to vector<128x128xf32>
    %166 = arith.maximumf %164, %165 : vector<128x128xf32>
    %167 = arith.truncf %166 : vector<128x128xf32> to vector<128x128xbf16>
    %c0_157 = arith.constant 0 : index
    %c0_158 = arith.constant 0 : index
    %168 = vector.load %arg5[%c0_157, %c0_158] : memref<128x128xbf16, #tpu.memory_space<vmem>>, vector<128x128xbf16>
    %cst_159 = arith.constant dense<0.000000e+00> : vector<128x128xf32>
    %169 = tpu.matmul %167, %168, %cst_159 {dimension_numbers = #tpu.dot_dimension_numbers<[1], [0], [0], [1], [0, 0, 1, 1], [], []>} : vector<128x128xbf16>, vector<128x128xbf16>, vector<128x128xf32> -> vector<128x128xf32>
    %c0_160 = arith.constant 0 : index
    %c0_161 = arith.constant 0 : index
    %170 = vector.load %arg10[%c0_160, %c0_161] : memref<1x128xf32, #tpu.memory_space<vmem>>, vector<1x128xf32>
    %c0_162 = arith.constant 0 : index
    %c0_163 = arith.constant 0 : index
    %171 = vector.load %arg11[%c0_162, %c0_163] : memref<1x128xf32, #tpu.memory_space<vmem>>, vector<1x128xf32>
    %cst_164 = arith.constant dense<0.000000e+00> : vector<128xf32>
    %172 = vector.multi_reduction <add>, %169, %cst_164 [0] : vector<128x128xf32> to vector<128xf32>
    %173 = vector.shape_cast %172 : vector<128xf32> to vector<1x128xf32>
    %174 = arith.mulf %169, %169 : vector<128x128xf32>
    %cst_165 = arith.constant dense<0.000000e+00> : vector<128xf32>
    %175 = vector.multi_reduction <add>, %174, %cst_165 [0] : vector<128x128xf32> to vector<128xf32>
    %176 = vector.shape_cast %175 : vector<128xf32> to vector<1x128xf32>
    %cst_166 = arith.constant 7.812500e-03 : f32
    %177 = vector.broadcast %cst_166 : f32 to vector<1x128xf32>
    %178 = arith.mulf %173, %177 : vector<1x128xf32>
    %cst_167 = arith.constant 7.812500e-03 : f32
    %179 = vector.broadcast %cst_167 : f32 to vector<1x128xf32>
    %180 = arith.mulf %176, %179 : vector<1x128xf32>
    %181 = arith.mulf %178, %178 : vector<1x128xf32>
    %182 = arith.subf %180, %181 : vector<1x128xf32>
    %cst_168 = arith.constant 9.99999974E-6 : f32
    %183 = vector.broadcast %cst_168 : f32 to vector<1x128xf32>
    %184 = arith.addf %182, %183 : vector<1x128xf32>
    %185 = math.rsqrt %184 : vector<1x128xf32>
    %186 = arith.mulf %185, %170 : vector<1x128xf32>
    %187 = vector.broadcast %186 : vector<1x128xf32> to vector<128x128xf32>
    %188 = arith.mulf %169, %187 : vector<128x128xf32>
    %189 = arith.mulf %178, %186 : vector<1x128xf32>
    %190 = arith.subf %171, %189 : vector<1x128xf32>
    %191 = vector.broadcast %190 : vector<1x128xf32> to vector<128x128xf32>
    %192 = arith.addf %188, %191 : vector<128x128xf32>
    %c0_169 = arith.constant 0 : index
    %c0_170 = arith.constant 0 : index
    %193 = vector.load %arg3[%c0_169, %c0_170] : memref<128x128xbf16, #tpu.memory_space<vmem>>, vector<128x128xbf16>
    %cst_171 = arith.constant dense<0.000000e+00> : vector<128x128xf32>
    %194 = tpu.matmul %1, %193, %cst_171 {dimension_numbers = #tpu.dot_dimension_numbers<[1], [0], [0], [1], [0, 0, 1, 1], [], []>} : vector<128x128xbf16>, vector<128x128xbf16>, vector<128x128xf32> -> vector<128x128xf32>
    %c0_172 = arith.constant 0 : index
    %c0_173 = arith.constant 0 : index
    %195 = vector.load %arg12[%c0_172, %c0_173] : memref<1x128xf32, #tpu.memory_space<vmem>>, vector<1x128xf32>
    %c0_174 = arith.constant 0 : index
    %c0_175 = arith.constant 0 : index
    %196 = vector.load %arg13[%c0_174, %c0_175] : memref<1x128xf32, #tpu.memory_space<vmem>>, vector<1x128xf32>
    %cst_176 = arith.constant dense<0.000000e+00> : vector<128xf32>
    %197 = vector.multi_reduction <add>, %194, %cst_176 [0] : vector<128x128xf32> to vector<128xf32>
    %198 = vector.shape_cast %197 : vector<128xf32> to vector<1x128xf32>
    %199 = arith.mulf %194, %194 : vector<128x128xf32>
    %cst_177 = arith.constant dense<0.000000e+00> : vector<128xf32>
    %200 = vector.multi_reduction <add>, %199, %cst_177 [0] : vector<128x128xf32> to vector<128xf32>
    %201 = vector.shape_cast %200 : vector<128xf32> to vector<1x128xf32>
    %cst_178 = arith.constant 7.812500e-03 : f32
    %202 = vector.broadcast %cst_178 : f32 to vector<1x128xf32>
    %203 = arith.mulf %198, %202 : vector<1x128xf32>
    %cst_179 = arith.constant 7.812500e-03 : f32
    %204 = vector.broadcast %cst_179 : f32 to vector<1x128xf32>
    %205 = arith.mulf %201, %204 : vector<1x128xf32>
    %206 = arith.mulf %203, %203 : vector<1x128xf32>
    %207 = arith.subf %205, %206 : vector<1x128xf32>
    %cst_180 = arith.constant 9.99999974E-6 : f32
    %208 = vector.broadcast %cst_180 : f32 to vector<1x128xf32>
    %209 = arith.addf %207, %208 : vector<1x128xf32>
    %210 = math.rsqrt %209 : vector<1x128xf32>
    %211 = arith.mulf %210, %195 : vector<1x128xf32>
    %212 = vector.broadcast %211 : vector<1x128xf32> to vector<128x128xf32>
    %213 = arith.mulf %194, %212 : vector<128x128xf32>
    %214 = arith.mulf %203, %211 : vector<1x128xf32>
    %215 = arith.subf %196, %214 : vector<1x128xf32>
    %216 = vector.broadcast %215 : vector<1x128xf32> to vector<128x128xf32>
    %217 = arith.addf %213, %216 : vector<128x128xf32>
    %218 = arith.addf %192, %217 : vector<128x128xf32>
    %cst_181 = arith.constant 0.000000e+00 : f32
    %219 = vector.broadcast %cst_181 : f32 to vector<128x128xf32>
    %220 = arith.maximumf %218, %219 : vector<128x128xf32>
    %c0_182 = arith.constant 0 : index
    %c0_183 = arith.constant 0 : index
    %221 = vector.load %arg14[%c0_182, %c0_183] : memref<128x128xf32, #tpu.memory_space<vmem>>, vector<128x128xf32>
    tpu.vector_store %arg14[%c0_182, %c0_183], %220 {strides = array<i32>} : memref<128x128xf32, #tpu.memory_space<vmem>>, vector<128x128xf32>,
    return
  }
  func.func @transform_0(%arg0: i32) -> (i32, i32, i32) {
    %c0_i32 = arith.constant 0 : i32
    %c0_i32_0 = arith.constant 0 : i32
    %c0_i32_1 = arith.constant 0 : i32
    %c0_i32_2 = arith.constant 0 : i32
    return %c0_i32, %c0_i32_0, %c0_i32_1 : i32, i32, i32
  }
  func.func @transform_1(%arg0: i32) -> (i32, i32) {
    %c0_i32 = arith.constant 0 : i32
    %c0_i32_0 = arith.constant 0 : i32
    %c0_i32_1 = arith.constant 0 : i32
    return %c0_i32, %c0_i32_0 : i32, i32
  }
  func.func @transform_2(%arg0: i32) -> (i32, i32) {
    %c0_i32 = arith.constant 0 : i32
    %c0_i32_0 = arith.constant 0 : i32
    %c0_i32_1 = arith.constant 0 : i32
    return %c0_i32, %c0_i32_0 : i32, i32
  }
  func.func @transform_3(%arg0: i32) -> (i32, i32) {
    %c0_i32 = arith.constant 0 : i32
    %c0_i32_0 = arith.constant 0 : i32
    %c0_i32_1 = arith.constant 0 : i32
    return %c0_i32, %c0_i32_0 : i32, i32
  }
  func.func @transform_4(%arg0: i32) -> (i32, i32) {
    %c0_i32 = arith.constant 0 : i32
    %c0_i32_0 = arith.constant 0 : i32
    %c0_i32_1 = arith.constant 0 : i32
    return %c0_i32, %c0_i32_0 : i32, i32
  }
  func.func @transform_5(%arg0: i32) -> (i32, i32) {
    %c0_i32 = arith.constant 0 : i32
    %c0_i32_0 = arith.constant 0 : i32
    %c0_i32_1 = arith.constant 0 : i32
    return %c0_i32, %c0_i32_0 : i32, i32
  }
  func.func @transform_6(%arg0: i32) -> (i32, i32) {
    %c0_i32 = arith.constant 0 : i32
    %c0_i32_0 = arith.constant 0 : i32
    %c0_i32_1 = arith.constant 0 : i32
    return %c0_i32, %c0_i32_0 : i32, i32
  }
  func.func @transform_7(%arg0: i32) -> (i32, i32) {
    %c0_i32 = arith.constant 0 : i32
    %c0_i32_0 = arith.constant 0 : i32
    %c0_i32_1 = arith.constant 0 : i32
    return %c0_i32, %c0_i32_0 : i32, i32
  }
  func.func @transform_8(%arg0: i32) -> (i32, i32) {
    %c0_i32 = arith.constant 0 : i32
    %c0_i32_0 = arith.constant 0 : i32
    %c0_i32_1 = arith.constant 0 : i32
    return %c0_i32, %c0_i32_0 : i32, i32
  }
  func.func @transform_9(%arg0: i32) -> (i32, i32) {
    %c0_i32 = arith.constant 0 : i32
    %c0_i32_0 = arith.constant 0 : i32
    %c0_i32_1 = arith.constant 0 : i32
    return %c0_i32, %c0_i32_0 : i32, i32
  }
  func.func @transform_10(%arg0: i32) -> (i32, i32) {
    %c0_i32 = arith.constant 0 : i32
    %c0_i32_0 = arith.constant 0 : i32
    %c0_i32_1 = arith.constant 0 : i32
    return %c0_i32, %c0_i32_0 : i32, i32
  }
  func.func @transform_11(%arg0: i32) -> (i32, i32) {
    %c0_i32 = arith.constant 0 : i32
    %c0_i32_0 = arith.constant 0 : i32
    %c0_i32_1 = arith.constant 0 : i32
    return %c0_i32, %c0_i32_0 : i32, i32
  }
  func.func @transform_12(%arg0: i32) -> (i32, i32) {
    %c0_i32 = arith.constant 0 : i32
    %c0_i32_0 = arith.constant 0 : i32
    %c0_i32_1 = arith.constant 0 : i32
    return %c0_i32, %c0_i32_0 : i32, i32
  }
  func.func @transform_13(%arg0: i32) -> (i32, i32) {
    %c0_i32 = arith.constant 0 : i32
    %c0_i32_0 = arith.constant 0 : i32
    %c0_i32_1 = arith.constant 0 : i32
    return %c0_i32, %c0_i32_0 : i32, i32
  }
}

module attributes {stable_mosaic.version = 11 : i64} {
  func.func @_corblock_step_kernel(%arg0: i32, %arg1: memref<128x128xf32, #tpu.memory_space<vmem>>, %arg2: memref<128x128xbf16, #tpu.memory_space<vmem>>, %arg3: memref<1152x128xbf16, #tpu.memory_space<vmem>>, %arg4: memref<128x128xbf16, #tpu.memory_space<vmem>>, %arg5: memref<1x1x128xf32, #tpu.memory_space<vmem>>, %arg6: memref<1x1x128xf32, #tpu.memory_space<vmem>>, %arg7: memref<1x1x128xf32, #tpu.memory_space<vmem>>, %arg8: memref<1x1x128xf32, #tpu.memory_space<vmem>>, %arg9: memref<1x1x128xf32, #tpu.memory_space<vmem>>, %arg10: memref<1x1x128xf32, #tpu.memory_space<vmem>>, %arg11: memref<128x128xf32, #tpu.memory_space<vmem>>, %arg12: memref<128x128xf32, #tpu.memory_space<vmem>>, %arg13: memref<2x10x10x128xbf16, #tpu.memory_space<vmem>>, %arg14: memref<128x1152xbf16, #tpu.memory_space<vmem>>) attributes {dimension_semantics = [#tpu.dimension_semantics<arbitrary>], iteration_bounds = array<i64: 1>, scalar_prefetch = 0 : i64, scratch_operands = 3 : i64, tpu.core_type = #tpu.core_type<tc>, window_params = [{pipeline_mode = #tpu.pipeline_mode<synchronous>, transform_indices = @transform_0, window_bounds = array<i64: 128, 128>}, {pipeline_mode = #tpu.pipeline_mode<synchronous>, transform_indices = @transform_1, window_bounds = array<i64: 128, 128>}, {pipeline_mode = #tpu.pipeline_mode<synchronous>, transform_indices = @transform_2, window_bounds = array<i64: 1152, 128>}, {pipeline_mode = #tpu.pipeline_mode<synchronous>, transform_indices = @transform_3, window_bounds = array<i64: 128, 128>}, {transform_indices = @transform_4, window_bounds = array<i64: 1, 1, 128>}, {transform_indices = @transform_5, window_bounds = array<i64: 1, 1, 128>}, {transform_indices = @transform_6, window_bounds = array<i64: 1, 1, 128>}, {transform_indices = @transform_7, window_bounds = array<i64: 1, 1, 128>}, {transform_indices = @transform_8, window_bounds = array<i64: 1, 1, 128>}, {transform_indices = @transform_9, window_bounds = array<i64: 1, 1, 128>}, {pipeline_mode = #tpu.pipeline_mode<synchronous>, transform_indices = @transform_10, window_bounds = array<i64: 128, 128>}]} {
    %c0_i32 = arith.constant 0 : i32
    %0 = arith.cmpi eq, %arg0, %c0_i32 : i32
    %1 = arith.extui %0 : i1 to i32
    %c0_i32_0 = arith.constant 0 : i32
    %2 = arith.cmpi ne, %1, %c0_i32_0 : i32
    scf.if %2 {
      %c0_100 = arith.constant 0 : index
      %c0_101 = arith.constant 0 : index
      %129 = vector.load %arg1[%c0_100, %c0_101] : memref<128x128xf32, #tpu.memory_space<vmem>>, vector<128x128xf32>
      %c0_102 = arith.constant 0 : index
      %c0_103 = arith.constant 0 : index
      %130 = vector.load %arg12[%c0_102, %c0_103] : memref<128x128xf32, #tpu.memory_space<vmem>>, vector<128x128xf32>
      tpu.vector_store %arg12[%c0_102, %c0_103], %129 {strides = array<i32>} : memref<128x128xf32, #tpu.memory_space<vmem>>, vector<128x128xf32>,
      %cst_104 = arith.constant 0.000000e+00 : bf16
      %131 = vector.broadcast %cst_104 : bf16 to vector<2x1x10x128xbf16>
      %c0_105 = arith.constant 0 : index
      %c0_106 = arith.constant 0 : index
      %c0_107 = arith.constant 0 : index
      %c0_108 = arith.constant 0 : index
      %132 = vector.load %arg13[%c0_105, %c0_106, %c0_107, %c0_108] : memref<2x10x10x128xbf16, #tpu.memory_space<vmem>>, vector<2x1x10x128xbf16>
      tpu.vector_store %arg13[%c0_105, %c0_106, %c0_107, %c0_108], %131 {strides = array<i32>} : memref<2x10x10x128xbf16, #tpu.memory_space<vmem>>, vector<2x1x10x128xbf16>,
      %cst_109 = arith.constant 0.000000e+00 : bf16
      %133 = vector.broadcast %cst_109 : bf16 to vector<2x1x10x128xbf16>
      %c0_110 = arith.constant 0 : index
      %c9 = arith.constant 9 : index
      %c0_111 = arith.constant 0 : index
      %c0_112 = arith.constant 0 : index
      %134 = vector.load %arg13[%c0_110, %c9, %c0_111, %c0_112] : memref<2x10x10x128xbf16, #tpu.memory_space<vmem>>, vector<2x1x10x128xbf16>
      tpu.vector_store %arg13[%c0_110, %c9, %c0_111, %c0_112], %133 {strides = array<i32>} : memref<2x10x10x128xbf16, #tpu.memory_space<vmem>>, vector<2x1x10x128xbf16>,
      %cst_113 = arith.constant 0.000000e+00 : bf16
      %135 = vector.broadcast %cst_113 : bf16 to vector<2x10x1x128xbf16>
      %c0_114 = arith.constant 0 : index
      %c0_115 = arith.constant 0 : index
      %c0_116 = arith.constant 0 : index
      %c0_117 = arith.constant 0 : index
      %136 = vector.load %arg13[%c0_114, %c0_115, %c0_116, %c0_117] : memref<2x10x10x128xbf16, #tpu.memory_space<vmem>>, vector<2x10x1x128xbf16>
      tpu.vector_store %arg13[%c0_114, %c0_115, %c0_116, %c0_117], %135 {strides = array<i32>} : memref<2x10x10x128xbf16, #tpu.memory_space<vmem>>, vector<2x10x1x128xbf16>,
      %cst_118 = arith.constant 0.000000e+00 : bf16
      %137 = vector.broadcast %cst_118 : bf16 to vector<2x10x1x128xbf16>
      %c0_119 = arith.constant 0 : index
      %c0_120 = arith.constant 0 : index
      %c9_121 = arith.constant 9 : index
      %c0_122 = arith.constant 0 : index
      %138 = vector.load %arg13[%c0_119, %c0_120, %c9_121, %c0_122] : memref<2x10x10x128xbf16, #tpu.memory_space<vmem>>, vector<2x10x1x128xbf16>
      tpu.vector_store %arg13[%c0_119, %c0_120, %c9_121, %c0_122], %137 {strides = array<i32>} : memref<2x10x10x128xbf16, #tpu.memory_space<vmem>>, vector<2x10x1x128xbf16>,
    } else {
    }
    %c0 = arith.constant 0 : index
    %c0_1 = arith.constant 0 : index
    %3 = vector.load %arg12[%c0, %c0_1] : memref<128x128xf32, #tpu.memory_space<vmem>>, vector<128x128xf32>
    %4 = arith.truncf %3 : vector<128x128xf32> to vector<128x128xbf16>
    %c0_2 = arith.constant 0 : index
    %c0_3 = arith.constant 0 : index
    %5 = vector.load %arg2[%c0_2, %c0_3] : memref<128x128xbf16, #tpu.memory_space<vmem>>, vector<128x128xbf16>
    %cst = arith.constant dense<0.000000e+00> : vector<128x128xf32>
    %6 = tpu.matmul %4, %5, %cst {dimension_numbers = #tpu.dot_dimension_numbers<[1], [0], [0], [1], [0, 0, 1, 1], [], []>} : vector<128x128xbf16>, vector<128x128xbf16>, vector<128x128xf32> -> vector<128x128xf32>
    %c0_4 = arith.constant 0 : index
    %c0_5 = arith.constant 0 : index
    %c0_6 = arith.constant 0 : index
    %7 = vector.load %arg5[%c0_4, %c0_5, %c0_6] : memref<1x1x128xf32, #tpu.memory_space<vmem>>, vector<1x1x128xf32>
    %8 = vector.shape_cast %7 : vector<1x1x128xf32> to vector<1x128xf32>
    %c0_7 = arith.constant 0 : index
    %c0_8 = arith.constant 0 : index
    %c0_9 = arith.constant 0 : index
    %9 = vector.load %arg6[%c0_7, %c0_8, %c0_9] : memref<1x1x128xf32, #tpu.memory_space<vmem>>, vector<1x1x128xf32>
    %10 = vector.shape_cast %9 : vector<1x1x128xf32> to vector<1x128xf32>
    %cst_10 = arith.constant dense<0.000000e+00> : vector<128xf32>
    %11 = vector.multi_reduction <add>, %6, %cst_10 [0] : vector<128x128xf32> to vector<128xf32>
    %12 = vector.shape_cast %11 : vector<128xf32> to vector<1x128xf32>
    %13 = arith.mulf %6, %6 : vector<128x128xf32>
    %cst_11 = arith.constant dense<0.000000e+00> : vector<128xf32>
    %14 = vector.multi_reduction <add>, %13, %cst_11 [0] : vector<128x128xf32> to vector<128xf32>
    %15 = vector.shape_cast %14 : vector<128xf32> to vector<1x128xf32>
    %cst_12 = arith.constant 7.812500e-03 : f32
    %16 = vector.broadcast %cst_12 : f32 to vector<1x128xf32>
    %17 = arith.mulf %12, %16 : vector<1x128xf32>
    %cst_13 = arith.constant 7.812500e-03 : f32
    %18 = vector.broadcast %cst_13 : f32 to vector<1x128xf32>
    %19 = arith.mulf %15, %18 : vector<1x128xf32>
    %20 = arith.mulf %17, %17 : vector<1x128xf32>
    %21 = arith.subf %19, %20 : vector<1x128xf32>
    %cst_14 = arith.constant 9.99999974E-6 : f32
    %22 = vector.broadcast %cst_14 : f32 to vector<1x128xf32>
    %23 = arith.addf %21, %22 : vector<1x128xf32>
    %24 = math.rsqrt %23 : vector<1x128xf32>
    %25 = arith.mulf %24, %8 : vector<1x128xf32>
    %26 = vector.broadcast %25 : vector<1x128xf32> to vector<128x128xf32>
    %27 = arith.mulf %6, %26 : vector<128x128xf32>
    %28 = arith.mulf %17, %25 : vector<1x128xf32>
    %29 = arith.subf %10, %28 : vector<1x128xf32>
    %30 = vector.broadcast %29 : vector<1x128xf32> to vector<128x128xf32>
    %31 = arith.addf %27, %30 : vector<128x128xf32>
    %cst_15 = arith.constant 0.000000e+00 : f32
    %32 = vector.broadcast %cst_15 : f32 to vector<128x128xf32>
    %33 = arith.maximumf %31, %32 : vector<128x128xf32>
    %34 = vector.shape_cast %33 : vector<128x128xf32> to vector<2x8x8x128xf32>
    %35 = arith.truncf %34 : vector<2x8x8x128xf32> to vector<2x8x8x128xbf16>
    %c0_16 = arith.constant 0 : index
    %c1 = arith.constant 1 : index
    %c1_17 = arith.constant 1 : index
    %c0_18 = arith.constant 0 : index
    %36 = vector.load %arg13[%c0_16, %c1, %c1_17, %c0_18] : memref<2x10x10x128xbf16, #tpu.memory_space<vmem>>, vector<2x8x8x128xbf16>
    tpu.vector_store %arg13[%c0_16, %c1, %c1_17, %c0_18], %35 {strides = array<i32>} : memref<2x10x10x128xbf16, #tpu.memory_space<vmem>>, vector<2x8x8x128xbf16>,
    %c0_19 = arith.constant 0 : index
    %c0_20 = arith.constant 0 : index
    %c0_21 = arith.constant 0 : index
    %c0_22 = arith.constant 0 : index
    %37 = vector.load %arg13[%c0_19, %c0_20, %c0_21, %c0_22] : memref<2x10x10x128xbf16, #tpu.memory_space<vmem>>, vector<2x8x8x128xbf16>
    %38 = vector.shape_cast %37 : vector<2x8x8x128xbf16> to vector<128x128xbf16>
    %c0_23 = arith.constant 0 : index
    %c0_24 = arith.constant 0 : index
    %39 = vector.load %arg14[%c0_23, %c0_24] : memref<128x1152xbf16, #tpu.memory_space<vmem>>, vector<128x128xbf16>
    tpu.vector_store %arg14[%c0_23, %c0_24], %38 {strides = array<i32>} : memref<128x1152xbf16, #tpu.memory_space<vmem>>, vector<128x128xbf16>,
    %c0_25 = arith.constant 0 : index
    %c0_26 = arith.constant 0 : index
    %c1_27 = arith.constant 1 : index
    %c0_28 = arith.constant 0 : index
    %40 = vector.load %arg13[%c0_25, %c0_26, %c1_27, %c0_28] : memref<2x10x10x128xbf16, #tpu.memory_space<vmem>>, vector<2x8x8x128xbf16>
    %41 = vector.shape_cast %40 : vector<2x8x8x128xbf16> to vector<128x128xbf16>
    %c0_29 = arith.constant 0 : index
    %c128 = arith.constant 128 : index
    %42 = vector.load %arg14[%c0_29, %c128] : memref<128x1152xbf16, #tpu.memory_space<vmem>>, vector<128x128xbf16>
    tpu.vector_store %arg14[%c0_29, %c128], %41 {strides = array<i32>} : memref<128x1152xbf16, #tpu.memory_space<vmem>>, vector<128x128xbf16>,
    %c0_30 = arith.constant 0 : index
    %c0_31 = arith.constant 0 : index
    %c2 = arith.constant 2 : index
    %c0_32 = arith.constant 0 : index
    %43 = vector.load %arg13[%c0_30, %c0_31, %c2, %c0_32] : memref<2x10x10x128xbf16, #tpu.memory_space<vmem>>, vector<2x8x8x128xbf16>
    %44 = vector.shape_cast %43 : vector<2x8x8x128xbf16> to vector<128x128xbf16>
    %c0_33 = arith.constant 0 : index
    %c256 = arith.constant 256 : index
    %45 = vector.load %arg14[%c0_33, %c256] : memref<128x1152xbf16, #tpu.memory_space<vmem>>, vector<128x128xbf16>
    tpu.vector_store %arg14[%c0_33, %c256], %44 {strides = array<i32>} : memref<128x1152xbf16, #tpu.memory_space<vmem>>, vector<128x128xbf16>,
    %c0_34 = arith.constant 0 : index
    %c1_35 = arith.constant 1 : index
    %c0_36 = arith.constant 0 : index
    %c0_37 = arith.constant 0 : index
    %46 = vector.load %arg13[%c0_34, %c1_35, %c0_36, %c0_37] : memref<2x10x10x128xbf16, #tpu.memory_space<vmem>>, vector<2x8x8x128xbf16>
    %47 = vector.shape_cast %46 : vector<2x8x8x128xbf16> to vector<128x128xbf16>
    %c0_38 = arith.constant 0 : index
    %c384 = arith.constant 384 : index
    %48 = vector.load %arg14[%c0_38, %c384] : memref<128x1152xbf16, #tpu.memory_space<vmem>>, vector<128x128xbf16>
    tpu.vector_store %arg14[%c0_38, %c384], %47 {strides = array<i32>} : memref<128x1152xbf16, #tpu.memory_space<vmem>>, vector<128x128xbf16>,
    %c0_39 = arith.constant 0 : index
    %c1_40 = arith.constant 1 : index
    %c1_41 = arith.constant 1 : index
    %c0_42 = arith.constant 0 : index
    %49 = vector.load %arg13[%c0_39, %c1_40, %c1_41, %c0_42] : memref<2x10x10x128xbf16, #tpu.memory_space<vmem>>, vector<2x8x8x128xbf16>
    %50 = vector.shape_cast %49 : vector<2x8x8x128xbf16> to vector<128x128xbf16>
    %c0_43 = arith.constant 0 : index
    %c512 = arith.constant 512 : index
    %51 = vector.load %arg14[%c0_43, %c512] : memref<128x1152xbf16, #tpu.memory_space<vmem>>, vector<128x128xbf16>
    tpu.vector_store %arg14[%c0_43, %c512], %50 {strides = array<i32>} : memref<128x1152xbf16, #tpu.memory_space<vmem>>, vector<128x128xbf16>,
    %c0_44 = arith.constant 0 : index
    %c1_45 = arith.constant 1 : index
    %c2_46 = arith.constant 2 : index
    %c0_47 = arith.constant 0 : index
    %52 = vector.load %arg13[%c0_44, %c1_45, %c2_46, %c0_47] : memref<2x10x10x128xbf16, #tpu.memory_space<vmem>>, vector<2x8x8x128xbf16>
    %53 = vector.shape_cast %52 : vector<2x8x8x128xbf16> to vector<128x128xbf16>
    %c0_48 = arith.constant 0 : index
    %c640 = arith.constant 640 : index
    %54 = vector.load %arg14[%c0_48, %c640] : memref<128x1152xbf16, #tpu.memory_space<vmem>>, vector<128x128xbf16>
    tpu.vector_store %arg14[%c0_48, %c640], %53 {strides = array<i32>} : memref<128x1152xbf16, #tpu.memory_space<vmem>>, vector<128x128xbf16>,
    %c0_49 = arith.constant 0 : index
    %c2_50 = arith.constant 2 : index
    %c0_51 = arith.constant 0 : index
    %c0_52 = arith.constant 0 : index
    %55 = vector.load %arg13[%c0_49, %c2_50, %c0_51, %c0_52] : memref<2x10x10x128xbf16, #tpu.memory_space<vmem>>, vector<2x8x8x128xbf16>
    %56 = vector.shape_cast %55 : vector<2x8x8x128xbf16> to vector<128x128xbf16>
    %c0_53 = arith.constant 0 : index
    %c768 = arith.constant 768 : index
    %57 = vector.load %arg14[%c0_53, %c768] : memref<128x1152xbf16, #tpu.memory_space<vmem>>, vector<128x128xbf16>
    tpu.vector_store %arg14[%c0_53, %c768], %56 {strides = array<i32>} : memref<128x1152xbf16, #tpu.memory_space<vmem>>, vector<128x128xbf16>,
    %c0_54 = arith.constant 0 : index
    %c2_55 = arith.constant 2 : index
    %c1_56 = arith.constant 1 : index
    %c0_57 = arith.constant 0 : index
    %58 = vector.load %arg13[%c0_54, %c2_55, %c1_56, %c0_57] : memref<2x10x10x128xbf16, #tpu.memory_space<vmem>>, vector<2x8x8x128xbf16>
    %59 = vector.shape_cast %58 : vector<2x8x8x128xbf16> to vector<128x128xbf16>
    %c0_58 = arith.constant 0 : index
    %c896 = arith.constant 896 : index
    %60 = vector.load %arg14[%c0_58, %c896] : memref<128x1152xbf16, #tpu.memory_space<vmem>>, vector<128x128xbf16>
    tpu.vector_store %arg14[%c0_58, %c896], %59 {strides = array<i32>} : memref<128x1152xbf16, #tpu.memory_space<vmem>>, vector<128x128xbf16>,
    %c0_59 = arith.constant 0 : index
    %c2_60 = arith.constant 2 : index
    %c2_61 = arith.constant 2 : index
    %c0_62 = arith.constant 0 : index
    %61 = vector.load %arg13[%c0_59, %c2_60, %c2_61, %c0_62] : memref<2x10x10x128xbf16, #tpu.memory_space<vmem>>, vector<2x8x8x128xbf16>
    %62 = vector.shape_cast %61 : vector<2x8x8x128xbf16> to vector<128x128xbf16>
    %c0_63 = arith.constant 0 : index
    %c1024 = arith.constant 1024 : index
    %63 = vector.load %arg14[%c0_63, %c1024] : memref<128x1152xbf16, #tpu.memory_space<vmem>>, vector<128x128xbf16>
    tpu.vector_store %arg14[%c0_63, %c1024], %62 {strides = array<i32>} : memref<128x1152xbf16, #tpu.memory_space<vmem>>, vector<128x128xbf16>,
    %c0_64 = arith.constant 0 : index
    %c0_65 = arith.constant 0 : index
    %64 = vector.load %arg14[%c0_64, %c0_65] : memref<128x1152xbf16, #tpu.memory_space<vmem>>, vector<128x1152xbf16>
    %c0_66 = arith.constant 0 : index
    %c0_67 = arith.constant 0 : index
    %65 = vector.load %arg3[%c0_66, %c0_67] : memref<1152x128xbf16, #tpu.memory_space<vmem>>, vector<1152x128xbf16>
    %cst_68 = arith.constant dense<0.000000e+00> : vector<128x128xf32>
    %66 = tpu.matmul %64, %65, %cst_68 {dimension_numbers = #tpu.dot_dimension_numbers<[1], [0], [0], [1], [0, 0, 1, 1], [], []>} : vector<128x1152xbf16>, vector<1152x128xbf16>, vector<128x128xf32> -> vector<128x128xf32>
    %c0_69 = arith.constant 0 : index
    %c0_70 = arith.constant 0 : index
    %c0_71 = arith.constant 0 : index
    %67 = vector.load %arg7[%c0_69, %c0_70, %c0_71] : memref<1x1x128xf32, #tpu.memory_space<vmem>>, vector<1x1x128xf32>
    %68 = vector.shape_cast %67 : vector<1x1x128xf32> to vector<1x128xf32>
    %c0_72 = arith.constant 0 : index
    %c0_73 = arith.constant 0 : index
    %c0_74 = arith.constant 0 : index
    %69 = vector.load %arg8[%c0_72, %c0_73, %c0_74] : memref<1x1x128xf32, #tpu.memory_space<vmem>>, vector<1x1x128xf32>
    %70 = vector.shape_cast %69 : vector<1x1x128xf32> to vector<1x128xf32>
    %cst_75 = arith.constant dense<0.000000e+00> : vector<128xf32>
    %71 = vector.multi_reduction <add>, %66, %cst_75 [0] : vector<128x128xf32> to vector<128xf32>
    %72 = vector.shape_cast %71 : vector<128xf32> to vector<1x128xf32>
    %73 = arith.mulf %66, %66 : vector<128x128xf32>
    %cst_76 = arith.constant dense<0.000000e+00> : vector<128xf32>
    %74 = vector.multi_reduction <add>, %73, %cst_76 [0] : vector<128x128xf32> to vector<128xf32>
    %75 = vector.shape_cast %74 : vector<128xf32> to vector<1x128xf32>
    %cst_77 = arith.constant 7.812500e-03 : f32
    %76 = vector.broadcast %cst_77 : f32 to vector<1x128xf32>
    %77 = arith.mulf %72, %76 : vector<1x128xf32>
    %cst_78 = arith.constant 7.812500e-03 : f32
    %78 = vector.broadcast %cst_78 : f32 to vector<1x128xf32>
    %79 = arith.mulf %75, %78 : vector<1x128xf32>
    %80 = arith.mulf %77, %77 : vector<1x128xf32>
    %81 = arith.subf %79, %80 : vector<1x128xf32>
    %cst_79 = arith.constant 9.99999974E-6 : f32
    %82 = vector.broadcast %cst_79 : f32 to vector<1x128xf32>
    %83 = arith.addf %81, %82 : vector<1x128xf32>
    %84 = math.rsqrt %83 : vector<1x128xf32>
    %85 = arith.mulf %84, %68 : vector<1x128xf32>
    %86 = vector.broadcast %85 : vector<1x128xf32> to vector<128x128xf32>
    %87 = arith.mulf %66, %86 : vector<128x128xf32>
    %88 = arith.mulf %77, %85 : vector<1x128xf32>
    %89 = arith.subf %70, %88 : vector<1x128xf32>
    %90 = vector.broadcast %89 : vector<1x128xf32> to vector<128x128xf32>
    %91 = arith.addf %87, %90 : vector<128x128xf32>
    %cst_80 = arith.constant 0.000000e+00 : f32
    %92 = vector.broadcast %cst_80 : f32 to vector<128x128xf32>
    %93 = arith.maximumf %91, %92 : vector<128x128xf32>
    %94 = arith.truncf %93 : vector<128x128xf32> to vector<128x128xbf16>
    %c0_81 = arith.constant 0 : index
    %c0_82 = arith.constant 0 : index
    %95 = vector.load %arg4[%c0_81, %c0_82] : memref<128x128xbf16, #tpu.memory_space<vmem>>, vector<128x128xbf16>
    %cst_83 = arith.constant dense<0.000000e+00> : vector<128x128xf32>
    %96 = tpu.matmul %94, %95, %cst_83 {dimension_numbers = #tpu.dot_dimension_numbers<[1], [0], [0], [1], [0, 0, 1, 1], [], []>} : vector<128x128xbf16>, vector<128x128xbf16>, vector<128x128xf32> -> vector<128x128xf32>
    %c0_84 = arith.constant 0 : index
    %c0_85 = arith.constant 0 : index
    %c0_86 = arith.constant 0 : index
    %97 = vector.load %arg9[%c0_84, %c0_85, %c0_86] : memref<1x1x128xf32, #tpu.memory_space<vmem>>, vector<1x1x128xf32>
    %98 = vector.shape_cast %97 : vector<1x1x128xf32> to vector<1x128xf32>
    %c0_87 = arith.constant 0 : index
    %c0_88 = arith.constant 0 : index
    %c0_89 = arith.constant 0 : index
    %99 = vector.load %arg10[%c0_87, %c0_88, %c0_89] : memref<1x1x128xf32, #tpu.memory_space<vmem>>, vector<1x1x128xf32>
    %100 = vector.shape_cast %99 : vector<1x1x128xf32> to vector<1x128xf32>
    %cst_90 = arith.constant dense<0.000000e+00> : vector<128xf32>
    %101 = vector.multi_reduction <add>, %96, %cst_90 [0] : vector<128x128xf32> to vector<128xf32>
    %102 = vector.shape_cast %101 : vector<128xf32> to vector<1x128xf32>
    %103 = arith.mulf %96, %96 : vector<128x128xf32>
    %cst_91 = arith.constant dense<0.000000e+00> : vector<128xf32>
    %104 = vector.multi_reduction <add>, %103, %cst_91 [0] : vector<128x128xf32> to vector<128xf32>
    %105 = vector.shape_cast %104 : vector<128xf32> to vector<1x128xf32>
    %cst_92 = arith.constant 7.812500e-03 : f32
    %106 = vector.broadcast %cst_92 : f32 to vector<1x128xf32>
    %107 = arith.mulf %102, %106 : vector<1x128xf32>
    %cst_93 = arith.constant 7.812500e-03 : f32
    %108 = vector.broadcast %cst_93 : f32 to vector<1x128xf32>
    %109 = arith.mulf %105, %108 : vector<1x128xf32>
    %110 = arith.mulf %107, %107 : vector<1x128xf32>
    %111 = arith.subf %109, %110 : vector<1x128xf32>
    %cst_94 = arith.constant 9.99999974E-6 : f32
    %112 = vector.broadcast %cst_94 : f32 to vector<1x128xf32>
    %113 = arith.addf %111, %112 : vector<1x128xf32>
    %114 = math.rsqrt %113 : vector<1x128xf32>
    %115 = arith.mulf %114, %98 : vector<1x128xf32>
    %116 = vector.broadcast %115 : vector<1x128xf32> to vector<128x128xf32>
    %117 = arith.mulf %96, %116 : vector<128x128xf32>
    %118 = arith.mulf %107, %115 : vector<1x128xf32>
    %119 = arith.subf %100, %118 : vector<1x128xf32>
    %120 = vector.broadcast %119 : vector<1x128xf32> to vector<128x128xf32>
    %121 = arith.addf %117, %120 : vector<128x128xf32>
    %122 = arith.addf %121, %3 : vector<128x128xf32>
    %cst_95 = arith.constant 0.000000e+00 : f32
    %123 = vector.broadcast %cst_95 : f32 to vector<128x128xf32>
    %124 = arith.maximumf %122, %123 : vector<128x128xf32>
    %c0_96 = arith.constant 0 : index
    %c0_97 = arith.constant 0 : index
    %125 = vector.load %arg12[%c0_96, %c0_97] : memref<128x128xf32, #tpu.memory_space<vmem>>, vector<128x128xf32>
    tpu.vector_store %arg12[%c0_96, %c0_97], %124 {strides = array<i32>} : memref<128x128xf32, #tpu.memory_space<vmem>>, vector<128x128xf32>,
    %c0_i32_98 = arith.constant 0 : i32
    %126 = arith.cmpi eq, %arg0, %c0_i32_98 : i32
    %127 = arith.extui %126 : i1 to i32
    %c0_i32_99 = arith.constant 0 : i32
    %128 = arith.cmpi ne, %127, %c0_i32_99 : i32
    scf.if %128 {
      %c0_100 = arith.constant 0 : index
      %c0_101 = arith.constant 0 : index
      %129 = vector.load %arg12[%c0_100, %c0_101] : memref<128x128xf32, #tpu.memory_space<vmem>>, vector<128x128xf32>
      %c0_102 = arith.constant 0 : index
      %c0_103 = arith.constant 0 : index
      %130 = vector.load %arg11[%c0_102, %c0_103] : memref<128x128xf32, #tpu.memory_space<vmem>>, vector<128x128xf32>
      tpu.vector_store %arg11[%c0_102, %c0_103], %129 {strides = array<i32>} : memref<128x128xf32, #tpu.memory_space<vmem>>, vector<128x128xf32>,
    } else {
    }
    return
  }
  func.func @transform_0(%arg0: i32) -> (i32, i32) {
    %c0_i32 = arith.constant 0 : i32
    %c0_i32_0 = arith.constant 0 : i32
    %c0_i32_1 = arith.constant 0 : i32
    return %c0_i32, %c0_i32_0 : i32, i32
  }
  func.func @transform_1(%arg0: i32) -> (i32, i32) {
    %c0_i32 = arith.constant 0 : i32
    %c0_i32_0 = arith.constant 0 : i32
    %c0_i32_1 = arith.constant 0 : i32
    return %c0_i32, %c0_i32_0 : i32, i32
  }
  func.func @transform_2(%arg0: i32) -> (i32, i32) {
    %c0_i32 = arith.constant 0 : i32
    %c0_i32_0 = arith.constant 0 : i32
    %c0_i32_1 = arith.constant 0 : i32
    return %c0_i32, %c0_i32_0 : i32, i32
  }
  func.func @transform_3(%arg0: i32) -> (i32, i32) {
    %c0_i32 = arith.constant 0 : i32
    %c0_i32_0 = arith.constant 0 : i32
    %c0_i32_1 = arith.constant 0 : i32
    return %c0_i32, %c0_i32_0 : i32, i32
  }
  func.func @transform_4(%arg0: i32) -> (i32, i32, i32) {
    %c0_i32 = arith.constant 0 : i32
    %c0_i32_0 = arith.constant 0 : i32
    %c0_i32_1 = arith.constant 0 : i32
    return %arg0, %c0_i32, %c0_i32_0 : i32, i32, i32
  }
  func.func @transform_5(%arg0: i32) -> (i32, i32, i32) {
    %c0_i32 = arith.constant 0 : i32
    %c0_i32_0 = arith.constant 0 : i32
    %c0_i32_1 = arith.constant 0 : i32
    return %arg0, %c0_i32, %c0_i32_0 : i32, i32, i32
  }
  func.func @transform_6(%arg0: i32) -> (i32, i32, i32) {
    %c0_i32 = arith.constant 0 : i32
    %c0_i32_0 = arith.constant 0 : i32
    %c0_i32_1 = arith.constant 0 : i32
    return %arg0, %c0_i32, %c0_i32_0 : i32, i32, i32
  }
  func.func @transform_7(%arg0: i32) -> (i32, i32, i32) {
    %c0_i32 = arith.constant 0 : i32
    %c0_i32_0 = arith.constant 0 : i32
    %c0_i32_1 = arith.constant 0 : i32
    return %arg0, %c0_i32, %c0_i32_0 : i32, i32, i32
  }
  func.func @transform_8(%arg0: i32) -> (i32, i32, i32) {
    %c0_i32 = arith.constant 0 : i32
    %c0_i32_0 = arith.constant 0 : i32
    %c0_i32_1 = arith.constant 0 : i32
    return %arg0, %c0_i32, %c0_i32_0 : i32, i32, i32
  }
  func.func @transform_9(%arg0: i32) -> (i32, i32, i32) {
    %c0_i32 = arith.constant 0 : i32
    %c0_i32_0 = arith.constant 0 : i32
    %c0_i32_1 = arith.constant 0 : i32
    return %arg0, %c0_i32, %c0_i32_0 : i32, i32, i32
  }
  func.func @transform_10(%arg0: i32) -> (i32, i32) {
    %c0_i32 = arith.constant 0 : i32
    %c0_i32_0 = arith.constant 0 : i32
    %c0_i32_1 = arith.constant 0 : i32
    return %c0_i32, %c0_i32_0 : i32, i32
  }
}

</mosaic_0001>

<bundles_post_ra>
// kernel: corblock_s_forward.3
= control target key start
LH: loop header
LB: loop body
LE: loop exit
PB: predicated region body
PF: predicated region fallthrough
CT: control target
= control target key end

     0   :  { %vm81_vm0 = vcmask 1040384   ;;  %vm82_vm1 = vsmask.f32 256  ;;  %v132_v32 = vld [vmem:[#allocation3 + $0x80] sm:$0x1]  ;;  %v4878_v50 = vmov 0   ;;  %s6278_s1 = inlined_call_operand.vmem [shape: bf16[128,128], index: 1, kind: input, shape index: {}]   ;;  %s6279_s0 = inlined_call_operand.vmem [shape: f32[128,128], index: 0, kind: input, shape index: {}]   ;;  %s6280_s2 = inlined_call_operand.vmem [shape: bf16[1152,128], index: 2, kind: input, shape index: {}]   ;;  %s6281_s4 = inlined_call_operand.vmem [shape: f32[1,1,128], index: 4, kind: input, shape index: {}]   ;;  %s6282_s5 = inlined_call_operand.vmem [shape: f32[1,1,128], index: 5, kind: input, shape index: {}]   ;;  %s6283_s3 = inlined_call_operand.vmem [shape: bf16[128,128], index: 3, kind: input, shape index: {}]   ;;  %s6284_s6 = inlined_call_operand.vmem [shape: f32[1,1,128], index: 6, kind: input, shape index: {}]   ;;  %s6285_s7 = inlined_call_operand.vmem [shape: f32[1,1,128], index: 7, kind: input, shape index: {}]   ;;  %s6286_s8 = inlined_call_operand.vmem [shape: f32[1,1,128], index: 8, kind: input, shape index: {}]   ;;  %s6287_s9 = inlined_call_operand.vmem [shape: f32[1,1,128], index: 9, kind: input, shape index: {}]   ;;  %s6288_s10 = inlined_call_operand.vmem [shape: f32[128,128], index: 10, kind: output, shape index: {}]  }
   0x1   :  { %v4744_v0 = vld [vmem:[%s6278_s1] sm:$0xff]   ;;  %v4745_v1 = vld [vmem:[%s6278_s1 + $0x8] sm:$0xff]   ;;  %v4746_v2 = vld [vmem:[%s6278_s1 + $0x10] sm:$0xff]   ;;  %vm144_vm3 = vsmask.f32 7938  ;;  %vm1280_vm5 = vcmask 1042432  }
   0x2   :  { %4631 = vmatprep.subr.bf16.mxu0 %v4744_v0  ;;  %v4747_v3 = vld [vmem:[%s6278_s1 + $0x18] sm:$0xff]   ;;  %v40_v4 = vld [vmem:[%s6279_s0] sm:$0xff]  ;;  %v41_v5 = vld [vmem:[%s6279_s0 + $0x8] sm:$0xff]  ;;  %72 = vst [vmem:[#allocation3] sm:$0xf] %v4878_v50  ;;  %vm1281_vm6 = vcmask 1046532  }
   0x3   :  { %4632 = vmatpush3.bf16.msra.mxu0 %v4744_v0  ;;  %v222_v6 = vpack.c.bf16 %v41_v5, %v40_v4  ;;  %v4748_v7 = vld [vmem:[%s6278_s1 + $0x20] sm:$0xff]   ;;  %v4749_v8 = vld [vmem:[%s6278_s1 + $0x28] sm:$0xff]   ;;  %v4750_v9 = vld [vmem:[%s6278_s1 + $0x30] sm:$0xff]   ;;  %73 = vst [vmem:[#allocation3 + $0x4] sm:$0x1] %v4878_v50  ;;  %vm743_vm8 = vcmask 1043456  }
   0x4   :  { %4633 = vmatprep.subr.bf16.mxu0 %v4745_v1  ;;  %v4751_v10 = vld [vmem:[%s6278_s1 + $0x38] sm:$0xff]   ;;  %v42_v11 = vld [vmem:[%s6279_s0 + $0x10] sm:$0xff]  ;;  %v44_v13 = vld [vmem:[%s6279_s0 + $0x20] sm:$0xff]  ;;  %74 = vst [vmem:[#allocation3 + $0x50] sm:$0xf] %v4878_v50 }
   0x5   :  { %4647 = vmatprep.mubr.bf16.mxu0 %v222_v6  ;;  %v43_v12 = vld [vmem:[%s6279_s0 + $0x18] sm:$0xff]  ;;  %v45_v14 = vld [vmem:[%s6279_s0 + $0x28] sm:$0xff]  ;;  %v46_v17 = vld [vmem:[%s6279_s0 + $0x30] sm:$0xff]  ;;  %75 = vst [vmem:[#allocation3 + $0x54] sm:$0x1] %v4878_v50 }
   0x6   :  { %v223_v15 = vpack.c.bf16 %v43_v12, %v42_v11  ;;  %v224_v16 = vpack.c.bf16 %v45_v14, %v44_v13  ;;  %v47_v18 = vld [vmem:[%s6279_s0 + $0x38] sm:$0xff]  ;;  %v48_v19 = vld [vmem:[%s6279_s0 + $0x40] sm:$0xff]  ;;  %v49_v20 = vld [vmem:[%s6279_s0 + $0x48] sm:$0xff]  ;;  %77 = vst [vmem:[#allocation3 + $0x48] sm:$0xf] %v4878_v50 }
   0x7   :  { %4634 = vmatpush3.bf16.msra.mxu0 %v4745_v1  ;;  %v225_v21 = vpack.c.bf16 %v47_v18, %v46_v17  ;;  %v226_v22 = vpack.c.bf16 %v49_v20, %v48_v19  ;;  %v50_v23 = vld [vmem:[%s6279_s0 + $0x50] sm:$0xff]  ;;  %v51_v24 = vld [vmem:[%s6279_s0 + $0x58] sm:$0xff]  ;;  %v52_v25 = vld [vmem:[%s6279_s0 + $0x60] sm:$0xff]  ;;  %78 = vst [vmem:[#allocation3 + $0x4c] sm:$0x1] %v4878_v50 }
   0x8   :  { %4635 = vmatprep.subr.bf16.mxu0 %v4746_v2  ;;  %v53_v26 = vld [vmem:[%s6279_s0 + $0x68] sm:$0xff]  ;;  %v227_v27 = vpack.c.bf16 %v51_v24, %v50_v23  ;;  %v54_v29 = vld [vmem:[%s6279_s0 + $0x70] sm:$0xff]  ;;  %v55_v30 = vld [vmem:[%s6279_s0 + $0x78] sm:$0xff]  ;;  %79 = vst [vmem:[#allocation3 + $0x98] sm:$0xf] %v4878_v50 }
   0x9   :  { %v228_v28 = vpack.c.bf16 %v53_v26, %v52_v25  ;;  %v229_v31 = vpack.c.bf16 %v55_v30, %v54_v29  ;;  %vm5006_vm2 = vmand %vm81_vm0, %vm82_vm1  ;;  %v194_v34 = vld [vmem:[#allocation3 + $0x84] sm:$0x1]  ;;  %v4754_v40 = vld [vmem:[%s6280_s2 + $0xc8] sm:$0xff]   ;;  %80 = vst [vmem:[#allocation3 + $0x9c] sm:$0x1] %v4878_v50 }
   0xa   :  { %v133_v35 = vsel %vm5006_vm2, 0, %v132_v32  ;;  %vm5013_vm4 = vmand %vm81_vm0, %vm144_vm3  ;;  %v4752_v38 = vld [vmem:[%s6280_s2 + $0xc0] sm:$0xff]   ;;  %v4755_v41 = vld [vmem:[%s6280_s2 + $0x88] sm:$0xff]   ;;  %vm949_vm10 = vsmask.f32 3328 }
   0xb   :  { %4636 = vmatpush3.bf16.msra.mxu0 %v4746_v2  ;;  %134 = vst [vmem:[#allocation3 + $0x80] sm:$0x1] %v133_v35  ;;  %v195_v37 = vsel %vm5013_vm4, 0, %v194_v34  ;;  %v4753_v39 = vld [vmem:[%s6280_s2 + $0x80] sm:$0xff]   ;;  %v4758_v44 = vld [vmem:[%s6280_s2 + $0xd0] sm:$0xff]   ;;  %v4760_v46 = vld [vmem:[%s6280_s2 + $0x48] sm:$0xff]  }
   0xc   :  { %4637 = vmatprep.subr.bf16.mxu0 %v4747_v3  ;;  %196 = vst [vmem:[#allocation3 + $0x84] sm:$0x1] %v195_v37  ;;  %v4756_v42 = vld [vmem:[%s6280_s2 + $0x40] sm:$0xff]   ;;  %v4759_v45 = vld [vmem:[%s6280_s2 + $0x90] sm:$0xff]   ;;  %v4761_v47 = vld [vmem:[%s6280_s2 + $0x8] sm:$0xff]  }
   0xd   :  { %v4757_v43 = vld [vmem:[%s6280_s2] sm:$0xff]   ;;  %4343 = vmatprep.subr.bf16.mxu1 %v4756_v42  ;;  %v4762_v48 = vld [vmem:[%s6280_s2 + $0xd8] sm:$0xff]   ;;  %v4764_v51 = vld [vmem:[%s6280_s2 + $0x50] sm:$0xff]   ;;  %vm950_vm11 = vsmask.f32 7440 }
   0xe   :  { %4344 = vmatpush3.bf16.msra.mxu1 %v4757_v43  ;;  %v4763_v49 = vld [vmem:[%s6280_s2 + $0x98] sm:$0xff]   ;;  %v4765_v52 = vld [vmem:[%s6280_s2 + $0x10] sm:$0xff]   ;;  %v4766_v53 = vld [vmem:[%s6280_s2 + $0xe0] sm:$0xff]  }
   0xf   :  { %4638 = vmatpush3.bf16.msra.mxu0 %v4747_v3  ;;  %4345 = vmatprep.subr.bf16.mxu1 %v4760_v46  ;;  %v4767_v54 = vld [vmem:[%s6280_s2 + $0xa0] sm:$0xff]   ;;  %v4768_v55 = vld [vmem:[%s6280_s2 + $0x58] sm:$0xff]   ;;  %v4770_v57 = vld [vmem:[%s6280_s2 + $0xe8] sm:$0xff]  }
  0x10   :  { %4639 = vmatprep.subr.bf16.mxu0 %v4748_v7  ;;  %v4769_v56 = vld [vmem:[%s6280_s2 + $0x18] sm:$0xff]   ;;  %v4771_v58 = vld [vmem:[%s6280_s2 + $0xa8] sm:$0xff]   ;;  %v4772_v59 = vld [vmem:[%s6280_s2 + $0x60] sm:$0xff]  }
  0x11   :  { %v4773_v60 = vld [vmem:[%s6280_s2 + $0x20] sm:$0xff]   ;;  %v4774_v61 = vld [vmem:[%s6280_s2 + $0xf0] sm:$0xff]   ;;  %v4776_v63 = vld [vmem:[%s6280_s2 + $0x68] sm:$0xff]  }
  0x12   :  { %4346 = vmatpush3.bf16.msra.mxu1 %v4761_v47  ;;  %v4775_v62 = vld [vmem:[%s6280_s2 + $0xb0] sm:$0xff]   ;;  %v4777_v0 = vld [vmem:[%s6280_s2 + $0x28] sm:$0xff]   ;;  %v4778_v1 = vld [vmem:[%s6280_s2 + $0xf8] sm:$0xff]  }
  0x13   :  { %4640 = vmatpush3.bf16.msra.mxu0 %v4748_v7  ;;  %4347 = vmatprep.subr.bf16.mxu1 %v4764_v51  ;;  %v4779_v2 = vld [vmem:[%s6280_s2 + $0xb8] sm:$0xff]   ;;  %v87_v3 = vld [vmem:[#allocation3 + $0x8] sm:$0x1]  ;;  %v90_v4 = vld [vmem:[#allocation3 + $0x10] sm:$0x1] }
  0x14   :  { %4641 = vmatprep.subr.bf16.mxu0 %v4749_v8  ;;  %v88_v5 = vsel %vm5006_vm2, 0, %v87_v3  ;;  %v91_v6 = vsel %vm5006_vm2, 0, %v90_v4  ;;  %v4781_v7 = vld [vmem:[%s6280_s2 + $0x70] sm:$0xff]   ;;  %v93_v13 = vld [vmem:[#allocation3 + $0x18] sm:$0x1]  ;;  %v4786_v23 = vld [vmem:[%s6280_s2 + $0x140] sm:$0xff]  }
  0x15   :  { %89 = vst [vmem:[#allocation3 + $0x8] sm:$0x1] %v88_v5  ;;  %92 = vst [vmem:[#allocation3 + $0x10] sm:$0x1] %v91_v6  ;;  %v94_v14 = vsel %vm5006_vm2, 0, %v93_v13  ;;  %v4784_v17 = vld [vmem:[%s6280_s2 + $0x78] sm:$0xff]  }
  0x16   :  { %4348 = vmatpush3.bf16.msra.mxu1 %v4765_v52  ;;  %95 = vst [vmem:[#allocation3 + $0x18] sm:$0x1] %v94_v14  ;;  %v4785_v18 = vld [vmem:[%s6280_s2 + $0x38] sm:$0xff]   ;;  %v84_v19 = vld [vmem:[#allocation3] sm:$0x1]  ;;  %vm5278_vm7 = vmor %vm1280_vm5, %vm1281_vm6 }
  0x17   :  { %4642 = vmatpush3.bf16.msra.mxu0 %v4749_v8  ;;  %4349 = vmatprep.subr.bf16.mxu1 %v4768_v55  ;;  %v4782_v8 = vld [vmem:[%s6280_s2 + $0x30] sm:$0xff]   ;;  %v85_v20 = vsel %vm5006_vm2, 0, %v84_v19  ;;  %v99_v26 = vld [vmem:[#allocation3 + $0x28] sm:$0x1]  ;;  %v158_v30 = vld [vmem:[#allocation3 + $0x24] sm:$0x1] }
  0x18   :  { %4643 = vmatprep.subr.bf16.mxu0 %v4750_v9  ;;  %86 = vst [vmem:[#allocation3] sm:$0x1] %v85_v20  ;;  %v161_v32 = vld [vmem:[#allocation3 + $0x2c] sm:$0x1]  ;;  %v105_v35 = vld [vmem:[#allocation3 + $0x38] sm:$0x1]  ;;  %vm5367_vm9 = vmand %vm743_vm8, %vm144_vm3 }
  0x19   :  { %v162_v34 = vsel %vm5013_vm4, 0, %v161_v32  ;;  %v108_v37 = vld [vmem:[#allocation3 + $0x40] sm:$0x1]  ;;  %v167_v42 = vld [vmem:[#allocation3 + $0x3c] sm:$0x1]  ;;  %vm5444_vm12 = vmor %vm949_vm10, %vm950_vm11 }
  0x1a   :  { %4350 = vmatpush3.bf16.msra.mxu1 %v4769_v56  ;;  %163 = vst [vmem:[#allocation3 + $0x2c] sm:$0x1] %v162_v34  ;;  %v117_v43 = vld [vmem:[#allocation3 + $0x58] sm:$0x1]  ;;  %v120_v46 = vld [vmem:[#allocation3 + $0x60] sm:$0x1] }
  0x1b   :  { %4644 = vmatpush3.bf16.msra.mxu0 %v4750_v9  ;;  %4351 = vmatprep.subr.bf16.mxu1 %v4772_v59  ;;  %v146_v9 = vld [vmem:[#allocation3 + $0x4] sm:$0x1]  ;;  %v121_v47 = vsel %vm5006_vm2, 0, %v120_v46  ;;  %v123_v50 = vld [vmem:[#allocation3 + $0x68] sm:$0x1] }
  0x1c   :  { %4645 = vmatprep.subr.bf16.mxu0 %v4751_v10  ;;  %v147_v11 = vsel %vm5013_vm4, 0, %v146_v9  ;;  %122 = vst [vmem:[#allocation3 + $0x60] sm:$0x1] %v121_v47  ;;  %v124_v51 = vsel %vm5006_vm2, 0, %v123_v50  ;;  %v126_v52 = vld [vmem:[#allocation3 + $0x70] sm:$0x1] }
  0x1d   :  { %148 = vst [vmem:[#allocation3 + $0x4] sm:$0x1] %v147_v11  ;;  %125 = vst [vmem:[#allocation3 + $0x68] sm:$0x1] %v124_v51  ;;  %v182_v4 = vld [vmem:[#allocation3 + $0x64] sm:$0x1] }
  0x1e   :  { %4352 = vmatpush3.bf16.msra.mxu1 %v4773_v60  ;;  %v176_v60 = vld [vmem:[#allocation3 + $0x54] sm:$0x1]  ;;  %v183_v5 = vsel %vm5013_vm4, 0, %v182_v4  ;;  %v185_v6 = vld [vmem:[#allocation3 + $0x6c] sm:$0x1] }
  0x1f   :  { %4646 = vmatpush3.bf16.msra.mxu0 %v4751_v10  ;;  %4353 = vmatprep.subr.bf16.mxu1 %v4776_v63  ;;  %v149_v10 = vld [vmem:[#allocation3 + $0xc] sm:$0x1]  ;;  %184 = vst [vmem:[#allocation3 + $0x64] sm:$0x1] %v183_v5  ;;  %v186_v11 = vsel %vm5013_vm4, 0, %v185_v6 }
  0x20   :  { %4407 = vmatprep.subr.bf16.mxu0 %v4752_v38  ;;  %v150_v12 = vsel %vm5013_vm4, 0, %v149_v10  ;;  %v106_v38 = vsel %vm5006_vm2, 0, %v105_v35  ;;  %187 = vst [vmem:[#allocation3 + $0x6c] sm:$0x1] %v186_v11  ;;  %v129_v13 = vld [vmem:[#allocation3 + $0x78] sm:$0x1] }
  0x21   :  { %151 = vst [vmem:[#allocation3 + $0xc] sm:$0x1] %v150_v12  ;;  %107 = vst [vmem:[#allocation3 + $0x38] sm:$0x1] %v106_v38  ;;  %v188_v38 = vld [vmem:[#allocation3 + $0x74] sm:$0x1] }
  0x22   :  { %4648 = vmatmul.mubr.bf16.vlgmr.msra.gmra.mrb[0].mxu0 %v223_v15  ;;  %4354 = vmatpush3.bf16.msra.mxu1 %v4777_v0  ;;  %v96_v15 = vld [vmem:[#allocation3 + $0x20] sm:$0x1]  ;;  %v177_v0 = vsel %vm5013_vm4, 0, %v176_v60  ;;  %v135_v50 = vld [vmem:[#allocation3 + $0x88] sm:$0x1] }
  0x23   :  { %4651 = vmatprep.mubr.bf16.mxu0 %v224_v16  ;;  %4408 = vmatpush3.bf16.msra.mxu0 %v4753_v39  ;;  %v97_v16 = vsel %vm5006_vm2, 0, %v96_v15  ;;  %v109_v39 = vsel %vm5006_vm2, 0, %v108_v37  ;;  %178 = vst [vmem:[#allocation3 + $0x54] sm:$0x1] %v177_v0  ;;  %v138_v51 = vld [vmem:[#allocation3 + $0x90] sm:$0x1] }
  0x24   :  { %4409 = vmatprep.subr.bf16.mxu0 %v4754_v40  ;;  %4355 = vmatprep.subr.bf16.mxu1 %v4781_v7  ;;  %98 = vst [vmem:[#allocation3 + $0x20] sm:$0x1] %v97_v16  ;;  %110 = vst [vmem:[#allocation3 + $0x40] sm:$0x1] %v109_v39  ;;  %v164_v40 = vld [vmem:[#allocation3 + $0x34] sm:$0x1] }
  0x25   :  { %v191_v39 = vld [vmem:[#allocation3 + $0x7c] sm:$0x1]  ;;  %v139_v60 = vsel %vm5006_vm2, 0, %v138_v51 }
  0x26   :  { %4356 = vmatpush3.bf16.msra.mxu1 %v4782_v8  ;;  %140 = vst [vmem:[#allocation3 + $0x90] sm:$0x1] %v139_v60  ;;  %v918_v60 = vld [vmem:[#allocation3 + $0x4] sm:$0x1] }
  0x27   :  { %4410 = vmatpush3.bf16.msra.mxu0 %v4755_v41  ;;  %4357 = vmatprep.subr.bf16.mxu1 %v4784_v17  ;;  %v165_v41 = vsel %vm5013_vm4, 0, %v164_v40 }
  0x28   :  { %4411 = vmatprep.subr.bf16.mxu0 %v4758_v44  ;;  %166 = vst [vmem:[#allocation3 + $0x34] sm:$0x1] %v165_v41  ;;  %v168_v44 = vsel %vm5013_vm4, 0, %v167_v42 }
  0x29   :  { %169 = vst [vmem:[#allocation3 + $0x3c] sm:$0x1] %v168_v44  ;;  %v4801_v44 = vld [vmem:[%s6280_s2 + $0x1c0] sm:$0xff]  }
  0x2a   :  { %4652 = vmatmul.mubr.bf16.gmra.mrb[4].mxu0 %v225_v21  ;;  %4358 = vmatpush3.bf16.msra.mxu1 %v4785_v18  ;;  %v152_v21 = vld [vmem:[#allocation3 + $0x14] sm:$0x1]  ;;  %v130_v18 = vsel %vm5006_vm2, 0, %v129_v13 }
  0x2b   :  { %4655 = vmatprep.mubr.bf16.mxu0 %v226_v22  ;;  %4412 = vmatpush3.bf16.msra.mxu0 %v4759_v45  ;;  %v155_v22 = vld [vmem:[#allocation3 + $0x1c] sm:$0x1]  ;;  %v153_v24 = vsel %vm5013_vm4, 0, %v152_v21  ;;  %v118_v45 = vsel %vm5006_vm2, 0, %v117_v43  ;;  %131 = vst [vmem:[#allocation3 + $0x78] sm:$0x1] %v130_v18 }
  0x2c   :  { %4413 = vmatprep.subr.bf16.mxu0 %v4762_v48  ;;  %154 = vst [vmem:[#allocation3 + $0x14] sm:$0x1] %v153_v24  ;;  %v156_v25 = vsel %vm5013_vm4, 0, %v155_v22  ;;  %4471 = vmatprep.subr.bf16.mxu1 %v4786_v23  ;;  %119 = vst [vmem:[#allocation3 + $0x58] sm:$0x1] %v118_v45  ;;  %v189_v43 = vsel %vm5013_vm4, 0, %v188_v38 }
  0x2d   :  { %157 = vst [vmem:[#allocation3 + $0x1c] sm:$0x1] %v156_v25  ;;  %v179_v48 = vld [vmem:[#allocation3 + $0x5c] sm:$0x1]  ;;  %190 = vst [vmem:[#allocation3 + $0x74] sm:$0x1] %v189_v43 }
  0x2e   :  { %v192_v45 = vsel %vm5013_vm4, 0, %v191_v39 }
  0x2f   :  { %4414 = vmatpush3.bf16.msra.mxu0 %v4763_v49  ;;  %v180_v49 = vsel %vm5013_vm4, 0, %v179_v48  ;;  %193 = vst [vmem:[#allocation3 + $0x7c] sm:$0x1] %v192_v45  ;;  %v111_v45 = vld [vmem:[#allocation3 + $0x48] sm:$0x1] }
  0x30   :  { %4415 = vmatprep.subr.bf16.mxu0 %v4766_v53  ;;  %181 = vst [vmem:[#allocation3 + $0x5c] sm:$0x1] %v180_v49  ;;  %v127_v53 = vsel %vm5006_vm2, 0, %v126_v52 }
  0x31   :  { %128 = vst [vmem:[#allocation3 + $0x70] sm:$0x1] %v127_v53 }
  0x32   :  { %4656 = vmatmul.mubr.bf16.gmra.mrb[8].mxu0 %v227_v27  ;;  %v100_v27 = vsel %vm5006_vm2, 0, %v99_v26 }
  0x33   :  { %4659 = vmatprep.mubr.bf16.mxu0 %v228_v28  ;;  %4416 = vmatpush3.bf16.msra.mxu0 %v4767_v54  ;;  %v102_v28 = vld [vmem:[#allocation3 + $0x30] sm:$0x1]  ;;  %101 = vst [vmem:[#allocation3 + $0x28] sm:$0x1] %v100_v27 }
  0x34   :  { %4417 = vmatprep.subr.bf16.mxu0 %v4770_v57  ;;  %v103_v29 = vsel %vm5006_vm2, 0, %v102_v28  ;;  %v114_v57 = vld [vmem:[#allocation3 + $0x50] sm:$0x1] }
  0x35   :  { %104 = vst [vmem:[#allocation3 + $0x30] sm:$0x1] %v103_v29  ;;  %v115_v59 = vsel %vm5006_vm2, 0, %v114_v57 }
  0x36   :  { %116 = vst [vmem:[#allocation3 + $0x50] sm:$0x1] %v115_v59  ;;  %v136_v59 = vsel %vm5006_vm2, 0, %v135_v50 }
  0x37   :  { %4418 = vmatpush3.bf16.msra.mxu0 %v4771_v58  ;;  %137 = vst [vmem:[#allocation3 + $0x88] sm:$0x1] %v136_v59  ;;  %v1217_v59 = vld [vmem:[#allocation3 + $0x4] sm:$0x1] }
  0x38   :  { %4419 = vmatprep.subr.bf16.mxu0 %v4774_v61 }
  0x3a   :  { %4660 = vmatmul.mubr.bf16.gmra.mrb[12].mxu0 %v229_v31  ;;  %v159_v31 = vsel %vm5013_vm4, 0, %v158_v30 }
  0x3b   :  { %4420 = vmatpush3.bf16.msra.mxu0 %v4775_v62  ;;  %160 = vst [vmem:[#allocation3 + $0x24] sm:$0x1] %v159_v31 }
  0x3c   :  { %4421 = vmatprep.subr.bf16.mxu0 %v4778_v1 }
  0x3f   :  { %4422 = vmatpush3.bf16.msra.mxu0 %v4779_v2 }
  0x40   :  { %4535 = vmatprep.subr.bf16.mxu0 %v4801_v44  ;;  %v917_v44 = vld [vmem:[#allocation3] sm:$0xf] }
  0x41   :  { %v953_v50 = vshrl.u32 %v917_v44, 16  ;;  %v956_v51 = vshll.u32 %v917_v44, 16 }
  0xf5   :  { %v5162_v54 = vpop.f32.mrb[0].mxu0 }
  0xf6   :  { %v5164_v55 = vpop.f32.mrb[1].mxu0  ;;  %v416_v1 = vmul.f32 %v5162_v54, %v5162_v54 }
  0xf7   :  { %v5166_v56 = vpop.f32.mrb[2].mxu0  ;;  %v414_v61 = vmul.f32 %v5164_v55, %v5164_v55 }
  0xf8   :  { %v5168_v58 = vpop.f32.mrb[3].mxu0  ;;  %v417_v7 = vmul.f32 %v5166_v56, %v5166_v56 }
  0xf9   :  { %v393_v62 = vadd.f32 %v5168_v58, %v5164_v55  ;;  %v415_v63 = vmul.f32 %v5168_v58, %v5168_v58 }
  0xfb   :  { %v394_v2 = vadd.f32 %v5162_v54, %v393_v62  ;;  %v430_v3 = vadd.f32 %v415_v63, %v414_v61 }
  0xfd   :  { %v431_v8 = vadd.f32 %v430_v3, %v416_v1  ;;  %v5187_v9 = vpop.f32.mrb[4].mxu0  ;;  %v395_v10 = vadd.f32 %v5166_v56, %v394_v2 }
  0xfe   :  { %v5192_v12 = vpop.f32.mrb[5].mxu0  ;;  %v420_v23 = vmul.f32 %v5187_v9, %v5187_v9 }
  0xff   :  { %v396_v14 = vadd.f32 %v395_v10, %v5192_v12  ;;  %v418_v15 = vmul.f32 %v5192_v12, %v5192_v12  ;;  %v432_v16 = vadd.f32 %v431_v8, %v417_v7  ;;  %v5197_v17 = vpop.f32.mrb[6].mxu0  ;;  %v197_v10 = vld [vmem:[#allocation3 + $0x8c] sm:$0x1] }
 0x100   :  { %v5201_v19 = vpop.f32.mrb[7].mxu0  ;;  %v421_v26 = vmul.f32 %v5197_v17, %v5197_v17 }
 0x101   :  { %v433_v20 = vadd.f32 %v432_v16, %v418_v15  ;;  %v397_v21 = vadd.f32 %v396_v14, %v5201_v19  ;;  %v419_v22 = vmul.f32 %v5201_v19, %v5201_v19  ;;  %v198_v15 = vsel %vm5013_vm4, 0, %v197_v10 }
 0x102   :  { %199 = vst [vmem:[#allocation3 + $0x8c] sm:$0x1] %v198_v15  ;;  %v5283_v15 = vld [vmem:[#allocation3 + $0x50] sm:$0xe] }
 0x103   :  { %v398_v24 = vadd.f32 %v5187_v9, %v397_v21  ;;  %v434_v25 = vadd.f32 %v433_v20, %v419_v22 }
 0x105   :  { %v435_v27 = vadd.f32 %v434_v25, %v420_v23  ;;  %v5211_v28 = vpop.f32.mrb[8].mxu0  ;;  %v399_v29 = vadd.f32 %v5197_v17, %v398_v24 }
 0x106   :  { %v5214_v30 = vpop.f32.mrb[9].mxu0  ;;  %v424_v46 = vmul.f32 %v5211_v28, %v5211_v28 }
 0x107   :  { %v400_v31 = vadd.f32 %v399_v29, %v5214_v30  ;;  %v422_v32 = vmul.f32 %v5214_v30, %v5214_v30  ;;  %v436_v34 = vadd.f32 %v435_v27, %v421_v26  ;;  %v5219_v35 = vpop.f32.mrb[10].mxu0 }
 0x108   :  { %v5221_v37 = vpop.f32.mrb[11].mxu0  ;;  %v425_v49 = vmul.f32 %v5219_v35, %v5219_v35 }
 0x109   :  { %v437_v40 = vadd.f32 %v436_v34, %v422_v32  ;;  %v401_v41 = vadd.f32 %v400_v31, %v5221_v37  ;;  %v423_v42 = vmul.f32 %v5221_v37, %v5221_v37  ;;  %v170_v32 = vld [vmem:[#allocation3 + $0x44] sm:$0x1] }
 0x10a   :  { %v171_v39 = vsel %vm5013_vm4, 0, %v170_v32 }
 0x10b   :  { %v402_v47 = vadd.f32 %v5211_v28, %v401_v41  ;;  %v438_v48 = vadd.f32 %v437_v40, %v423_v42  ;;  %172 = vst [vmem:[#allocation3 + $0x44] sm:$0x1] %v171_v39 }
 0x10d   :  { %v439_v52 = vadd.f32 %v438_v48, %v424_v46  ;;  %v5238_v53 = vpop.f32.mrb[12].mxu0  ;;  %v403_v57 = vadd.f32 %v5219_v35, %v402_v47  ;;  %v173_v46 = vld [vmem:[#allocation3 + $0x4c] sm:$0x1]  ;;  %v458_v47 = vlaneseq  ;;  %v112_v48 = vsel %vm5006_vm2, 0, %v111_v45 }
 0x10e   :  { %v5245_v61 = vpop.f32.mrb[13].mxu0  ;;  %v428_v6 = vmul.f32 %v5238_v53, %v5238_v53  ;;  %113 = vst [vmem:[#allocation3 + $0x48] sm:$0x1] %v112_v48 }
 0x10f   :  { %v404_v62 = vadd.f32 %v403_v57, %v5245_v61  ;;  %v426_v63 = vmul.f32 %v5245_v61, %v5245_v61  ;;  %v440_v0 = vadd.f32 %v439_v52, %v425_v49  ;;  %v5250_v1 = vpop.f32.mrb[14].mxu0  ;;  %v174_v49 = vsel %vm5013_vm4, 0, %v173_v46  ;;  %v1216_v57 = vld [vmem:[#allocation3] sm:$0xe] }
 0x110   :  { %v5252_v2 = vpop.f32.mrb[15].mxu0  ;;  %v429_v11 = vmul.f32 %v5250_v1, %v5250_v1  ;;  %175 = vst [vmem:[#allocation3 + $0x4c] sm:$0x1] %v174_v49  ;;  %v459_v52 = vshrl.u32 %v458_v47, 7  ;;  %v5354_v47 = vld [vmem:[#allocation3 + $0x54] sm:$0x1] }
 0x111   :  { %v441_v3 = vadd.f32 %v440_v0, %v426_v63  ;;  %v405_v4 = vadd.f32 %v404_v62, %v5252_v2  ;;  %v427_v5 = vmul.f32 %v5252_v2, %v5252_v2  ;;  %v955_v62 = vrot.slane %v953_v50, 4  ;;  %v5271_v0 = vld [vmem:[#allocation3 + $0x50] sm:$0xf] }
 0x112   :  { %v958_v63 = vrot.slane %v956_v51, 5 }
 0x113   :  { %v406_v7 = vadd.f32 %v5238_v53, %v405_v4  ;;  %v442_v8 = vadd.f32 %v441_v3, %v427_v5  ;;  %v391_v3 = vld [vmem:[%s6281_s4] sm:$0x1]  ;;  %v5276_v4 = vsub.s32 0, %v459_v52  ;;  %v4127_v5 = vrot.slane %v1216_v57, 9 }
 0x115   :  { %v407_v13 = vadd.f32 %v5250_v1, %v406_v7  ;;  %v443_v14 = vadd.f32 %v442_v8, %v428_v6  ;;  %v1285_v6 = vrot.slane %v1217_v59, 5  ;;  %v962_v7 = vshll.u32 %v918_v60, 16 }
 0x117   :  { %v408_v16 = vrot.slane %v407_v13, 4  ;;  %v444_v18 = vadd.f32 %v443_v14, %v429_v11  ;;  %v959_v11 = vor.u32 %v958_v63, %v955_v62 }
 0x119   :  { %v409_v20 = vadd.f32 %v408_v16, %v407_v13  ;;  %v445_v21 = vrot.slane %v444_v18, 4  ;;  %v1065_v13 = vshrl.u32 %v5271_v0, 16  ;;  %v392_v16 = vld [vmem:[%s6282_s5] sm:$0x1] }
 0x11b   :  { %v410_v22 = vrot.slane %v409_v20, 2  ;;  %v446_v23 = vadd.f32 %v445_v21, %v444_v18  ;;  %v5293_v21 = vsel %vm5278_vm7, %v4127_v5, %v1285_v6  ;;  %v1074_v5 = vshll.u32 %v5354_v47, 16 }
 0x11d   :  { %v411_v24 = vadd.f32 %v410_v22, %v409_v20  ;;  %v447_v25 = vrot.slane %v446_v23, 2  ;;  %v5295_v22 = vrot.slane %v962_v7, 5 }
 0x11f   :  { %v412_v26 = vrot.slane %v411_v24, 1  ;;  %v448_v27 = vadd.f32 %v447_v25, %v446_v23  ;;  %v5297_v23 = vrot.slane %v959_v11, 4  ;;  %v1068_v25 = vshll.u32 %v5271_v0, 16 }
 0x121   :  { %v413_v29 = vadd.f32 %v412_v26, %v411_v24  ;;  %v449_v31 = vrot.slane %v448_v27, 1  ;;  %v5299_v24 = vrot.slane %v1065_v13, 4  ;;  %v4135_v26 = vrot.slane %v5283_v15, 9  ;;  %v827_v13 = vld [vmem:[#allocation3 + $0x80] sm:$0xf] }
 0x123   :  { %v450_v34 = vadd.f32 %v449_v31, %v448_v27  ;;  %v451_v38 = vmul.f32 0.0078125, %v413_v29 }
 0x125   :  { %v452_v40 = vmul.f32 0.0078125, %v450_v34  ;;  %v453_v41 = vmul.f32 %v451_v38, %v451_v38 }
 0x127   :  { %v454_v42 = vsub.f32 %v452_v40, %v453_v41 }
 0x129   :  { %v455_v43 = vadd.f32 1e-05, %v454_v42 }
 0x12b   :  { %4856 = vrsqrt.f32 %v455_v43 }
 0x135   :  { %v4857_v8 = vpop.eup %4856 }
 0x136   :  { %v457_v14 = vmul.f32 %v4857_v8, %v391_v3 }
 0x138   :  { %v5289_v18 = vrot.slane %v457_v14, %v5276_v4  ;;  %v478_v20 = vmul.f32 %v457_v14, %v451_v38  ;;  %v830_v14 = vld [vmem:[#allocation3 + $0x84] sm:$0x1] }
 0x13a   :  { %v475_v27 = vmul.f32 %v5289_v18, %v5252_v2  ;;  %v479_v29 = vsub.f32 %v392_v16, %v478_v20  ;;  %v462_v31 = vmul.f32 %v5289_v18, %v5164_v55  ;;  %v463_v32 = vmul.f32 %v5289_v18, %v5168_v58 }
 0x13b   :  { %v464_v34 = vmul.f32 %v5162_v54, %v5289_v18  ;;  %v465_v38 = vmul.f32 %v5166_v56, %v5289_v18  ;;  %v466_v39 = vmul.f32 %v5289_v18, %v5192_v12  ;;  %v467_v40 = vmul.f32 %v5289_v18, %v5201_v19 }
 0x13c   :  { %v5318_v2 = vrot.slane %v479_v29, %v5276_v4  ;;  %v468_v55 = vmul.f32 %v5187_v9, %v5289_v18  ;;  %v469_v58 = vmul.f32 %v5197_v17, %v5289_v18  ;;  %v5326_v54 = vmul.f32 %v5289_v18, %v5214_v30  ;;  %v746_v29 = vld [vmem:[#allocation3 + $0x8] sm:$0xf] }
 0x13d   :  { %v5330_v56 = vmul.f32 %v5289_v18, %v5221_v37  ;;  %v5334_v12 = vmul.f32 %v5211_v28, %v5289_v18  ;;  %v5338_v19 = vmul.f32 %v5219_v35, %v5289_v18  ;;  %v5342_v9 = vmul.f32 %v5289_v18, %v5245_v61 }
 0x13e   :  { %v499_v17 = vadd.f32 %v5318_v2, %v475_v27  ;;  %v486_v30 = vadd.f32 %v5318_v2, %v462_v31  ;;  %v487_v41 = vadd.f32 %v5318_v2, %v463_v32  ;;  %v488_v37 = vadd.f32 %v5318_v2, %v464_v34 }
 0x13f   :  { %v489_v42 = vadd.f32 %v5318_v2, %v465_v38  ;;  %v490_v28 = vadd.f32 %v5318_v2, %v466_v39  ;;  %v491_v43 = vadd.f32 %v5318_v2, %v467_v40  ;;  %v5352_v35 = vadd.f32 %v5318_v2, %v468_v55  ;;  %v755_v38 = vld [vmem:[#allocation3 + $0x10] sm:$0xf] }
 0x140   :  { %v515_v44 = vmax.f32 %v499_v17, 0.0  ;;  %v502_v61 = vmax.f32 %v486_v30, 0.0  ;;  %v503_v45 = vmax.f32 %v487_v41, 0.0  ;;  %v504_v46 = vmax.f32 %v488_v37, 0.0  ;;  %v752_v17 = vld [vmem:[#allocation3 + $0xc] sm:$0x1] }
 0x141   :  { %v505_v48 = vmax.f32 %v489_v42, 0.0  ;;  %v506_v49 = vmax.f32 %v490_v28, 0.0  ;;  %v507_v50 = vmax.f32 %v491_v43, 0.0  ;;  %v5357_v51 = vadd.f32 %v5318_v2, %v469_v58 }
 0x142   :  { %v4324_v52 = vpack.c.bf16 %v515_v44, %v515_v44  ;;  %v4311_v57 = vpack.c.bf16 %v502_v61, %v502_v61  ;;  %v4312_v59 = vpack.c.bf16 %v503_v45, %v503_v45  ;;  %v4313_v60 = vpack.c.bf16 %v504_v46, %v504_v46  ;;  %v761_v44 = vld [vmem:[#allocation3 + $0x18] sm:$0xf]  ;;  %v758_v61 = vld [vmem:[#allocation3 + $0x14] sm:$0x1] }
 0x143   :  { %v4314_v62 = vpack.c.bf16 %v505_v48, %v505_v48  ;;  %v5359_v63 = vpack.c.bf16 %v506_v49, %v506_v49  ;;  %v5361_v3 = vpack.c.bf16 %v507_v50, %v507_v50  ;;  %v508_v11 = vmax.f32 %v5352_v35, 0.0  ;;  %v764_v50 = vld [vmem:[#allocation3 + $0x1c] sm:$0x1] }
 0x144   :  { %v687_v6 = vshrl.u32 %v4324_v52, 16  ;;  %v690_v7 = vshll.u32 %v4324_v52, 16  ;;  %v583_v8 = vshrl.u32 %v4311_v57, 16  ;;  %v586_v16 = vshll.u32 %v4311_v57, 16 }
 0x145   :  { %v591_v20 = vshrl.u32 %v4312_v59, 16  ;;  %v594_v27 = vshll.u32 %v4312_v59, 16  ;;  %v599_v31 = vshrl.u32 %v4313_v60, 16  ;;  %v602_v39 = vshll.u32 %v4313_v60, 16 }
 0x146   :  { %v689_v32 = vrot.slane %v687_v6, 7  ;;  %v585_v34 = vrot.slane %v583_v8, 7  ;;  %v607_v40 = vshrl.u32 %v4314_v62, 16  ;;  %v610_v41 = vshll.u32 %v4314_v62, 16  ;;  %v767_v8 = vld [vmem:[#allocation3 + $0x20] sm:$0xf] }
 0x147   :  { %v593_v58 = vrot.slane %v591_v20, 7  ;;  %v601_v30 = vrot.slane %v599_v31, 7  ;;  %v615_v37 = vshrl.u32 %v5359_v63, 16  ;;  %v618_v20 = vshll.u32 %v5359_v63, 16 }
 0x148   :  { %v692_v42 = vor.u32 %v690_v7, %v689_v32  ;;  %v693_v28 = vrot.slane %v689_v32, 4  ;;  %v588_v43 = vor.u32 %v586_v16, %v585_v34  ;;  %v589_v35 = vrot.slane %v585_v34, 4 }
 0x149   :  { %v596_v45 = vor.u32 %v594_v27, %v593_v58  ;;  %v597_v46 = vrot.slane %v593_v58, 4  ;;  %v604_v48 = vor.u32 %v602_v39, %v601_v30  ;;  %v605_v49 = vrot.slane %v601_v30, 4  ;;  %v776_v39 = vld [vmem:[#allocation3 + $0x2c] sm:$0x1] }
 0x14a   :  { %v828_v52 = vsel %vm5367_vm9, %v692_v42, %v827_v13  ;;  %v831_v57 = vsel %vm5006_vm2, %v693_v28, %v830_v14  ;;  %v747_v59 = vsel %vm5367_vm9, %v588_v43, %v746_v29  ;;  %v753_v60 = vsel %vm5006_vm2, %v589_v35, %v752_v17  ;;  %v770_v29 = vld [vmem:[#allocation3 + $0x24] sm:$0x1] }
 0x14b   :  { %829 = vst [vmem:[#allocation3 + $0x80] sm:$0xf] %v828_v52  ;;  %832 = vst [vmem:[#allocation3 + $0x84] sm:$0x1] %v831_v57  ;;  %v756_v62 = vsel %vm5367_vm9, %v596_v45, %v755_v38  ;;  %v609_v6 = vrot.slane %v607_v40, 7  ;;  %v762_v7 = vsel %vm5367_vm9, %v604_v48, %v761_v44  ;;  %v759_v13 = vsel %vm5006_vm2, %v597_v46, %v758_v61 }
 0x14c   :  { %748 = vst [vmem:[#allocation3 + $0x8] sm:$0xf] %v747_v59  ;;  %754 = vst [vmem:[#allocation3 + $0xc] sm:$0x1] %v753_v60  ;;  %v765_v14 = vsel %vm5006_vm2, %v605_v49, %v764_v50  ;;  %v617_v16 = vrot.slane %v615_v37, 7  ;;  %v623_v27 = vshrl.u32 %v5361_v3, 16  ;;  %v4317_v40 = vpack.c.bf16 %v508_v11, %v508_v11 }
 0x14d   :  { %757 = vst [vmem:[#allocation3 + $0x10] sm:$0xf] %v756_v62  ;;  %763 = vst [vmem:[#allocation3 + $0x18] sm:$0xf] %v762_v7  ;;  %v612_v31 = vor.u32 %v610_v41, %v609_v6  ;;  %v613_v32 = vrot.slane %v609_v6, 4  ;;  %v626_v34 = vshll.u32 %v5361_v3, 16  ;;  %v5393_v42 = vadd.f32 %v5318_v2, %v5326_v54 }
 0x14e   :  { %760 = vst [vmem:[#allocation3 + $0x14] sm:$0x1] %v759_v13  ;;  %766 = vst [vmem:[#allocation3 + $0x1c] sm:$0x1] %v765_v14  ;;  %v773_v38 = vld [vmem:[#allocation3 + $0x28] sm:$0xf]  ;;  %v620_v58 = vor.u32 %v618_v20, %v617_v16  ;;  %v5419_v60 = vadd.f32 %v5318_v2, %v5330_v56  ;;  %v5423_v62 = vadd.f32 %v5318_v2, %v5334_v12 }
 0x14f   :  { %v621_v17 = vrot.slane %v617_v16, 4  ;;  %v625_v30 = vrot.slane %v623_v27, 7  ;;  %v5395_v37 = vld [vmem:[#allocation3 + $0x48] sm:$0xf]  ;;  %v768_v63 = vsel %vm5367_vm9, %v612_v31, %v767_v8  ;;  %v779_v41 = vld [vmem:[#allocation3 + $0x30] sm:$0xf]  ;;  %v771_v28 = vsel %vm5006_vm2, %v613_v32, %v770_v29 }
 0x150   :  { %v509_v3 = vmax.f32 %v5357_v51, 0.0  ;;  %v631_v43 = vshrl.u32 %v4317_v40, 16  ;;  %v782_v11 = vld [vmem:[#allocation3 + $0x34] sm:$0x1]  ;;  %769 = vst [vmem:[#allocation3 + $0x20] sm:$0xf] %v768_v63  ;;  %v774_v54 = vsel %vm5367_vm9, %v620_v58, %v773_v38  ;;  %v5428_v8 = vadd.f32 %v5318_v2, %v5338_v19 }
 0x151   :  { %v628_v35 = vor.u32 %v626_v34, %v625_v30  ;;  %v629_v44 = vrot.slane %v625_v30, 4  ;;  %772 = vst [vmem:[#allocation3 + $0x24] sm:$0x1] %v771_v28  ;;  %v777_v61 = vsel %vm5006_vm2, %v621_v17, %v776_v39  ;;  %775 = vst [vmem:[#allocation3 + $0x28] sm:$0xf] %v774_v54  ;;  %v634_v46 = vshll.u32 %v4317_v40, 16 }
 0x152   :  { %778 = vst [vmem:[#allocation3 + $0x2c] sm:$0x1] %v777_v61  ;;  %v5406_v45 = vrot.slane %v631_v43, 7  ;;  %v785_v48 = vld [vmem:[#allocation3 + $0x38] sm:$0xf]  ;;  %v5410_v51 = vrot.slane %v1068_v25, 5  ;;  %v5430_v16 = vpack.c.bf16 %v509_v3, %v509_v3  ;;  %v5434_v56 = vadd.f32 %v5318_v2, %v5342_v9 }
 0x153   :  { %v2127_v49 = vshrl.u32 %v5395_v37, 16  ;;  %v1218_v50 = vld [vmem:[#allocation3 + $0x8] sm:$0xe]  ;;  %v1219_v52 = vld [vmem:[#allocation3 + $0xc] sm:$0x1]  ;;  %v780_v57 = vsel %vm5367_vm9, %v628_v35, %v779_v41  ;;  %v783_v59 = vsel %vm5006_vm2, %v629_v44, %v782_v11  ;;  %v476_v12 = vmul.f32 %v5238_v53, %v5289_v18  ;;  %v4803_v53 = vld [vmem:[%s6280_s2 + $0x180] sm:$0xff]  }
 0x154   :  { %v4780_v0 = vld [vmem:[#allocation3 + $0x8] ss:$8 sps:$4 sm:$0xff]   ;;  %v4128_v25 = vrot.slane %v1218_v50, 9  ;;  %v1289_v6 = vrot.slane %v1219_v52, 5  ;;  %781 = vst [vmem:[#allocation3 + $0x30] sm:$0xf] %v780_v57  ;;  %v636_v7 = vor.u32 %v634_v46, %v5406_v45  ;;  %v477_v20 = vmul.f32 %v5250_v1, %v5289_v18 }
 0x155   :  { %784 = vst [vmem:[#allocation3 + $0x34] sm:$0x1] %v783_v59  ;;  %v919_v13 = vld [vmem:[#allocation3 + $0x8] sm:$0xf]  ;;  %v920_v14 = vld [vmem:[#allocation3 + $0xc] sm:$0x1]  ;;  %3237 = vmatprep.mubr.bf16.mxu0 %v4780_v0  ;;  %v5458_v39 = vadd.f32 %v5318_v2, %v476_v12  ;;  %v965_v63 = vsel %vm5444_vm12, %v5297_v23, %v5295_v22 }
 0x156   :  { %v1290_v27 = vsel %vm5278_vm7, %v4128_v25, %v1289_v6  ;;  %v967_v29 = vshrl.u32 %v919_v13, 16  ;;  %v970_v31 = vshll.u32 %v919_v13, 16  ;;  %v976_v9 = vshll.u32 %v920_v14, 16  ;;  %v921_v1 = vld [vmem:[#allocation3 + $0x10] sm:$0xf]  ;;  %v4804_v38 = vld [vmem:[%s6280_s2 + $0x1c8] sm:$0xff]  }
 0x157   :  { %v4143_v32 = vcombine.low %v5293_v21, %v1290_v27  ;;  %v922_v18 = vld [vmem:[#allocation3 + $0x14] sm:$0x1]  ;;  %v786_v34 = vsel %vm5367_vm9, %v636_v7, %v785_v48  ;;  %v5461_v40 = vadd.f32 %v5318_v2, %v477_v20  ;;  %v4783_v58 = vld [vmem:[#allocation3 + $0x18] ss:$8 sps:$4 sm:$0xff]   ;;  %v4805_v21 = vld [vmem:[%s6280_s2 + $0x188] sm:$0xff]   ;;  %v981_v3 = vshrl.u32 %v921_v1, 16 }
 0x158   :  { %v969_v17 = vrot.slane %v967_v29, 4  ;;  %v972_v30 = vrot.slane %v970_v31, 5  ;;  %787 = vst [vmem:[#allocation3 + $0x38] sm:$0xf] %v786_v34  ;;  %v923_v41 = vld [vmem:[#allocation3 + $0x18] sm:$0xf] }
 0x159   :  { %3238 = vmatmul.mubr.bf16.vlgmr.msra.gmra.mrb[16].mxu0 %v4143_v32  ;;  %v924_v28 = vld [vmem:[#allocation3 + $0x1c] sm:$0x1]  ;;  %v639_v2 = vshrl.u32 %v5430_v16, 16  ;;  %v984_v11 = vshll.u32 %v921_v1, 16  ;;  %v990_v35 = vshll.u32 %v922_v18, 16  ;;  %v995_v44 = vshrl.u32 %v923_v41, 16 }
 0x15a   :  { %3245 = vmatprep.mubr.bf16.mxu0 %v4783_v58  ;;  %v973_v43 = vor.u32 %v972_v30, %v969_v17  ;;  %v1220_v54 = vld [vmem:[#allocation3 + $0x10] sm:$0xe]  ;;  %4536 = vmatpush3.bf16.msra.mxu0 %v4803_v53  ;;  %v983_v46 = vrot.slane %v981_v3, 4  ;;  %v998_v48 = vshll.u32 %v923_v41, 16  ;;  %v1004_v50 = vshll.u32 %v924_v28, 16  ;;  %v4788_v13 = vld [vmem:[%s6280_s2 + $0x100] sm:$0xff]  }
 0x15b   :  { %v4809_v61 = vld [vmem:[%s6280_s2 + $0x1d0] sm:$0xff]   ;;  %v4129_v23 = vrot.slane %v1220_v54, 9  ;;  %v788_v52 = vld [vmem:[#allocation3 + $0x3c] sm:$0x1]  ;;  %4537 = vmatprep.subr.bf16.mxu0 %v4804_v38  ;;  %v978_v59 = vrot.slane %v976_v9, 5  ;;  %v986_v0 = vrot.slane %v984_v11, 5 }
 0x15c   :  { %v1221_v22 = vld [vmem:[#allocation3 + $0x14] sm:$0x1]  ;;  %v974_v57 = vrot.slane %v973_v43, 4  ;;  %v997_v25 = vrot.slane %v995_v44, 4  ;;  %v1222_v6 = vld [vmem:[#allocation3 + $0x18] sm:$0xe] }
 0x15d   :  { %v4811_v7 = vld [vmem:[%s6280_s2 + $0x190] sm:$0xff]   ;;  %v992_v14 = vrot.slane %v990_v35, 5  ;;  %v1000_v12 = vrot.slane %v998_v48, 5  ;;  %v1223_v20 = vld [vmem:[#allocation3 + $0x1c] sm:$0x1]  ;;  %v1293_v27 = vrot.slane %v1221_v22, 5  ;;  %v987_v53 = vor.u32 %v986_v0, %v983_v46 }
 0x15e   :  { %v4130_v29 = vrot.slane %v1222_v6, 9  ;;  %v979_v31 = vsel %vm5444_vm12, %v974_v57, %v978_v59  ;;  %v4787_v9 = vld [vmem:[#allocation3] ss:$8 sps:$4 sm:$0xff]   ;;  %v1297_v32 = vrot.slane %v1223_v20, 5  ;;  %v637_v18 = vrot.slane %v5406_v45, 4  ;;  %4538 = vmatpush3.bf16.msra.mxu0 %v4805_v21  ;;  %v4812_v30 = vld [vmem:[%s6280_s2 + $0x1d8] sm:$0xff]  }
 0x15f   :  { %v4790_v1 = vld [vmem:[%s6280_s2 + $0x148] sm:$0xff]   ;;  %v4119_v34 = vcombine.low %v965_v63, %v979_v31  ;;  %v1001_v38 = vor.u32 %v1000_v12, %v997_v25  ;;  %v1006_v58 = vrot.slane %v1004_v50, 5  ;;  %v1294_v17 = vsel %vm5278_vm7, %v4129_v23, %v1293_v27  ;;  %4539 = vmatprep.subr.bf16.mxu0 %v4809_v61  ;;  %v925_v43 = vld [vmem:[#allocation3 + $0x20] sm:$0xf]  ;;  %v926_v44 = vld [vmem:[#allocation3 + $0x24] sm:$0x1] }
 0x160   :  { %v988_v41 = vrot.slane %v987_v53, 4  ;;  %v1298_v28 = vsel %vm5278_vm7, %v4130_v29, %v1297_v32  ;;  %v4789_v3 = vld [vmem:[#allocation3 + $0x28] ss:$8 sps:$4 sm:$0xff]   ;;  %v5493_v11 = vrot.slane %v639_v2, 7  ;;  %v789_v45 = vsel %vm5006_vm2, %v637_v18, %v788_v52  ;;  %v928_v2 = vld [vmem:[#allocation3 + $0x2c] sm:$0x1] }
 0x161   :  { %3140 = vmatprep.mubr.bf16.mxu1 %v4119_v34  ;;  %v1002_v21 = vrot.slane %v1001_v38, 4  ;;  %v4144_v63 = vcombine.low %v1294_v17, %v1298_v28  ;;  %v4792_v35 = vld [vmem:[%s6280_s2 + $0x108] sm:$0xff]   ;;  %v1009_v61 = vshrl.u32 %v925_v43, 16  ;;  %790 = vst [vmem:[#allocation3 + $0x3c] sm:$0x1] %v789_v45  ;;  %v1012_v48 = vshll.u32 %v925_v43, 16 }
 0x162   :  { %v927_v54 = vld [vmem:[#allocation3 + $0x28] sm:$0xf]  ;;  %3141 = vmatmul.mubr.bf16.vlgmr.msra.gmra.mrb[0].mxu1 %v4787_v9  ;;  %v993_v46 = vsel %vm5444_vm12, %v988_v41, %v992_v14  ;;  %v1018_v50 = vshll.u32 %v926_v44, 16  ;;  %v791_v23 = vld [vmem:[#allocation3 + $0x40] sm:$0xf]  ;;  %v4794_v52 = vld [vmem:[%s6280_s2 + $0x150] sm:$0xff]   ;;  %4540 = vmatpush3.bf16.msra.mxu0 %v4811_v7 }
 0x163   :  { %v1023_v22 = vshrl.u32 %v927_v54, 16  ;;  %v4813_v57 = vld [vmem:[%s6280_s2 + $0x198] sm:$0xff]   ;;  %4472 = vmatpush3.bf16.msra.mxu1 %v4788_v13  ;;  %v1007_v59 = vsel %vm5444_vm12, %v1002_v21, %v1006_v58  ;;  %3246 = vmatmul.mubr.bf16.gmra.mrb[20].mxu0 %v4144_v63  ;;  %v1011_v0 = vrot.slane %v1009_v61, 4  ;;  %v1026_v25 = vshll.u32 %v927_v54, 16  ;;  %v1224_v6 = vld [vmem:[#allocation3 + $0x20] sm:$0xe] }
 0x164   :  { %v642_v14 = vshll.u32 %v5430_v16, 16  ;;  %v4817_v12 = vld [vmem:[%s6280_s2 + $0x1e0] sm:$0xff]   ;;  %v4120_v20 = vcombine.low %v993_v46, %v1007_v59  ;;  %3253 = vmatprep.mubr.bf16.mxu0 %v4789_v3  ;;  %4473 = vmatprep.subr.bf16.mxu1 %v4790_v1  ;;  %v1014_v7 = vrot.slane %v1012_v48, 5  ;;  %v1032_v29 = vshll.u32 %v928_v2, 16  ;;  %v1226_v18 = vld [vmem:[#allocation3 + $0x28] sm:$0xe] }
 0x165   :  { %v1025_v27 = vrot.slane %v1023_v22, 4  ;;  %v1225_v13 = vld [vmem:[#allocation3 + $0x24] sm:$0x1]  ;;  %v1020_v53 = vrot.slane %v1018_v50, 5  ;;  %v1028_v32 = vrot.slane %v1026_v25, 5  ;;  %v4796_v38 = vld [vmem:[%s6280_s2 + $0x110] sm:$0xff]   ;;  %v1071_v1 = vor.u32 %v5410_v51, %v5299_v24  ;;  %4541 = vmatprep.subr.bf16.mxu0 %v4812_v30 }
 0x166   :  { %v4819_v31 = vld [vmem:[%s6280_s2 + $0x1a0] sm:$0xff]   ;;  %v1227_v16 = vld [vmem:[#allocation3 + $0x2c] sm:$0x1]  ;;  %v644_v34 = vor.u32 %v642_v14, %v5493_v11  ;;  %3148 = vmatprep.mubr.bf16.mxu1 %v4120_v20  ;;  %v4791_v58 = vld [vmem:[#allocation3 + $0x10] ss:$8 sps:$4 sm:$0xff]   ;;  %v1015_v17 = vor.u32 %v1014_v7, %v1011_v0  ;;  %v4131_v41 = vrot.slane %v1224_v6, 9  ;;  %4542 = vmatpush3.bf16.msra.mxu0 %v4813_v57 }
 0x167   :  { %v794_v9 = vld [vmem:[#allocation3 + $0x44] sm:$0x1]  ;;  %v1301_v28 = vrot.slane %v1225_v13, 5  ;;  %v4132_v3 = vrot.slane %v1226_v18, 9  ;;  %v4798_v43 = vld [vmem:[%s6280_s2 + $0x158] sm:$0xff]   ;;  %v4820_v45 = vld [vmem:[%s6280_s2 + $0x1e8] sm:$0xff]   ;;  %4474 = vmatpush3.bf16.msra.mxu1 %v4792_v35  ;;  %v1029_v21 = vor.u32 %v1028_v32, %v1025_v27  ;;  %4543 = vmatprep.subr.bf16.mxu0 %v4817_v12 }
 0x168   :  { %v1305_v63 = vrot.slane %v1227_v16, 5  ;;  %v645_v30 = vrot.slane %v5493_v11, 4  ;;  %v792_v44 = vsel %vm5367_vm9, %v644_v34, %v791_v23  ;;  %v1016_v54 = vrot.slane %v1015_v17, 4  ;;  %4475 = vmatprep.subr.bf16.mxu1 %v4794_v52  ;;  %v929_v2 = vld [vmem:[#allocation3 + $0x30] sm:$0xf]  ;;  %v4821_v35 = vld [vmem:[%s6280_s2 + $0x1a8] sm:$0xff]  }
 0x169   :  { %v1034_v61 = vrot.slane %v1032_v29, 5  ;;  %v1302_v46 = vsel %vm5278_vm7, %v4131_v41, %v1301_v28  ;;  %793 = vst [vmem:[#allocation3 + $0x40] sm:$0xf] %v792_v44  ;;  %v510_v48 = vmax.f32 %v5393_v42, 0.0  ;;  %v1030_v50 = vrot.slane %v1029_v21, 4  ;;  %v4800_v59 = vld [vmem:[%s6280_s2 + $0x118] sm:$0xff]  }
 0x16a   :  { %v1306_v11 = vsel %vm5278_vm7, %v4132_v3, %v1305_v63  ;;  %v930_v22 = vld [vmem:[#allocation3 + $0x34] sm:$0x1]  ;;  %v931_v23 = vld [vmem:[#allocation3 + $0x38] sm:$0xf]  ;;  %v1037_v57 = vshrl.u32 %v929_v2, 16  ;;  %v795_v52 = vsel %vm5006_vm2, %v645_v30, %v794_v9  ;;  %3149 = vmatmul.mubr.bf16.gmra.mrb[4].mxu1 %v4791_v58  ;;  %v1021_v42 = vsel %vm5444_vm12, %v1016_v54, %v1020_v53  ;;  %4544 = vmatpush3.bf16.msra.mxu0 %v4819_v31  ;;  %v4806_v31 = vld [vmem:[%s6280_s2 + $0x160] sm:$0xff]  }
 0x16b   :  { %v4145_v0 = vcombine.low %v1302_v46, %v1306_v11  ;;  %v932_v25 = vld [vmem:[#allocation3 + $0x3c] sm:$0x1]  ;;  %v1040_v6 = vshll.u32 %v929_v2, 16  ;;  %v1046_v14 = vshll.u32 %v930_v22, 16  ;;  %v1228_v12 = vld [vmem:[#allocation3 + $0x30] sm:$0xe]  ;;  %v1035_v20 = vsel %vm5444_vm12, %v1030_v50, %v1034_v61  ;;  %4476 = vmatpush3.bf16.msra.mxu1 %v4796_v38  ;;  %4545 = vmatprep.subr.bf16.mxu0 %v4820_v45 }
 0x16c   :  { %796 = vst [vmem:[#allocation3 + $0x44] sm:$0x1] %v795_v52  ;;  %v1039_v7 = vrot.slane %v1037_v57, 4  ;;  %v1051_v27 = vshrl.u32 %v931_v23, 16  ;;  %v1054_v29 = vshll.u32 %v931_v23, 16  ;;  %v4825_v9 = vld [vmem:[%s6280_s2 + $0x1f0] sm:$0xff]   ;;  %v4121_v53 = vcombine.low %v1021_v42, %v1035_v20  ;;  %4477 = vmatprep.subr.bf16.mxu1 %v4798_v43 }
 0x16d   :  { %v1229_v13 = vld [vmem:[#allocation3 + $0x34] sm:$0x1]  ;;  %3254 = vmatmul.mubr.bf16.gmra.mrb[24].mxu0 %v4145_v0  ;;  %v1042_v32 = vrot.slane %v1040_v6, 5  ;;  %v1060_v18 = vshll.u32 %v932_v25, 16  ;;  %v1230_v16 = vld [vmem:[#allocation3 + $0x38] sm:$0xe]  ;;  %v4319_v50 = vpack.c.bf16 %v510_v48, %v510_v48 }
 0x16e   :  { %v2130_v34 = vshll.u32 %v5395_v37, 16  ;;  %v1053_v38 = vrot.slane %v1051_v27, 4  ;;  %v1056_v58 = vrot.slane %v1054_v29, 5  ;;  %v1231_v17 = vld [vmem:[#allocation3 + $0x3c] sm:$0x1]  ;;  %v4133_v41 = vrot.slane %v1228_v12, 9  ;;  %3156 = vmatprep.mubr.bf16.mxu1 %v4121_v53  ;;  %4546 = vmatpush3.bf16.msra.mxu0 %v4821_v35 }
 0x16f   :  { %v1309_v28 = vrot.slane %v1229_v13, 5  ;;  %v4808_v3 = vld [vmem:[%s6280_s2 + $0x120] sm:$0xff]   ;;  %v1043_v21 = vor.u32 %v1042_v32, %v1039_v7  ;;  %v1048_v63 = vrot.slane %v1046_v14, 5  ;;  %v4134_v43 = vrot.slane %v1230_v16, 9  ;;  %v4826_v44 = vld [vmem:[%s6280_s2 + $0x1b0] sm:$0xff]   ;;  %4478 = vmatpush3.bf16.msra.mxu1 %v4800_v59  ;;  %4547 = vmatprep.subr.bf16.mxu0 %v4825_v9  ;;  %v4827_v11 = vld [vmem:[%s6280_s2 + $0x1f8] sm:$0xff]  }
 0x170   :  { %v4795_v45 = vld [vmem:[#allocation3 + $0x20] ss:$8 sps:$4 sm:$0xff]   ;;  %v1313_v30 = vrot.slane %v1231_v17, 5  ;;  %v1057_v61 = vor.u32 %v1056_v58, %v1053_v38  ;;  %v511_v2 = vmax.f32 %v5419_v60, 0.0  ;;  %v1062_v35 = vrot.slane %v1060_v18, 5  ;;  %4479 = vmatprep.subr.bf16.mxu1 %v4806_v31  ;;  %v4822_v31 = vld [vmem:[%s6280_s2 + $0x170] sm:$0xff]  }
 0x171   :  { %v4793_v54 = vld [vmem:[#allocation3 + $0x38] ss:$8 sps:$4 sm:$0xff]   ;;  %v1310_v46 = vsel %vm5278_vm7, %v4133_v41, %v1309_v28  ;;  %v1044_v22 = vrot.slane %v1043_v21, 4  ;;  %v512_v57 = vmax.f32 %v5423_v62, 0.0  ;;  %v4814_v52 = vld [vmem:[%s6280_s2 + $0x168] sm:$0xff]   ;;  %v647_v42 = vshrl.u32 %v4319_v50, 16 }
 0x172   :  { %v1314_v23 = vsel %vm5278_vm7, %v4134_v43, %v1313_v30  ;;  %3261 = vmatprep.mubr.bf16.mxu0 %v4793_v54  ;;  %v1058_v60 = vrot.slane %v1057_v61, 4  ;;  %v4320_v59 = vpack.c.bf16 %v511_v2, %v511_v2  ;;  %3157 = vmatmul.mubr.bf16.gmra.mrb[8].mxu1 %v4795_v45  ;;  %v650_v25 = vshll.u32 %v4319_v50, 16  ;;  %v4828_v62 = vld [vmem:[%s6280_s2 + $0x1b8] sm:$0xff]   ;;  %v4816_v13 = vld [vmem:[%s6280_s2 + $0x128] sm:$0xff]   ;;  %v803_v9 = vld [vmem:[#allocation3 + $0x60] sm:$0xf] }
 0x173   :  { %v4146_v48 = vcombine.low %v1310_v46, %v1314_v23  ;;  %v1049_v0 = vsel %vm5444_vm12, %v1044_v22, %v1048_v63  ;;  %v513_v6 = vmax.f32 %v5428_v8, 0.0  ;;  %v4321_v14 = vpack.c.bf16 %v512_v57, %v512_v57  ;;  %4548 = vmatpush3.bf16.msra.mxu0 %v4826_v44  ;;  %v797_v29 = vld [vmem:[#allocation3 + $0x58] sm:$0xf]  ;;  %4480 = vmatpush3.bf16.msra.mxu1 %v4808_v3  ;;  %v800_v53 = vld [vmem:[#allocation3 + $0x5c] sm:$0x1]  ;;  %v4824_v50 = vld [vmem:[%s6280_s2 + $0x130] sm:$0xff]  }
 0x174   :  { %v1063_v12 = vsel %vm5444_vm12, %v1058_v60, %v1062_v35  ;;  %v649_v20 = vrot.slane %v647_v42, 7  ;;  %v655_v7 = vshrl.u32 %v4320_v59, 16  ;;  %v658_v27 = vshll.u32 %v4320_v59, 16  ;;  %4549 = vmatprep.subr.bf16.mxu0 %v4827_v11  ;;  %4481 = vmatprep.subr.bf16.mxu1 %v4814_v52  ;;  %v809_v41 = vld [vmem:[#allocation3 + $0x68] sm:$0xf]  ;;  %v4829_v57 = vld [vmem:[%s6280_s2 + $0x178] sm:$0xff]  }
 0x175   :  { %v4122_v8 = vcombine.low %v1049_v0, %v1063_v12  ;;  %3262 = vmatmul.mubr.bf16.gmra.mrb[28].mxu0 %v4146_v48  ;;  %v4322_v32 = vpack.c.bf16 %v513_v6, %v513_v6  ;;  %v663_v18 = vshrl.u32 %v4321_v14, 16  ;;  %v666_v16 = vshll.u32 %v4321_v14, 16  ;;  %v5589_v3 = vld [vmem:[#allocation3 + $0x54] sm:$0x1]  ;;  %v806_v43 = vld [vmem:[#allocation3 + $0x64] sm:$0x1] }
 0x176   :  { %v652_v38 = vor.u32 %v650_v25, %v649_v20  ;;  %v653_v58 = vrot.slane %v649_v20, 4  ;;  %v657_v17 = vrot.slane %v655_v7, 7  ;;  %v514_v28 = vmax.f32 %v5434_v56, 0.0  ;;  %v815_v2 = vld [vmem:[#allocation3 + $0x70] sm:$0xf]  ;;  %v4831_v7 = vld [vmem:[%s6280_s2 + $0x138] sm:$0xff]  }
 0x177   :  { %3164 = vmatprep.mubr.bf16.mxu1 %v4122_v8  ;;  %v665_v45 = vrot.slane %v663_v18, 7  ;;  %v671_v21 = vshrl.u32 %v4322_v32, 16  ;;  %v674_v63 = vshll.u32 %v4322_v32, 16  ;;  %v516_v30 = vmax.f32 %v5458_v39, 0.0  ;;  %4550 = vmatpush3.bf16.msra.mxu0 %v4828_v62  ;;  %v812_v56 = vld [vmem:[#allocation3 + $0x6c] sm:$0x1] }
 0x178   :  { %v660_v44 = vor.u32 %v658_v27, %v657_v17  ;;  %v661_v54 = vrot.slane %v657_v17, 4  ;;  %v798_v61 = vsel %vm5367_vm9, %v652_v38, %v797_v29  ;;  %v801_v46 = vsel %vm5006_vm2, %v653_v58, %v800_v53  ;;  %4482 = vmatpush3.bf16.msra.mxu1 %v4816_v13  ;;  %v4799_v11 = vld [vmem:[#allocation3 + $0x30] ss:$8 sps:$4 sm:$0xff]   ;;  %v818_v48 = vld [vmem:[#allocation3 + $0x74] sm:$0x1] }
 0x179   :  { %799 = vst [vmem:[#allocation3 + $0x58] sm:$0xf] %v798_v61  ;;  %802 = vst [vmem:[#allocation3 + $0x5c] sm:$0x1] %v801_v46  ;;  %v668_v39 = vor.u32 %v666_v16, %v665_v45  ;;  %v669_v22 = vrot.slane %v665_v45, 4  ;;  %v673_v35 = vrot.slane %v671_v21, 7  ;;  %v4323_v23 = vpack.c.bf16 %v514_v28, %v514_v28  ;;  %4483 = vmatprep.subr.bf16.mxu1 %v4822_v31 }
 0x17a   :  { %v804_v52 = vsel %vm5367_vm9, %v660_v44, %v803_v9  ;;  %v807_v60 = vsel %vm5006_vm2, %v661_v54, %v806_v43  ;;  %v517_v59 = vmax.f32 %v5461_v40, 0.0  ;;  %v4325_v42 = vpack.c.bf16 %v516_v30, %v516_v30  ;;  %3165 = vmatmul.mubr.bf16.gmra.mrb[12].mxu1 %v4799_v11  ;;  %v5612_v40 = vld [vmem:[#allocation3 + $0x80] sm:$0xf]  ;;  %v824_v53 = vld [vmem:[#allocation3 + $0x7c] sm:$0x1] }
 0x17b   :  { %805 = vst [vmem:[#allocation3 + $0x60] sm:$0xf] %v804_v52  ;;  %v676_v0 = vor.u32 %v674_v63, %v673_v35  ;;  %v677_v25 = vrot.slane %v673_v35, 4  ;;  %v810_v6 = vsel %vm5367_vm9, %v668_v39, %v809_v41  ;;  %808 = vst [vmem:[#allocation3 + $0x64] sm:$0x1] %v807_v60  ;;  %v813_v14 = vsel %vm5006_vm2, %v669_v22, %v812_v56  ;;  %v5633_v9 = vld [vmem:[%s6280_s2 + $0x200] sm:$0xff]  }
 0x17c   :  { %v1317_v62 = vrot.slane %v5589_v3, 5  ;;  %811 = vst [vmem:[#allocation3 + $0x68] sm:$0xf] %v810_v6  ;;  %814 = vst [vmem:[#allocation3 + $0x6c] sm:$0x1] %v813_v14  ;;  %v679_v12 = vshrl.u32 %v4323_v23, 16  ;;  %4484 = vmatpush3.bf16.msra.mxu1 %v4824_v50  ;;  %v5635_v32 = vpack.c.bf16 %v517_v59, %v517_v59 }
 0x17d   :  { %v695_v20 = vshrl.u32 %v4325_v42, 16  ;;  %v5620_v27 = vrot.slane %v1071_v1, 4  ;;  %v5624_v29 = vrot.slane %v1074_v5, 5  ;;  %v816_v13 = vsel %vm5367_vm9, %v676_v0, %v815_v2  ;;  %4485 = vmatprep.subr.bf16.mxu1 %v4829_v57  ;;  %v821_v1 = vld [vmem:[#allocation3 + $0x78] sm:$0xf] }
 0x17e   :  { %v819_v8 = vsel %vm5006_vm2, %v677_v25, %v818_v48  ;;  %817 = vst [vmem:[#allocation3 + $0x70] sm:$0xf] %v816_v13  ;;  %v681_v24 = vrot.slane %v679_v12, 7  ;;  %v682_v51 = vshll.u32 %v4323_v23, 16  ;;  %v698_v5 = vshll.u32 %v4325_v42, 16 }
 0x17f   :  { %820 = vst [vmem:[#allocation3 + $0x74] sm:$0x1] %v819_v8  ;;  %v697_v47 = vrot.slane %v695_v20, 7  ;;  %v833_v18 = vld [vmem:[#allocation3 + $0x88] sm:$0xf]  ;;  %v1149_v16 = vshrl.u32 %v5612_v40, 16  ;;  %v1318_v37 = vsel %vm5278_vm7, %v4135_v26, %v1317_v62  ;;  %v1077_v57 = vsel %vm5444_vm12, %v5620_v27, %v5624_v29 }
 0x180   :  { %v5640_v31 = vrot.slane %v2127_v49, 4  ;;  %v5644_v38 = vrot.slane %v2130_v34, 5  ;;  %v935_v58 = vld [vmem:[#allocation3 + $0x58] sm:$0xf]  ;;  %v936_v17 = vld [vmem:[#allocation3 + $0x5c] sm:$0x1]  ;;  %v684_v41 = vor.u32 %v682_v51, %v681_v24  ;;  %4486 = vmatpush3.bf16.msra.mxu1 %v4831_v7 }
 0x181   :  { %v700_v28 = vor.u32 %v698_v5, %v697_v47  ;;  %v1079_v3 = vshrl.u32 %v935_v58, 16  ;;  %v1082_v45 = vshll.u32 %v935_v58, 16  ;;  %v1088_v21 = vshll.u32 %v936_v17, 16  ;;  %v1234_v63 = vld [vmem:[#allocation3 + $0x58] sm:$0xe]  ;;  %4663 = vmatprep.subr.bf16.mxu1 %v5633_v9 }
 0x182   :  { %v685_v43 = vrot.slane %v681_v24, 4  ;;  %v836_v30 = vld [vmem:[#allocation3 + $0x8c] sm:$0x1]  ;;  %v4797_v44 = vld [vmem:[#allocation3 + $0x58] ss:$8 sps:$4 sm:$0xff]   ;;  %v822_v34 = vsel %vm5367_vm9, %v684_v41, %v821_v1  ;;  %v4136_v2 = vrot.slane %v1234_v63, 9 }
 0x183   :  { %v1235_v49 = vld [vmem:[#allocation3 + $0x5c] sm:$0x1]  ;;  %v834_v54 = vsel %vm5367_vm9, %v700_v28, %v833_v18  ;;  %v1081_v61 = vrot.slane %v1079_v3, 4  ;;  %v1084_v46 = vrot.slane %v1082_v45, 5  ;;  %823 = vst [vmem:[#allocation3 + $0x78] sm:$0xf] %v822_v34  ;;  %3269 = vmatprep.mubr.bf16.mxu0 %v4797_v44 }
 0x184   :  { %v703_v56 = vshrl.u32 %v5635_v32, 16  ;;  %835 = vst [vmem:[#allocation3 + $0x88] sm:$0xf] %v834_v54  ;;  %v1321_v50 = vrot.slane %v1235_v49, 5  ;;  %v825_v15 = vsel %vm5006_vm2, %v685_v43, %v824_v53  ;;  %v701_v11 = vrot.slane %v697_v47, 4 }
 0x185   :  { %v706_v26 = vshll.u32 %v5635_v32, 16  ;;  %v1085_v39 = vor.u32 %v1084_v46, %v1081_v61  ;;  %v1090_v22 = vrot.slane %v1088_v21, 5  ;;  %v937_v35 = vld [vmem:[#allocation3 + $0x60] sm:$0xf]  ;;  %826 = vst [vmem:[#allocation3 + $0x7c] sm:$0x1] %v825_v15 }
 0x186   :  { %v5659_v23 = vrot.slane %v1149_v16, 4  ;;  %v1322_v52 = vsel %vm5278_vm7, %v4136_v2, %v1321_v50  ;;  %v4802_v60 = vld [vmem:[#allocation3 + $0x68] ss:$8 sps:$4 sm:$0xff]   ;;  %v938_v48 = vld [vmem:[#allocation3 + $0x64] sm:$0x1]  ;;  %v837_v0 = vsel %vm5006_vm2, %v701_v11, %v836_v30  ;;  %v1093_v62 = vshrl.u32 %v937_v35, 16 }
 0x187   :  { %v939_v59 = vld [vmem:[#allocation3 + $0x68] sm:$0xf]  ;;  %v940_v42 = vld [vmem:[#allocation3 + $0x6c] sm:$0x1]  ;;  %v5669_v25 = vld [vmem:[#allocation3 + $0x84] sm:$0x1]  ;;  %v4147_v14 = vcombine.low %v1318_v37, %v1322_v52 }
 0x188   :  { %v1086_v6 = vrot.slane %v1085_v39, 4  ;;  %v1096_v12 = vshll.u32 %v937_v35, 16  ;;  %v1236_v20 = vld [vmem:[#allocation3 + $0x60] sm:$0xe]  ;;  %838 = vst [vmem:[#allocation3 + $0x8c] sm:$0x1] %v837_v0 }
 0x189   :  { %v1102_v7 = vshll.u32 %v938_v48, 16  ;;  %v1107_v27 = vshrl.u32 %v939_v59, 16  ;;  %v1110_v29 = vshll.u32 %v939_v59, 16  ;;  %v1116_v13 = vshll.u32 %v940_v42, 16  ;;  %v1237_v8 = vld [vmem:[#allocation3 + $0x64] sm:$0x1]  ;;  %3270 = vmatmul.mubr.bf16.gmra.mrb[32].mxu0 %v4147_v14 }
 0x18a   :  { %v1091_v24 = vsel %vm5444_vm12, %v1086_v6, %v1090_v22  ;;  %v1095_v51 = vrot.slane %v1093_v62, 4  ;;  %v1098_v1 = vrot.slane %v1096_v12, 5  ;;  %v1238_v47 = vld [vmem:[#allocation3 + $0x68] sm:$0xe]  ;;  %v1239_v5 = vld [vmem:[#allocation3 + $0x6c] sm:$0x1]  ;;  %3277 = vmatprep.mubr.bf16.mxu0 %v4802_v60 }
 0x18b   :  { %v4123_v53 = vcombine.low %v1077_v57, %v1091_v24  ;;  %v1109_v18 = vrot.slane %v1107_v27, 4  ;;  %v1112_v16 = vrot.slane %v1110_v29, 5  ;;  %v1152_v58 = vshll.u32 %v5612_v40, 16  ;;  %v4807_v17 = vld [vmem:[#allocation3 + $0x50] ss:$8 sps:$4 sm:$0xff]  }
 0x18c   :  { %v1099_v41 = vor.u32 %v1098_v1, %v1095_v51  ;;  %v4137_v28 = vrot.slane %v1236_v20, 9  ;;  %v1325_v3 = vrot.slane %v1237_v8, 5  ;;  %v1158_v45 = vshll.u32 %v5669_v25, 16  ;;  %v941_v34 = vld [vmem:[#allocation3 + $0x70] sm:$0xf] }
 0x18d   :  { %3172 = vmatprep.mubr.bf16.mxu1 %v4123_v53  ;;  %v1113_v21 = vor.u32 %v1112_v16, %v1109_v18  ;;  %v4138_v63 = vrot.slane %v1238_v47, 9  ;;  %v1329_v43 = vrot.slane %v1239_v5, 5  ;;  %v1104_v44 = vrot.slane %v1102_v7, 5  ;;  %v4810_v61 = vld [vmem:[#allocation3 + $0x78] ss:$8 sps:$4 sm:$0xff]  }
 0x18e   :  { %3173 = vmatmul.mubr.bf16.gmra.mrb[16].mxu1 %v4807_v17  ;;  %v1100_v30 = vrot.slane %v1099_v41, 4  ;;  %v1118_v49 = vrot.slane %v1116_v13, 5  ;;  %v1326_v37 = vsel %vm5278_vm7, %v4137_v28, %v1325_v3  ;;  %v942_v46 = vld [vmem:[#allocation3 + $0x74] sm:$0x1]  ;;  %v943_v2 = vld [vmem:[#allocation3 + $0x78] sm:$0xf] }
 0x18f   :  { %v1114_v54 = vrot.slane %v1113_v21, 4  ;;  %v1330_v40 = vsel %vm5278_vm7, %v4138_v63, %v1329_v43  ;;  %v1121_v50 = vshrl.u32 %v941_v34, 16  ;;  %v944_v39 = vld [vmem:[#allocation3 + $0x7c] sm:$0x1]  ;;  %v1124_v22 = vshll.u32 %v941_v34, 16 }
 0x190   :  { %v1105_v15 = vsel %vm5444_vm12, %v1100_v30, %v1104_v44  ;;  %v4148_v11 = vcombine.low %v1326_v37, %v1330_v40  ;;  %v1240_v35 = vld [vmem:[#allocation3 + $0x70] sm:$0xe]  ;;  %v5683_v57 = vrot.slane %v703_v56, 7  ;;  %v5685_v52 = vld [vmem:[#allocation3 + $0x80] sm:$0xe]  ;;  %v1135_v59 = vshrl.u32 %v943_v2, 16 }
 0x191   :  { %v1119_v60 = vsel %vm5444_vm12, %v1114_v54, %v1118_v49  ;;  %v1123_v48 = vrot.slane %v1121_v50, 4  ;;  %v1138_v42 = vshll.u32 %v943_v2, 16  ;;  %v1241_v0 = vld [vmem:[#allocation3 + $0x74] sm:$0x1]  ;;  %v1126_v14 = vrot.slane %v1124_v22, 5 }
 0x192   :  { %v4124_v6 = vcombine.low %v1105_v15, %v1119_v60  ;;  %3278 = vmatmul.mubr.bf16.gmra.mrb[36].mxu0 %v4148_v11  ;;  %v1130_v62 = vshll.u32 %v942_v46, 16  ;;  %v1144_v12 = vshll.u32 %v944_v39, 16  ;;  %v1242_v20 = vld [vmem:[#allocation3 + $0x78] sm:$0xe]  ;;  %v839_v7 = vld [vmem:[#allocation3 + $0x90] sm:$0xf]  ;;  %v708_v16 = vor.u32 %v706_v26, %v5683_v57 }
 0x193   :  { %3285 = vmatprep.mubr.bf16.mxu0 %v4810_v61  ;;  %v1137_v27 = vrot.slane %v1135_v59, 4  ;;  %v1140_v56 = vrot.slane %v1138_v42, 5  ;;  %v1243_v29 = vld [vmem:[#allocation3 + $0x7c] sm:$0x1]  ;;  %v4139_v13 = vrot.slane %v1240_v35, 9  ;;  %v1333_v8 = vrot.slane %v1241_v0, 5 }
 0x194   :  { %3180 = vmatprep.mubr.bf16.mxu1 %v4124_v6  ;;  %v4815_v24 = vld [vmem:[#allocation3 + $0x60] ss:$8 sps:$4 sm:$0xff]   ;;  %v1127_v51 = vor.u32 %v1126_v14, %v1123_v48  ;;  %v4140_v1 = vrot.slane %v1242_v20, 9  ;;  %v1337_v47 = vrot.slane %v1243_v29, 5  ;;  %v1245_v5 = vld [vmem:[#allocation3 + $0x84] sm:$0x1]  ;;  %v840_v37 = vsel %vm5367_vm9, %v708_v16, %v839_v7 }
 0x195   :  { %v1141_v53 = vor.u32 %v1140_v56, %v1137_v27  ;;  %v1334_v18 = vsel %vm5278_vm7, %v4139_v13, %v1333_v8  ;;  %v4141_v17 = vrot.slane %v5685_v52, 9  ;;  %v1132_v28 = vrot.slane %v1130_v62, 5  ;;  %v947_v21 = vld [vmem:[#allocation3 + $0x88] sm:$0xf]  ;;  %v1996_v43 = vld [vmem:[#allocation3 + $0x10] sm:$0xf] }
 0x196   :  { %3181 = vmatmul.mubr.bf16.gmra.mrb[20].mxu1 %v4815_v24  ;;  %v1128_v41 = vrot.slane %v1127_v51, 4  ;;  %v1338_v3 = vsel %vm5278_vm7, %v4140_v1, %v1337_v47  ;;  %v1154_v63 = vrot.slane %v1152_v58, 5  ;;  %v1146_v44 = vrot.slane %v1144_v12, 5  ;;  %v948_v34 = vld [vmem:[#allocation3 + $0x8c] sm:$0x1] }
 0x197   :  { %v1142_v30 = vrot.slane %v1141_v53, 4  ;;  %v4149_v49 = vcombine.low %v1334_v18, %v1338_v3  ;;  %v1246_v32 = vld [vmem:[#allocation3 + $0x88] sm:$0xe]  ;;  %841 = vst [vmem:[#allocation3 + $0x90] sm:$0xf] %v840_v37  ;;  %v1163_v40 = vshrl.u32 %v947_v21, 16 }
 0x198   :  { %v1133_v26 = vsel %vm5444_vm12, %v1128_v41, %v1132_v28  ;;  %v1155_v54 = vor.u32 %v1154_v63, %v5659_v23  ;;  %v1166_v61 = vshll.u32 %v947_v21, 16  ;;  %v1247_v46 = vld [vmem:[#allocation3 + $0x8c] sm:$0x1]  ;;  %v1172_v2 = vshll.u32 %v948_v34, 16  ;;  %v1997_v11 = vld [vmem:[#allocation3 + $0x14] sm:$0x1] }
 0x199   :  { %v1147_v58 = vsel %vm5444_vm12, %v1142_v30, %v1146_v44  ;;  %v1341_v50 = vrot.slane %v1245_v5, 5  ;;  %v4142_v15 = vrot.slane %v1246_v32, 9  ;;  %v1165_v22 = vrot.slane %v1163_v40, 4  ;;  %v1998_v52 = vld [vmem:[#allocation3 + $0x18] sm:$0xf] }
 0x19a   :  { %v4125_v55 = vcombine.low %v1133_v26, %v1147_v58  ;;  %3286 = vmatmul.mubr.bf16.gmra.mrb[40].mxu0 %v4149_v49  ;;  %v1156_v39 = vrot.slane %v1155_v54, 4  ;;  %v1168_v35 = vrot.slane %v1166_v61, 5  ;;  %v1160_v60 = vrot.slane %v1158_v45, 5  ;;  %v1999_v59 = vld [vmem:[#allocation3 + $0x1c] sm:$0x1] }
 0x19b   :  { %v1174_v23 = vrot.slane %v1172_v2, 5  ;;  %v1345_v48 = vrot.slane %v1247_v46, 5  ;;  %v2029_v42 = vshrl.u32 %v1996_v43, 16  ;;  %v1755_v0 = vld [vmem:[#allocation3 + $0x8] sm:$0xe]  ;;  %v1342_v62 = vsel %vm5278_vm7, %v4141_v17, %v1341_v50 }
 0x19c   :  { %3188 = vmatprep.mubr.bf16.mxu1 %v4125_v55  ;;  %v4823_v6 = vld [vmem:[#allocation3 + $0x70] ss:$8 sps:$4 sm:$0xff]   ;;  %v1169_v14 = vor.u32 %v1168_v35, %v1165_v22  ;;  %v2032_v12 = vshll.u32 %v1996_v43, 16  ;;  %v2038_v20 = vshll.u32 %v1997_v11, 16  ;;  %v1756_v7 = vld [vmem:[#allocation3 + $0xc] sm:$0x1]  ;;  %v1161_v8 = vsel %vm5444_vm12, %v1156_v39, %v1160_v60 }
 0x19d   :  { %v1757_v27 = vld [vmem:[#allocation3 + $0x10] sm:$0xe]  ;;  %v1346_v56 = vsel %vm5278_vm7, %v4142_v15, %v1345_v48  ;;  %v2031_v25 = vrot.slane %v2029_v42, 4  ;;  %v2043_v45 = vshrl.u32 %v1998_v52, 16  ;;  %v2046_v29 = vshll.u32 %v1998_v52, 16 }
 0x19e   :  { %v1758_v13 = vld [vmem:[#allocation3 + $0x14] sm:$0x1]  ;;  %3189 = vmatmul.mubr.bf16.gmra.mrb[24].mxu1 %v4823_v6  ;;  %v1170_v24 = vrot.slane %v1169_v14, 4  ;;  %v2034_v51 = vrot.slane %v2032_v12, 5  ;;  %v2040_v1 = vrot.slane %v2038_v20, 5  ;;  %v4150_v53 = vcombine.low %v1342_v62, %v1346_v56 }
 0x19f   :  { %v2000_v47 = vld [vmem:[#allocation3 + $0x20] sm:$0xf]  ;;  %v4818_v5 = vld [vmem:[#allocation3 + $0x88] ss:$8 sps:$4 sm:$0xff]   ;;  %v2045_v18 = vrot.slane %v2043_v45, 4  ;;  %v2048_v16 = vrot.slane %v2046_v29, 5  ;;  %v2133_v17 = vor.u32 %v5644_v38, %v5640_v31 }
 0x1a0   :  { %v1175_v41 = vsel %vm5444_vm12, %v1170_v24, %v1174_v23  ;;  %v2035_v28 = vor.u32 %v2034_v51, %v2031_v25  ;;  %v2052_v3 = vshll.u32 %v1999_v59, 16  ;;  %v4167_v21 = vrot.slane %v1755_v0, 9  ;;  %v2001_v63 = vld [vmem:[#allocation3 + $0x24] sm:$0x1]  ;;  %3293 = vmatprep.mubr.bf16.mxu0 %v4818_v5  ;;  %v2002_v37 = vld [vmem:[#allocation3 + $0x28] sm:$0xf] }
 0x1a1   :  { %v4126_v43 = vcombine.low %v1161_v8, %v1175_v41  ;;  %v2049_v30 = vor.u32 %v2048_v16, %v2045_v18  ;;  %v1821_v44 = vrot.slane %v1756_v7, 5  ;;  %v4168_v49 = vrot.slane %v1757_v27, 9  ;;  %v2003_v54 = vld [vmem:[#allocation3 + $0x2c] sm:$0x1]  ;;  %v1459_v50 = vld [vmem:[#allocation3 + $0x8] sm:$0xf] }
 0x1a2   :  { %3294 = vmatmul.mubr.bf16.gmra.mrb[44].mxu0 %v4150_v53  ;;  %v2036_v34 = vrot.slane %v2035_v28, 4  ;;  %v2054_v32 = vrot.slane %v2052_v3, 5  ;;  %v1825_v26 = vrot.slane %v1758_v13, 5  ;;  %v2057_v40 = vshrl.u32 %v2000_v47, 16  ;;  %v4830_v11 = vld [vmem:[#allocation3 + $0x80] ss:$8 sps:$4 sm:$0xff]  }
 0x1a3   :  { %3196 = vmatprep.mubr.bf16.mxu1 %v4126_v43  ;;  %v2050_v61 = vrot.slane %v2049_v30, 4  ;;  %v1822_v46 = vsel %vm5278_vm7, %v4167_v21, %v1821_v44  ;;  %v2060_v58 = vshll.u32 %v2000_v47, 16  ;;  %v2066_v2 = vshll.u32 %v2001_v63, 16  ;;  %v1460_v35 = vld [vmem:[#allocation3 + $0xc] sm:$0x1] }
 0x1a4   :  { %v2041_v15 = vsel %vm5444_vm12, %v2036_v34, %v2040_v1  ;;  %v1826_v55 = vsel %vm5278_vm7, %v4168_v49, %v1825_v26  ;;  %v2059_v39 = vrot.slane %v2057_v40, 4  ;;  %v2071_v22 = vshrl.u32 %v2002_v37, 16  ;;  %v1461_v59 = vld [vmem:[#allocation3 + $0x10] sm:$0xf]  ;;  %v1462_v42 = vld [vmem:[#allocation3 + $0x14] sm:$0x1] }
 0x1a5   :  { %v2055_v52 = vsel %vm5444_vm12, %v2050_v61, %v2054_v32  ;;  %v4183_v60 = vcombine.low %v1822_v46, %v1826_v55  ;;  %v2062_v23 = vrot.slane %v2060_v58, 5  ;;  %v2068_v48 = vrot.slane %v2066_v2, 5  ;;  %v4832_v6 = vld [vmem:[#allocation3 + $0x10] ss:$8 sps:$4 sm:$0xff]   ;;  %v1760_v45 = vld [vmem:[#allocation3 + $0x1c] sm:$0x1] }
 0x1a6   :  { %v4199_v0 = vcombine.low %v2041_v15, %v2055_v52  ;;  %3197 = vmatmul.mubr.bf16.gmra.mrb[28].mxu1 %v4830_v11  ;;  %v2073_v14 = vrot.slane %v2071_v22, 4  ;;  %v2074_v62 = vshll.u32 %v2002_v37, 16  ;;  %v2080_v12 = vshll.u32 %v2003_v54, 16  ;;  %v1759_v20 = vld [vmem:[#allocation3 + $0x18] sm:$0xe] }
 0x1a7   :  { %3334 = vmatprep.mubr.bf16.mxu1 %v4183_v60  ;;  %v2063_v7 = vor.u32 %v2062_v23, %v2059_v39  ;;  %v1492_v27 = vshrl.u32 %v1459_v50, 16  ;;  %v1495_v56 = vshll.u32 %v1459_v50, 16  ;;  %v1501_v25 = vshll.u32 %v1460_v35, 16  ;;  %v1761_v51 = vld [vmem:[#allocation3 + $0x20] sm:$0xe] }
 0x1a8   :  { %3431 = vmatprep.mubr.bf16.mxu0 %v4199_v0  ;;  %v2076_v29 = vrot.slane %v2074_v62, 5  ;;  %v2082_v13 = vrot.slane %v2080_v12, 5  ;;  %v1506_v8 = vshrl.u32 %v1461_v59, 16  ;;  %v1509_v24 = vshll.u32 %v1461_v59, 16  ;;  %v1762_v18 = vld [vmem:[#allocation3 + $0x24] sm:$0x1] }
 0x1a9   :  { %v2064_v1 = vrot.slane %v2063_v7, 4  ;;  %v1494_v47 = vrot.slane %v1492_v27, 4  ;;  %v1497_v5 = vrot.slane %v1495_v56, 5  ;;  %v1503_v53 = vrot.slane %v1501_v25, 5  ;;  %v2004_v21 = vld [vmem:[#allocation3 + $0x30] sm:$0xf] }
 0x1aa   :  { %3432 = vmatmul.mubr.bf16.vlgmr.msra.gmra.mrb[48].mxu0 %v4832_v6  ;;  %v2077_v16 = vor.u32 %v2076_v29, %v2073_v14  ;;  %v1508_v41 = vrot.slane %v1506_v8, 4  ;;  %v1511_v28 = vrot.slane %v1509_v24, 5  ;;  %v1515_v3 = vshll.u32 %v1462_v42, 16  ;;  %v2005_v49 = vld [vmem:[#allocation3 + $0x34] sm:$0x1]  ;;  %v4835_v56 = vld [vmem:[%s6280_s2 + $0x208] sm:$0xff]  }
 0x1ab   :  { %v2069_v63 = vsel %vm5444_vm12, %v2064_v1, %v2068_v48  ;;  %v1498_v43 = vor.u32 %v1497_v5, %v1494_v47  ;;  %v4169_v30 = vrot.slane %v1759_v20, 9  ;;  %v1829_v44 = vrot.slane %v1760_v45, 5  ;;  %v2006_v46 = vld [vmem:[#allocation3 + $0x38] sm:$0xf]  ;;  %v4834_v15 = vld [vmem:[#allocation3 + $0x20] ss:$8 sps:$4 sm:$0xff]  }
 0x1ac   :  { %v2078_v37 = vrot.slane %v2077_v16, 4  ;;  %v1512_v34 = vor.u32 %v1511_v28, %v1508_v41  ;;  %v1517_v32 = vrot.slane %v1515_v3, 5  ;;  %v4170_v26 = vrot.slane %v1761_v51, 9  ;;  %v2007_v11 = vld [vmem:[#allocation3 + $0x3c] sm:$0x1] }
 0x1ad   :  { %v1499_v54 = vrot.slane %v1498_v43, 4  ;;  %v1830_v40 = vsel %vm5278_vm7, %v4169_v30, %v1829_v44  ;;  %v1833_v61 = vrot.slane %v1762_v18, 5  ;;  %v2085_v58 = vshrl.u32 %v2004_v21, 16  ;;  %v1463_v23 = vld [vmem:[#allocation3 + $0x18] sm:$0xf] }
 0x1ae   :  { %v2083_v2 = vsel %vm5444_vm12, %v2078_v37, %v2082_v13  ;;  %v1513_v50 = vrot.slane %v1512_v34, 4  ;;  %v2088_v55 = vshll.u32 %v2004_v21, 16  ;;  %v2094_v39 = vshll.u32 %v2005_v49, 16  ;;  %v1464_v48 = vld [vmem:[#allocation3 + $0x1c] sm:$0x1]  ;;  %v4837_v49 = vld [vmem:[%s6280_s2 + $0x210] sm:$0xff]  }
 0x1af   :  { %v4200_v22 = vcombine.low %v2069_v63, %v2083_v2  ;;  %v1504_v35 = vsel %vm5444_vm12, %v1499_v54, %v1503_v53  ;;  %v1834_v52 = vsel %vm5278_vm7, %v4170_v26, %v1833_v61  ;;  %v2087_v60 = vrot.slane %v2085_v58, 4  ;;  %v1465_v14 = vld [vmem:[#allocation3 + $0x20] sm:$0xf]  ;;  %v1466_v62 = vld [vmem:[#allocation3 + $0x24] sm:$0x1] }
 0x1b0   :  { %v1518_v59 = vsel %vm5444_vm12, %v1513_v50, %v1517_v32  ;;  %v4184_v42 = vcombine.low %v1830_v40, %v1834_v52  ;;  %v2090_v0 = vrot.slane %v2088_v55, 5  ;;  %v2096_v6 = vrot.slane %v2094_v39, 5  ;;  %v1763_v25 = vld [vmem:[#allocation3 + $0x28] sm:$0xe]  ;;  %v1764_v24 = vld [vmem:[#allocation3 + $0x2c] sm:$0x1] }
 0x1b1   :  { %3439 = vmatprep.mubr.bf16.mxu0 %v4200_v22  ;;  %v4159_v12 = vcombine.low %v1504_v35, %v1518_v59  ;;  %v2099_v20 = vshrl.u32 %v2006_v46, 16  ;;  %v2102_v7 = vshll.u32 %v2006_v46, 16  ;;  %v2108_v27 = vshll.u32 %v2007_v11, 16  ;;  %v1765_v53 = vld [vmem:[#allocation3 + $0x30] sm:$0xe]  ;;  %v4839_v55 = vld [vmem:[%s6280_s2 + $0x218] sm:$0xff]  }
 0x1b2   :  { %3440 = vmatmul.mubr.bf16.gmra.mrb[52].mxu0 %v4834_v15  ;;  %v2091_v45 = vor.u32 %v2090_v0, %v2087_v60  ;;  %v1520_v29 = vshrl.u32 %v1463_v23, 16  ;;  %v1523_v13 = vshll.u32 %v1463_v23, 16  ;;  %v1529_v8 = vshll.u32 %v1464_v48, 16  ;;  %v1766_v3 = vld [vmem:[#allocation3 + $0x34] sm:$0x1] }
 0x1b3   :  { %3335 = vmatmul.mubr.bf16.vlgmr.msra.gmra.mrb[32].mxu1 %v4159_v12  ;;  %v2101_v51 = vrot.slane %v2099_v20, 4  ;;  %v2104_v1 = vrot.slane %v2102_v7, 5  ;;  %v2110_v47 = vrot.slane %v2108_v27, 5  ;;  %v1534_v5 = vshrl.u32 %v1465_v14, 16  ;;  %v2008_v44 = vld [vmem:[#allocation3 + $0x40] sm:$0xf] }
 0x1b4   :  { %4664 = vmatpush3.bf16.msra.mxu1 %v5633_v9  ;;  %3342 = vmatprep.mubr.bf16.mxu1 %v4184_v42  ;;  %v2092_v18 = vrot.slane %v2091_v45, 4  ;;  %v1522_v16 = vrot.slane %v1520_v29, 4  ;;  %v1525_v41 = vrot.slane %v1523_v13, 5  ;;  %v1531_v28 = vrot.slane %v1529_v8, 5  ;;  %v2009_v26 = vld [vmem:[#allocation3 + $0x44] sm:$0x1] }
 0x1b5   :  { %v2105_v21 = vor.u32 %v2104_v1, %v2101_v51  ;;  %4665 = vmatprep.subr.bf16.mxu1 %v4835_v56  ;;  %v1536_v63 = vrot.slane %v1534_v5, 4  ;;  %v1537_v43 = vshll.u32 %v1465_v14, 16  ;;  %v1543_v30 = vshll.u32 %v1466_v62, 16  ;;  %v2011_v15 = vld [vmem:[#allocation3 + $0x4c] sm:$0x1] }
 0x1b6   :  { %v2097_v37 = vsel %vm5444_vm12, %v2092_v18, %v2096_v6  ;;  %v1526_v9 = vor.u32 %v1525_v41, %v1522_v16  ;;  %v4171_v34 = vrot.slane %v1763_v25, 9  ;;  %v1837_v32 = vrot.slane %v1764_v24, 5  ;;  %v4836_v35 = vld [vmem:[#allocation3 + $0x30] ss:$8 sps:$4 sm:$0xff]   ;;  %v1467_v23 = vld [vmem:[#allocation3 + $0x28] sm:$0xf] }
 0x1b7   :  { %v2106_v54 = vrot.slane %v2105_v21, 4  ;;  %v1539_v40 = vrot.slane %v1537_v43, 5  ;;  %v1545_v61 = vrot.slane %v1543_v30, 5  ;;  %v4172_v46 = vrot.slane %v1765_v53, 9  ;;  %v1468_v6 = vld [vmem:[#allocation3 + $0x2c] sm:$0x1] }
 0x1b8   :  { %v1527_v58 = vrot.slane %v1526_v9, 4  ;;  %4666 = vmatpush3.bf16.msra.mxu1 %v4835_v56  ;;  %v1838_v2 = vsel %vm5278_vm7, %v4171_v34, %v1837_v32  ;;  %v1841_v50 = vrot.slane %v1766_v3, 5  ;;  %v2113_v11 = vshrl.u32 %v2008_v44, 16  ;;  %v1469_v14 = vld [vmem:[#allocation3 + $0x30] sm:$0xf] }
 0x1b9   :  { %v2111_v39 = vsel %vm5444_vm12, %v2106_v54, %v2110_v47  ;;  %v1540_v22 = vor.u32 %v1539_v40, %v1536_v63  ;;  %v2116_v52 = vshll.u32 %v2008_v44, 16  ;;  %v2122_v60 = vshll.u32 %v2009_v26, 16  ;;  %4667 = vmatprep.subr.bf16.mxu1 %v4837_v49  ;;  %v1470_v27 = vld [vmem:[#allocation3 + $0x34] sm:$0x1]  ;;  %v1767_v56 = vld [vmem:[#allocation3 + $0x38] sm:$0xe] }
 0x1ba   :  { %v4201_v48 = vcombine.low %v2097_v37, %v2111_v39  ;;  %v1532_v59 = vsel %vm5444_vm12, %v1527_v58, %v1531_v28  ;;  %v1842_v42 = vsel %vm5278_vm7, %v4172_v46, %v1841_v50  ;;  %v2115_v0 = vrot.slane %v2113_v11, 4  ;;  %v1768_v8 = vld [vmem:[#allocation3 + $0x3c] sm:$0x1]  ;;  %v1769_v5 = vld [vmem:[#allocation3 + $0x40] sm:$0xe] }
 0x1bb   :  { %v1541_v62 = vrot.slane %v1540_v22, 4  ;;  %v4185_v12 = vcombine.low %v1838_v2, %v1842_v42  ;;  %v2118_v20 = vrot.slane %v2116_v52, 5  ;;  %v2124_v7 = vrot.slane %v2122_v60, 5  ;;  %v1770_v53 = vld [vmem:[#allocation3 + $0x44] sm:$0x1]  ;;  %v4843_v2 = vld [vmem:[%s6280_s2 + $0x228] sm:$0xff]  }
 0x1bc   :  { %3447 = vmatprep.mubr.bf16.mxu0 %v4201_v48  ;;  %v2134_v25 = vrot.slane %v2133_v17, 4  ;;  %v2136_v45 = vshll.u32 %v2011_v15, 16  ;;  %v1548_v29 = vshrl.u32 %v1467_v23, 16  ;;  %v1551_v13 = vshll.u32 %v1467_v23, 16  ;;  %4668 = vmatpush3.bf16.msra.mxu1 %v4837_v49  ;;  %v2012_v38 = vld [vmem:[#allocation3 + $0x60] sm:$0xf] }
 0x1bd   :  { %v1546_v24 = vsel %vm5444_vm12, %v1541_v62, %v1545_v61  ;;  %3448 = vmatmul.mubr.bf16.gmra.mrb[56].mxu0 %v4836_v35  ;;  %v2119_v51 = vor.u32 %v2118_v20, %v2115_v0  ;;  %v1557_v1 = vshll.u32 %v1468_v6, 16  ;;  %v1562_v47 = vshrl.u32 %v1469_v14, 16  ;;  %4669 = vmatprep.subr.bf16.mxu1 %v4839_v55  ;;  %v4841_v17 = vld [vmem:[%s6280_s2 + $0x220] sm:$0xff]   ;;  %v2014_v54 = vld [vmem:[#allocation3 + $0x68] sm:$0xf] }
 0x1be   :  { %v4160_v18 = vcombine.low %v1532_v59, %v1546_v24  ;;  %v2138_v16 = vrot.slane %v2136_v45, 5  ;;  %v1550_v41 = vrot.slane %v1548_v29, 4  ;;  %v1553_v31 = vrot.slane %v1551_v13, 5  ;;  %v2013_v43 = vld [vmem:[#allocation3 + $0x64] sm:$0x1] }
 0x1bf   :  { %v2120_v28 = vrot.slane %v2119_v51, 4  ;;  %v1559_v3 = vrot.slane %v1557_v1, 5  ;;  %v1564_v21 = vrot.slane %v1562_v47, 4  ;;  %v1565_v63 = vshll.u32 %v1469_v14, 16  ;;  %v4838_v11 = vld [vmem:[#allocation3 + $0x40] ss:$8 sps:$4 sm:$0xff]  }
 0x1c0   :  { %3343 = vmatmul.mubr.bf16.gmra.mrb[36].mxu1 %v4160_v18  ;;  %v2139_v30 = vsel %vm5444_vm12, %v2134_v25, %v2138_v16  ;;  %v1554_v44 = vor.u32 %v1553_v31, %v1550_v41  ;;  %v1571_v49 = vshll.u32 %v1470_v27, 16  ;;  %v4173_v37 = vrot.slane %v1767_v56, 9  ;;  %v2015_v39 = vld [vmem:[#allocation3 + $0x6c] sm:$0x1]  ;;  %v1471_v48 = vld [vmem:[#allocation3 + $0x38] sm:$0xf] }
 0x1c1   :  { %3350 = vmatprep.mubr.bf16.mxu1 %v4185_v12  ;;  %v2125_v9 = vsel %vm5444_vm12, %v2120_v28, %v2124_v7  ;;  %v1567_v34 = vrot.slane %v1565_v63, 5  ;;  %v1845_v32 = vrot.slane %v1768_v8, 5  ;;  %v4174_v26 = vrot.slane %v1769_v5, 9  ;;  %4670 = vmatpush3.bf16.msra.mxu1 %v4839_v55  ;;  %v1472_v59 = vld [vmem:[#allocation3 + $0x3c] sm:$0x1]  ;;  %v4845_v12 = vld [vmem:[%s6280_s2 + $0x230] sm:$0xff]  }
 0x1c2   :  { %v4202_v40 = vcombine.low %v2125_v9, %v2139_v30  ;;  %v1555_v61 = vrot.slane %v1554_v44, 4  ;;  %v1573_v46 = vrot.slane %v1571_v49, 5  ;;  %v1849_v58 = vrot.slane %v1770_v53, 5  ;;  %4671 = vmatprep.subr.bf16.mxu1 %v4841_v17  ;;  %v1473_v62 = vld [vmem:[#allocation3 + $0x40] sm:$0xf]  ;;  %v4847_v30 = vld [vmem:[%s6280_s2 + $0x238] sm:$0xff]  }
 0x1c3   :  { %v1568_v50 = vor.u32 %v1567_v34, %v1564_v21  ;;  %v1846_v15 = vsel %vm5278_vm7, %v4173_v37, %v1845_v32  ;;  %v2141_v22 = vshrl.u32 %v2012_v38, 16  ;;  %v2144_v35 = vshll.u32 %v2012_v38, 16  ;;  %v1474_v25 = vld [vmem:[#allocation3 + $0x44] sm:$0x1]  ;;  %v1771_v24 = vld [vmem:[#allocation3 + $0x58] sm:$0xe] }
 0x1c4   :  { %3455 = vmatprep.mubr.bf16.mxu0 %v4202_v40  ;;  %v1560_v55 = vsel %vm5444_vm12, %v1555_v61, %v1559_v3  ;;  %v1850_v52 = vsel %vm5278_vm7, %v4174_v26, %v1849_v58  ;;  %v2150_v60 = vshll.u32 %v2013_v43, 16  ;;  %v2155_v23 = vshrl.u32 %v2014_v54, 16  ;;  %v1772_v51 = vld [vmem:[#allocation3 + $0x5c] sm:$0x1]  ;;  %v1773_v18 = vld [vmem:[#allocation3 + $0x60] sm:$0xe] }
 0x1c5   :  { %v1569_v42 = vrot.slane %v1568_v50, 4  ;;  %v4186_v0 = vcombine.low %v1846_v15, %v1850_v52  ;;  %3456 = vmatmul.mubr.bf16.gmra.mrb[60].mxu0 %v4838_v11  ;;  %v2143_v6 = vrot.slane %v2141_v22, 4  ;;  %v2146_v14 = vrot.slane %v2144_v35, 5  ;;  %4672 = vmatpush3.bf16.msra.mxu1 %v4841_v17  ;;  %v1774_v17 = vld [vmem:[#allocation3 + $0x64] sm:$0x1] }
 0x1c6   :  { %v2152_v20 = vrot.slane %v2150_v60, 5  ;;  %v2157_v7 = vrot.slane %v2155_v23, 4  ;;  %v2158_v27 = vshll.u32 %v2014_v54, 16  ;;  %v2164_v56 = vshll.u32 %v2015_v39, 16  ;;  %4673 = vmatprep.subr.bf16.mxu1 %v4843_v2  ;;  %v2016_v43 = vld [vmem:[#allocation3 + $0x70] sm:$0xf] }
 0x1c7   :  { %v1574_v45 = vsel %vm5444_vm12, %v1569_v42, %v1573_v46  ;;  %v2147_v29 = vor.u32 %v2146_v14, %v2143_v6  ;;  %v1576_v13 = vshrl.u32 %v1471_v48, 16  ;;  %v1579_v8 = vshll.u32 %v1471_v48, 16  ;;  %v2017_v40 = vld [vmem:[#allocation3 + $0x74] sm:$0x1]  ;;  %v2019_v22 = vld [vmem:[#allocation3 + $0x7c] sm:$0x1] }
 0x1c8   :  { %v4161_v1 = vcombine.low %v1560_v55, %v1574_v45  ;;  %v2160_v47 = vrot.slane %v2158_v27, 5  ;;  %v2166_v5 = vrot.slane %v2164_v56, 5  ;;  %v1585_v53 = vshll.u32 %v1472_v59, 16  ;;  %v1475_v55 = vld [vmem:[#allocation3 + $0x58] sm:$0xf] }
 0x1c9   :  { %v2148_v16 = vrot.slane %v2147_v29, 4  ;;  %v1578_v41 = vrot.slane %v1576_v13, 4  ;;  %v1581_v31 = vrot.slane %v1579_v8, 5  ;;  %v1590_v38 = vshrl.u32 %v1473_v62, 16  ;;  %4674 = vmatpush3.bf16.msra.mxu1 %v4843_v2  ;;  %v2018_v2 = vld [vmem:[#allocation3 + $0x78] sm:$0xf] }
 0x1ca   :  { %3351 = vmatmul.mubr.bf16.gmra.mrb[40].mxu1 %v4161_v1  ;;  %v2161_v28 = vor.u32 %v2160_v47, %v2157_v7  ;;  %v1587_v3 = vrot.slane %v1585_v53, 5  ;;  %v1593_v21 = vshll.u32 %v1473_v62, 16  ;;  %v1599_v63 = vshll.u32 %v1474_v25, 16  ;;  %4675 = vmatprep.subr.bf16.mxu1 %v4845_v12  ;;  %v4840_v48 = vld [vmem:[#allocation3 + $0x60] ss:$8 sps:$4 sm:$0xff]  }
 0x1cb   :  { %3358 = vmatprep.mubr.bf16.mxu1 %v4186_v0  ;;  %v2153_v44 = vsel %vm5444_vm12, %v2148_v16, %v2152_v20  ;;  %v1582_v49 = vor.u32 %v1581_v31, %v1578_v41  ;;  %v1592_v37 = vrot.slane %v1590_v38, 4  ;;  %v4175_v9 = vrot.slane %v1771_v24, 9  ;;  %v1476_v62 = vld [vmem:[#allocation3 + $0x5c] sm:$0x1]  ;;  %v1477_v27 = vld [vmem:[#allocation3 + $0x60] sm:$0xf] }
 0x1cc   :  { %v2162_v34 = vrot.slane %v2161_v28, 4  ;;  %v1595_v32 = vrot.slane %v1593_v21, 5  ;;  %v1601_v26 = vrot.slane %v1599_v63, 5  ;;  %v1853_v54 = vrot.slane %v1772_v51, 5  ;;  %v1478_v13 = vld [vmem:[#allocation3 + $0x64] sm:$0x1] }
 0x1cd   :  { %v1583_v61 = vrot.slane %v1582_v49, 4  ;;  %v4176_v46 = vrot.slane %v1773_v18, 9  ;;  %v1857_v58 = vrot.slane %v1774_v17, 5  ;;  %v2169_v50 = vshrl.u32 %v2016_v43, 16  ;;  %4676 = vmatpush3.bf16.msra.mxu1 %v4845_v12  ;;  %v1775_v24 = vld [vmem:[#allocation3 + $0x68] sm:$0xe] }
 0x1ce   :  { %v2167_v15 = vsel %vm5444_vm12, %v2162_v34, %v2166_v5  ;;  %v1596_v11 = vor.u32 %v1595_v32, %v1592_v37  ;;  %v1854_v39 = vsel %vm5278_vm7, %v4175_v9, %v1853_v54  ;;  %v2172_v35 = vshll.u32 %v2016_v43, 16  ;;  %4677 = vmatprep.subr.bf16.mxu1 %v4847_v30  ;;  %v1776_v53 = vld [vmem:[#allocation3 + $0x6c] sm:$0x1]  ;;  %v1777_v18 = vld [vmem:[#allocation3 + $0x70] sm:$0xe] }
 0x1cf   :  { %v4203_v52 = vcombine.low %v2153_v44, %v2167_v15  ;;  %v1588_v60 = vsel %vm5444_vm12, %v1583_v61, %v1587_v3  ;;  %v1858_v23 = vsel %vm5278_vm7, %v4176_v46, %v1857_v58  ;;  %v2171_v59 = vrot.slane %v2169_v50, 4  ;;  %v1778_v17 = vld [vmem:[#allocation3 + $0x74] sm:$0x1]  ;;  %v2020_v43 = vld [vmem:[#allocation3 + $0x80] sm:$0xf] }
 0x1d0   :  { %v1597_v42 = vrot.slane %v1596_v11, 4  ;;  %v4187_v0 = vcombine.low %v1854_v39, %v1858_v23  ;;  %v2174_v6 = vrot.slane %v2172_v35, 5  ;;  %v2178_v14 = vshll.u32 %v2017_v40, 16  ;;  %v2021_v58 = vld [vmem:[#allocation3 + $0x84] sm:$0x1] }
 0x1d1   :  { %3463 = vmatprep.mubr.bf16.mxu0 %v4203_v52  ;;  %v2183_v12 = vshrl.u32 %v2018_v2, 16  ;;  %v2186_v20 = vshll.u32 %v2018_v2, 16  ;;  %v2192_v7 = vshll.u32 %v2019_v22, 16  ;;  %v1604_v56 = vshrl.u32 %v1475_v55, 16  ;;  %4678 = vmatpush3.bf16.msra.mxu1 %v4847_v30  ;;  %v2022_v15 = vld [vmem:[#allocation3 + $0x88] sm:$0xf] }
 0x1d2   :  { %v1602_v25 = vsel %vm5444_vm12, %v1597_v42, %v1601_v26  ;;  %3464 = vmatmul.mubr.bf16.gmra.mrb[64].mxu0 %v4840_v48  ;;  %v2175_v45 = vor.u32 %v2174_v6, %v2171_v59  ;;  %v2180_v29 = vrot.slane %v2178_v14, 5  ;;  %v1607_v8 = vshll.u32 %v1475_v55, 16  ;;  %v2023_v11 = vld [vmem:[#allocation3 + $0x8c] sm:$0x1]  ;;  %v4842_v23 = vld [vmem:[#allocation3 + $0x70] ss:$8 sps:$4 sm:$0xff]  }
 0x1d3   :  { %v4162_v51 = vcombine.low %v1588_v60, %v1602_v25  ;;  %v2185_v1 = vrot.slane %v2183_v12, 4  ;;  %v2188_v47 = vrot.slane %v2186_v20, 5  ;;  %v2194_v5 = vrot.slane %v2192_v7, 5  ;;  %v1479_v48 = vld [vmem:[#allocation3 + $0x68] sm:$0xf] }
 0x1d4   :  { %v2176_v16 = vrot.slane %v2175_v45, 4  ;;  %v1606_v41 = vrot.slane %v1604_v56, 4  ;;  %v1609_v31 = vrot.slane %v1607_v8, 5  ;;  %v1613_v38 = vshll.u32 %v1476_v62, 16  ;;  %v1480_v14 = vld [vmem:[#allocation3 + $0x6c] sm:$0x1] }
 0x1d5   :  { %3359 = vmatmul.mubr.bf16.gmra.mrb[44].mxu1 %v4162_v51  ;;  %v2189_v28 = vor.u32 %v2188_v47, %v2185_v1  ;;  %v1618_v3 = vshrl.u32 %v1477_v27, 16  ;;  %v1621_v21 = vshll.u32 %v1477_v27, 16  ;;  %v1627_v63 = vshll.u32 %v1478_v13, 16  ;;  %v1481_v27 = vld [vmem:[#allocation3 + $0x70] sm:$0xf] }
 0x1d6   :  { %3366 = vmatprep.mubr.bf16.mxu1 %v4187_v0  ;;  %v2181_v30 = vsel %vm5444_vm12, %v2176_v16, %v2180_v29  ;;  %v1610_v44 = vor.u32 %v1609_v31, %v1606_v41  ;;  %v1615_v49 = vrot.slane %v1613_v38, 5  ;;  %v4177_v37 = vrot.slane %v1775_v24, 9  ;;  %v1482_v45 = vld [vmem:[#allocation3 + $0x74] sm:$0x1]  ;;  %v1779_v8 = vld [vmem:[#allocation3 + $0x78] sm:$0xe] }
 0x1d7   :  { %v2190_v9 = vrot.slane %v2189_v28, 4  ;;  %v1620_v34 = vrot.slane %v1618_v3, 4  ;;  %v1623_v32 = vrot.slane %v1621_v21, 5  ;;  %v1629_v26 = vrot.slane %v1627_v63, 5  ;;  %v1782_v21 = vld [vmem:[#allocation3 + $0x84] sm:$0x1] }
 0x1d8   :  { %v1611_v54 = vrot.slane %v1610_v44, 4  ;;  %v1861_v40 = vrot.slane %v1776_v53, 5  ;;  %v4178_v61 = vrot.slane %v1777_v18, 9  ;;  %v1865_v46 = vrot.slane %v1778_v17, 5  ;;  %v1781_v53 = vld [vmem:[#allocation3 + $0x80] sm:$0xe] }
 0x1d9   :  { %v2195_v2 = vsel %vm5444_vm12, %v2190_v9, %v2194_v5  ;;  %v1624_v50 = vor.u32 %v1623_v32, %v1620_v34  ;;  %v2197_v39 = vshrl.u32 %v2020_v43, 16  ;;  %v2200_v22 = vshll.u32 %v2020_v43, 16  ;;  %v1780_v5 = vld [vmem:[#allocation3 + $0x7c] sm:$0x1] }
 0x1da   :  { %v4204_v35 = vcombine.low %v2181_v30, %v2195_v2  ;;  %v1616_v55 = vsel %vm5444_vm12, %v1611_v54, %v1615_v49  ;;  %v1862_v52 = vsel %vm5278_vm7, %v4177_v37, %v1861_v40  ;;  %v1866_v60 = vsel %vm5278_vm7, %v4178_v61, %v1865_v46  ;;  %v141_v49 = vld [vmem:[#allocation3 + $0x98] sm:$0x1]  ;;  %v200_v37 = vld [vmem:[#allocation3 + $0x94] sm:$0x1]  ;;  %v203_v54 = vld [vmem:[#allocation3 + $0x9c] sm:$0x1] }
 0x1db   :  { %v1625_v59 = vrot.slane %v1624_v50, 4  ;;  %v4188_v42 = vcombine.low %v1862_v52, %v1866_v60  ;;  %v2199_v0 = vrot.slane %v2197_v39, 4  ;;  %v2202_v6 = vrot.slane %v2200_v22, 5  ;;  %v2024_v2 = vld [vmem:[#allocation3 + $0x90] sm:$0xf] }
 0x1dc   :  { %3471 = vmatprep.mubr.bf16.mxu0 %v4204_v35  ;;  %v2206_v62 = vshll.u32 %v2021_v58, 16  ;;  %v2211_v12 = vshrl.u32 %v2022_v15, 16  ;;  %v2214_v20 = vshll.u32 %v2022_v15, 16  ;;  %v2220_v7 = vshll.u32 %v2023_v11, 16  ;;  %v1483_v22 = vld [vmem:[#allocation3 + $0x78] sm:$0xf] }
 0x1dd   :  { %v1630_v56 = vsel %vm5444_vm12, %v1625_v59, %v1629_v26  ;;  %3472 = vmatmul.mubr.bf16.gmra.mrb[68].mxu0 %v4842_v23  ;;  %v2203_v25 = vor.u32 %v2202_v6, %v2199_v0  ;;  %v1632_v29 = vshrl.u32 %v1479_v48, 16  ;;  %v1635_v13 = vshll.u32 %v1479_v48, 16  ;;  %v1485_v23 = vld [vmem:[#allocation3 + $0x80] sm:$0xf] }
 0x1de   :  { %v4163_v24 = vcombine.low %v1616_v55, %v1630_v56  ;;  %v2208_v51 = vrot.slane %v2206_v62, 5  ;;  %v2213_v1 = vrot.slane %v2211_v12, 4  ;;  %v2216_v47 = vrot.slane %v2214_v20, 5  ;;  %v1484_v62 = vld [vmem:[#allocation3 + $0x7c] sm:$0x1] }
 0x1df   :  { %v2204_v18 = vrot.slane %v2203_v25, 4  ;;  %v2222_v16 = vrot.slane %v2220_v7, 5  ;;  %v1634_v41 = vrot.slane %v1632_v29, 4  ;;  %v1637_v31 = vrot.slane %v1635_v13, 5  ;;  %v1486_v25 = vld [vmem:[#allocation3 + $0x84] sm:$0x1] }
 0x1e0   :  { %3367 = vmatmul.mubr.bf16.gmra.mrb[48].mxu1 %v4163_v24  ;;  %v2217_v38 = vor.u32 %v2216_v47, %v2213_v1  ;;  %v1641_v17 = vshll.u32 %v1480_v14, 16  ;;  %v1646_v28 = vshrl.u32 %v1481_v27, 16  ;;  %v1649_v3 = vshll.u32 %v1481_v27, 16  ;;  %v1487_v24 = vld [vmem:[#allocation3 + $0x88] sm:$0xf] }
 0x1e1   :  { %3374 = vmatprep.mubr.bf16.mxu1 %v4188_v42  ;;  %v2209_v63 = vsel %vm5444_vm12, %v2204_v18, %v2208_v51  ;;  %v1638_v43 = vor.u32 %v1637_v31, %v1634_v41  ;;  %v1655_v30 = vshll.u32 %v1482_v45, 16  ;;  %v4179_v44 = vrot.slane %v1779_v8, 9  ;;  %v4844_v42 = vld [vmem:[#allocation3 + $0x80] ss:$8 sps:$4 sm:$0xff]   ;;  %v1489_v31 = vld [vmem:[#allocation3 + $0x90] sm:$0xf] }
 0x1e2   :  { %v2218_v9 = vrot.slane %v2217_v38, 4  ;;  %v1643_v34 = vrot.slane %v1641_v17, 5  ;;  %v1648_v32 = vrot.slane %v1646_v28, 4  ;;  %v1651_v26 = vrot.slane %v1649_v3, 5  ;;  %v1783_v41 = vld [vmem:[#allocation3 + $0x88] sm:$0xe] }
 0x1e3   :  { %v1639_v40 = vrot.slane %v1638_v43, 4  ;;  %v1657_v61 = vrot.slane %v1655_v30, 5  ;;  %v1869_v46 = vrot.slane %v1780_v5, 5  ;;  %v4180_v58 = vrot.slane %v1781_v53, 9  ;;  %v1785_v43 = vld [vmem:[#allocation3 + $0x90] sm:$0xe] }
 0x1e4   :  { %v2223_v50 = vsel %vm5444_vm12, %v2218_v9, %v2222_v16  ;;  %v1652_v15 = vor.u32 %v1651_v26, %v1648_v32  ;;  %v1873_v11 = vrot.slane %v1782_v21, 5  ;;  %v142_v39 = vsel %vm5006_vm2, 0, %v141_v49 }
 0x1e5   :  { %v4205_v35 = vcombine.low %v2209_v63, %v2223_v50  ;;  %v1644_v55 = vsel %vm5444_vm12, %v1639_v40, %v1643_v34  ;;  %v1870_v52 = vsel %vm5278_vm7, %v4179_v44, %v1869_v46  ;;  %143 = vst [vmem:[#allocation3 + $0x98] sm:$0x1] %v142_v39  ;;  %v201_v60 = vsel %vm5013_vm4, 0, %v200_v37  ;;  %v1784_v63 = vld [vmem:[#allocation3 + $0x8c] sm:$0x1] }
 0x1e6   :  { %v1653_v48 = vrot.slane %v1652_v15, 4  ;;  %v1874_v59 = vsel %vm5278_vm7, %v4180_v58, %v1873_v11  ;;  %202 = vst [vmem:[#allocation3 + $0x94] sm:$0x1] %v201_v60  ;;  %v204_v0 = vsel %vm5013_vm4, 0, %v203_v54  ;;  %v2225_v6 = vshrl.u32 %v2024_v2, 16 }
 0x1e7   :  { %3479 = vmatprep.mubr.bf16.mxu0 %v4205_v35  ;;  %205 = vst [vmem:[#allocation3 + $0x9c] sm:$0x1] %v204_v0  ;;  %v2228_v14 = vshll.u32 %v2024_v2, 16  ;;  %v1660_v12 = vshrl.u32 %v1483_v22, 16  ;;  %v1663_v20 = vshll.u32 %v1483_v22, 16  ;;  %v709_v7 = vrot.slane %v5683_v57, 4 }
 0x1e8   :  { %v1658_v27 = vsel %vm5444_vm12, %v1653_v48, %v1657_v61  ;;  %v4189_v56 = vcombine.low %v1870_v52, %v1874_v59  ;;  %3480 = vmatmul.mubr.bf16.gmra.mrb[72].mxu0 %v4844_v42  ;;  %v1674_v45 = vshrl.u32 %v1485_v23, 16  ;;  %v2227_v13 = vrot.slane %v2225_v6, 4  ;;  %v1488_v40 = vld [vmem:[#allocation3 + $0x8c] sm:$0x1]  ;;  %v2292_v50 = vld [vmem:[#allocation3 + $0x10] sm:$0xe] }
 0x1e9   :  { %v4164_v29 = vcombine.low %v1644_v55, %v1658_v27  ;;  %v1662_v36 = vrot.slane %v1660_v12, 4  ;;  %v1665_v8 = vrot.slane %v1663_v20, 5  ;;  %v2230_v51 = vrot.slane %v2228_v14, 5  ;;  %v2293_v22 = vld [vmem:[#allocation3 + $0x14] sm:$0x1] }
 0x1ea   :  { %v1669_v1 = vshll.u32 %v1484_v62, 16  ;;  %v1676_v47 = vrot.slane %v1674_v45, 4  ;;  %v1677_v5 = vshll.u32 %v1485_v23, 16  ;;  %v1683_v18 = vshll.u32 %v1486_v25, 16  ;;  %v2294_v23 = vld [vmem:[#allocation3 + $0x18] sm:$0xe] }
 0x1eb   :  { %3375 = vmatmul.mubr.bf16.gmra.mrb[52].mxu1 %v4164_v29  ;;  %v1666_v53 = vor.u32 %v1665_v8, %v1662_v36  ;;  %v1688_v38 = vshrl.u32 %v1487_v24, 16  ;;  %v2231_v49 = vor.u32 %v2230_v51, %v2227_v13  ;;  %v1691_v2 = vshll.u32 %v1487_v24, 16  ;;  %v2295_v12 = vld [vmem:[#allocation3 + $0x1c] sm:$0x1] }
 0x1ec   :  { %3382 = vmatprep.mubr.bf16.mxu1 %v4189_v56  ;;  %v2026_v57 = vld [vmem:[#allocation3 + $0x98] sm:$0xf]  ;;  %v1679_v16 = vrot.slane %v1677_v5, 5  ;;  %v1671_v37 = vrot.slane %v1669_v1, 5  ;;  %v1685_v54 = vrot.slane %v1683_v18, 5  ;;  %v4181_v33 = vrot.slane %v1783_v41, 9 }
 0x1ed   :  { %v842_v17 = vld [vmem:[#allocation3 + $0x94] sm:$0x1]  ;;  %v2239_v28 = vshrl.u32 %v2026_v57, 16  ;;  %v2242_v3 = vshll.u32 %v2026_v57, 16  ;;  %v1667_v21 = vrot.slane %v1666_v53, 4  ;;  %v1690_v58 = vrot.slane %v1688_v38, 4 }
 0x1ee   :  { %v843_v30 = vsel %vm5006_vm2, %v709_v7, %v842_v17  ;;  %v2027_v44 = vld [vmem:[#allocation3 + $0x9c] sm:$0x1]  ;;  %v1680_v9 = vor.u32 %v1679_v16, %v1676_v47  ;;  %v1702_v11 = vshrl.u32 %v1489_v31, 16  ;;  %v1705_v39 = vshll.u32 %v1489_v31, 16  ;;  %v2296_v17 = vld [vmem:[#allocation3 + $0x20] sm:$0xe] }
 0x1ef   :  { %844 = vst [vmem:[#allocation3 + $0x94] sm:$0x1] %v843_v30  ;;  %v2241_v34 = vrot.slane %v2239_v28, 4  ;;  %v2244_v32 = vrot.slane %v2242_v3, 5  ;;  %v2248_v26 = vshll.u32 %v2027_v44, 16  ;;  %v1672_v61 = vsel %vm5444_vm12, %v1667_v21, %v1671_v37 }
 0x1f0   :  { %v1681_v46 = vrot.slane %v1680_v9, 4  ;;  %v1877_v55 = vrot.slane %v1784_v63, 5  ;;  %v4182_v52 = vrot.slane %v1785_v43, 9  ;;  %v1693_v60 = vrot.slane %v1691_v2, 5  ;;  %v2297_v28 = vld [vmem:[#allocation3 + $0x24] sm:$0x1] }
 0x1f1   :  { %v2245_v15 = vor.u32 %v2244_v32, %v2241_v34  ;;  %v2232_v48 = vrot.slane %v2231_v49, 4  ;;  %v1704_v42 = vrot.slane %v1702_v11, 4  ;;  %v1707_v0 = vrot.slane %v1705_v39, 5  ;;  %v2298_v43 = vld [vmem:[#allocation3 + $0x28] sm:$0xe] }
 0x1f2   :  { %v1686_v35 = vsel %vm5444_vm12, %v1681_v46, %v1685_v54  ;;  %v2250_v6 = vrot.slane %v2248_v26, 5  ;;  %v1694_v14 = vor.u32 %v1693_v60, %v1690_v58  ;;  %v1697_v62 = vshll.u32 %v1488_v40, 16  ;;  %v2299_v30 = vld [vmem:[#allocation3 + $0x2c] sm:$0x1]  ;;  %v2300_v44 = vld [vmem:[#allocation3 + $0x30] sm:$0xe] }
 0x1f3   :  { %v4165_v59 = vcombine.low %v1672_v61, %v1686_v35  ;;  %v4207_v20 = vrot.slane %v2292_v50, 9  ;;  %v2246_v7 = vrot.slane %v2245_v15, 4  ;;  %v1708_v27 = vor.u32 %v1707_v0, %v1704_v42  ;;  %v2301_v9 = vld [vmem:[#allocation3 + $0x34] sm:$0x1]  ;;  %v2302_v34 = vld [vmem:[#allocation3 + $0x38] sm:$0xe] }
 0x1f4   :  { %v2358_v56 = vrot.slane %v2293_v22, 5  ;;  %v4208_v25 = vrot.slane %v2294_v23, 9  ;;  %v1878_v13 = vsel %vm5278_vm7, %v4181_v33, %v1877_v55  ;;  %v1695_v51 = vrot.slane %v1694_v14, 4  ;;  %v2303_v32 = vld [vmem:[#allocation3 + $0x3c] sm:$0x1] }
 0x1f5   :  { %3383 = vmatmul.mubr.bf16.gmra.mrb[56].mxu1 %v4165_v59  ;;  %v2362_v1 = vrot.slane %v2295_v12, 5  ;;  %v1699_v47 = vrot.slane %v1697_v62, 5  ;;  %v1709_v5 = vrot.slane %v1708_v27, 4  ;;  %v2251_v57 = vsel %vm5444_vm12, %v2246_v7, %v2250_v6  ;;  %v4846_v26 = vld [vmem:[#allocation3 + $0x90] ss:$8 sps:$4 sm:$0xff]  }
 0x1f6   :  { %v2025_v45 = vld [vmem:[#allocation3 + $0x94] sm:$0x1]  ;;  %v2359_v21 = vsel %vm5278_vm7, %v4207_v20, %v2358_v56  ;;  %v4209_v40 = vrot.slane %v2296_v17, 9  ;;  %v2366_v46 = vrot.slane %v2297_v28, 5  ;;  %v4210_v58 = vrot.slane %v2298_v43, 9 }
 0x1f7   :  { %v1786_v29 = vld [vmem:[#allocation3 + $0x94] sm:$0x1]  ;;  %v2234_v8 = vshll.u32 %v2025_v45, 16  ;;  %v1700_v31 = vsel %vm5444_vm12, %v1695_v51, %v1699_v47  ;;  %v2363_v63 = vsel %vm5278_vm7, %v4208_v25, %v2362_v1  ;;  %v2370_v2 = vrot.slane %v2299_v30, 5  ;;  %v2304_v22 = vld [vmem:[#allocation3 + $0x40] sm:$0xe] }
 0x1f8   :  { %v1490_v36 = vld [vmem:[#allocation3 + $0x94] sm:$0x1]  ;;  %v1881_v24 = vrot.slane %v1786_v29, 5  ;;  %v4223_v61 = vcombine.low %v2359_v21, %v2363_v63  ;;  %v4211_v50 = vrot.slane %v2300_v44, 9  ;;  %v2374_v15 = vrot.slane %v2301_v9, 5 }
 0x1f9   :  { %v1711_v53 = vshll.u32 %v1490_v36, 16  ;;  %v2236_v18 = vrot.slane %v2234_v8, 5  ;;  %v4212_v33 = vrot.slane %v2302_v34, 9  ;;  %v2378_v11 = vrot.slane %v2303_v32, 5  ;;  %v2305_v35 = vld [vmem:[#allocation3 + $0x44] sm:$0x1] }
 0x1fa   :  { %v1882_v16 = vsel %vm5278_vm7, %v4182_v52, %v1881_v24  ;;  %v2367_v19 = vsel %vm5278_vm7, %v4209_v40, %v2366_v46  ;;  %v2371_v39 = vsel %vm5278_vm7, %v4210_v58, %v2370_v2  ;;  %v2375_v55 = vsel %vm5278_vm7, %v4211_v50, %v2374_v15  ;;  %v2306_v60 = vld [vmem:[#allocation3 + $0x48] sm:$0xe]  ;;  %v2307_v23 = vld [vmem:[#allocation3 + $0x4c] sm:$0x1]  ;;  %v2309_v59 = vld [vmem:[#allocation3 + $0x64] sm:$0x1] }
 0x1fb   :  { %v4190_v41 = vcombine.low %v1878_v13, %v1882_v16  ;;  %v1713_v38 = vrot.slane %v1711_v53, 5  ;;  %v2237_v3 = vsel %vm5444_vm12, %v2232_v48, %v2236_v18  ;;  %v2379_v52 = vsel %vm5278_vm7, %v4212_v33, %v2378_v11  ;;  %v2308_v48 = vld [vmem:[#allocation3 + $0x60] sm:$0xe]  ;;  %v2310_v42 = vld [vmem:[#allocation3 + $0x68] sm:$0xe] }
 0x1fc   :  { %v4206_v49 = vcombine.low %v2237_v3, %v2251_v57  ;;  %v2311_v0 = vld [vmem:[#allocation3 + $0x6c] sm:$0x1]  ;;  %v4224_v6 = vcombine.low %v2367_v19, %v2371_v39  ;;  %v4213_v14 = vrot.slane %v2304_v22, 9  ;;  %v4225_v62 = vcombine.low %v2375_v55, %v2379_v52  ;;  %v2312_v36 = vld [vmem:[#allocation3 + $0x70] sm:$0xe] }
 0x1fd   :  { %3390 = vmatprep.mubr.bf16.mxu1 %v4190_v41  ;;  %v1714_v37 = vsel %vm5444_vm12, %v1709_v5, %v1713_v38  ;;  %v2382_v12 = vrot.slane %v2305_v35, 5  ;;  %v4214_v20 = vrot.slane %v2306_v60, 9  ;;  %v2386_v7 = vrot.slane %v2307_v23, 5  ;;  %v2313_v8 = vld [vmem:[#allocation3 + $0x74] sm:$0x1] }
 0x1fe   :  { %v4166_v54 = vcombine.low %v1700_v31, %v1714_v37  ;;  %3487 = vmatprep.mubr.bf16.mxu0 %v4206_v49  ;;  %v4215_v27 = vrot.slane %v2308_v48, 9  ;;  %v2390_v56 = vrot.slane %v2309_v59, 5  ;;  %v4216_v25 = vrot.slane %v2310_v42, 9  ;;  %v2314_v1 = vld [vmem:[#allocation3 + $0x78] sm:$0xe] }
 0x1ff   :  { %3488 = vmatmul.mubr.bf16.gmra.mrb[76].mxu0 %v4846_v26  ;;  %v2394_v45 = vrot.slane %v2311_v0, 5  ;;  %v2383_v29 = vsel %vm5278_vm7, %v4213_v14, %v2382_v12  ;;  %v2387_v13 = vsel %vm5278_vm7, %v4214_v20, %v2386_v7  ;;  %v2315_v47 = vld [vmem:[#allocation3 + $0x7c] sm:$0x1]  ;;  %v2316_v5 = vld [vmem:[#allocation3 + $0x80] sm:$0xe]  ;;  %v4217_v41 = vrot.slane %v2312_v36, 9 }
 0x200   :  { %3391 = vmatmul.mubr.bf16.gmra.mrb[60].mxu1 %v4166_v54  ;;  %v2391_v24 = vsel %vm5278_vm7, %v4215_v27, %v2390_v56  ;;  %v2317_v53 = vld [vmem:[#allocation3 + $0x84] sm:$0x1]  ;;  %v2318_v18 = vld [vmem:[#allocation3 + $0x88] sm:$0xe]  ;;  %v2319_v57 = vld [vmem:[#allocation3 + $0x8c] sm:$0x1]  ;;  %v4226_v16 = vcombine.low %v2383_v29, %v2387_v13 }
 0x201   :  { %4679 = vmatprep.mubr.bf16.mxu1 %v4223_v61  ;;  %v2395_v51 = vsel %vm5278_vm7, %v4216_v25, %v2394_v45  ;;  %v2398_v38 = vrot.slane %v2313_v8, 5  ;;  %v4218_v17 = vrot.slane %v2314_v1, 9  ;;  %v2402_v28 = vrot.slane %v2315_v47, 5  ;;  %v2320_v49 = vld [vmem:[#allocation3 + $0x90] sm:$0xe] }
 0x202   :  { %v4227_v31 = vcombine.low %v2391_v24, %v2395_v51  ;;  %v4219_v3 = vrot.slane %v2316_v5, 9  ;;  %v2406_v21 = vrot.slane %v2317_v53, 5  ;;  %v4220_v63 = vrot.slane %v2318_v18, 9  ;;  %v2321_v34 = vld [vmem:[#allocation3 + $0x94] sm:$0x1] }
 0x203   :  { %v2410_v43 = vrot.slane %v2319_v57, 5  ;;  %v2399_v30 = vsel %vm5278_vm7, %v4217_v41, %v2398_v38  ;;  %v2403_v44 = vsel %vm5278_vm7, %v4218_v17, %v2402_v28  ;;  %v2322_v32 = vld [vmem:[#allocation3 + $0x98] sm:$0xe]  ;;  %v2323_v26 = vld [vmem:[#allocation3 + $0x9c] sm:$0x1]  ;;  %v4221_v40 = vrot.slane %v2320_v49, 9 }
 0x204   :  { %v2407_v37 = vsel %vm5278_vm7, %v4219_v3, %v2406_v21  ;;  %v4228_v54 = vcombine.low %v2399_v30, %v2403_v44  ;;  %v2414_v46 = vrot.slane %v2321_v34, 5  ;;  %v4222_v58 = vrot.slane %v2322_v32, 9 }
 0x205   :  { %v2411_v9 = vsel %vm5278_vm7, %v4220_v63, %v2410_v43  ;;  %v2418_v2 = vrot.slane %v2323_v26, 5 }
 0x206   :  { %v4229_v61 = vcombine.low %v2407_v37, %v2411_v9  ;;  %v2415_v50 = vsel %vm5278_vm7, %v4221_v40, %v2414_v46 }
 0x207   :  { %v2419_v15 = vsel %vm5278_vm7, %v4222_v58, %v2418_v2 }
 0x208   :  { %4680 = vmatmul.mubr.bf16.vlgmr.msra.gmra.mrb[64].mxu1 %v4224_v6  ;;  %v4230_v33 = vcombine.low %v2415_v50, %v2419_v15 }
 0x209   :  { %4683 = vmatprep.mubr.bf16.mxu1 %v4225_v62 }
 0x210   :  { %4684 = vmatmul.mubr.bf16.gmra.mrb[68].mxu1 %v4226_v16 }
 0x211   :  { %4687 = vmatprep.mubr.bf16.mxu1 %v4227_v31 }
 0x218   :  { %4688 = vmatmul.mubr.bf16.gmra.mrb[72].mxu1 %v4228_v54 }
 0x219   :  { %4691 = vmatprep.mubr.bf16.mxu1 %v4229_v61 }
 0x220   :  { %4692 = vmatmul.mubr.bf16.gmra.mrb[76].mxu1 %v4230_v33 }
 0x22c   :  { %v4423_v11 = vpop.f32.mrb[16].mxu0 }
 0x22d   :  { %v4424_v19 = vpop.f32.mrb[17].mxu0 }
 0x22e   :  { %v4425_v39 = vadd.f32 %v4424_v19, %v4423_v11  ;;  %v4426_v22 = vpop.f32.mrb[18].mxu0 }
 0x22f   :  { %v4427_v35 = vpop.f32.mrb[19].mxu0 }
 0x230   :  { %v4428_v55 = vadd.f32 %v4427_v35, %v4426_v22 }
 0x235   :  { %v4359_v52 = vpop.f32.mrb[0].mxu1 }
 0x236   :  { %v4360_v60 = vpop.f32.mrb[1].mxu1  ;;  %v4429_v23 = vpop.f32.mrb[20].mxu0 }
 0x237   :  { %v4361_v48 = vadd.f32 %v4360_v60, %v4359_v52  ;;  %v4362_v59 = vpop.f32.mrb[2].mxu1  ;;  %v4430_v42 = vpop.f32.mrb[21].mxu0 }
 0x238   :  { %v4431_v0 = vadd.f32 %v4430_v42, %v4429_v23  ;;  %v4363_v6 = vpop.f32.mrb[3].mxu1  ;;  %v4432_v14 = vpop.f32.mrb[22].mxu0 }
 0x239   :  { %v5878_v62 = vadd.f32 %v4425_v39, %v4361_v48  ;;  %v4364_v10 = vadd.f32 %v4363_v6, %v4362_v59  ;;  %v4433_v12 = vpop.f32.mrb[23].mxu0 }
 0x23a   :  { %v4434_v20 = vadd.f32 %v4433_v12, %v4432_v14 }
 0x23b   :  { %v5880_v7 = vadd.f32 %v4428_v55, %v4364_v10 }
 0x23d   :  { %v4365_v27 = vpop.f32.mrb[4].mxu1 }
 0x23e   :  { %v4366_v56 = vpop.f32.mrb[5].mxu1 }
 0x23f   :  { %v4367_v25 = vadd.f32 %v4366_v56, %v4365_v27  ;;  %v4368_v29 = vpop.f32.mrb[6].mxu1 }
 0x240   :  { %v4435_v45 = vpop.f32.mrb[24].mxu0  ;;  %v4369_v36 = vpop.f32.mrb[7].mxu1 }
 0x241   :  { %v4436_v13 = vpop.f32.mrb[25].mxu0  ;;  %v5882_v8 = vadd.f32 %v4431_v0, %v4367_v25  ;;  %v4370_v51 = vadd.f32 %v4369_v36, %v4368_v29 }
 0x242   :  { %v4437_v24 = vadd.f32 %v4436_v13, %v4435_v45  ;;  %v4438_v1 = vpop.f32.mrb[26].mxu0 }
 0x243   :  { %v4439_v47 = vpop.f32.mrb[27].mxu0  ;;  %v5884_v5 = vadd.f32 %v4434_v20, %v4370_v51 }
 0x244   :  { %v4440_v53 = vadd.f32 %v4439_v47, %v4438_v1  ;;  %v4848_v47 = vld [vmem:[%s6283_s3] sm:$0xff]  }
 0x245   :  { %v4371_v18 = vpop.f32.mrb[8].mxu1  ;;  %4695 = vmatprep.subr.bf16.mxu0 %v4848_v47  ;;  %4727 = vmatprep.subr.bf16.mxu1 %v4848_v47 }
 0x246   :  { %v4372_v57 = vpop.f32.mrb[9].mxu1  ;;  %4696 = vmatpush3.bf16.msra.mxu0 %v4848_v47  ;;  %4735 = vmatpush3.bf16.msra.mxu1 %v4848_v47 }
 0x247   :  { %v4373_v16 = vadd.f32 %v4372_v57, %v4371_v18  ;;  %v4374_v31 = vpop.f32.mrb[10].mxu1 }
 0x248   :  { %v4441_v41 = vpop.f32.mrb[28].mxu0  ;;  %v4375_v17 = vpop.f32.mrb[11].mxu1 }
 0x249   :  { %v4442_v38 = vpop.f32.mrb[29].mxu0  ;;  %v5886_v28 = vadd.f32 %v4437_v24, %v4373_v16  ;;  %v4376_v21 = vadd.f32 %v4375_v17, %v4374_v31 }
 0x24a   :  { %v4443_v3 = vadd.f32 %v4442_v38, %v4441_v41  ;;  %v4444_v63 = vpop.f32.mrb[30].mxu0 }
 0x24b   :  { %v4445_v43 = vpop.f32.mrb[31].mxu0  ;;  %v5888_v30 = vadd.f32 %v4440_v53, %v4376_v21 }
 0x24c   :  { %v4446_v44 = vadd.f32 %v4445_v43, %v4444_v63 }
 0x24d   :  { %v4377_v49 = vpop.f32.mrb[12].mxu1 }
 0x24e   :  { %v4378_v37 = vpop.f32.mrb[13].mxu1 }
 0x24f   :  { %v4379_v9 = vadd.f32 %v4378_v37, %v4377_v49  ;;  %v4380_v34 = vpop.f32.mrb[14].mxu1 }
 0x250   :  { %v4381_v32 = vpop.f32.mrb[15].mxu1 }
 0x251   :  { %v5890_v26 = vadd.f32 %v4443_v3, %v4379_v9  ;;  %v4382_v54 = vadd.f32 %v4381_v32, %v4380_v34 }
 0x253   :  { %v5892_v40 = vadd.f32 %v4446_v44, %v4382_v54  ;;  %v4849_v44 = vld [vmem:[%s6283_s3 + $0x8] sm:$0xff]  }
 0x254   :  { %4697 = vmatprep.subr.bf16.mxu0 %v4849_v44  ;;  %4728 = vmatprep.subr.bf16.mxu1 %v4849_v44 }
 0x255   :  { %4698 = vmatpush3.bf16.msra.mxu0 %v4849_v44  ;;  %4736 = vmatpush3.bf16.msra.mxu1 %v4849_v44 }
 0x25c   :  { %v4447_v61 = vpop.f32.mrb[32].mxu0 }
 0x25d   :  { %v4448_v46 = vpop.f32.mrb[33].mxu0 }
 0x25e   :  { %v4449_v58 = vadd.f32 %v4448_v46, %v4447_v61  ;;  %v4450_v2 = vpop.f32.mrb[34].mxu0 }
 0x25f   :  { %v4451_v50 = vpop.f32.mrb[35].mxu0 }
 0x260   :  { %v4452_v15 = vadd.f32 %v4451_v50, %v4450_v2 }
 0x261   :  { %v4383_v33 = vpop.f32.mrb[16].mxu1 }
 0x262   :  { %v4384_v11 = vpop.f32.mrb[17].mxu1 }
 0x263   :  { %v4385_v19 = vadd.f32 %v4384_v11, %v4383_v33  ;;  %v4386_v39 = vpop.f32.mrb[18].mxu1 }
 0x264   :  { %v4387_v22 = vpop.f32.mrb[19].mxu1 }
 0x265   :  { %v5894_v35 = vadd.f32 %v4449_v58, %v4385_v19  ;;  %v4453_v55 = vpop.f32.mrb[36].mxu0  ;;  %v4388_v52 = vadd.f32 %v4387_v22, %v4386_v39 }
 0x266   :  { %v4454_v60 = vpop.f32.mrb[37].mxu0 }
 0x267   :  { %v4455_v23 = vadd.f32 %v4454_v60, %v4453_v55  ;;  %v5896_v48 = vadd.f32 %v4452_v15, %v4388_v52  ;;  %v4456_v59 = vpop.f32.mrb[38].mxu0 }
 0x268   :  { %v4457_v42 = vpop.f32.mrb[39].mxu0 }
 0x269   :  { %v4458_v0 = vadd.f32 %v4457_v42, %v4456_v59  ;;  %v4389_v6 = vpop.f32.mrb[20].mxu1 }
 0x26a   :  { %v4390_v14 = vpop.f32.mrb[21].mxu1 }
 0x26b   :  { %v4391_v10 = vadd.f32 %v4390_v14, %v4389_v6  ;;  %v4392_v12 = vpop.f32.mrb[22].mxu1 }
 0x26c   :  { %v4393_v20 = vpop.f32.mrb[23].mxu1 }
 0x26d   :  { %v5898_v27 = vadd.f32 %v4455_v23, %v4391_v10  ;;  %v4459_v56 = vpop.f32.mrb[40].mxu0  ;;  %v4394_v25 = vadd.f32 %v4393_v20, %v4392_v12 }
 0x26e   :  { %v4460_v45 = vpop.f32.mrb[41].mxu0 }
 0x26f   :  { %v4461_v29 = vadd.f32 %v4460_v45, %v4459_v56  ;;  %v5900_v13 = vadd.f32 %v4458_v0, %v4394_v25  ;;  %v4462_v36 = vpop.f32.mrb[42].mxu0 }
 0x270   :  { %v4463_v24 = vpop.f32.mrb[43].mxu0 }
 0x271   :  { %v4464_v51 = vadd.f32 %v4463_v24, %v4462_v36  ;;  %v4395_v1 = vpop.f32.mrb[24].mxu1 }
 0x272   :  { %v4396_v53 = vpop.f32.mrb[25].mxu1 }
 0x273   :  { %v4397_v18 = vadd.f32 %v4396_v53, %v4395_v1  ;;  %v4398_v57 = vpop.f32.mrb[26].mxu1 }
 0x274   :  { %v4399_v16 = vpop.f32.mrb[27].mxu1 }
 0x275   :  { %v5905_v41 = vadd.f32 %v4461_v29, %v4397_v18  ;;  %v4465_v31 = vpop.f32.mrb[44].mxu0  ;;  %v4400_v38 = vadd.f32 %v4399_v16, %v4398_v57 }
 0x276   :  { %v4466_v17 = vpop.f32.mrb[45].mxu0 }
 0x277   :  { %v4467_v3 = vadd.f32 %v4466_v17, %v4465_v31  ;;  %v5907_v21 = vadd.f32 %v4464_v51, %v4400_v38  ;;  %v4468_v63 = vpop.f32.mrb[46].mxu0 }
 0x278   :  { %v4469_v43 = vpop.f32.mrb[47].mxu0 }
 0x279   :  { %v4470_v49 = vadd.f32 %v4469_v43, %v4468_v63  ;;  %v4401_v37 = vpop.f32.mrb[28].mxu1 }
 0x27a   :  { %v4402_v9 = vpop.f32.mrb[29].mxu1 }
 0x27b   :  { %v4403_v34 = vadd.f32 %v4402_v9, %v4401_v37  ;;  %v4404_v32 = vpop.f32.mrb[30].mxu1 }
 0x27c   :  { %v4405_v54 = vpop.f32.mrb[31].mxu1 }
 0x27d   :  { %v5912_v61 = vadd.f32 %v4467_v3, %v4403_v34  ;;  %v4551_v46 = vpop.f32.mrb[48].mxu0  ;;  %v4406_v58 = vadd.f32 %v4405_v54, %v4404_v32 }
 0x27e   :  { %v4552_v2 = vpop.f32.mrb[49].mxu0 }
 0x27f   :  { %v4553_v50 = vadd.f32 %v4552_v2, %v4551_v46  ;;  %v5914_v15 = vadd.f32 %v4470_v49, %v4406_v58  ;;  %v4554_v33 = vpop.f32.mrb[50].mxu0 }
 0x280   :  { %v4555_v11 = vpop.f32.mrb[51].mxu0 }
 0x281   :  { %v4556_v19 = vadd.f32 %v4555_v11, %v4554_v33  ;;  %v4851_v33 = vld [vmem:[%s6283_s3 + $0x18] sm:$0xff]  }
 0x285   :  { %v4557_v39 = vpop.f32.mrb[52].mxu0 }
 0x286   :  { %v4487_v22 = vpop.f32.mrb[32].mxu1  ;;  %v4558_v55 = vpop.f32.mrb[53].mxu0 }
 0x287   :  { %v4488_v52 = vpop.f32.mrb[33].mxu1  ;;  %v4559_v60 = vadd.f32 %v4558_v55, %v4557_v39  ;;  %v4560_v23 = vpop.f32.mrb[54].mxu0 }
 0x288   :  { %v4489_v59 = vadd.f32 %v4488_v52, %v4487_v22  ;;  %v4490_v42 = vpop.f32.mrb[34].mxu1  ;;  %v4561_v0 = vpop.f32.mrb[55].mxu0  ;;  %v4852_v22 = vld [vmem:[%s6283_s3 + $0x20] sm:$0xff]  }
 0x289   :  { %v4491_v6 = vpop.f32.mrb[35].mxu1  ;;  %v4562_v14 = vadd.f32 %v4561_v0, %v4560_v23 }
 0x28a   :  { %v3337_v10 = vadd.f32 %v4489_v59, %v5878_v62  ;;  %v4492_v12 = vadd.f32 %v4491_v6, %v4490_v42  ;;  %v4853_v6 = vld [vmem:[%s6283_s3 + $0x28] sm:$0xff]  }
 0x28c   :  { %v3340_v20 = vadd.f32 %v4492_v12, %v5880_v7  ;;  %v5918_v56 = vadd.f32 %v4553_v50, %v3337_v10  ;;  %v4850_v50 = vld [vmem:[%s6283_s3 + $0x10] sm:$0xff]  }
 0x28d   :  { %4699 = vmatprep.subr.bf16.mxu0 %v4850_v50  ;;  %4729 = vmatprep.subr.bf16.mxu1 %v4850_v50 }
 0x28e   :  { %v5920_v25 = vadd.f32 %v4556_v19, %v3340_v20  ;;  %4700 = vmatpush3.bf16.msra.mxu0 %v4850_v50  ;;  %4737 = vmatpush3.bf16.msra.mxu1 %v4850_v50 }
 0x28f   :  { %4701 = vmatprep.subr.bf16.mxu0 %v4851_v33  ;;  %4730 = vmatprep.subr.bf16.mxu1 %v4851_v33 }
 0x290   :  { %v4563_v45 = vpop.f32.mrb[56].mxu0 }
 0x291   :  { %v4564_v29 = vpop.f32.mrb[57].mxu0 }
 0x292   :  { %v4565_v36 = vadd.f32 %v4564_v29, %v4563_v45  ;;  %v4566_v24 = vpop.f32.mrb[58].mxu0  ;;  %4702 = vmatpush3.bf16.msra.mxu0 %v4851_v33  ;;  %4738 = vmatpush3.bf16.msra.mxu1 %v4851_v33  ;;  %v4854_v45 = vld [vmem:[%s6283_s3 + $0x30] sm:$0xff]  }
 0x293   :  { %v4493_v51 = vpop.f32.mrb[36].mxu1  ;;  %v4567_v1 = vpop.f32.mrb[59].mxu0  ;;  %4703 = vmatprep.subr.bf16.mxu0 %v4852_v22  ;;  %4731 = vmatprep.subr.bf16.mxu1 %v4852_v22 }
 0x294   :  { %v4494_v47 = vpop.f32.mrb[37].mxu1  ;;  %v4568_v53 = vadd.f32 %v4567_v1, %v4566_v24 }
 0x295   :  { %v4495_v18 = vadd.f32 %v4494_v47, %v4493_v51  ;;  %v4496_v57 = vpop.f32.mrb[38].mxu1  ;;  %v4855_v47 = vld [vmem:[%s6283_s3 + $0x38] sm:$0xff]  }
 0x296   :  { %v4497_v16 = vpop.f32.mrb[39].mxu1  ;;  %4704 = vmatpush3.bf16.msra.mxu0 %v4852_v22  ;;  %4739 = vmatpush3.bf16.msra.mxu1 %v4852_v22 }
 0x297   :  { %v3345_v62 = vadd.f32 %v4495_v18, %v5882_v8  ;;  %v4498_v31 = vadd.f32 %v4497_v16, %v4496_v57  ;;  %4705 = vmatprep.subr.bf16.mxu0 %v4853_v6  ;;  %4732 = vmatprep.subr.bf16.mxu1 %v4853_v6 }
 0x298   :  { %v4569_v38 = vpop.f32.mrb[60].mxu0 }
 0x299   :  { %v3348_v7 = vadd.f32 %v4498_v31, %v5884_v5  ;;  %v4570_v17 = vpop.f32.mrb[61].mxu0  ;;  %v5924_v3 = vadd.f32 %v4559_v60, %v3345_v62 }
 0x29a   :  { %v4571_v63 = vadd.f32 %v4570_v17, %v4569_v38  ;;  %v4572_v43 = vpop.f32.mrb[62].mxu0  ;;  %4706 = vmatpush3.bf16.msra.mxu0 %v4853_v6  ;;  %4740 = vmatpush3.bf16.msra.mxu1 %v4853_v6 }
 0x29b   :  { %v4573_v44 = vpop.f32.mrb[63].mxu0  ;;  %v5926_v49 = vadd.f32 %v4562_v14, %v3348_v7  ;;  %4707 = vmatprep.subr.bf16.mxu0 %v4854_v45  ;;  %4733 = vmatprep.subr.bf16.mxu1 %v4854_v45 }
 0x29c   :  { %v4574_v37 = vadd.f32 %v4573_v44, %v4572_v43 }
 0x29d   :  { %v4499_v9 = vpop.f32.mrb[40].mxu1 }
 0x29e   :  { %v4500_v34 = vpop.f32.mrb[41].mxu1  ;;  %4708 = vmatpush3.bf16.msra.mxu0 %v4854_v45  ;;  %4741 = vmatpush3.bf16.msra.mxu1 %v4854_v45 }
 0x29f   :  { %v4501_v32 = vadd.f32 %v4500_v34, %v4499_v9  ;;  %v4502_v54 = vpop.f32.mrb[42].mxu1  ;;  %4709 = vmatprep.subr.bf16.mxu0 %v4855_v47  ;;  %4734 = vmatprep.subr.bf16.mxu1 %v4855_v47 }
 0x2a0   :  { %v4503_v46 = vpop.f32.mrb[43].mxu1 }
 0x2a1   :  { %v3353_v8 = vadd.f32 %v4501_v32, %v5886_v28  ;;  %v4504_v58 = vadd.f32 %v4503_v46, %v4502_v54 }
 0x2a2   :  { %4710 = vmatpush3.bf16.msra.mxu0 %v4855_v47  ;;  %4742 = vmatpush3.bf16.msra.mxu1 %v4855_v47 }
 0x2a3   :  { %v3356_v2 = vadd.f32 %v4504_v58, %v5888_v30  ;;  %v5930_v5 = vadd.f32 %v4565_v36, %v3353_v8 }
 0x2a5   :  { %v4575_v11 = vpop.f32.mrb[64].mxu0  ;;  %v5938_v19 = vadd.f32 %v4568_v53, %v3356_v2 }
 0x2a6   :  { %v4576_v39 = vpop.f32.mrb[65].mxu0 }
 0x2a7   :  { %v4577_v28 = vadd.f32 %v4576_v39, %v4575_v11  ;;  %v4578_v30 = vpop.f32.mrb[66].mxu0 }
 0x2a8   :  { %v4505_v55 = vpop.f32.mrb[44].mxu1  ;;  %v4579_v52 = vpop.f32.mrb[67].mxu0 }
 0x2a9   :  { %v4506_v60 = vpop.f32.mrb[45].mxu1  ;;  %v4580_v23 = vadd.f32 %v4579_v52, %v4578_v30 }
 0x2aa   :  { %v4507_v59 = vadd.f32 %v4506_v60, %v4505_v55  ;;  %v4508_v42 = vpop.f32.mrb[46].mxu1 }
 0x2ab   :  { %v4509_v0 = vpop.f32.mrb[47].mxu1 }
 0x2ac   :  { %v3361_v14 = vadd.f32 %v4507_v59, %v5890_v26  ;;  %v4510_v10 = vadd.f32 %v4509_v0, %v4508_v42 }
 0x2ae   :  { %v3364_v12 = vadd.f32 %v4510_v10, %v5892_v40  ;;  %v5948_v20 = vadd.f32 %v4571_v63, %v3361_v14 }
 0x2b0   :  { %v4581_v29 = vpop.f32.mrb[68].mxu0  ;;  %v5953_v36 = vadd.f32 %v4574_v37, %v3364_v12 }
 0x2b1   :  { %v4582_v24 = vpop.f32.mrb[69].mxu0 }
 0x2b2   :  { %v4583_v51 = vadd.f32 %v4582_v24, %v4581_v29  ;;  %v4584_v1 = vpop.f32.mrb[70].mxu0 }
 0x2b3   :  { %v4511_v26 = vpop.f32.mrb[48].mxu1  ;;  %v4585_v40 = vpop.f32.mrb[71].mxu0 }
 0x2b4   :  { %v4512_v53 = vpop.f32.mrb[49].mxu1  ;;  %v4586_v18 = vadd.f32 %v4585_v40, %v4584_v1 }
 0x2b5   :  { %v4513_v57 = vadd.f32 %v4512_v53, %v4511_v26  ;;  %v4514_v16 = vpop.f32.mrb[50].mxu1 }
 0x2b6   :  { %v4515_v62 = vpop.f32.mrb[51].mxu1 }
 0x2b7   :  { %v3369_v31 = vadd.f32 %v4513_v57, %v5894_v35  ;;  %v4516_v38 = vadd.f32 %v4515_v62, %v4514_v16 }
 0x2b9   :  { %v3372_v7 = vadd.f32 %v4516_v38, %v5896_v48  ;;  %v5960_v17 = vadd.f32 %v4577_v28, %v3369_v31 }
 0x2bb   :  { %v4587_v63 = vpop.f32.mrb[72].mxu0  ;;  %v5962_v43 = vadd.f32 %v4580_v23, %v3372_v7 }
 0x2bc   :  { %v4588_v44 = vpop.f32.mrb[73].mxu0 }
 0x2bd   :  { %v4589_v37 = vadd.f32 %v4588_v44, %v4587_v63  ;;  %v4590_v9 = vpop.f32.mrb[74].mxu0 }
 0x2be   :  { %v4517_v34 = vpop.f32.mrb[52].mxu1  ;;  %v4591_v32 = vpop.f32.mrb[75].mxu0 }
 0x2bf   :  { %v4518_v54 = vpop.f32.mrb[53].mxu1  ;;  %v4592_v46 = vadd.f32 %v4591_v32, %v4590_v9 }
 0x2c0   :  { %v4519_v35 = vadd.f32 %v4518_v54, %v4517_v34  ;;  %v4520_v8 = vpop.f32.mrb[54].mxu1 }
 0x2c1   :  { %v4521_v58 = vpop.f32.mrb[55].mxu1 }
 0x2c2   :  { %v3377_v2 = vadd.f32 %v4519_v35, %v5898_v27  ;;  %v4522_v48 = vadd.f32 %v4521_v58, %v4520_v8 }
 0x2c4   :  { %v3380_v50 = vadd.f32 %v4522_v48, %v5900_v13  ;;  %v5966_v33 = vadd.f32 %v4583_v51, %v3377_v2 }
 0x2c6   :  { %v5968_v11 = vadd.f32 %v4586_v18, %v3380_v50 }
 0x2c8   :  { %v4523_v39 = vpop.f32.mrb[56].mxu1 }
 0x2c9   :  { %v4524_v28 = vpop.f32.mrb[57].mxu1 }
 0x2ca   :  { %v4525_v30 = vadd.f32 %v4524_v28, %v4523_v39  ;;  %v4526_v22 = vpop.f32.mrb[58].mxu1 }
 0x2cb   :  { %v4527_v55 = vpop.f32.mrb[59].mxu1 }
 0x2cc   :  { %v3385_v52 = vadd.f32 %v4525_v30, %v5905_v41  ;;  %v4528_v60 = vadd.f32 %v4527_v55, %v4526_v22 }
 0x2ce   :  { %v3388_v23 = vadd.f32 %v4528_v60, %v5907_v21  ;;  %v5972_v59 = vadd.f32 %v4589_v37, %v3385_v52 }
 0x2d0   :  { %v5974_v27 = vadd.f32 %v4592_v46, %v3388_v23 }
 0x2d2   :  { %v4593_v42 = vpop.f32.mrb[76].mxu0 }
 0x2d3   :  { %v4529_v13 = vpop.f32.mrb[60].mxu1  ;;  %v4594_v0 = vpop.f32.mrb[77].mxu0 }
 0x2d4   :  { %v4530_v6 = vpop.f32.mrb[61].mxu1  ;;  %v4595_v14 = vadd.f32 %v4594_v0, %v4593_v42  ;;  %v4596_v10 = vpop.f32.mrb[78].mxu0 }
 0x2d5   :  { %v4531_v12 = vadd.f32 %v4530_v6, %v4529_v13  ;;  %v4532_v45 = vpop.f32.mrb[62].mxu1  ;;  %v4597_v29 = vpop.f32.mrb[79].mxu0 }
 0x2d6   :  { %v4533_v24 = vpop.f32.mrb[63].mxu1  ;;  %v4598_v51 = vadd.f32 %v4597_v29, %v4596_v10 }
 0x2d7   :  { %v3393_v41 = vadd.f32 %v4531_v12, %v5912_v61  ;;  %v4534_v1 = vadd.f32 %v4533_v24, %v4532_v45 }
 0x2d9   :  { %v3396_v21 = vadd.f32 %v4534_v1, %v5914_v15  ;;  %v3490_v26 = vadd.f32 %v4595_v14, %v3393_v41 }
 0x2db   :  { %v4681_v40 = vpop.f32.mrb[64].mxu1  ;;  %v3493_v47 = vadd.f32 %v4598_v51, %v3396_v21 }
 0x2dc   :  { %v5979_v53 = vadd.f32 %v4681_v40, %v5924_v3  ;;  %v3530_v18 = vpop.f32.mrb[65].mxu1 }
 0x2dd   :  { %v5982_v57 = vadd.f32 %v3530_v18, %v5918_v56  ;;  %v4682_v16 = vpop.f32.mrb[66].mxu1 }
 0x2de   :  { %v5985_v62 = vadd.f32 %v4682_v16, %v5926_v49  ;;  %v3533_v31 = vpop.f32.mrb[67].mxu1  ;;  %v3618_v56 = vmul.f32 %v5979_v53, %v5979_v53 }
 0x2df   :  { %v5988_v61 = vadd.f32 %v3533_v31, %v5920_v25  ;;  %v3616_v15 = vmul.f32 %v5982_v57, %v5982_v57 }
 0x2e0   :  { %v3619_v37 = vmul.f32 %v5985_v62, %v5985_v62 }
 0x2e1   :  { %v3595_v38 = vadd.f32 %v5988_v61, %v5982_v57  ;;  %v3617_v3 = vmul.f32 %v5988_v61, %v5988_v61 }
 0x2e3   :  { %v3596_v7 = vadd.f32 %v3595_v38, %v5979_v53  ;;  %v3632_v49 = vadd.f32 %v3617_v3, %v3616_v15  ;;  %v4685_v63 = vpop.f32.mrb[68].mxu1 }
 0x2e4   :  { %v6000_v44 = vadd.f32 %v4685_v63, %v5948_v20  ;;  %v3546_v25 = vpop.f32.mrb[69].mxu1 }
 0x2e5   :  { %v3633_v9 = vadd.f32 %v3632_v49, %v3618_v56  ;;  %v6005_v34 = vadd.f32 %v3546_v25, %v5930_v5  ;;  %v3597_v32 = vadd.f32 %v3596_v7, %v5985_v62  ;;  %v4686_v54 = vpop.f32.mrb[70].mxu1 }
 0x2e6   :  { %v6009_v46 = vadd.f32 %v4686_v54, %v5953_v36  ;;  %v3549_v35 = vpop.f32.mrb[71].mxu1  ;;  %v3622_v36 = vmul.f32 %v6000_v44, %v6000_v44 }
 0x2e7   :  { %v3598_v8 = vadd.f32 %v3597_v32, %v6005_v34  ;;  %v3620_v20 = vmul.f32 %v6005_v34, %v6005_v34  ;;  %v3634_v58 = vadd.f32 %v3633_v9, %v3619_v37  ;;  %v6015_v2 = vadd.f32 %v3549_v35, %v5938_v19 }
 0x2e8   :  { %v3623_v19 = vmul.f32 %v6009_v46, %v6009_v46 }
 0x2e9   :  { %v3635_v48 = vadd.f32 %v3634_v58, %v3620_v20  ;;  %v3599_v5 = vadd.f32 %v3598_v8, %v6015_v2  ;;  %v3621_v50 = vmul.f32 %v6015_v2, %v6015_v2 }
 0x2eb   :  { %v3600_v39 = vadd.f32 %v3599_v5, %v6000_v44  ;;  %v3636_v28 = vadd.f32 %v3635_v48, %v3621_v50  ;;  %v4689_v30 = vpop.f32.mrb[72].mxu1 }
 0x2ec   :  { %v6024_v22 = vadd.f32 %v4689_v30, %v5966_v33  ;;  %v3562_v55 = vpop.f32.mrb[73].mxu1 }
 0x2ed   :  { %v3637_v52 = vadd.f32 %v3636_v28, %v3622_v36  ;;  %v6029_v60 = vadd.f32 %v3562_v55, %v5960_v17  ;;  %v3601_v23 = vadd.f32 %v3600_v39, %v6009_v46  ;;  %v4690_v42 = vpop.f32.mrb[74].mxu1 }
 0x2ee   :  { %v6033_v13 = vadd.f32 %v4690_v42, %v5968_v11  ;;  %v3565_v0 = vpop.f32.mrb[75].mxu1  ;;  %v3626_v17 = vmul.f32 %v6024_v22, %v6024_v22 }
 0x2ef   :  { %v3602_v6 = vadd.f32 %v3601_v23, %v6029_v60  ;;  %v3624_v33 = vmul.f32 %v6029_v60, %v6029_v60  ;;  %v3638_v14 = vadd.f32 %v3637_v52, %v3623_v19  ;;  %v3566_v10 = vadd.f32 %v3565_v0, %v5962_v43  ;;  %v3593_v0 = vld [vmem:[%s6284_s6] sm:$0x1] }
 0x2f0   :  { %v3627_v21 = vmul.f32 %v6033_v13, %v6033_v13 }
 0x2f1   :  { %v3639_v12 = vadd.f32 %v3638_v14, %v3624_v33  ;;  %v3603_v45 = vadd.f32 %v3602_v6, %v3566_v10  ;;  %v3625_v29 = vmul.f32 %v3566_v10, %v3566_v10  ;;  %v3594_v14 = vld [vmem:[%s6285_s7] sm:$0x1] }
 0x2f3   :  { %v3604_v24 = vadd.f32 %v3603_v45, %v6024_v22  ;;  %v3640_v51 = vadd.f32 %v3639_v12, %v3625_v29  ;;  %v4693_v11 = vpop.f32.mrb[76].mxu1 }
 0x2f4   :  { %v6042_v41 = vadd.f32 %v4693_v11, %v3490_v26  ;;  %v3578_v1 = vpop.f32.mrb[77].mxu1 }
 0x2f5   :  { %v3641_v40 = vadd.f32 %v3640_v51, %v3626_v17  ;;  %v3579_v18 = vadd.f32 %v3578_v1, %v5972_v59  ;;  %v3605_v43 = vadd.f32 %v3604_v24, %v6033_v13  ;;  %v4694_v16 = vpop.f32.mrb[78].mxu1 }
 0x2f6   :  { %v6048_v31 = vadd.f32 %v4694_v16, %v3493_v47  ;;  %v3581_v15 = vpop.f32.mrb[79].mxu1  ;;  %v3630_v25 = vmul.f32 %v6042_v41, %v6042_v41 }
 0x2f7   :  { %v3606_v38 = vadd.f32 %v3605_v43, %v3579_v18  ;;  %v3628_v3 = vmul.f32 %v3579_v18, %v3579_v18  ;;  %v3642_v56 = vadd.f32 %v3641_v40, %v3627_v21  ;;  %v3582_v7 = vadd.f32 %v3581_v15, %v5974_v27 }
 0x2f8   :  { %v3631_v9 = vmul.f32 %v6048_v31, %v6048_v31 }
 0x2f9   :  { %v3643_v26 = vadd.f32 %v3642_v56, %v3628_v3  ;;  %v3607_v49 = vadd.f32 %v3606_v38, %v3582_v7  ;;  %v3629_v63 = vmul.f32 %v3582_v7, %v3582_v7 }
 0x2fb   :  { %v3608_v37 = vadd.f32 %v3607_v49, %v6042_v41  ;;  %v3644_v59 = vadd.f32 %v3643_v26, %v3629_v63 }
 0x2fd   :  { %v3609_v47 = vadd.f32 %v3608_v37, %v6048_v31  ;;  %v3645_v32 = vadd.f32 %v3644_v59, %v3630_v25 }
 0x2ff   :  { %v3610_v54 = vrot.slane %v3609_v47, 4  ;;  %v3646_v35 = vadd.f32 %v3645_v32, %v3631_v9 }
 0x301   :  { %v3611_v8 = vadd.f32 %v3610_v54, %v3609_v47  ;;  %v3647_v20 = vrot.slane %v3646_v35, 4 }
 0x303   :  { %v3612_v27 = vrot.slane %v3611_v8, 2  ;;  %v3648_v58 = vadd.f32 %v3647_v20, %v3646_v35 }
 0x305   :  { %v3613_v48 = vadd.f32 %v3612_v27, %v3611_v8  ;;  %v3649_v5 = vrot.slane %v3648_v58, 2 }
 0x307   :  { %v3614_v50 = vrot.slane %v3613_v48, 1  ;;  %v3650_v36 = vadd.f32 %v3649_v5, %v3648_v58 }
 0x309   :  { %v3615_v39 = vadd.f32 %v3614_v50, %v3613_v48  ;;  %v3651_v28 = vrot.slane %v3650_v36, 1 }
 0x30b   :  { %v3652_v30 = vadd.f32 %v3651_v28, %v3650_v36  ;;  %v3653_v55 = vmul.f32 0.0078125, %v3615_v39 }
 0x30d   :  { %v3654_v19 = vmul.f32 0.0078125, %v3652_v30  ;;  %v3655_v52 = vmul.f32 %v3653_v55, %v3653_v55 }
 0x30f   :  { %v3656_v23 = vsub.f32 %v3654_v19, %v3655_v52 }
 0x311   :  { %v3657_v42 = vadd.f32 1e-05, %v3656_v23 }
 0x313   :  { %4858 = vrsqrt.f32 %v3657_v42 }
 0x31d   :  { %v4859_v6 = vpop.eup %4858 }
 0x31e   :  { %v3659_v33 = vmul.f32 %v4859_v6, %v3593_v0 }
 0x320   :  { %v3663_v12 = vrot.slane %v3659_v33, %v5276_v4  ;;  %v3680_v45 = vmul.f32 %v3659_v33, %v3653_v55 }
 0x322   :  { %v3677_v29 = vmul.f32 %v3663_v12, %v3582_v7  ;;  %v3681_v17 = vsub.f32 %v3594_v14, %v3680_v45  ;;  %v3664_v24 = vmul.f32 %v3663_v12, %v5982_v57  ;;  %v3665_v51 = vmul.f32 %v3663_v12, %v5988_v61 }
 0x323   :  { %v3672_v11 = vmul.f32 %v3663_v12, %v6029_v60  ;;  %v3673_v1 = vmul.f32 %v3663_v12, %v3566_v10  ;;  %v3666_v21 = vmul.f32 %v3663_v12, %v5979_v53  ;;  %v3667_v40 = vmul.f32 %v3663_v12, %v5985_v62 }
 0x324   :  { %v3686_v43 = vrot.slane %v3681_v17, %v5276_v4  ;;  %v3674_v16 = vmul.f32 %v3663_v12, %v6024_v22  ;;  %v3675_v15 = vmul.f32 %v3663_v12, %v6033_v13  ;;  %v3668_v38 = vmul.f32 %v3663_v12, %v6005_v34 }
 0x325   :  { %v3669_v3 = vmul.f32 %v3663_v12, %v6015_v2  ;;  %v3676_v57 = vmul.f32 %v3663_v12, %v3579_v18  ;;  %v3670_v61 = vmul.f32 %v3663_v12, %v6000_v44  ;;  %v3671_v60 = vmul.f32 %v3663_v12, %v6009_v46 }
 0x326   :  { %v3688_v10 = vadd.f32 %v3686_v43, %v3664_v24  ;;  %v3689_v56 = vadd.f32 %v3686_v43, %v3665_v51  ;;  %v3696_v53 = vadd.f32 %v3686_v43, %v3672_v11  ;;  %v3697_v7 = vadd.f32 %v3686_v43, %v3673_v1 }
 0x327   :  { %v3690_v62 = vadd.f32 %v3686_v43, %v3666_v21  ;;  %v3691_v26 = vadd.f32 %v3686_v43, %v3667_v40  ;;  %v3698_v49 = vadd.f32 %v3686_v43, %v3674_v16  ;;  %v3699_v63 = vadd.f32 %v3686_v43, %v3675_v15 }
 0x328   :  { %v3704_v22 = vmax.f32 %v3688_v10, 0.0  ;;  %v3705_v25 = vmax.f32 %v3689_v56, 0.0  ;;  %v3712_v13 = vmax.f32 %v3696_v53, 0.0  ;;  %v3713_v37 = vmax.f32 %v3697_v7, 0.0 }
 0x329   :  { %v3706_v34 = vmax.f32 %v3690_v62, 0.0  ;;  %v3707_v59 = vmax.f32 %v3691_v26, 0.0  ;;  %v3714_v2 = vmax.f32 %v3698_v49, 0.0  ;;  %v3715_v18 = vmax.f32 %v3699_v63, 0.0 }
 0x32a   :  { %v3720_v9 = vpack.c.bf16 %v3705_v25, %v3704_v22  ;;  %v3724_v44 = vpack.c.bf16 %v3713_v37, %v3712_v13  ;;  %v3692_v47 = vadd.f32 %v3686_v43, %v3668_v38  ;;  %v3693_v46 = vadd.f32 %v3686_v43, %v3669_v3 }
 0x32b   :  { %v3721_v32 = vpack.c.bf16 %v3707_v59, %v3706_v34  ;;  %v3725_v54 = vpack.c.bf16 %v3715_v18, %v3714_v2  ;;  %v3700_v35 = vadd.f32 %v3686_v43, %v3676_v57  ;;  %v3701_v8 = vadd.f32 %v3686_v43, %v3677_v29 }
 0x32c   :  { %4711 = vmatprep.mubr.bf16.mxu0 %v3720_v9  ;;  %4719 = vmatprep.mubr.bf16.mxu1 %v3724_v44  ;;  %v3708_v20 = vmax.f32 %v3692_v47, 0.0  ;;  %v3709_v27 = vmax.f32 %v3693_v46, 0.0  ;;  %v3694_v58 = vadd.f32 %v3686_v43, %v3670_v61  ;;  %v3695_v48 = vadd.f32 %v3686_v43, %v3671_v60 }
 0x32d   :  { %4712 = vmatmul.mubr.bf16.vlgmr.msra.gmra.mrb[80].mxu0 %v3721_v32  ;;  %4720 = vmatmul.mubr.bf16.vlgmr.msra.gmra.mrb[80].mxu1 %v3725_v54  ;;  %v3716_v5 = vmax.f32 %v3700_v35, 0.0  ;;  %v3717_v50 = vmax.f32 %v3701_v8, 0.0  ;;  %v3678_v36 = vmul.f32 %v3663_v12, %v6042_v41  ;;  %v3679_v39 = vmul.f32 %v3663_v12, %v6048_v31 }
 0x32e   :  { %v3722_v28 = vpack.c.bf16 %v3709_v27, %v3708_v20  ;;  %v3710_v30 = vmax.f32 %v3694_v58, 0.0  ;;  %v3711_v55 = vmax.f32 %v3695_v48, 0.0 }
 0x32f   :  { %v3726_v19 = vpack.c.bf16 %v3717_v50, %v3716_v5  ;;  %v3702_v52 = vadd.f32 %v3686_v43, %v3678_v36  ;;  %v3703_v23 = vadd.f32 %v3686_v43, %v3679_v39 }
 0x330   :  { %4715 = vmatprep.mubr.bf16.mxu0 %v3722_v28  ;;  %v3723_v42 = vpack.c.bf16 %v3711_v55, %v3710_v30 }
 0x331   :  { %4723 = vmatprep.mubr.bf16.mxu1 %v3726_v19  ;;  %v3718_v0 = vmax.f32 %v3702_v52, 0.0  ;;  %v3719_v6 = vmax.f32 %v3703_v23, 0.0 }
 0x333   :  { %v3727_v33 = vpack.c.bf16 %v3719_v6, %v3718_v0 }
 0x335   :  { %4716 = vmatmul.mubr.bf16.gmra.mrb[84].mxu0 %v3723_v42  ;;  %4724 = vmatmul.mubr.bf16.gmra.mrb[84].mxu1 %v3727_v33 }
 0x400   :  { %v6078_v14 = vpop.f32.mrb[80].mxu0  ;;  %v6080_v45 = vpop.f32.mrb[80].mxu1 }
 0x401   :  { %v6082_v41 = vpop.f32.mrb[81].mxu0  ;;  %v6084_v31 = vpop.f32.mrb[81].mxu1  ;;  %v3914_v21 = vmul.f32 %v6078_v14, %v6078_v14  ;;  %v3922_v35 = vmul.f32 %v6080_v45, %v6080_v45 }
 0x402   :  { %v6086_v12 = vpop.f32.mrb[82].mxu0  ;;  %v6088_v29 = vpop.f32.mrb[82].mxu1  ;;  %v3912_v51 = vmul.f32 %v6082_v41, %v6082_v41  ;;  %v3920_v9 = vmul.f32 %v6084_v31, %v6084_v31 }
 0x403   :  { %v6090_v17 = vpop.f32.mrb[83].mxu0  ;;  %v6092_v24 = vpop.f32.mrb[83].mxu1  ;;  %v3915_v16 = vmul.f32 %v6086_v12, %v6086_v12  ;;  %v3923_v27 = vmul.f32 %v6088_v29, %v6088_v29 }
 0x404   :  { %v3891_v11 = vadd.f32 %v6090_v17, %v6082_v41  ;;  %v3913_v1 = vmul.f32 %v6090_v17, %v6090_v17  ;;  %v3921_v46 = vmul.f32 %v6092_v24, %v6092_v24 }
 0x406   :  { %v3892_v40 = vadd.f32 %v6078_v14, %v3891_v11  ;;  %v3928_v43 = vadd.f32 %v3913_v1, %v3912_v51 }
 0x408   :  { %v3929_v15 = vadd.f32 %v3928_v43, %v3914_v21  ;;  %v6105_v38 = vpop.f32.mrb[84].mxu0  ;;  %v6107_v3 = vpop.f32.mrb[84].mxu1  ;;  %v3893_v57 = vadd.f32 %v6086_v12, %v3892_v40 }
 0x409   :  { %v6110_v61 = vpop.f32.mrb[85].mxu0  ;;  %v6112_v60 = vpop.f32.mrb[85].mxu1  ;;  %v3918_v13 = vmul.f32 %v6105_v38, %v6105_v38  ;;  %v3926_v55 = vmul.f32 %v6107_v3, %v6107_v3 }
 0x40a   :  { %v3894_v10 = vadd.f32 %v3893_v57, %v6110_v61  ;;  %v3916_v56 = vmul.f32 %v6110_v61, %v6110_v61  ;;  %v3930_v53 = vadd.f32 %v3929_v15, %v3915_v16  ;;  %v6117_v7 = vpop.f32.mrb[86].mxu0  ;;  %v6119_v62 = vpop.f32.mrb[86].mxu1  ;;  %v3924_v5 = vmul.f32 %v6112_v60, %v6112_v60 }
 0x40b   :  { %v6121_v26 = vpop.f32.mrb[87].mxu0  ;;  %v6123_v49 = vpop.f32.mrb[87].mxu1  ;;  %v3919_v59 = vmul.f32 %v6117_v7, %v6117_v7  ;;  %v3927_v23 = vmul.f32 %v6119_v62, %v6119_v62 }
 0x40c   :  { %v3931_v63 = vadd.f32 %v3930_v53, %v3916_v56  ;;  %v3895_v22 = vadd.f32 %v3894_v10, %v6121_v26  ;;  %v3917_v25 = vmul.f32 %v6121_v26, %v6121_v26  ;;  %v3925_v28 = vmul.f32 %v6123_v49, %v6123_v49 }
 0x40e   :  { %v3896_v37 = vadd.f32 %v6105_v38, %v3895_v22  ;;  %v3932_v34 = vadd.f32 %v3931_v63, %v3917_v25 }
 0x410   :  { %v3897_v2 = vadd.f32 %v6117_v7, %v3896_v37  ;;  %v3933_v18 = vadd.f32 %v3932_v34, %v3918_v13  ;;  %v3889_v37 = vld [vmem:[%s6286_s8] sm:$0x1] }
 0x412   :  { %v3898_v44 = vadd.f32 %v3897_v2, %v6084_v31  ;;  %v3934_v47 = vadd.f32 %v3933_v18, %v3919_v59 }
 0x414   :  { %v3935_v32 = vadd.f32 %v3934_v47, %v3920_v9  ;;  %v3899_v54 = vadd.f32 %v3898_v44, %v6092_v24 }
 0x416   :  { %v3900_v8 = vadd.f32 %v6080_v45, %v3899_v54  ;;  %v3936_v20 = vadd.f32 %v3935_v32, %v3921_v46  ;;  %v3890_v32 = vld [vmem:[%s6287_s9] sm:$0x1] }
 0x418   :  { %v3901_v58 = vadd.f32 %v6088_v29, %v3900_v8  ;;  %v3937_v48 = vadd.f32 %v3936_v20, %v3922_v35 }
 0x41a   :  { %v3902_v50 = vadd.f32 %v3901_v58, %v6112_v60  ;;  %v3938_v36 = vadd.f32 %v3937_v48, %v3923_v27 }
 0x41c   :  { %v3903_v39 = vadd.f32 %v3902_v50, %v6123_v49  ;;  %v3939_v30 = vadd.f32 %v3938_v36, %v3924_v5 }
 0x41e   :  { %v3904_v19 = vadd.f32 %v6107_v3, %v3903_v39  ;;  %v3940_v52 = vadd.f32 %v3939_v30, %v3925_v28 }
 0x420   :  { %v3905_v42 = vadd.f32 %v6119_v62, %v3904_v19  ;;  %v3941_v0 = vadd.f32 %v3940_v52, %v3926_v55  ;;  %v4863_v52 = vld [vmem:[%s6279_s0 + $0x8] sm:$0xff] }
 0x422   :  { %v3906_v6 = vrot.slane %v3905_v42, 4  ;;  %v3942_v33 = vadd.f32 %v3941_v0, %v3927_v23 }
 0x424   :  { %v3907_v51 = vadd.f32 %v3906_v6, %v3905_v42  ;;  %v3943_v11 = vrot.slane %v3942_v33, 4  ;;  %v4864_v42 = vld [vmem:[%s6279_s0 + $0x10] sm:$0xff]  ;;  %v4865_v6 = vld [vmem:[%s6279_s0 + $0x18] sm:$0xff] }
 0x426   :  { %v3908_v1 = vrot.slane %v3907_v51, 2  ;;  %v3944_v21 = vadd.f32 %v3943_v11, %v3942_v33 }
 0x428   :  { %v3909_v40 = vadd.f32 %v3908_v1, %v3907_v51  ;;  %v3945_v43 = vrot.slane %v3944_v21, 2  ;;  %v4866_v51 = vld [vmem:[%s6279_s0 + $0x20] sm:$0xff]  ;;  %v4867_v1 = vld [vmem:[%s6279_s0 + $0x28] sm:$0xff] }
 0x42a   :  { %v3910_v16 = vrot.slane %v3909_v40, 1  ;;  %v3946_v15 = vadd.f32 %v3945_v43, %v3944_v21 }
 0x42c   :  { %v3911_v57 = vadd.f32 %v3910_v16, %v3909_v40  ;;  %v3947_v10 = vrot.slane %v3946_v15, 1  ;;  %v4868_v40 = vld [vmem:[%s6279_s0 + $0x30] sm:$0xff]  ;;  %v4869_v16 = vld [vmem:[%s6279_s0 + $0x38] sm:$0xff] }
 0x42e   :  { %v3948_v56 = vadd.f32 %v3947_v10, %v3946_v15  ;;  %v3949_v53 = vmul.f32 0.0078125, %v3911_v57  ;;  %v4870_v57 = vld [vmem:[%s6279_s0 + $0x40] sm:$0xff] }
 0x430   :  { %v3950_v63 = vmul.f32 0.0078125, %v3948_v56  ;;  %v3951_v22 = vmul.f32 %v3949_v53, %v3949_v53  ;;  %v4871_v56 = vld [vmem:[%s6279_s0 + $0x48] sm:$0xff] }
 0x432   :  { %v3952_v25 = vsub.f32 %v3950_v63, %v3951_v22  ;;  %v4872_v63 = vld [vmem:[%s6279_s0 + $0x50] sm:$0xff] }
 0x434   :  { %v3953_v13 = vadd.f32 1e-05, %v3952_v25  ;;  %v4873_v25 = vld [vmem:[%s6279_s0 + $0x58] sm:$0xff] }
 0x436   :  { %4860 = vrsqrt.f32 %v3953_v13 }
 0x440   :  { %v4861_v34 = vpop.eup %4860 }
 0x441   :  { %v3955_v59 = vmul.f32 %v4861_v34, %v3889_v37  ;;  %v4874_v37 = vld [vmem:[%s6279_s0 + $0x60] sm:$0xff] }
 0x443   :  { %v3959_v2 = vrot.slane %v3955_v59, %v5276_v4  ;;  %v3976_v18 = vmul.f32 %v3955_v59, %v3949_v53  ;;  %v4875_v59 = vld [vmem:[%s6279_s0 + $0x68] sm:$0xff] }
 0x445   :  { %v3960_v9 = vmul.f32 %v3959_v2, %v6082_v41  ;;  %v3961_v44 = vmul.f32 %v3959_v2, %v6090_v17  ;;  %v3962_v47 = vmul.f32 %v6078_v14, %v3959_v2  ;;  %v3963_v46 = vmul.f32 %v6086_v12, %v3959_v2 }
 0x446   :  { %v3964_v54 = vmul.f32 %v3959_v2, %v6110_v61  ;;  %v3965_v35 = vmul.f32 %v3959_v2, %v6121_v26  ;;  %v3966_v8 = vmul.f32 %v6105_v38, %v3959_v2  ;;  %v3967_v20 = vmul.f32 %v6117_v7, %v3959_v2 }
 0x447   :  { %v3968_v41 = vmul.f32 %v3959_v2, %v6084_v31  ;;  %v3969_v17 = vmul.f32 %v3959_v2, %v6092_v24  ;;  %v3970_v14 = vmul.f32 %v6080_v45, %v3959_v2  ;;  %v3971_v12 = vmul.f32 %v6088_v29, %v3959_v2 }
 0x448   :  { %v3972_v27 = vmul.f32 %v3959_v2, %v6112_v60  ;;  %v3973_v58 = vmul.f32 %v3959_v2, %v6123_v49  ;;  %v3974_v61 = vmul.f32 %v6107_v3, %v3959_v2  ;;  %v3975_v26 = vmul.f32 %v6119_v62, %v3959_v2 }
 0x449   :  { %v3977_v48 = vsub.f32 %v3890_v32, %v3976_v18  ;;  %v4876_v18 = vld [vmem:[%s6279_s0 + $0x70] sm:$0xff] }
 0x44b   :  { %v3982_v38 = vrot.slane %v3977_v48, %v5276_v4  ;;  %v4862_v4 = vld [vmem:[%s6279_s0] sm:$0xff] }
 0x44d   :  { %v3984_v7 = vadd.f32 %v3982_v38, %v3960_v9  ;;  %v3985_v5 = vadd.f32 %v3982_v38, %v3961_v44  ;;  %v3986_v31 = vadd.f32 %v3982_v38, %v3962_v47  ;;  %v3987_v50 = vadd.f32 %v3982_v38, %v3963_v46  ;;  %v4877_v44 = vld [vmem:[%s6279_s0 + $0x78] sm:$0xff] }
 0x44e   :  { %v3988_v24 = vadd.f32 %v3982_v38, %v3964_v54  ;;  %v3989_v36 = vadd.f32 %v3982_v38, %v3965_v35  ;;  %v3990_v45 = vadd.f32 %v3982_v38, %v3966_v8  ;;  %v3991_v39 = vadd.f32 %v3982_v38, %v3967_v20 }
 0x44f   :  { %v3992_v29 = vadd.f32 %v3982_v38, %v3968_v41  ;;  %v3993_v28 = vadd.f32 %v3982_v38, %v3969_v17  ;;  %v3994_v60 = vadd.f32 %v3982_v38, %v3970_v14  ;;  %v3995_v30 = vadd.f32 %v3982_v38, %v3971_v12 }
 0x450   :  { %v3996_v49 = vadd.f32 %v3982_v38, %v3972_v27  ;;  %v3997_v55 = vadd.f32 %v3982_v38, %v3973_v58  ;;  %v3998_v3 = vadd.f32 %v3982_v38, %v3974_v61  ;;  %v3999_v19 = vadd.f32 %v3982_v38, %v3975_v26 }
 0x451   :  { %v4000_v62 = vadd.f32 %v4862_v4, %v3984_v7  ;;  %v4001_v23 = vadd.f32 %v4863_v52, %v3985_v5  ;;  %v4002_v0 = vadd.f32 %v4864_v42, %v3986_v31  ;;  %v4003_v33 = vadd.f32 %v4865_v6, %v3987_v50 }
 0x452   :  { %v4004_v11 = vadd.f32 %v4866_v51, %v3988_v24  ;;  %v4005_v21 = vadd.f32 %v4867_v1, %v3989_v36  ;;  %v4006_v43 = vadd.f32 %v4868_v40, %v3990_v45  ;;  %v4007_v15 = vadd.f32 %v4869_v16, %v3991_v39 }
 0x453   :  { %v4008_v10 = vadd.f32 %v4870_v57, %v3992_v29  ;;  %v4009_v53 = vadd.f32 %v4871_v56, %v3993_v28  ;;  %v4010_v22 = vadd.f32 %v4872_v63, %v3994_v60  ;;  %v4011_v13 = vadd.f32 %v4873_v25, %v3995_v30 }
 0x454   :  { %v4012_v34 = vadd.f32 %v4874_v37, %v3996_v49  ;;  %v4013_v2 = vadd.f32 %v4875_v59, %v3997_v55  ;;  %v4014_v9 = vadd.f32 %v4876_v18, %v3998_v3  ;;  %v4015_v47 = vadd.f32 %v4877_v44, %v3999_v19 }
 0x455   :  { %v4016_v46 = vmax.f32 %v4000_v62, 0.0  ;;  %v4017_v32 = vmax.f32 %v4001_v23, 0.0  ;;  %v4018_v54 = vmax.f32 %v4002_v0, 0.0  ;;  %v4019_v35 = vmax.f32 %v4003_v33, 0.0 }
 0x456   :  { %v4020_v8 = vmax.f32 %v4004_v11, 0.0  ;;  %v4021_v20 = vmax.f32 %v4005_v21, 0.0  ;;  %v4022_v41 = vmax.f32 %v4006_v43, 0.0  ;;  %v4023_v17 = vmax.f32 %v4007_v15, 0.0 }
 0x457   :  { %v4024_v14 = vmax.f32 %v4008_v10, 0.0  ;;  %v4025_v12 = vmax.f32 %v4009_v53, 0.0  ;;  %v4026_v27 = vmax.f32 %v4010_v22, 0.0  ;;  %v4027_v58 = vmax.f32 %v4011_v13, 0.0  ;;  %4067 = vst [vmem:[%s6288_s10] sm:$0xff] %v4016_v46  ;;  %4068 = vst [vmem:[%s6288_s10 + $0x8] sm:$0xff] %v4017_v32 }
 0x458   :  { %4069 = vst [vmem:[%s6288_s10 + $0x10] sm:$0xff] %v4018_v54  ;;  %4070 = vst [vmem:[%s6288_s10 + $0x18] sm:$0xff] %v4019_v35  ;;  %v4028_v61 = vmax.f32 %v4012_v34, 0.0  ;;  %v4029_v26 = vmax.f32 %v4013_v2, 0.0  ;;  %v4030_v48 = vmax.f32 %v4014_v9, 0.0  ;;  %v4031_v38 = vmax.f32 %v4015_v47, 0.0 }
 0x459   :  { %4071 = vst [vmem:[%s6288_s10 + $0x20] sm:$0xff] %v4020_v8  ;;  %4072 = vst [vmem:[%s6288_s10 + $0x28] sm:$0xff] %v4021_v20 }
 0x45a   :  { %4073 = vst [vmem:[%s6288_s10 + $0x30] sm:$0xff] %v4022_v41  ;;  %4074 = vst [vmem:[%s6288_s10 + $0x38] sm:$0xff] %v4023_v17 }
 0x45b   :  { %4075 = vst [vmem:[%s6288_s10 + $0x40] sm:$0xff] %v4024_v14  ;;  %4076 = vst [vmem:[%s6288_s10 + $0x48] sm:$0xff] %v4025_v12 }
 0x45c   :  { %4077 = vst [vmem:[%s6288_s10 + $0x50] sm:$0xff] %v4026_v27  ;;  %4078 = vst [vmem:[%s6288_s10 + $0x58] sm:$0xff] %v4027_v58 }
 0x45d   :  { %4079 = vst [vmem:[%s6288_s10 + $0x60] sm:$0xff] %v4028_v61  ;;  %4080 = vst [vmem:[%s6288_s10 + $0x68] sm:$0xff] %v4029_v26 }
 0x45e   :  { %4081 = vst [vmem:[%s6288_s10 + $0x70] sm:$0xff] %v4030_v48  ;;  %4082 = vst [vmem:[%s6288_s10 + $0x78] sm:$0xff] %v4031_v38 }

// kernel: corblock_s_forward.2
= control target key start
LH: loop header
LB: loop body
LE: loop exit
PB: predicated region body
PF: predicated region fallthrough
CT: control target
= control target key end

     0   :  { %vm1008_vm0 = vcmask 1040384   ;;  %vm1009_vm1 = vsmask.f32 256  ;;  %v1027_v40 = vld [vmem:[#allocation2 + $0x18] sm:$0x1]  ;;  %v11152_v41 = vmov 0  ;;  %s11105_s1 = inlined_call_operand.vmem [shape: bf16[128,128], index: 1, kind: input, shape index: {}]   ;;  %s11106_s0 = inlined_call_operand.vmem [shape: bf16[4,128,128], index: 0, kind: input, shape index: {}]   ;;  %s11107_s3 = inlined_call_operand.vmem [shape: bf16[1152,128], index: 3, kind: input, shape index: {}]   ;;  %s11108_s5 = inlined_call_operand.vmem [shape: f32[1,128], index: 5, kind: input, shape index: {}]   ;;  %s11109_s6 = inlined_call_operand.vmem [shape: f32[1,128], index: 6, kind: input, shape index: {}]   ;;  %s11110_s4 = inlined_call_operand.vmem [shape: bf16[128,128], index: 4, kind: input, shape index: {}]   ;;  %s11111_s2 = inlined_call_operand.vmem [shape: bf16[128,128], index: 2, kind: input, shape index: {}]   ;;  %s11112_s7 = inlined_call_operand.vmem [shape: f32[1,128], index: 7, kind: input, shape index: {}]   ;;  %s11113_s8 = inlined_call_operand.vmem [shape: f32[1,128], index: 8, kind: input, shape index: {}]   ;;  %s11114_s9 = inlined_call_operand.vmem [shape: f32[1,128], index: 9, kind: input, shape index: {}]   ;;  %s11115_s10 = inlined_call_operand.vmem [shape: f32[1,128], index: 10, kind: input, shape index: {}]   ;;  %s11116_s11 = inlined_call_operand.vmem [shape: f32[1,128], index: 11, kind: input, shape index: {}]   ;;  %s11117_s12 = inlined_call_operand.vmem [shape: f32[1,128], index: 12, kind: input, shape index: {}]   ;;  %s11118_s13 = inlined_call_operand.vmem [shape: f32[128,128], index: 13, kind: output, shape index: {}]  }
   0x1   :  { %v7591_v0 = vld [vmem:[%s11105_s1] sm:$0xff]   ;;  %v7592_v1 = vld [vmem:[%s11105_s1 + $0x8] sm:$0xff]   ;;  %v7593_v2 = vld [vmem:[%s11105_s1 + $0x10] sm:$0xff]   ;;  %vm1355_vm3 = vcmask 1043456   ;;  %vm1356_vm4 = vsmask.f32 7938 }
   0x2   :  { %7350 = vmatprep.subr.bf16.mxu0 %v7591_v0  ;;  %7382 = vmatprep.subr.bf16.mxu1 %v7591_v0  ;;  %v7842_v3 = vld [vmem:[%s11105_s1 + $0x18] sm:$0xff]   ;;  %v7599_v4 = vld [vmem:[%s11106_s0] sm:$0xff]   ;;  %v7864_v7 = vld [vmem:[%s11105_s1 + $0x28] sm:$0xff]   ;;  %vm2851_vm6 = vsmask.f32 3328 }
   0x3   :  { %7351 = vmatpush3.bf16.msra.mxu0 %v7591_v0  ;;  %7383 = vmatpush3.bf16.msra.mxu1 %v7591_v0  ;;  %v7600_v5 = vld [vmem:[%s11106_s0 + $0x40] sm:$0xff]   ;;  %v7873_v8 = vld [vmem:[%s11105_s1 + $0x30] sm:$0xff]   ;;  %v7882_v9 = vld [vmem:[%s11105_s1 + $0x38] sm:$0xff]   ;;  %vm2852_vm7 = vsmask.f32 7440 }
   0x4   :  { %7352 = vmatprep.subr.bf16.mxu0 %v7592_v1  ;;  %7384 = vmatprep.subr.bf16.mxu1 %v7592_v1  ;;  %v7855_v6 = vld [vmem:[%s11105_s1 + $0x20] sm:$0xff]   ;;  %v7601_v10 = vld [vmem:[%s11106_s0 + $0x8] sm:$0xff]   ;;  %v7603_v12 = vld [vmem:[%s11106_s0 + $0x10] sm:$0xff]  }
   0x5   :  { %7366 = vmatprep.mubr.bf16.mxu0 %v7599_v4  ;;  %7398 = vmatprep.mubr.bf16.mxu1 %v7600_v5  ;;  %v7602_v11 = vld [vmem:[%s11106_s0 + $0x48] sm:$0xff]   ;;  %v7604_v13 = vld [vmem:[%s11106_s0 + $0x50] sm:$0xff]   ;;  %v7605_v14 = vld [vmem:[%s11106_s0 + $0x18] sm:$0xff]  }
   0x6   :  { %v7606_v15 = vld [vmem:[%s11106_s0 + $0x58] sm:$0xff]   ;;  %v7607_v16 = vld [vmem:[%s11106_s0 + $0x20] sm:$0xff]   ;;  %v7609_v18 = vld [vmem:[%s11106_s0 + $0x28] sm:$0xff]  }
   0x7   :  { %7353 = vmatpush3.bf16.msra.mxu0 %v7592_v1  ;;  %7385 = vmatpush3.bf16.msra.mxu1 %v7592_v1  ;;  %v7608_v17 = vld [vmem:[%s11106_s0 + $0x60] sm:$0xff]   ;;  %v7610_v19 = vld [vmem:[%s11106_s0 + $0x68] sm:$0xff]   ;;  %v7611_v20 = vld [vmem:[%s11106_s0 + $0x30] sm:$0xff]  }
   0x8   :  { %7354 = vmatprep.subr.bf16.mxu0 %v7593_v2  ;;  %7386 = vmatprep.subr.bf16.mxu1 %v7593_v2  ;;  %v7612_v21 = vld [vmem:[%s11106_s0 + $0x70] sm:$0xff]   ;;  %v7613_v22 = vld [vmem:[%s11106_s0 + $0x38] sm:$0xff]   ;;  %v7615_v24 = vld [vmem:[%s11106_s0 + $0x80] sm:$0xff]  }
   0x9   :  { %v7614_v23 = vld [vmem:[%s11106_s0 + $0x78] sm:$0xff]   ;;  %v7616_v25 = vld [vmem:[%s11106_s0 + $0xc0] sm:$0xff]   ;;  %v7617_v26 = vld [vmem:[%s11106_s0 + $0x88] sm:$0xff]  }
   0xa   :  { %v7618_v27 = vld [vmem:[%s11106_s0 + $0xc8] sm:$0xff]   ;;  %v7619_v28 = vld [vmem:[%s11106_s0 + $0x90] sm:$0xff]   ;;  %v7621_v30 = vld [vmem:[%s11106_s0 + $0x98] sm:$0xff]  }
   0xb   :  { %7355 = vmatpush3.bf16.msra.mxu0 %v7593_v2  ;;  %7387 = vmatpush3.bf16.msra.mxu1 %v7593_v2  ;;  %v7620_v29 = vld [vmem:[%s11106_s0 + $0xd0] sm:$0xff]   ;;  %v7622_v31 = vld [vmem:[%s11106_s0 + $0xd8] sm:$0xff]   ;;  %v7623_v32 = vld [vmem:[%s11106_s0 + $0xa0] sm:$0xff]  }
   0xc   :  { %7356 = vmatprep.subr.bf16.mxu0 %v7842_v3  ;;  %7388 = vmatprep.subr.bf16.mxu1 %v7842_v3  ;;  %v7624_v33 = vld [vmem:[%s11106_s0 + $0xe0] sm:$0xff]   ;;  %v7625_v34 = vld [vmem:[%s11106_s0 + $0xa8] sm:$0xff]   ;;  %v7627_v36 = vld [vmem:[%s11106_s0 + $0xb0] sm:$0xff]  }
   0xd   :  { %v7626_v35 = vld [vmem:[%s11106_s0 + $0xe8] sm:$0xff]   ;;  %v7628_v37 = vld [vmem:[%s11106_s0 + $0xf0] sm:$0xff]   ;;  %v7629_v38 = vld [vmem:[%s11106_s0 + $0xb8] sm:$0xff]  }
   0xe   :  { %v7630_v39 = vld [vmem:[%s11106_s0 + $0xf8] sm:$0xff]   ;;  %vm8000_vm2 = vmand %vm1008_vm0, %vm1009_vm1  ;;  %v1471_v42 = vld [vmem:[#allocation3 + $0x18] sm:$0x1] }
   0xf   :  { %7357 = vmatpush3.bf16.msra.mxu0 %v7842_v3  ;;  %7389 = vmatpush3.bf16.msra.mxu1 %v7842_v3  ;;  %v11153_v41 = vsel %vm8000_vm2, 4294967295, %v11152_v41  ;;  %v1028_v43 = vsel %vm8000_vm2, 0, %v1027_v40  ;;  %v1472_v44 = vsel %vm8000_vm2, 0, %v1471_v42  ;;  %v1021_v45 = vld [vmem:[#allocation2 + $0x8] sm:$0x1]  ;;  %vm8660_vm5 = vmand %vm1355_vm3, %vm1356_vm4 }
  0x10   :  { %7358 = vmatprep.subr.bf16.mxu0 %v7855_v6  ;;  %7390 = vmatprep.subr.bf16.mxu1 %v7855_v6  ;;  %11154 = vst [vmem:[#allocation7_spill] sm:$0xff] %v11153_v41  ;;  %1029 = vst [vmem:[#allocation2 + $0x18] sm:$0x1] %v1028_v43  ;;  %v1022_v46 = vsel %vm8000_vm2, 0, %v1021_v45  ;;  %v1465_v47 = vld [vmem:[#allocation3 + $0x8] sm:$0x1] }
  0x11   :  { %1473 = vst [vmem:[#allocation3 + $0x18] sm:$0x1] %v1472_v44  ;;  %1023 = vst [vmem:[#allocation2 + $0x8] sm:$0x1] %v1022_v46  ;;  %v1466_v48 = vsel %vm8000_vm2, 0, %v1465_v47 }
  0x12   :  { %v1030_v49 = vld [vmem:[#allocation2 + $0x20] sm:$0x1]  ;;  %1467 = vst [vmem:[#allocation3 + $0x8] sm:$0x1] %v1466_v48  ;;  %v1474_v51 = vld [vmem:[#allocation3 + $0x20] sm:$0x1]  ;;  %vm10112_vm8 = vmor %vm2851_vm6, %vm2852_vm7 }
  0x13   :  { %7359 = vmatpush3.bf16.msra.mxu0 %v7855_v6  ;;  %7391 = vmatpush3.bf16.msra.mxu1 %v7855_v6  ;;  %v1031_v50 = vsel %vm8000_vm2, 0, %v1030_v49  ;;  %v1475_v52 = vsel %vm8000_vm2, 0, %v1474_v51  ;;  %v1024_v53 = vld [vmem:[#allocation2 + $0x10] sm:$0x1]  ;;  %v1468_v54 = vld [vmem:[#allocation3 + $0x10] sm:$0x1] }
  0x14   :  { %7360 = vmatprep.subr.bf16.mxu0 %v7864_v7  ;;  %7392 = vmatprep.subr.bf16.mxu1 %v7864_v7  ;;  %1032 = vst [vmem:[#allocation2 + $0x20] sm:$0x1] %v1031_v50  ;;  %1476 = vst [vmem:[#allocation3 + $0x20] sm:$0x1] %v1475_v52  ;;  %v1025_v55 = vsel %vm8000_vm2, 0, %v1024_v53  ;;  %v1469_v56 = vsel %vm8000_vm2, 0, %v1468_v54 }
  0x15   :  { %v1039_v57 = vld [vmem:[#allocation2 + $0x38] sm:$0x1]  ;;  %1026 = vst [vmem:[#allocation2 + $0x10] sm:$0x1] %v1025_v55  ;;  %1470 = vst [vmem:[#allocation3 + $0x10] sm:$0x1] %v1469_v56 }
  0x16   :  { %v1040_v58 = vsel %vm8000_vm2, 0, %v1039_v57  ;;  %v1483_v59 = vld [vmem:[#allocation3 + $0x38] sm:$0x1]  ;;  %v1477_v63 = vld [vmem:[#allocation3 + $0x28] sm:$0x1] }
  0x17   :  { %7361 = vmatpush3.bf16.msra.mxu0 %v7864_v7  ;;  %7393 = vmatpush3.bf16.msra.mxu1 %v7864_v7  ;;  %1041 = vst [vmem:[#allocation2 + $0x38] sm:$0x1] %v1040_v58  ;;  %v1484_v60 = vsel %vm8000_vm2, 0, %v1483_v59  ;;  %v1033_v61 = vld [vmem:[#allocation2 + $0x28] sm:$0x1] }
  0x18   :  { %7362 = vmatprep.subr.bf16.mxu0 %v7873_v8  ;;  %7394 = vmatprep.subr.bf16.mxu1 %v7873_v8  ;;  %1485 = vst [vmem:[#allocation3 + $0x38] sm:$0x1] %v1484_v60  ;;  %v1034_v62 = vsel %vm8000_vm2, 0, %v1033_v61  ;;  %v1036_v5 = vld [vmem:[#allocation2 + $0x30] sm:$0x1] }
  0x19   :  { %1035 = vst [vmem:[#allocation2 + $0x28] sm:$0x1] %v1034_v62  ;;  %v1902_v40 = vld [vmem:[#allocation4 + $0x18] sm:$0x1]  ;;  %v2333_v44 = vld [vmem:[#allocation5 + $0x18] sm:$0x1] }
  0x1a   :  { %v1903_v43 = vsel %vm8000_vm2, 0, %v1902_v40  ;;  %v2334_v45 = vsel %vm8000_vm2, 0, %v2333_v44  ;;  %v1896_v46 = vld [vmem:[#allocation4 + $0x8] sm:$0x1]  ;;  %v2327_v48 = vld [vmem:[#allocation5 + $0x8] sm:$0x1] }
  0x1b   :  { %7363 = vmatpush3.bf16.msra.mxu0 %v7873_v8  ;;  %7395 = vmatpush3.bf16.msra.mxu1 %v7873_v8  ;;  %1904 = vst [vmem:[#allocation4 + $0x18] sm:$0x1] %v1903_v43  ;;  %2335 = vst [vmem:[#allocation5 + $0x18] sm:$0x1] %v2334_v45  ;;  %v1897_v47 = vsel %vm8000_vm2, 0, %v1896_v46  ;;  %v2328_v49 = vsel %vm8000_vm2, 0, %v2327_v48 }
  0x1c   :  { %7364 = vmatprep.subr.bf16.mxu0 %v7882_v9  ;;  %7396 = vmatprep.subr.bf16.mxu1 %v7882_v9  ;;  %1898 = vst [vmem:[#allocation4 + $0x8] sm:$0x1] %v1897_v47  ;;  %v1905_v50 = vld [vmem:[#allocation4 + $0x20] sm:$0x1]  ;;  %2329 = vst [vmem:[#allocation5 + $0x8] sm:$0x1] %v2328_v49 }
  0x1d   :  { %v1906_v51 = vsel %vm8000_vm2, 0, %v1905_v50  ;;  %v2336_v52 = vld [vmem:[#allocation5 + $0x20] sm:$0x1]  ;;  %v2330_v55 = vld [vmem:[#allocation5 + $0x10] sm:$0x1] }
  0x1e   :  { %1907 = vst [vmem:[#allocation4 + $0x20] sm:$0x1] %v1906_v51  ;;  %v2337_v53 = vsel %vm8000_vm2, 0, %v2336_v52  ;;  %v1899_v54 = vld [vmem:[#allocation4 + $0x10] sm:$0x1]  ;;  %v2331_v57 = vsel %vm8000_vm2, 0, %v2330_v55 }
  0x1f   :  { %7365 = vmatpush3.bf16.msra.mxu0 %v7882_v9  ;;  %7397 = vmatpush3.bf16.msra.mxu1 %v7882_v9  ;;  %2338 = vst [vmem:[#allocation5 + $0x20] sm:$0x1] %v2337_v53  ;;  %v1900_v56 = vsel %vm8000_vm2, 0, %v1899_v54  ;;  %v1914_v58 = vld [vmem:[#allocation4 + $0x38] sm:$0x1]  ;;  %v7631_v47 = vld [vmem:[%s11107_s3 + $0xc0] sm:$0xff]  }
  0x20   :  { %7414 = vmatprep.subr.bf16.mxu0 %v7591_v0  ;;  %7446 = vmatprep.subr.bf16.mxu1 %v7591_v0  ;;  %1901 = vst [vmem:[#allocation4 + $0x10] sm:$0x1] %v1900_v56  ;;  %2332 = vst [vmem:[#allocation5 + $0x10] sm:$0x1] %v2331_v57  ;;  %v1915_v59 = vsel %vm8000_vm2, 0, %v1914_v58 }
  0x21   :  { %1916 = vst [vmem:[#allocation4 + $0x38] sm:$0x1] %v1915_v59  ;;  %v2345_v60 = vld [vmem:[#allocation5 + $0x38] sm:$0x1] }
  0x22   :  { %7367 = vmatmul.mubr.bf16.vlgmr.msra.gmra.mrb[0].mxu0 %v7601_v10  ;;  %7399 = vmatmul.mubr.bf16.vlgmr.msra.gmra.mrb[0].mxu1 %v7602_v11  ;;  %v1498_v11 = vld [vmem:[#allocation3 + $0x60] sm:$0x1]  ;;  %v2346_v61 = vsel %vm8000_vm2, 0, %v2345_v60  ;;  %v1908_v62 = vld [vmem:[#allocation4 + $0x28] sm:$0x1] }
  0x23   :  { %7415 = vmatpush3.bf16.msra.mxu0 %v7591_v0  ;;  %7447 = vmatpush3.bf16.msra.mxu1 %v7591_v0  ;;  %v1478_v0 = vsel %vm8000_vm2, 0, %v1477_v63  ;;  %2347 = vst [vmem:[#allocation5 + $0x38] sm:$0x1] %v2346_v61  ;;  %v1909_v63 = vsel %vm8000_vm2, 0, %v1908_v62  ;;  %v2369_v40 = vld [vmem:[#allocation5 + $0x78] sm:$0x1] }
  0x24   :  { %7416 = vmatprep.subr.bf16.mxu0 %v7592_v1  ;;  %7448 = vmatprep.subr.bf16.mxu1 %v7592_v1  ;;  %1479 = vst [vmem:[#allocation3 + $0x28] sm:$0x1] %v1478_v0  ;;  %v2339_v0 = vld [vmem:[#allocation5 + $0x28] sm:$0x1]  ;;  %1910 = vst [vmem:[#allocation4 + $0x28] sm:$0x1] %v1909_v63 }
  0x25   :  { %7370 = vmatprep.mubr.bf16.mxu0 %v7603_v12  ;;  %7402 = vmatprep.mubr.bf16.mxu1 %v7604_v13  ;;  %v1048_v12 = vld [vmem:[#allocation2 + $0x50] sm:$0x1]  ;;  %v1499_v13 = vsel %vm8000_vm2, 0, %v1498_v11 }
  0x26   :  { %1500 = vst [vmem:[#allocation3 + $0x60] sm:$0x1] %v1499_v13  ;;  %v2360_v11 = vld [vmem:[#allocation5 + $0x60] sm:$0x1] }
  0x27   :  { %7417 = vmatpush3.bf16.msra.mxu0 %v7592_v1  ;;  %7449 = vmatpush3.bf16.msra.mxu1 %v7592_v1  ;;  %v1042_v1 = vld [vmem:[#allocation2 + $0x40] sm:$0x1]  ;;  %v2361_v13 = vsel %vm8000_vm2, 0, %v2360_v11 }
  0x28   :  { %7418 = vmatprep.subr.bf16.mxu0 %v7593_v2  ;;  %7450 = vmatprep.subr.bf16.mxu1 %v7593_v2  ;;  %2362 = vst [vmem:[#allocation5 + $0x60] sm:$0x1] %v2361_v13 }
  0x2a   :  { %7371 = vmatmul.mubr.bf16.gmra.mrb[4].mxu0 %v7605_v14  ;;  %7403 = vmatmul.mubr.bf16.gmra.mrb[4].mxu1 %v7606_v15  ;;  %v1049_v14 = vsel %vm8000_vm2, 0, %v1048_v12  ;;  %v1492_v15 = vld [vmem:[#allocation3 + $0x50] sm:$0x1] }
  0x2b   :  { %7419 = vmatpush3.bf16.msra.mxu0 %v7593_v2  ;;  %7451 = vmatpush3.bf16.msra.mxu1 %v7593_v2  ;;  %v1043_v2 = vsel %vm8000_vm2, 0, %v1042_v1  ;;  %1050 = vst [vmem:[#allocation2 + $0x50] sm:$0x1] %v1049_v14  ;;  %v2340_v1 = vsel %vm8000_vm2, 0, %v2339_v0  ;;  %v1923_v14 = vld [vmem:[#allocation4 + $0x50] sm:$0x1] }
  0x2c   :  { %7420 = vmatprep.subr.bf16.mxu0 %v7842_v3  ;;  %7452 = vmatprep.subr.bf16.mxu1 %v7842_v3  ;;  %1044 = vst [vmem:[#allocation2 + $0x40] sm:$0x1] %v1043_v2  ;;  %2341 = vst [vmem:[#allocation5 + $0x28] sm:$0x1] %v2340_v1  ;;  %v1917_v2 = vld [vmem:[#allocation4 + $0x40] sm:$0x1] }
  0x2d   :  { %7374 = vmatprep.mubr.bf16.mxu0 %v7607_v16  ;;  %7406 = vmatprep.mubr.bf16.mxu1 %v7608_v17  ;;  %v1493_v16 = vsel %vm8000_vm2, 0, %v1492_v15  ;;  %v1057_v17 = vld [vmem:[#allocation2 + $0x68] sm:$0x1]  ;;  %v1924_v15 = vsel %vm8000_vm2, 0, %v1923_v14 }
  0x2e   :  { %1494 = vst [vmem:[#allocation3 + $0x50] sm:$0x1] %v1493_v16  ;;  %v2354_v16 = vld [vmem:[#allocation5 + $0x50] sm:$0x1]  ;;  %1925 = vst [vmem:[#allocation4 + $0x50] sm:$0x1] %v1924_v15 }
  0x2f   :  { %7421 = vmatpush3.bf16.msra.mxu0 %v7842_v3  ;;  %7453 = vmatpush3.bf16.msra.mxu1 %v7842_v3  ;;  %v1486_v3 = vld [vmem:[#allocation3 + $0x40] sm:$0x1] }
  0x30   :  { %7422 = vmatprep.subr.bf16.mxu0 %v7855_v6  ;;  %7454 = vmatprep.subr.bf16.mxu1 %v7855_v6  ;;  %v1487_v4 = vsel %vm8000_vm2, 0, %v1486_v3  ;;  %v2348_v3 = vld [vmem:[#allocation5 + $0x40] sm:$0x1] }
  0x31   :  { %1488 = vst [vmem:[#allocation3 + $0x40] sm:$0x1] %v1487_v4  ;;  %v1918_v4 = vsel %vm8000_vm2, 0, %v1917_v2 }
  0x32   :  { %7375 = vmatmul.mubr.bf16.gmra.mrb[8].mxu0 %v7609_v18  ;;  %7407 = vmatmul.mubr.bf16.gmra.mrb[8].mxu1 %v7610_v19  ;;  %v1058_v18 = vsel %vm8000_vm2, 0, %v1057_v17  ;;  %v1501_v19 = vld [vmem:[#allocation3 + $0x68] sm:$0x1]  ;;  %1919 = vst [vmem:[#allocation4 + $0x40] sm:$0x1] %v1918_v4  ;;  %v2355_v17 = vsel %vm8000_vm2, 0, %v2354_v16 }
  0x33   :  { %7423 = vmatpush3.bf16.msra.mxu0 %v7855_v6  ;;  %7455 = vmatpush3.bf16.msra.mxu1 %v7855_v6  ;;  %v1037_v6 = vsel %vm8000_vm2, 0, %v1036_v5  ;;  %1059 = vst [vmem:[#allocation2 + $0x68] sm:$0x1] %v1058_v18  ;;  %v2349_v5 = vsel %vm8000_vm2, 0, %v2348_v3  ;;  %2356 = vst [vmem:[#allocation5 + $0x50] sm:$0x1] %v2355_v17 }
  0x34   :  { %7424 = vmatprep.subr.bf16.mxu0 %v7864_v7  ;;  %7456 = vmatprep.subr.bf16.mxu1 %v7864_v7  ;;  %1038 = vst [vmem:[#allocation2 + $0x30] sm:$0x1] %v1037_v6  ;;  %2350 = vst [vmem:[#allocation5 + $0x40] sm:$0x1] %v2349_v5  ;;  %v1911_v6 = vld [vmem:[#allocation4 + $0x30] sm:$0x1] }
  0x35   :  { %7378 = vmatprep.mubr.bf16.mxu0 %v7611_v20  ;;  %7410 = vmatprep.mubr.bf16.mxu1 %v7612_v21  ;;  %v1502_v20 = vsel %vm8000_vm2, 0, %v1501_v19  ;;  %v1051_v21 = vld [vmem:[#allocation2 + $0x58] sm:$0x1]  ;;  %v1932_v18 = vld [vmem:[#allocation4 + $0x68] sm:$0x1] }
  0x36   :  { %1503 = vst [vmem:[#allocation3 + $0x68] sm:$0x1] %v1502_v20  ;;  %v2363_v19 = vld [vmem:[#allocation5 + $0x68] sm:$0x1]  ;;  %v1933_v20 = vsel %vm8000_vm2, 0, %v1932_v18 }
  0x37   :  { %7425 = vmatpush3.bf16.msra.mxu0 %v7864_v7  ;;  %7457 = vmatpush3.bf16.msra.mxu1 %v7864_v7  ;;  %v1480_v7 = vld [vmem:[#allocation3 + $0x30] sm:$0x1]  ;;  %1934 = vst [vmem:[#allocation4 + $0x68] sm:$0x1] %v1933_v20 }
  0x38   :  { %7426 = vmatprep.subr.bf16.mxu0 %v7873_v8  ;;  %7458 = vmatprep.subr.bf16.mxu1 %v7873_v8 }
  0x3a   :  { %7379 = vmatmul.mubr.bf16.gmra.mrb[12].mxu0 %v7613_v22  ;;  %7411 = vmatmul.mubr.bf16.gmra.mrb[12].mxu1 %v7614_v23  ;;  %v1495_v22 = vld [vmem:[#allocation3 + $0x58] sm:$0x1]  ;;  %v1052_v23 = vsel %vm8000_vm2, 0, %v1051_v21  ;;  %v2364_v21 = vsel %vm8000_vm2, 0, %v2363_v19 }
  0x3b   :  { %7427 = vmatpush3.bf16.msra.mxu0 %v7873_v8  ;;  %7459 = vmatpush3.bf16.msra.mxu1 %v7873_v8  ;;  %v1054_v8 = vld [vmem:[#allocation2 + $0x60] sm:$0x1]  ;;  %1053 = vst [vmem:[#allocation2 + $0x58] sm:$0x1] %v1052_v23  ;;  %2365 = vst [vmem:[#allocation5 + $0x68] sm:$0x1] %v2364_v21 }
  0x3c   :  { %7428 = vmatprep.subr.bf16.mxu0 %v7882_v9  ;;  %7460 = vmatprep.subr.bf16.mxu1 %v7882_v9  ;;  %v1055_v10 = vsel %vm8000_vm2, 0, %v1054_v8  ;;  %v2342_v8 = vld [vmem:[#allocation5 + $0x30] sm:$0x1] }
  0x3d   :  { %7430 = vmatprep.mubr.bf16.mxu0 %v7615_v24  ;;  %7462 = vmatprep.mubr.bf16.mxu1 %v7616_v25  ;;  %1056 = vst [vmem:[#allocation2 + $0x60] sm:$0x1] %v1055_v10  ;;  %v1496_v24 = vsel %vm8000_vm2, 0, %v1495_v22  ;;  %v1066_v25 = vld [vmem:[#allocation2 + $0x80] sm:$0x1] }
  0x3e   :  { %1497 = vst [vmem:[#allocation3 + $0x58] sm:$0x1] %v1496_v24  ;;  %v1929_v10 = vld [vmem:[#allocation4 + $0x60] sm:$0x1]  ;;  %v1926_v22 = vld [vmem:[#allocation4 + $0x58] sm:$0x1] }
  0x3f   :  { %7429 = vmatpush3.bf16.msra.mxu0 %v7882_v9  ;;  %7461 = vmatpush3.bf16.msra.mxu1 %v7882_v9  ;;  %v1481_v9 = vsel %vm8000_vm2, 0, %v1480_v7  ;;  %v1912_v7 = vsel %vm8000_vm2, 0, %v1911_v6  ;;  %v1930_v12 = vsel %vm8000_vm2, 0, %v1929_v10  ;;  %v1927_v23 = vsel %vm8000_vm2, 0, %v1926_v22  ;;  %v2357_v24 = vld [vmem:[#allocation5 + $0x58] sm:$0x1] }
  0x40   :  { %1482 = vst [vmem:[#allocation3 + $0x30] sm:$0x1] %v1481_v9  ;;  %1913 = vst [vmem:[#allocation4 + $0x30] sm:$0x1] %v1912_v7  ;;  %v2343_v9 = vsel %vm8000_vm2, 0, %v2342_v8  ;;  %7110 = vmatprep.subr.bf16.mxu1 %v7631_v47 }
  0x41   :  { %2344 = vst [vmem:[#allocation5 + $0x30] sm:$0x1] %v2343_v9  ;;  %1931 = vst [vmem:[#allocation4 + $0x60] sm:$0x1] %v1930_v12 }
  0x42   :  { %7431 = vmatmul.mubr.bf16.vlgmr.msra.gmra.mrb[16].mxu0 %v7617_v26  ;;  %7463 = vmatmul.mubr.bf16.vlgmr.msra.gmra.mrb[16].mxu1 %v7618_v27  ;;  %v1067_v26 = vsel %vm8000_vm2, 0, %v1066_v25  ;;  %v1510_v27 = vld [vmem:[#allocation3 + $0x80] sm:$0x1]  ;;  %1928 = vst [vmem:[#allocation4 + $0x58] sm:$0x1] %v1927_v23  ;;  %v2358_v25 = vsel %vm8000_vm2, 0, %v2357_v24 }
  0x43   :  { %7434 = vmatprep.mubr.bf16.mxu0 %v7619_v28  ;;  %7466 = vmatprep.mubr.bf16.mxu1 %v7620_v29  ;;  %1068 = vst [vmem:[#allocation2 + $0x80] sm:$0x1] %v1067_v26  ;;  %v1060_v28 = vld [vmem:[#allocation2 + $0x70] sm:$0x1]  ;;  %v1511_v29 = vsel %vm8000_vm2, 0, %v1510_v27 }
  0x44   :  { %1512 = vst [vmem:[#allocation3 + $0x80] sm:$0x1] %v1511_v29  ;;  %2359 = vst [vmem:[#allocation5 + $0x58] sm:$0x1] %v2358_v25  ;;  %v1941_v26 = vld [vmem:[#allocation4 + $0x80] sm:$0x1] }
  0x45   :  { %v2372_v27 = vld [vmem:[#allocation5 + $0x80] sm:$0x1] }
  0x46   :  { %v2373_v29 = vsel %vm8000_vm2, 0, %v2372_v27 }
  0x47   :  { %2374 = vst [vmem:[#allocation5 + $0x80] sm:$0x1] %v2373_v29 }
  0x4a   :  { %7435 = vmatmul.mubr.bf16.gmra.mrb[20].mxu0 %v7621_v30  ;;  %7467 = vmatmul.mubr.bf16.gmra.mrb[20].mxu1 %v7622_v31  ;;  %v1061_v30 = vsel %vm8000_vm2, 0, %v1060_v28  ;;  %v1504_v31 = vld [vmem:[#allocation3 + $0x70] sm:$0x1]  ;;  %v1942_v28 = vsel %vm8000_vm2, 0, %v1941_v26 }
  0x4b   :  { %7438 = vmatprep.mubr.bf16.mxu0 %v7623_v32  ;;  %7470 = vmatprep.mubr.bf16.mxu1 %v7624_v33  ;;  %1062 = vst [vmem:[#allocation2 + $0x70] sm:$0x1] %v1061_v30  ;;  %v1505_v32 = vsel %vm8000_vm2, 0, %v1504_v31  ;;  %v1069_v33 = vld [vmem:[#allocation2 + $0x88] sm:$0x1] }
  0x4c   :  { %1506 = vst [vmem:[#allocation3 + $0x70] sm:$0x1] %v1505_v32  ;;  %1943 = vst [vmem:[#allocation4 + $0x80] sm:$0x1] %v1942_v28  ;;  %v1935_v30 = vld [vmem:[#allocation4 + $0x70] sm:$0x1] }
  0x4d   :  { %v1936_v31 = vsel %vm8000_vm2, 0, %v1935_v30  ;;  %v2366_v32 = vld [vmem:[#allocation5 + $0x70] sm:$0x1] }
  0x4e   :  { %1937 = vst [vmem:[#allocation4 + $0x70] sm:$0x1] %v1936_v31 }
  0x52   :  { %7439 = vmatmul.mubr.bf16.gmra.mrb[24].mxu0 %v7625_v34  ;;  %7471 = vmatmul.mubr.bf16.gmra.mrb[24].mxu1 %v7626_v35  ;;  %v1070_v34 = vsel %vm8000_vm2, 0, %v1069_v33  ;;  %v1513_v35 = vld [vmem:[#allocation3 + $0x88] sm:$0x1]  ;;  %v2367_v33 = vsel %vm8000_vm2, 0, %v2366_v32 }
  0x53   :  { %7442 = vmatprep.mubr.bf16.mxu0 %v7627_v36  ;;  %7474 = vmatprep.mubr.bf16.mxu1 %v7628_v37  ;;  %1071 = vst [vmem:[#allocation2 + $0x88] sm:$0x1] %v1070_v34  ;;  %v1514_v36 = vsel %vm8000_vm2, 0, %v1513_v35  ;;  %v1063_v37 = vld [vmem:[#allocation2 + $0x78] sm:$0x1] }
  0x54   :  { %1515 = vst [vmem:[#allocation3 + $0x88] sm:$0x1] %v1514_v36  ;;  %2368 = vst [vmem:[#allocation5 + $0x70] sm:$0x1] %v2367_v33  ;;  %v1944_v34 = vld [vmem:[#allocation4 + $0x88] sm:$0x1] }
  0x55   :  { %v2375_v35 = vld [vmem:[#allocation5 + $0x88] sm:$0x1]  ;;  %v1945_v36 = vsel %vm8000_vm2, 0, %v1944_v34  ;;  %v1011_v33 = vld [vmem:[#allocation2 + $0x4] sm:$0x1] }
  0x56   :  { %1946 = vst [vmem:[#allocation4 + $0x88] sm:$0x1] %v1945_v36  ;;  %v1015_v34 = vld [vmem:[#allocation2 + $0x4c] sm:$0x1] }
  0x5a   :  { %7443 = vmatmul.mubr.bf16.gmra.mrb[28].mxu0 %v7629_v38  ;;  %7475 = vmatmul.mubr.bf16.gmra.mrb[28].mxu1 %v7630_v39  ;;  %v1064_v38 = vsel %vm8000_vm2, 0, %v1063_v37  ;;  %v1507_v39 = vld [vmem:[#allocation3 + $0x78] sm:$0x1]  ;;  %v2376_v37 = vsel %vm8000_vm2, 0, %v2375_v35 }
  0x5b   :  { %1065 = vst [vmem:[#allocation2 + $0x78] sm:$0x1] %v1064_v38  ;;  %v1508_v42 = vsel %vm8000_vm2, 0, %v1507_v39  ;;  %2377 = vst [vmem:[#allocation5 + $0x88] sm:$0x1] %v2376_v37 }
  0x5c   :  { %1509 = vst [vmem:[#allocation3 + $0x78] sm:$0x1] %v1508_v42  ;;  %v1938_v38 = vld [vmem:[#allocation4 + $0x78] sm:$0x1]  ;;  %v2370_v42 = vsel %vm8000_vm2, 0, %v2369_v40  ;;  %v1012_v40 = vsel %vm8000_vm2, 0, %v1011_v33 }
  0x5d   :  { %v1939_v39 = vsel %vm8000_vm2, 0, %v1938_v38  ;;  %2371 = vst [vmem:[#allocation5 + $0x78] sm:$0x1] %v2370_v42  ;;  %1013 = vst [vmem:[#allocation2 + $0x4] sm:$0x1] %v1012_v40 }
  0x5e   :  { %1940 = vst [vmem:[#allocation4 + $0x78] sm:$0x1] %v1939_v39 }
  0xf5   :  { %v8132_v43 = vpop.f32.mrb[0].mxu0  ;;  %v8134_v44 = vpop.f32.mrb[0].mxu1 }
  0xf6   :  { %v8136_v45 = vpop.f32.mrb[1].mxu0  ;;  %v8138_v46 = vpop.f32.mrb[1].mxu1  ;;  %v846_v58 = vmul.f32 %v8132_v43, %v8132_v43  ;;  %v884_v59 = vmul.f32 %v8134_v44, %v8134_v44 }
  0xf7   :  { %v882_v48 = vmul.f32 %v8138_v46, %v8138_v46  ;;  %v8145_v49 = vpop.f32.mrb[2].mxu0  ;;  %v8147_v50 = vpop.f32.mrb[2].mxu1  ;;  %v844_v51 = vmul.f32 %v8136_v45, %v8136_v45 }
  0xf8   :  { %v8151_v52 = vpop.f32.mrb[3].mxu0  ;;  %v8153_v53 = vpop.f32.mrb[3].mxu1  ;;  %v847_v0 = vmul.f32 %v8145_v49, %v8145_v49  ;;  %v885_v7 = vmul.f32 %v8147_v50, %v8147_v50 }
  0xf9   :  { %v756_v54 = vadd.f32 %v8151_v52, %v8136_v45  ;;  %v845_v55 = vmul.f32 %v8151_v52, %v8151_v52  ;;  %v778_v56 = vadd.f32 %v8153_v53, %v8138_v46  ;;  %v883_v57 = vmul.f32 %v8153_v53, %v8153_v53 }
  0xfb   :  { %v757_v60 = vadd.f32 %v8132_v43, %v756_v54  ;;  %v860_v61 = vadd.f32 %v845_v55, %v844_v51  ;;  %v779_v62 = vadd.f32 %v8134_v44, %v778_v56  ;;  %v898_v63 = vadd.f32 %v883_v57, %v882_v48 }
  0xfc   :  { %v1016_v54 = vsel %vm8000_vm2, 0, %v1015_v34 }
  0xfd   :  { %v861_v1 = vadd.f32 %v860_v61, %v846_v58  ;;  %v899_v2 = vadd.f32 %v898_v63, %v884_v59  ;;  %v8171_v3 = vpop.f32.mrb[4].mxu0  ;;  %v8173_v4 = vpop.f32.mrb[4].mxu1  ;;  %v758_v5 = vadd.f32 %v8145_v49, %v757_v60  ;;  %v780_v6 = vadd.f32 %v8147_v50, %v779_v62  ;;  %1017 = vst [vmem:[#allocation2 + $0x4c] sm:$0x1] %v1016_v54 }
  0xfe   :  { %v8179_v8 = vpop.f32.mrb[5].mxu0  ;;  %v8181_v9 = vpop.f32.mrb[5].mxu1  ;;  %v850_v26 = vmul.f32 %v8171_v3, %v8171_v3  ;;  %v888_v30 = vmul.f32 %v8173_v4, %v8173_v4 }
  0xff   :  { %v759_v10 = vadd.f32 %v758_v5, %v8179_v8  ;;  %v848_v11 = vmul.f32 %v8179_v8, %v8179_v8  ;;  %v862_v12 = vadd.f32 %v861_v1, %v847_v0  ;;  %v781_v13 = vadd.f32 %v780_v6, %v8181_v9  ;;  %v8187_v14 = vpop.f32.mrb[6].mxu0  ;;  %v8189_v15 = vpop.f32.mrb[6].mxu1 }
 0x100   :  { %v886_v16 = vmul.f32 %v8181_v9, %v8181_v9  ;;  %v900_v17 = vadd.f32 %v899_v2, %v885_v7  ;;  %v8193_v18 = vpop.f32.mrb[7].mxu0  ;;  %v8195_v19 = vpop.f32.mrb[7].mxu1  ;;  %v851_v31 = vmul.f32 %v8187_v14, %v8187_v14  ;;  %v889_v42 = vmul.f32 %v8189_v15, %v8189_v15 }
 0x101   :  { %v863_v20 = vadd.f32 %v862_v12, %v848_v11  ;;  %v760_v21 = vadd.f32 %v759_v10, %v8193_v18  ;;  %v849_v22 = vmul.f32 %v8193_v18, %v8193_v18  ;;  %v782_v23 = vadd.f32 %v781_v13, %v8195_v19 }
 0x102   :  { %v901_v24 = vadd.f32 %v900_v17, %v886_v16  ;;  %v887_v25 = vmul.f32 %v8195_v19, %v8195_v19 }
 0x103   :  { %v761_v27 = vadd.f32 %v8171_v3, %v760_v21  ;;  %v864_v28 = vadd.f32 %v863_v20, %v849_v22  ;;  %v783_v29 = vadd.f32 %v8173_v4, %v782_v23 }
 0x104   :  { %v902_v32 = vadd.f32 %v901_v24, %v887_v25 }
 0x105   :  { %v865_v35 = vadd.f32 %v864_v28, %v850_v26  ;;  %v8211_v36 = vpop.f32.mrb[8].mxu0  ;;  %v8213_v37 = vpop.f32.mrb[8].mxu1  ;;  %v762_v38 = vadd.f32 %v8187_v14, %v761_v27  ;;  %v784_v39 = vadd.f32 %v8189_v15, %v783_v29 }
 0x106   :  { %v903_v47 = vadd.f32 %v902_v32, %v888_v30  ;;  %v8221_v48 = vpop.f32.mrb[9].mxu0  ;;  %v8223_v51 = vpop.f32.mrb[9].mxu1  ;;  %v854_v11 = vmul.f32 %v8211_v36, %v8211_v36  ;;  %v892_v17 = vmul.f32 %v8213_v37, %v8213_v37 }
 0x107   :  { %v763_v55 = vadd.f32 %v762_v38, %v8221_v48  ;;  %v852_v56 = vmul.f32 %v8221_v48, %v8221_v48  ;;  %v866_v57 = vadd.f32 %v865_v35, %v851_v31  ;;  %v785_v58 = vadd.f32 %v784_v39, %v8223_v51  ;;  %v8231_v59 = vpop.f32.mrb[10].mxu0  ;;  %v8233_v60 = vpop.f32.mrb[10].mxu1 }
 0x108   :  { %v890_v61 = vmul.f32 %v8223_v51, %v8223_v51  ;;  %v904_v62 = vadd.f32 %v903_v47, %v889_v42  ;;  %v8237_v63 = vpop.f32.mrb[11].mxu0  ;;  %v8239_v0 = vpop.f32.mrb[11].mxu1  ;;  %v855_v21 = vmul.f32 %v8231_v59, %v8231_v59  ;;  %v893_v27 = vmul.f32 %v8233_v60, %v8233_v60 }
 0x109   :  { %v867_v1 = vadd.f32 %v866_v57, %v852_v56  ;;  %v764_v2 = vadd.f32 %v763_v55, %v8237_v63  ;;  %v853_v5 = vmul.f32 %v8237_v63, %v8237_v63  ;;  %v786_v6 = vadd.f32 %v785_v58, %v8239_v0 }
 0x10a   :  { %v905_v7 = vadd.f32 %v904_v62, %v890_v61  ;;  %v891_v10 = vmul.f32 %v8239_v0, %v8239_v0 }
 0x10b   :  { %v765_v12 = vadd.f32 %v8211_v36, %v764_v2  ;;  %v868_v13 = vadd.f32 %v867_v1, %v853_v5  ;;  %v787_v16 = vadd.f32 %v8213_v37, %v786_v6 }
 0x10c   :  { %v906_v20 = vadd.f32 %v905_v7, %v891_v10 }
 0x10d   :  { %v869_v22 = vadd.f32 %v868_v13, %v854_v11  ;;  %v8255_v23 = vpop.f32.mrb[12].mxu0  ;;  %v8257_v24 = vpop.f32.mrb[12].mxu1  ;;  %v766_v25 = vadd.f32 %v8231_v59, %v765_v12  ;;  %v788_v26 = vadd.f32 %v8233_v60, %v787_v16 }
 0x10e   :  { %11155 = vst [vmem:[#allocation8_spill] sm:$0xff] %v8257_v24  ;;  %v907_v28 = vadd.f32 %v906_v20, %v892_v17  ;;  %v8263_v29 = vpop.f32.mrb[13].mxu0  ;;  %v8265_v30 = vpop.f32.mrb[13].mxu1  ;;  %v858_v62 = vmul.f32 %v8255_v23, %v8255_v23  ;;  %v896_v6 = vmul.f32 %v8257_v24, %v8257_v24 }
 0x10f   :  { %v767_v31 = vadd.f32 %v766_v25, %v8263_v29  ;;  %v856_v32 = vmul.f32 %v8263_v29, %v8263_v29  ;;  %v870_v33 = vadd.f32 %v869_v22, %v855_v21  ;;  %v789_v34 = vadd.f32 %v788_v26, %v8265_v30  ;;  %v8271_v35 = vpop.f32.mrb[14].mxu0  ;;  %v8273_v38 = vpop.f32.mrb[14].mxu1 }
 0x110   :  { %11156 = vst [vmem:[#allocation9_spill] sm:$0xff] %v8273_v38  ;;  %v894_v39 = vmul.f32 %v8265_v30, %v8265_v30  ;;  %v908_v40 = vadd.f32 %v907_v28, %v893_v27  ;;  %v8277_v42 = vpop.f32.mrb[15].mxu0  ;;  %v8279_v47 = vpop.f32.mrb[15].mxu1  ;;  %v859_v10 = vmul.f32 %v8271_v35, %v8271_v35  ;;  %v897_v20 = vmul.f32 %v8273_v38, %v8273_v38 }
 0x111   :  { %11157 = vst [vmem:[#allocation10_spill] sm:$0xff] %v8279_v47  ;;  %v871_v54 = vadd.f32 %v870_v33, %v856_v32  ;;  %v768_v55 = vadd.f32 %v767_v31, %v8277_v42  ;;  %v857_v56 = vmul.f32 %v8277_v42, %v8277_v42  ;;  %v790_v57 = vadd.f32 %v789_v34, %v8279_v47 }
 0x112   :  { %v909_v58 = vadd.f32 %v908_v40, %v894_v39  ;;  %v895_v61 = vmul.f32 %v8279_v47, %v8279_v47 }
 0x113   :  { %v769_v1 = vadd.f32 %v8255_v23, %v768_v55  ;;  %v872_v2 = vadd.f32 %v871_v54, %v857_v56  ;;  %v791_v5 = vadd.f32 %v8257_v24, %v790_v57 }
 0x114   :  { %v910_v7 = vadd.f32 %v909_v58, %v895_v61 }
 0x115   :  { %v770_v11 = vadd.f32 %v8271_v35, %v769_v1  ;;  %v873_v12 = vadd.f32 %v872_v2, %v858_v62  ;;  %v792_v13 = vadd.f32 %v8273_v38, %v791_v5  ;;  %v8297_v16 = vpop.f32.mrb[16].mxu0  ;;  %v8299_v17 = vpop.f32.mrb[16].mxu1 }
 0x116   :  { %11158 = vst [vmem:[#allocation11_spill] sm:$0xff] %v8297_v16  ;;  %11159 = vst [vmem:[#allocation12_spill] sm:$0xff] %v8299_v17  ;;  %v911_v21 = vadd.f32 %v910_v7, %v896_v6  ;;  %v8303_v22 = vpop.f32.mrb[17].mxu0  ;;  %v8305_v25 = vpop.f32.mrb[17].mxu1  ;;  %v922_v31 = vmul.f32 %v8297_v16, %v8297_v16  ;;  %v960_v39 = vmul.f32 %v8299_v17, %v8299_v17 }
 0x117   :  { %11160 = vst [vmem:[#allocation13_spill] sm:$0xff] %v8303_v22  ;;  %11161 = vst [vmem:[#allocation14_spill] sm:$0xff] %v8305_v25  ;;  %v771_v26 = vrot.slane %v770_v11, 4  ;;  %v874_v27 = vadd.f32 %v873_v12, %v859_v10  ;;  %v793_v28 = vrot.slane %v792_v13, 4  ;;  %v8309_v32 = vpop.f32.mrb[18].mxu0  ;;  %v8311_v33 = vpop.f32.mrb[18].mxu1  ;;  %v920_v40 = vmul.f32 %v8303_v22, %v8303_v22 }
 0x118   :  { %11162 = vst [vmem:[#allocation15_spill] sm:$0xff] %v8309_v32  ;;  %11163 = vst [vmem:[#allocation16_spill] sm:$0xff] %v8311_v33  ;;  %v912_v34 = vadd.f32 %v911_v21, %v897_v20  ;;  %v958_v54 = vmul.f32 %v8305_v25, %v8305_v25  ;;  %v8319_v55 = vpop.f32.mrb[19].mxu0  ;;  %v8321_v56 = vpop.f32.mrb[19].mxu1 }
 0x119   :  { %11164 = vst [vmem:[#allocation17_spill] sm:$0xff] %v8319_v55  ;;  %11165 = vst [vmem:[#allocation18_spill] sm:$0xff] %v8321_v56  ;;  %v772_v57 = vadd.f32 %v771_v26, %v770_v11  ;;  %v875_v58 = vrot.slane %v874_v27, 4  ;;  %v794_v61 = vadd.f32 %v793_v28, %v792_v13  ;;  %v800_v62 = vadd.f32 %v8319_v55, %v8303_v22 }
 0x11a   :  { %v913_v1 = vrot.slane %v912_v34, 4  ;;  %v921_v2 = vmul.f32 %v8319_v55, %v8319_v55  ;;  %v822_v5 = vadd.f32 %v8321_v56, %v8305_v25  ;;  %v959_v6 = vmul.f32 %v8321_v56, %v8321_v56 }
 0x11b   :  { %v773_v7 = vrot.slane %v772_v57, 2  ;;  %v876_v10 = vadd.f32 %v875_v58, %v874_v27  ;;  %v795_v12 = vrot.slane %v794_v61, 2  ;;  %v801_v11 = vadd.f32 %v8297_v16, %v800_v62 }
 0x11c   :  { %v914_v20 = vadd.f32 %v913_v1, %v912_v34  ;;  %v936_v13 = vadd.f32 %v921_v2, %v920_v40  ;;  %v823_v21 = vadd.f32 %v8299_v17, %v822_v5  ;;  %v974_v26 = vadd.f32 %v959_v6, %v958_v54 }
 0x11d   :  { %v774_v28 = vadd.f32 %v773_v7, %v772_v57  ;;  %v877_v22 = vrot.slane %v876_v10, 2  ;;  %v796_v38 = vadd.f32 %v795_v12, %v794_v61  ;;  %v8333_v55 = vpop.f32.mrb[20].mxu0  ;;  %v8335_v24 = vpop.f32.mrb[20].mxu1  ;;  %v802_v25 = vadd.f32 %v8309_v32, %v801_v11 }
 0x11e   :  { %11166 = vst [vmem:[#allocation19_spill] sm:$0xff] %v8335_v24  ;;  %v915_v56 = vrot.slane %v914_v20, 2  ;;  %v923_v27 = vmul.f32 %v8309_v32, %v8309_v32  ;;  %v937_v58 = vadd.f32 %v936_v13, %v922_v31  ;;  %v975_v62 = vadd.f32 %v974_v26, %v960_v39  ;;  %v8340_v34 = vpop.f32.mrb[21].mxu0  ;;  %v8342_v40 = vpop.f32.mrb[21].mxu1 }
 0x11f   :  { %11167 = vst [vmem:[#allocation20_spill] sm:$0xff] %v8340_v34  ;;  %11168 = vst [vmem:[#allocation21_spill] sm:$0xff] %v8342_v40  ;;  %v775_v54 = vrot.slane %v774_v28, 1  ;;  %v878_v57 = vadd.f32 %v877_v22, %v876_v10  ;;  %v797_v1 = vrot.slane %v796_v38, 1  ;;  %v961_v61 = vmul.f32 %v8311_v33, %v8311_v33  ;;  %v8346_v2 = vpop.f32.mrb[22].mxu0  ;;  %v8348_v5 = vpop.f32.mrb[22].mxu1 }
 0x120   :  { %11169 = vst [vmem:[#allocation22_spill] sm:$0xff] %v8348_v5  ;;  %v916_v6 = vadd.f32 %v915_v56, %v914_v20  ;;  %v803_v7 = vadd.f32 %v802_v25, %v8340_v34  ;;  %v924_v31 = vmul.f32 %v8340_v34, %v8340_v34  ;;  %v938_v39 = vadd.f32 %v937_v58, %v923_v27  ;;  %v8353_v12 = vpop.f32.mrb[23].mxu0  ;;  %v8355_v11 = vpop.f32.mrb[23].mxu1 }
 0x121   :  { %11170 = vst [vmem:[#allocation23_spill] sm:$0xff] %v8355_v11  ;;  %v776_v22 = vadd.f32 %v775_v54, %v774_v28  ;;  %v879_v10 = vrot.slane %v878_v57, 1  ;;  %v798_v13 = vadd.f32 %v797_v1, %v796_v38  ;;  %v824_v26 = vadd.f32 %v8311_v33, %v823_v21 }
 0x122   :  { %v917_v17 = vrot.slane %v916_v6, 1  ;;  %v939_v32 = vadd.f32 %v938_v39, %v924_v31  ;;  %v962_v56 = vmul.f32 %v8342_v40, %v8342_v40  ;;  %v976_v20 = vadd.f32 %v975_v62, %v961_v61 }
 0x123   :  { %v880_v25 = vadd.f32 %v879_v10, %v878_v57  ;;  %v8360_v16 = vadd.f32 %v798_v13, %v776_v22  ;;  %v825_v27 = vadd.f32 %v824_v26, %v8342_v40  ;;  %v804_v47 = vadd.f32 %v803_v7, %v8353_v12 }
 0x124   :  { %v918_v58 = vadd.f32 %v917_v17, %v916_v6  ;;  %v977_v34 = vadd.f32 %v976_v20, %v962_v56  ;;  %v925_v38 = vmul.f32 %v8353_v12, %v8353_v12  ;;  %v963_v28 = vmul.f32 %v8355_v11, %v8355_v11 }
 0x125   :  { %v826_v21 = vadd.f32 %v825_v27, %v8355_v11  ;;  %v8369_v54 = vpop.f32.mrb[24].mxu0  ;;  %v8371_v62 = vpop.f32.mrb[24].mxu1  ;;  %v926_v17 = vmul.f32 %v8333_v55, %v8333_v55  ;;  %v805_v1 = vadd.f32 %v8333_v55, %v804_v47  ;;  %v964_v7 = vmul.f32 %v8335_v24, %v8335_v24 }
 0x126   :  { %11171 = vst [vmem:[#allocation24_spill] sm:$0xff] %v8369_v54  ;;  %11172 = vst [vmem:[#allocation25_spill] sm:$0xff] %v8371_v62  ;;  %v8373_v57 = vadd.f32 %v918_v58, %v880_v25  ;;  %v8378_v61 = vpop.f32.mrb[25].mxu0  ;;  %v8380_v6 = vpop.f32.mrb[25].mxu1  ;;  %v940_v31 = vadd.f32 %v939_v32, %v925_v38  ;;  %v978_v22 = vadd.f32 %v977_v34, %v963_v28  ;;  %v1459_v28 = vld [vmem:[#allocation3 + $0x4c] sm:$0x1] }
 0x127   :  { %11173 = vst [vmem:[#allocation26_spill] sm:$0xff] %v8378_v61  ;;  %11174 = vst [vmem:[#allocation27_spill] sm:$0xff] %v8380_v6  ;;  %v827_v39 = vadd.f32 %v8335_v24, %v826_v21  ;;  %v8385_v10 = vpop.f32.mrb[26].mxu0  ;;  %v8387_v13 = vpop.f32.mrb[26].mxu1  ;;  %v927_v26 = vmul.f32 %v8346_v2, %v8346_v2  ;;  %v965_v47 = vmul.f32 %v8348_v5, %v8348_v5  ;;  %v1455_v21 = vld [vmem:[#allocation3 + $0x4] sm:$0x1] }
 0x128   :  { %11175 = vst [vmem:[#allocation28_spill] sm:$0xff] %v8385_v10  ;;  %11176 = vst [vmem:[#allocation29_spill] sm:$0xff] %v8387_v13  ;;  %v806_v56 = vadd.f32 %v8346_v2, %v805_v1  ;;  %v928_v20 = vmul.f32 %v8378_v61, %v8378_v61  ;;  %v8396_v25 = vpop.f32.mrb[27].mxu0  ;;  %v8398_v32 = vpop.f32.mrb[27].mxu1  ;;  %v941_v34 = vadd.f32 %v940_v31, %v926_v17  ;;  %v1456_v11 = vsel %vm8000_vm2, 0, %v1455_v21 }
 0x129   :  { %11177 = vst [vmem:[#allocation30_spill] sm:$0xff] %v8398_v32  ;;  %v979_v27 = vadd.f32 %v978_v22, %v964_v7  ;;  %v828_v58 = vadd.f32 %v8348_v5, %v827_v39  ;;  %v966_v38 = vmul.f32 %v8380_v6, %v8380_v6  ;;  %v929_v1 = vmul.f32 %v8396_v25, %v8396_v25 }
 0x12a   :  { %v807_v24 = vadd.f32 %v806_v56, %v8378_v61  ;;  %v1460_v40 = vsel %vm8000_vm2, 0, %v1459_v28  ;;  %v942_v17 = vadd.f32 %v941_v34, %v927_v26  ;;  %v967_v39 = vmul.f32 %v8398_v32, %v8398_v32  ;;  %1457 = vst [vmem:[#allocation3 + $0x4] sm:$0x1] %v1456_v11 }
 0x12b   :  { %v829_v7 = vadd.f32 %v828_v58, %v8380_v6  ;;  %v980_v31 = vadd.f32 %v979_v27, %v965_v47  ;;  %1461 = vst [vmem:[#allocation3 + $0x4c] sm:$0x1] %v1460_v40  ;;  %v930_v26 = vmul.f32 %v8369_v54, %v8369_v54  ;;  %v931_v28 = vmul.f32 %v8385_v10, %v8385_v10 }
 0x12c   :  { %v808_v22 = vadd.f32 %v807_v24, %v8396_v25  ;;  %v943_v56 = vadd.f32 %v942_v17, %v928_v20  ;;  %v968_v24 = vmul.f32 %v8371_v62, %v8371_v62  ;;  %v969_v17 = vmul.f32 %v8387_v13, %v8387_v13 }
 0x12d   :  { %v981_v5 = vadd.f32 %v980_v31, %v966_v38  ;;  %v830_v33 = vadd.f32 %v829_v7, %v8398_v32  ;;  %v8415_v61 = vpop.f32.mrb[28].mxu0  ;;  %v8417_v21 = vpop.f32.mrb[28].mxu1 }
 0x12e   :  { %11178 = vst [vmem:[#allocation31_spill] sm:$0xff] %v8415_v61  ;;  %11179 = vst [vmem:[#allocation32_spill] sm:$0xff] %v8417_v21  ;;  %v809_v47 = vadd.f32 %v8369_v54, %v808_v22  ;;  %v8422_v34 = vpop.f32.mrb[29].mxu0  ;;  %v8424_v27 = vpop.f32.mrb[29].mxu1  ;;  %v944_v40 = vadd.f32 %v943_v56, %v929_v1 }
 0x12f   :  { %11180 = vst [vmem:[#allocation33_spill] sm:$0xff] %v8422_v34  ;;  %11181 = vst [vmem:[#allocation34_spill] sm:$0xff] %v8424_v27  ;;  %v831_v11 = vadd.f32 %v8371_v62, %v830_v33  ;;  %v982_v20 = vadd.f32 %v981_v5, %v967_v39  ;;  %v8429_v58 = vpop.f32.mrb[30].mxu0  ;;  %v8431_v38 = vpop.f32.mrb[30].mxu1  ;;  %v932_v31 = vmul.f32 %v8422_v34, %v8422_v34 }
 0x130   :  { %11182 = vst [vmem:[#allocation35_spill] sm:$0xff] %v8429_v58  ;;  %v810_v7 = vadd.f32 %v8385_v10, %v809_v47  ;;  %v8440_v22 = vpop.f32.mrb[31].mxu0  ;;  %v8442_v1 = vpop.f32.mrb[31].mxu1  ;;  %v945_v33 = vadd.f32 %v944_v40, %v930_v26  ;;  %v970_v56 = vmul.f32 %v8424_v27, %v8424_v27 }
 0x131   :  { %11183 = vst [vmem:[#allocation36_spill] sm:$0xff] %v8440_v22  ;;  %v983_v5 = vadd.f32 %v982_v20, %v968_v24  ;;  %v832_v39 = vadd.f32 %v8387_v13, %v831_v11  ;;  %v933_v32 = vmul.f32 %v8440_v22, %v8440_v22  ;;  %v971_v10 = vmul.f32 %v8442_v1, %v8442_v1 }
 0x132   :  { %v811_v62 = vadd.f32 %v810_v7, %v8422_v34  ;;  %v946_v47 = vadd.f32 %v945_v33, %v931_v28  ;;  %v934_v20 = vmul.f32 %v8415_v61, %v8415_v61  ;;  %v972_v28 = vmul.f32 %v8417_v21, %v8417_v21 }
 0x133   :  { %v833_v6 = vadd.f32 %v832_v39, %v8424_v27  ;;  %v984_v41 = vadd.f32 %v983_v5, %v969_v17  ;;  %v935_v39 = vmul.f32 %v8429_v58, %v8429_v58 }
 0x134   :  { %v812_v26 = vadd.f32 %v811_v62, %v8440_v22  ;;  %v947_v24 = vadd.f32 %v946_v47, %v932_v31 }
 0x135   :  { %v985_v40 = vadd.f32 %v984_v41, %v970_v56  ;;  %v834_v11 = vadd.f32 %v833_v6, %v8442_v1  ;;  %v973_v41 = vmul.f32 %v8431_v38, %v8431_v38 }
 0x136   :  { %v813_v7 = vadd.f32 %v8415_v61, %v812_v26  ;;  %v948_v33 = vadd.f32 %v947_v24, %v933_v32 }
 0x137   :  { %v835_v17 = vadd.f32 %v8417_v21, %v834_v11  ;;  %v986_v5 = vadd.f32 %v985_v40, %v971_v10 }
 0x138   :  { %v814_v62 = vadd.f32 %v8429_v58, %v813_v7  ;;  %v949_v6 = vadd.f32 %v948_v33, %v934_v20 }
 0x139   :  { %v836_v31 = vadd.f32 %v8431_v38, %v835_v17  ;;  %v987_v56 = vadd.f32 %v986_v5, %v972_v28 }
 0x13a   :  { %v815_v47 = vrot.slane %v814_v62, 4  ;;  %v950_v26 = vadd.f32 %v949_v6, %v935_v39 }
 0x13b   :  { %v837_v27 = vrot.slane %v836_v31, 4  ;;  %v988_v13 = vadd.f32 %v987_v56, %v973_v41 }
 0x13c   :  { %v816_v32 = vadd.f32 %v815_v47, %v814_v62  ;;  %v951_v24 = vrot.slane %v950_v26, 4 }
 0x13d   :  { %v838_v11 = vadd.f32 %v837_v27, %v836_v31  ;;  %v989_v10 = vrot.slane %v988_v13, 4 }
 0x13e   :  { %v817_v40 = vrot.slane %v816_v32, 2  ;;  %v952_v21 = vadd.f32 %v951_v24, %v950_v26 }
 0x13f   :  { %v839_v61 = vrot.slane %v838_v11, 2  ;;  %v990_v22 = vadd.f32 %v989_v10, %v988_v13 }
 0x140   :  { %v818_v7 = vadd.f32 %v817_v40, %v816_v32  ;;  %v953_v58 = vrot.slane %v952_v21, 2 }
 0x141   :  { %v840_v34 = vadd.f32 %v839_v61, %v838_v11  ;;  %v991_v54 = vrot.slane %v990_v22, 2 }
 0x142   :  { %v819_v20 = vrot.slane %v818_v7, 1  ;;  %v954_v33 = vadd.f32 %v953_v58, %v952_v21  ;;  %v1072_v21 = vlaneseq  ;;  %v1002_v58 = vld [vmem:[%s11108_s5] sm:$0x1] }
 0x143   :  { %v841_v17 = vrot.slane %v840_v34, 1  ;;  %v992_v28 = vadd.f32 %v991_v54, %v990_v22 }
 0x144   :  { %v820_v5 = vadd.f32 %v819_v20, %v818_v7  ;;  %v955_v39 = vrot.slane %v954_v33, 1  ;;  %v1073_v54 = vshrl.u32 %v1072_v21, 7 }
 0x145   :  { %v993_v6 = vrot.slane %v992_v28, 1  ;;  %v842_v41 = vadd.f32 %v841_v17, %v840_v34 }
 0x146   :  { %v821_v62 = vadd.f32 %v820_v5, %v8360_v16  ;;  %v956_v27 = vadd.f32 %v955_v39, %v954_v33  ;;  %v8472_v16 = vsub.s32 0, %v1073_v54  ;;  %v11192_v54 = vld [vmem:[#allocation20_spill] sm:$0xff] }
 0x147   :  { %v994_v47 = vadd.f32 %v993_v6, %v992_v28 }
 0x148   :  { %v843_v31 = vadd.f32 %v842_v41, %v821_v62  ;;  %v957_v56 = vadd.f32 %v956_v27, %v8373_v57  ;;  %11184 = vst [vmem:[#allocation37_spill] sm:$0xff] %v8472_v16  ;;  %v1004_v57 = vld [vmem:[%s11109_s6] sm:$0x1]  ;;  %v11185_v27 = vld [vmem:[#allocation10_spill] sm:$0xff] }
 0x14a   :  { %v996_v13 = vmul.f32 0.001953125, %v843_v31  ;;  %v995_v26 = vadd.f32 %v994_v47, %v957_v56  ;;  %v11188_v47 = vld [vmem:[#allocation13_spill] sm:$0xff] }
 0x14c   :  { %v998_v32 = vmul.f32 %v996_v13, %v996_v13  ;;  %v997_v61 = vmul.f32 0.001953125, %v995_v26 }
 0x14e   :  { %v999_v24 = vsub.f32 %v997_v61, %v998_v32  ;;  %v11190_v61 = vld [vmem:[#allocation11_spill] sm:$0xff] }
 0x150   :  { %v1000_v11 = vadd.f32 1e-05, %v999_v24 }
 0x152   :  { %7743 = vrsqrt.f32 %v1000_v11  ;;  %v11191_v11 = vld [vmem:[#allocation15_spill] sm:$0xff] }
 0x15c   :  { %v7744_v34 = vpop.eup %7743 }
 0x15d   :  { %v1003_v22 = vmul.f32 %v7744_v34, %v1002_v58 }
 0x15f   :  { %v1005_v10 = vmul.f32 %v1003_v22, %v996_v13  ;;  %v8478_v40 = vrot.slane %v1003_v22, %v8472_v16  ;;  %v11189_v13 = vld [vmem:[#allocation17_spill] sm:$0xff] }
 0x161   :  { %v1006_v7 = vsub.f32 %v1004_v57, %v1005_v10  ;;  %v2391_v20 = vmul.f32 %v8478_v40, %v8442_v1  ;;  %v8484_v33 = vmul.f32 %v8478_v40, %v8136_v45  ;;  %v8488_v17 = vmul.f32 %v8478_v40, %v8151_v52 }
 0x162   :  { %v8492_v28 = vmul.f32 %v8132_v43, %v8478_v40  ;;  %v8496_v5 = vmul.f32 %v8145_v49, %v8478_v40  ;;  %v8500_v39 = vmul.f32 %v8478_v40, %v8179_v8  ;;  %v8504_v45 = vmul.f32 %v8478_v40, %v8193_v18 }
 0x163   :  { %v8507_v52 = vrot.slane %v1006_v7, %v8472_v16  ;;  %v8511_v43 = vmul.f32 %v8171_v3, %v8478_v40  ;;  %v8515_v49 = vmul.f32 %v8187_v14, %v8478_v40  ;;  %v8519_v8 = vmul.f32 %v8478_v40, %v8221_v48  ;;  %v11193_v7 = vld [vmem:[#allocation26_spill] sm:$0xff] }
 0x164   :  { %v8523_v18 = vmul.f32 %v8478_v40, %v8237_v63  ;;  %v8527_v1 = vmul.f32 %v8211_v36, %v8478_v40  ;;  %v8531_v3 = vmul.f32 %v8231_v59, %v8478_v40  ;;  %v8535_v14 = vmul.f32 %v8478_v40, %v8263_v29 }
 0x165   :  { %v2407_v6 = vadd.f32 %v2391_v20, %v8507_v52  ;;  %v8540_v48 = vmul.f32 %v8478_v40, %v8277_v42  ;;  %v8544_v63 = vmul.f32 %v8255_v23, %v8478_v40  ;;  %v8548_v36 = vmul.f32 %v8271_v35, %v8478_v40 }
 0x166   :  { %v8552_v59 = vmul.f32 %v8478_v40, %v8138_v46  ;;  %v8556_v29 = vmul.f32 %v8478_v40, %v8153_v53  ;;  %v8560_v42 = vmul.f32 %v8134_v44, %v8478_v40  ;;  %v8564_v23 = vmul.f32 %v8147_v50, %v8478_v40 }
 0x167   :  { %v2423_v62 = vmax.f32 %v2407_v6, 0.0  ;;  %v8568_v35 = vmul.f32 %v8478_v40, %v8181_v9  ;;  %v8572_v46 = vmul.f32 %v8478_v40, %v8195_v19  ;;  %v8576_v53 = vmul.f32 %v8173_v4, %v8478_v40 }
 0x168   :  { %v8580_v44 = vmul.f32 %v8189_v15, %v8478_v40  ;;  %v8584_v50 = vmul.f32 %v8478_v40, %v8223_v51  ;;  %v8588_v9 = vmul.f32 %v8478_v40, %v8239_v0  ;;  %v8592_v19 = vmul.f32 %v8213_v37, %v8478_v40  ;;  %v11186_v0 = vld [vmem:[#allocation8_spill] sm:$0xff]  ;;  %v11187_v37 = vld [vmem:[#allocation9_spill] sm:$0xff] }
 0x169   :  { %v6979_v41 = vpack.c.bf16 %v2423_v62, %v2423_v62  ;;  %v8596_v4 = vmul.f32 %v8233_v60, %v8478_v40  ;;  %v8600_v15 = vmul.f32 %v8478_v40, %v8265_v30  ;;  %v8604_v51 = vmul.f32 %v8478_v40, %v11185_v27  ;;  %v11197_v27 = vld [vmem:[#allocation28_spill] sm:$0xff] }
 0x16a   :  { %v8608_v31 = vmul.f32 %v11186_v0, %v8478_v40  ;;  %v8612_v56 = vmul.f32 %v11187_v37, %v8478_v40  ;;  %v8616_v60 = vmul.f32 %v8478_v40, %v11188_v47  ;;  %v8620_v30 = vmul.f32 %v8478_v40, %v11189_v13  ;;  %v11198_v37 = vld [vmem:[#allocation33_spill] sm:$0xff]  ;;  %v11200_v47 = vld [vmem:[#allocation36_spill] sm:$0xff] }
 0x16b   :  { %v2595_v26 = vshrl.u32 %v6979_v41, 16  ;;  %v2598_v32 = vshll.u32 %v6979_v41, 16  ;;  %v8624_v24 = vmul.f32 %v11190_v61, %v8478_v40  ;;  %v8628_v21 = vmul.f32 %v11191_v11, %v8478_v40  ;;  %v2732_v41 = vld [vmem:[#allocation5 + $0x7c] sm:$0x1] }
 0x16c   :  { %v8632_v58 = vmul.f32 %v8478_v40, %v11192_v54  ;;  %v8636_v34 = vmul.f32 %v8478_v40, %v8353_v12  ;;  %v8640_v22 = vmul.f32 %v8333_v55, %v8478_v40  ;;  %v8644_v57 = vmul.f32 %v8346_v2, %v8478_v40  ;;  %v11194_v12 = vld [vmem:[#allocation24_spill] sm:$0xff] }
 0x16d   :  { %v2597_v10 = vrot.slane %v2595_v26, 7  ;;  %v8648_v20 = vmul.f32 %v8478_v40, %v11193_v7  ;;  %v8652_v6 = vmul.f32 %v8478_v40, %v8396_v25  ;;  %v8656_v62 = vmul.f32 %v11194_v12, %v8478_v40  ;;  %v2729_v2 = vld [vmem:[#allocation5 + $0x78] sm:$0xf]  ;;  %v11202_v26 = vld [vmem:[#allocation31_spill] sm:$0xff] }
 0x16e   :  { %v8666_v0 = vmul.f32 %v11197_v27, %v8478_v40  ;;  %v8670_v25 = vmul.f32 %v8478_v40, %v11198_v37  ;;  %v8674_v13 = vmul.f32 %v8478_v40, %v11200_v47  ;;  %v8678_v61 = vmul.f32 %v11202_v26, %v8478_v40  ;;  %v11203_v7 = vld [vmem:[#allocation35_spill] sm:$0xff]  ;;  %v11205_v27 = vld [vmem:[#allocation14_spill] sm:$0xff]  ;;  %v11209_v47 = vld [vmem:[#allocation12_spill] sm:$0xff] }
 0x16f   :  { %v2600_v11 = vor.u32 %v2598_v32, %v2597_v10  ;;  %v2601_v54 = vrot.slane %v2597_v10, 4  ;;  %v8682_v12 = vmul.f32 %v11203_v7, %v8478_v40  ;;  %v8686_v16 = vmul.f32 %v8478_v40, %v11205_v27  ;;  %v11207_v37 = vld [vmem:[#allocation18_spill] sm:$0xff]  ;;  %v11211_v26 = vld [vmem:[#allocation16_spill] sm:$0xff]  ;;  %v11212_v10 = vld [vmem:[#allocation21_spill] sm:$0xff] }
 0x170   :  { %11199 = vst [vmem:[#allocation10_spill] sm:$0xff] %v8670_v25  ;;  %11201 = vst [vmem:[#allocation8_spill] sm:$0xff] %v8674_v13  ;;  %v8690_v25 = vmul.f32 %v8478_v40, %v11207_v37  ;;  %v8694_v13 = vmul.f32 %v11209_v47, %v8478_v40  ;;  %v8698_v32 = vmul.f32 %v11211_v26, %v8478_v40  ;;  %v11215_v37 = vld [vmem:[#allocation23_spill] sm:$0xff]  ;;  %v11217_v26 = vld [vmem:[#allocation22_spill] sm:$0xff] }
 0x171   :  { %11204 = vst [vmem:[#allocation9_spill] sm:$0xff] %v8682_v12  ;;  %11206 = vst [vmem:[#allocation13_spill] sm:$0xff] %v8686_v16  ;;  %v8702_v7 = vmul.f32 %v8478_v40, %v11212_v10  ;;  %v2730_v27 = vsel %vm8660_vm5, %v2600_v11, %v2729_v2  ;;  %v2733_v12 = vsel %vm8000_vm2, %v2601_v54, %v2732_v41  ;;  %v11216_v47 = vld [vmem:[#allocation19_spill] sm:$0xff]  ;;  %v11219_v11 = vld [vmem:[#allocation30_spill] sm:$0xff] }
 0x172   :  { %11208 = vst [vmem:[#allocation17_spill] sm:$0xff] %v8690_v25  ;;  %11210 = vst [vmem:[#allocation11_spill] sm:$0xff] %v8694_v13  ;;  %v8710_v25 = vmul.f32 %v8478_v40, %v11215_v37  ;;  %v8714_v13 = vmul.f32 %v11216_v47, %v8478_v40  ;;  %v8718_v10 = vmul.f32 %v11217_v26, %v8478_v40  ;;  %v11220_v54 = vld [vmem:[#allocation25_spill] sm:$0xff]  ;;  %v11223_v16 = vld [vmem:[#allocation32_spill] sm:$0xff] }
 0x173   :  { %11213 = vst [vmem:[#allocation15_spill] sm:$0xff] %v8702_v7  ;;  %2731 = vst [vmem:[#allocation5 + $0x78] sm:$0xf] %v2730_v27  ;;  %v11218_v7 = vld [vmem:[#allocation27_spill] sm:$0xff]  ;;  %v8726_v41 = vmul.f32 %v8478_v40, %v11219_v11  ;;  %v8730_v37 = vmul.f32 %v11220_v54, %v8478_v40  ;;  %v11221_v47 = vld [vmem:[#allocation29_spill] sm:$0xff]  ;;  %v8746_v11 = vmul.f32 %v8431_v38, %v8478_v40 }
 0x174   :  { %2734 = vst [vmem:[#allocation5 + $0x7c] sm:$0x1] %v2733_v12  ;;  %v8722_v2 = vmul.f32 %v8478_v40, %v11218_v7  ;;  %v8734_v27 = vmul.f32 %v11221_v47, %v8478_v40  ;;  %v11222_v12 = vld [vmem:[#allocation34_spill] sm:$0xff]  ;;  %v8742_v7 = vmul.f32 %v11223_v16, %v8478_v40  ;;  %v8750_v54 = vadd.f32 %v8507_v52, %v8484_v33 }
 0x175   :  { %v8738_v26 = vmul.f32 %v8478_v40, %v11222_v12  ;;  %v8754_v47 = vadd.f32 %v8507_v52, %v8488_v17  ;;  %v8758_v12 = vadd.f32 %v8507_v52, %v8492_v28  ;;  %v8762_v16 = vadd.f32 %v8507_v52, %v8496_v5 }
 0x176   :  { %v8766_v38 = vadd.f32 %v8507_v52, %v8500_v39  ;;  %v8770_v40 = vadd.f32 %v8507_v52, %v8504_v45  ;;  %v8774_v33 = vadd.f32 %v8507_v52, %v8511_v43  ;;  %v8778_v17 = vadd.f32 %v8507_v52, %v8515_v49 }
 0x177   :  { %v8782_v28 = vadd.f32 %v8507_v52, %v8519_v8  ;;  %v8786_v5 = vadd.f32 %v8507_v52, %v8523_v18  ;;  %v8790_v39 = vadd.f32 %v8507_v52, %v8527_v1  ;;  %v8794_v45 = vadd.f32 %v8507_v52, %v8531_v3 }
 0x178   :  { %v8798_v43 = vadd.f32 %v8507_v52, %v8535_v14  ;;  %v8802_v49 = vadd.f32 %v8507_v52, %v8540_v48  ;;  %v8806_v8 = vadd.f32 %v8507_v52, %v8544_v63  ;;  %v8810_v18 = vadd.f32 %v8507_v52, %v8548_v36 }
 0x179   :  { %v8814_v1 = vadd.f32 %v8552_v59, %v8507_v52  ;;  %v8818_v3 = vadd.f32 %v8556_v29, %v8507_v52  ;;  %v8822_v14 = vadd.f32 %v8560_v42, %v8507_v52  ;;  %v8826_v48 = vadd.f32 %v8564_v23, %v8507_v52 }
 0x17a   :  { %v8830_v63 = vadd.f32 %v8568_v35, %v8507_v52  ;;  %v8834_v36 = vadd.f32 %v8572_v46, %v8507_v52  ;;  %v8838_v59 = vadd.f32 %v8576_v53, %v8507_v52  ;;  %v8842_v29 = vadd.f32 %v8580_v44, %v8507_v52 }
 0x17b   :  { %11224 = vst [vmem:[#allocation20_spill] sm:$0xff] %v8822_v14  ;;  %11225 = vst [vmem:[#allocation26_spill] sm:$0xff] %v8826_v48  ;;  %v8846_v42 = vadd.f32 %v8584_v50, %v8507_v52  ;;  %v8850_v23 = vadd.f32 %v8588_v9, %v8507_v52  ;;  %v8854_v35 = vadd.f32 %v8592_v19, %v8507_v52  ;;  %v1409_v48 = vld [vmem:[#allocation2 + $0x54] sm:$0x1] }
 0x17c   :  { %11226 = vst [vmem:[#allocation24_spill] sm:$0xff] %v8830_v63  ;;  %11227 = vst [vmem:[#allocation28_spill] sm:$0xff] %v8834_v36  ;;  %v8858_v46 = vadd.f32 %v8596_v4, %v8507_v52  ;;  %v8862_v53 = vadd.f32 %v8600_v15, %v8507_v52  ;;  %v8866_v44 = vadd.f32 %v8604_v51, %v8507_v52  ;;  %v1400_v63 = vld [vmem:[#allocation2 + $0x40] sm:$0xf] }
 0x17d   :  { %11228 = vst [vmem:[#allocation33_spill] sm:$0xff] %v8838_v59  ;;  %11229 = vst [vmem:[#allocation36_spill] sm:$0xff] %v8842_v29  ;;  %v8870_v50 = vadd.f32 %v8608_v31, %v8507_v52  ;;  %v8874_v9 = vadd.f32 %v8612_v56, %v8507_v52  ;;  %v8878_v19 = vadd.f32 %v8616_v60, %v8507_v52  ;;  %v7700_v59 = vld [vmem:[%s11107_s3 + $0x1a0] sm:$0xff]  }
 0x17e   :  { %11230 = vst [vmem:[#allocation31_spill] sm:$0xff] %v8846_v42  ;;  %11231 = vst [vmem:[#allocation35_spill] sm:$0xff] %v8850_v23  ;;  %v8882_v4 = vadd.f32 %v8620_v30, %v8507_v52  ;;  %v8886_v15 = vadd.f32 %v8624_v24, %v8507_v52  ;;  %v8890_v51 = vadd.f32 %v8628_v21, %v8507_v52  ;;  %v1391_v23 = vld [vmem:[#allocation2 + $0x34] sm:$0x1] }
 0x17f   :  { %11232 = vst [vmem:[#allocation14_spill] sm:$0xff] %v8854_v35  ;;  %11233 = vst [vmem:[#allocation18_spill] sm:$0xff] %v8858_v46  ;;  %v8894_v31 = vadd.f32 %v8632_v58, %v8507_v52  ;;  %v8898_v56 = vadd.f32 %v8636_v34, %v8507_v52  ;;  %v8902_v60 = vadd.f32 %v8640_v22, %v8507_v52  ;;  %v11250_v22 = vld [vmem:[#allocation10_spill] sm:$0xff]  ;;  %v1388_v35 = vld [vmem:[#allocation2 + $0x30] sm:$0xf] }
 0x180   :  { %11234 = vst [vmem:[#allocation12_spill] sm:$0xff] %v8862_v53  ;;  %11235 = vst [vmem:[#allocation16_spill] sm:$0xff] %v8866_v44  ;;  %v8906_v30 = vadd.f32 %v8644_v57, %v8507_v52  ;;  %v8910_v24 = vadd.f32 %v8648_v20, %v8507_v52  ;;  %v8914_v21 = vadd.f32 %v8652_v6, %v8507_v52  ;;  %v7661_v44 = vld [vmem:[%s11107_s3 + $0x78] sm:$0xff]  }
 0x181   :  { %11236 = vst [vmem:[#allocation21_spill] sm:$0xff] %v8870_v50  ;;  %11237 = vst [vmem:[#allocation23_spill] sm:$0xff] %v8874_v9  ;;  %v8918_v58 = vadd.f32 %v8656_v62, %v8507_v52  ;;  %v8922_v34 = vadd.f32 %v8666_v0, %v8507_v52  ;;  %v8926_v57 = vadd.f32 %v11250_v22, %v8507_v52  ;;  %v1385_v9 = vld [vmem:[#allocation2 + $0x2c] sm:$0x1]  ;;  %v1394_v53 = vld [vmem:[#allocation2 + $0x38] sm:$0xf] }
 0x182   :  { %11238 = vst [vmem:[#allocation19_spill] sm:$0xff] %v8878_v19  ;;  %11239 = vst [vmem:[#allocation22_spill] sm:$0xff] %v8882_v4  ;;  %v8934_v6 = vadd.f32 %v8678_v61, %v8507_v52  ;;  %v8954_v61 = vadd.f32 %v8698_v32, %v8507_v52  ;;  %v8974_v32 = vadd.f32 %v8722_v2, %v8507_v52  ;;  %v1370_v4 = vld [vmem:[#allocation2 + $0x18] sm:$0xf] }
 0x183   :  { %11240 = vst [vmem:[#allocation27_spill] sm:$0xff] %v8886_v15  ;;  %11241 = vst [vmem:[#allocation30_spill] sm:$0xff] %v8890_v51  ;;  %v8994_v2 = vadd.f32 %v8742_v7, %v8507_v52  ;;  %v7633_v7 = vld [vmem:[%s11107_s3 + $0x80] sm:$0xff]  }
 0x184   :  { %11242 = vst [vmem:[#allocation25_spill] sm:$0xff] %v8894_v31  ;;  %11243 = vst [vmem:[#allocation29_spill] sm:$0xff] %v8898_v56  ;;  %7111 = vmatpush3.bf16.msra.mxu1 %v7633_v7  ;;  %v1379_v31 = vld [vmem:[#allocation2 + $0x24] sm:$0x1] }
 0x185   :  { %11244 = vst [vmem:[#allocation34_spill] sm:$0xff] %v8902_v60  ;;  %11245 = vst [vmem:[#allocation32_spill] sm:$0xff] %v8906_v30  ;;  %v11252_v30 = vld [vmem:[#allocation8_spill] sm:$0xff] }
 0x186   :  { %11246 = vst [vmem:[#allocation38_spill] sm:$0xff] %v8910_v24  ;;  %11247 = vst [vmem:[#allocation39_spill] sm:$0xff] %v8914_v21  ;;  %v8930_v20 = vadd.f32 %v11252_v30, %v8507_v52  ;;  %v11255_v21 = vld [vmem:[#allocation9_spill] sm:$0xff] }
 0x187   :  { %11248 = vst [vmem:[#allocation40_spill] sm:$0xff] %v8918_v58  ;;  %11249 = vst [vmem:[#allocation41_spill] sm:$0xff] %v8922_v34  ;;  %v8938_v62 = vadd.f32 %v11255_v21, %v8507_v52  ;;  %v11257_v58 = vld [vmem:[#allocation13_spill] sm:$0xff] }
 0x188   :  { %11251 = vst [vmem:[#allocation10_spill] sm:$0xff] %v8926_v57  ;;  %11253 = vst [vmem:[#allocation8_spill] sm:$0xff] %v8930_v20  ;;  %v8942_v0 = vadd.f32 %v11257_v58, %v8507_v52  ;;  %v11259_v34 = vld [vmem:[#allocation17_spill] sm:$0xff]  ;;  %v11261_v57 = vld [vmem:[#allocation11_spill] sm:$0xff]  ;;  %v8962_v58 = vadd.f32 %v8710_v25, %v8507_v52  ;;  %v8982_v25 = vadd.f32 %v8730_v37, %v8507_v52  ;;  %v1115_v37 = vmax.f32 %v8754_v47, 0.0 }
 0x189   :  { %11254 = vst [vmem:[#allocation42_spill] sm:$0xff] %v8934_v6  ;;  %11256 = vst [vmem:[#allocation9_spill] sm:$0xff] %v8938_v62  ;;  %v8946_v22 = vadd.f32 %v11259_v34, %v8507_v52  ;;  %v8950_v30 = vadd.f32 %v11261_v57, %v8507_v52  ;;  %v11264_v6 = vld [vmem:[#allocation15_spill] sm:$0xff]  ;;  %v8966_v34 = vadd.f32 %v8714_v13, %v8507_v52  ;;  %v1122_v47 = vmax.f32 %v8782_v28, 0.0  ;;  %v1367_v24 = vld [vmem:[#allocation2 + $0x14] sm:$0x1] }
 0x18a   :  { %11258 = vst [vmem:[#allocation13_spill] sm:$0xff] %v8942_v0  ;;  %11263 = vst [vmem:[#allocation43_spill] sm:$0xff] %v8954_v61  ;;  %v8958_v21 = vadd.f32 %v11264_v6, %v8507_v52  ;;  %v8970_v57 = vadd.f32 %v8718_v10, %v8507_v52  ;;  %v8978_v6 = vadd.f32 %v8726_v41, %v8507_v52  ;;  %v7650_v61 = vld [vmem:[%s11107_s3 + $0x20] sm:$0xff]  }
 0x18b   :  { %11260 = vst [vmem:[#allocation17_spill] sm:$0xff] %v8946_v22  ;;  %11262 = vst [vmem:[#allocation11_spill] sm:$0xff] %v8950_v30  ;;  %v8986_v13 = vadd.f32 %v8734_v27, %v8507_v52  ;;  %v8990_v10 = vadd.f32 %v8738_v26, %v8507_v52  ;;  %v8998_v41 = vadd.f32 %v8746_v11, %v8507_v52  ;;  %v1117_v27 = vmax.f32 %v8762_v16, 0.0  ;;  %v7632_v26 = vld [vmem:[%s11107_s3 + $0x40] sm:$0xff]  }
 0x18c   :  { %11265 = vst [vmem:[#allocation15_spill] sm:$0xff] %v8958_v21  ;;  %11266 = vst [vmem:[#allocation44_spill] sm:$0xff] %v8962_v58  ;;  %v1119_v52 = vmax.f32 %v8770_v40, 0.0  ;;  %v1120_v11 = vmax.f32 %v8774_v33, 0.0  ;;  %v1123_v16 = vmax.f32 %v8786_v5, 0.0  ;;  %7046 = vmatprep.subr.bf16.mxu0 %v7632_v26  ;;  %v1127_v40 = vmax.f32 %v8802_v49, 0.0 }
 0x18d   :  { %11267 = vst [vmem:[#allocation45_spill] sm:$0xff] %v8966_v34  ;;  %11268 = vst [vmem:[#allocation46_spill] sm:$0xff] %v8970_v57  ;;  %v1128_v33 = vmax.f32 %v8806_v8, 0.0  ;;  %v7635_v5 = vld [vmem:[%s11107_s3 + $0xc8] sm:$0xff]   ;;  %v9042_v26 = vpack.c.bf16 %v1122_v47, %v1122_v47 }
 0x18e   :  { %11269 = vst [vmem:[#allocation47_spill] sm:$0xff] %v8974_v32  ;;  %11270 = vst [vmem:[#allocation48_spill] sm:$0xff] %v8978_v6  ;;  %v1114_v6 = vmax.f32 %v8750_v54, 0.0  ;;  %v1121_v54 = vmax.f32 %v8778_v17, 0.0  ;;  %v1129_v17 = vmax.f32 %v8810_v18, 0.0  ;;  %v6921_v32 = vpack.c.bf16 %v1117_v27, %v1117_v27  ;;  %v7637_v49 = vld [vmem:[%s11107_s3 + $0x88] sm:$0xff]   ;;  %7112 = vmatprep.subr.bf16.mxu1 %v7635_v5 }
 0x18f   :  { %11271 = vst [vmem:[#allocation49_spill] sm:$0xff] %v8982_v25  ;;  %11272 = vst [vmem:[#allocation50_spill] sm:$0xff] %v8986_v13  ;;  %v1116_v25 = vmax.f32 %v8758_v12, 0.0  ;;  %v1118_v13 = vmax.f32 %v8766_v38, 0.0  ;;  %v7634_v12 = vld [vmem:[%s11107_s3] sm:$0xff]   ;;  %v1124_v38 = vmax.f32 %v8790_v39, 0.0  ;;  %v9036_v8 = vpack.c.bf16 %v1119_v52, %v1119_v52  ;;  %7113 = vmatpush3.bf16.msra.mxu1 %v7637_v49 }
 0x190   :  { %11273 = vst [vmem:[#allocation51_spill] sm:$0xff] %v8990_v10  ;;  %11274 = vst [vmem:[#allocation52_spill] sm:$0xff] %v8994_v2  ;;  %v1126_v2 = vmax.f32 %v8798_v43, 0.0  ;;  %v6918_v28 = vpack.c.bf16 %v1114_v6, %v1114_v6  ;;  %7047 = vmatpush3.bf16.msra.mxu0 %v7634_v12  ;;  %v6919_v10 = vpack.c.bf16 %v1115_v37, %v1115_v37  ;;  %v7636_v43 = vld [vmem:[%s11107_s3 + $0x48] sm:$0xff]   ;;  %v7639_v12 = vld [vmem:[%s11107_s3 + $0xd0] sm:$0xff]   ;;  %v1222_v49 = vshll.u32 %v6921_v32, 16 }
 0x191   :  { %11275 = vst [vmem:[#allocation53_spill] sm:$0xff] %v8998_v41  ;;  %v1125_v41 = vmax.f32 %v8794_v45, 0.0  ;;  %v6920_v39 = vpack.c.bf16 %v1116_v25, %v1116_v25  ;;  %v9028_v45 = vpack.c.bf16 %v1118_v13, %v1118_v13  ;;  %v9038_v18 = vpack.c.bf16 %v1120_v11, %v1120_v11  ;;  %v7638_v25 = vld [vmem:[%s11107_s3 + $0x8] sm:$0xff]   ;;  %7048 = vmatprep.subr.bf16.mxu0 %v7636_v43 }
 0x192   :  { %v9040_v6 = vpack.c.bf16 %v1121_v54, %v1121_v54  ;;  %v9047_v13 = vpack.c.bf16 %v1123_v16, %v1123_v16  ;;  %v9049_v37 = vpack.c.bf16 %v1124_v38, %v1124_v38  ;;  %v9053_v7 = vpack.c.bf16 %v1126_v2, %v1126_v2  ;;  %v7640_v2 = vld [vmem:[%s11107_s3 + $0x50] sm:$0xff]   ;;  %7114 = vmatprep.subr.bf16.mxu1 %v7639_v12 }
 0x193   :  { %v9051_v27 = vpack.c.bf16 %v1125_v41, %v1125_v41  ;;  %v9055_v52 = vpack.c.bf16 %v1127_v40, %v1127_v40  ;;  %v9057_v11 = vpack.c.bf16 %v1128_v33, %v1128_v33  ;;  %v9059_v54 = vpack.c.bf16 %v1129_v17, %v1129_v17  ;;  %v7641_v40 = vld [vmem:[%s11107_s3 + $0x90] sm:$0xff]  }
 0x194   :  { %v1195_v47 = vshrl.u32 %v6918_v28, 16  ;;  %7049 = vmatpush3.bf16.msra.mxu0 %v7638_v25  ;;  %v1198_v16 = vshll.u32 %v6918_v28, 16  ;;  %v1203_v38 = vshrl.u32 %v6919_v10, 16  ;;  %v1206_v41 = vshll.u32 %v6919_v10, 16  ;;  %v7642_v28 = vld [vmem:[%s11107_s3 + $0x10] sm:$0xff]   ;;  %7115 = vmatpush3.bf16.msra.mxu1 %v7641_v40  ;;  %v7645_v40 = vld [vmem:[%s11107_s3 + $0x98] sm:$0xff]  }
 0x195   :  { %v1211_v5 = vshrl.u32 %v6920_v39, 16  ;;  %v1214_v17 = vshll.u32 %v6920_v39, 16  ;;  %v1219_v43 = vshrl.u32 %v6921_v32, 16  ;;  %v1227_v57 = vshrl.u32 %v9028_v45, 16  ;;  %7050 = vmatprep.subr.bf16.mxu0 %v7640_v2 }
 0x196   :  { %v9070_v33 = vrot.slane %v1195_v47, 7  ;;  %v9075_v10 = vrot.slane %v1203_v38, 7  ;;  %v1230_v34 = vshll.u32 %v9028_v45, 16  ;;  %v1235_v12 = vshrl.u32 %v9036_v8, 16  ;;  %v7643_v38 = vld [vmem:[%s11107_s3 + $0xd8] sm:$0xff]  }
 0x197   :  { %v9077_v25 = vrot.slane %v1211_v5, 7  ;;  %v9085_v32 = vrot.slane %v1219_v43, 7  ;;  %v7644_v43 = vld [vmem:[%s11107_s3 + $0x58] sm:$0xff]   ;;  %v9109_v39 = vrot.slane %v1227_v57, 7  ;;  %7116 = vmatprep.subr.bf16.mxu1 %v7643_v38  ;;  %v1238_v2 = vshll.u32 %v9036_v8, 16  ;;  %v7647_v57 = vld [vmem:[%s11107_s3 + $0xe0] sm:$0xff]  }
 0x198   :  { %v9082_v47 = vor.u32 %v1198_v16, %v9070_v33  ;;  %7051 = vmatpush3.bf16.msra.mxu0 %v7642_v28  ;;  %v9092_v5 = vor.u32 %v1206_v41, %v9075_v10  ;;  %v9111_v45 = vrot.slane %v1235_v12, 7  ;;  %v1243_v58 = vshrl.u32 %v9038_v18, 16  ;;  %v7648_v12 = vld [vmem:[%s11107_s3 + $0x60] sm:$0xff]   ;;  %7117 = vmatpush3.bf16.msra.mxu1 %v7645_v40  ;;  %v7652_v40 = vld [vmem:[%s11107_s3 + $0x68] sm:$0xff]  }
 0x199   :  { %v9096_v16 = vor.u32 %v1214_v17, %v9077_v25  ;;  %v9106_v28 = vor.u32 %v1222_v49, %v9085_v32  ;;  %v7646_v17 = vld [vmem:[%s11107_s3 + $0x18] sm:$0xff]   ;;  %v1246_v21 = vshll.u32 %v9038_v18, 16  ;;  %v1251_v49 = vshrl.u32 %v9040_v6, 16  ;;  %7052 = vmatprep.subr.bf16.mxu0 %v7644_v43  ;;  %v7649_v43 = vld [vmem:[%s11107_s3 + $0xa0] sm:$0xff]   ;;  %7118 = vmatprep.subr.bf16.mxu1 %v7647_v57  ;;  %v1361_v57 = vld [vmem:[#allocation2 + $0xc] sm:$0x1] }
 0x19a   :  { %v9127_v38 = vor.u32 %v1230_v34, %v9109_v39  ;;  %v1254_v18 = vshll.u32 %v9040_v6, 16  ;;  %v9139_v30 = vor.u32 %v1238_v2, %v9111_v45  ;;  %v9141_v34 = vrot.slane %v1243_v58, 7  ;;  %v7651_v6 = vld [vmem:[%s11107_s3 + $0xe8] sm:$0xff]  }
 0x19b   :  { %v9143_v8 = vrot.slane %v1251_v49, 7  ;;  %v1259_v41 = vshrl.u32 %v9042_v26, 16  ;;  %v1267_v2 = vshrl.u32 %v9047_v13, 16  ;;  %v1270_v58 = vshll.u32 %v9047_v13, 16 }
 0x19c   :  { %7053 = vmatpush3.bf16.msra.mxu0 %v7646_v17  ;;  %v1262_v17 = vshll.u32 %v9042_v26, 16  ;;  %v1275_v49 = vshrl.u32 %v9049_v37, 16  ;;  %v9157_v22 = vor.u32 %v1246_v21, %v9141_v34  ;;  %v1278_v13 = vshll.u32 %v9049_v37, 16  ;;  %7119 = vmatpush3.bf16.msra.mxu1 %v7649_v43  ;;  %v7653_v21 = vld [vmem:[%s11107_s3 + $0xa8] sm:$0xff]   ;;  %v7657_v37 = vld [vmem:[%s11107_s3 + $0x70] sm:$0xff]  }
 0x19d   :  { %7054 = vmatprep.subr.bf16.mxu0 %v7648_v12  ;;  %v9161_v12 = vor.u32 %v1254_v18, %v9143_v8  ;;  %v9164_v62 = vrot.slane %v1259_v41, 7  ;;  %v9166_v20 = vrot.slane %v1267_v2, 7  ;;  %v7654_v18 = vld [vmem:[%s11107_s3 + $0x28] sm:$0xff]   ;;  %v1283_v0 = vshrl.u32 %v9051_v27, 16  ;;  %7120 = vmatprep.subr.bf16.mxu1 %v7651_v6 }
 0x19e   :  { %v9168_v26 = vrot.slane %v1275_v49, 7  ;;  %v1286_v41 = vshll.u32 %v9051_v27, 16  ;;  %v1291_v2 = vshrl.u32 %v9053_v7, 16  ;;  %v1294_v49 = vshll.u32 %v9053_v7, 16  ;;  %v1358_v43 = vld [vmem:[#allocation2 + $0x8] sm:$0xf] }
 0x19f   :  { %v9188_v60 = vor.u32 %v1262_v17, %v9164_v62  ;;  %v9192_v7 = vor.u32 %v1270_v58, %v9166_v20  ;;  %v9199_v51 = vrot.slane %v1283_v0, 7  ;;  %v1373_v17 = vld [vmem:[#allocation2 + $0x1c] sm:$0x1]  ;;  %v1299_v19 = vshrl.u32 %v9055_v52, 16  ;;  %v7659_v0 = vld [vmem:[%s11107_s3 + $0x30] sm:$0xff]  }
 0x1a0   :  { %7055 = vmatpush3.bf16.msra.mxu0 %v7650_v61  ;;  %v7656_v61 = vld [vmem:[%s11107_s3 + $0xf0] sm:$0xff]   ;;  %v9196_v56 = vor.u32 %v1278_v13, %v9168_v26  ;;  %v9201_v15 = vrot.slane %v1291_v2, 7  ;;  %v1302_v27 = vshll.u32 %v9055_v52, 16  ;;  %v1307_v58 = vshrl.u32 %v9057_v11, 16  ;;  %7121 = vmatpush3.bf16.msra.mxu1 %v7653_v21  ;;  %v1376_v2 = vld [vmem:[#allocation2 + $0x20] sm:$0xf] }
 0x1a1   :  { %7056 = vmatprep.subr.bf16.mxu0 %v7652_v40  ;;  %v1364_v40 = vld [vmem:[#allocation2 + $0x10] sm:$0xf]  ;;  %v1310_v6 = vshll.u32 %v9057_v11, 16  ;;  %v9214_v50 = vor.u32 %v1286_v41, %v9199_v51  ;;  %7122 = vmatprep.subr.bf16.mxu1 %v7656_v61  ;;  %v9227_v41 = vrot.slane %v1299_v19, 7  ;;  %v1318_v52 = vshll.u32 %v9059_v54, 16 }
 0x1a2   :  { %v7658_v13 = vld [vmem:[%s11107_s3 + $0xb0] sm:$0xff]   ;;  %v9218_v11 = vor.u32 %v1294_v49, %v9201_v15  ;;  %v9229_v46 = vrot.slane %v1307_v58, 7  ;;  %v1315_v49 = vshrl.u32 %v9059_v54, 16  ;;  %v1397_v21 = vld [vmem:[#allocation2 + $0x3c] sm:$0x1]  ;;  %v1359_v42 = vsel %vm8660_vm5, %v9082_v47, %v1358_v43 }
 0x1a3   :  { %v1382_v61 = vld [vmem:[#allocation2 + $0x28] sm:$0xf]  ;;  %v11276_v29 = vrot.slane %v9070_v33, 4  ;;  %v1365_v58 = vsel %vm8660_vm5, %v9092_v5, %v1364_v40  ;;  %v11278_v54 = vrot.slane %v9075_v10, 4  ;;  %v9248_v14 = vor.u32 %v1302_v27, %v9227_v41  ;;  %1360 = vst [vmem:[#allocation2 + $0x8] sm:$0xf] %v1359_v42 }
 0x1a4   :  { %7057 = vmatpush3.bf16.msra.mxu0 %v7654_v18  ;;  %v7660_v18 = vld [vmem:[%s11107_s3 + $0xf8] sm:$0xff]   ;;  %v1305_v47 = vrot.slane %v9227_v41, 4  ;;  %v9252_v33 = vor.u32 %v1310_v6, %v9229_v46  ;;  %1366 = vst [vmem:[#allocation2 + $0x10] sm:$0xf] %v1365_v58  ;;  %7123 = vmatpush3.bf16.msra.mxu1 %v7658_v13  ;;  %v1421_v10 = vld [vmem:[#allocation2 + $0x64] sm:$0x1]  ;;  %v1371_v6 = vsel %vm8660_vm5, %v9096_v16, %v1370_v4 }
 0x1a5   :  { %7058 = vmatprep.subr.bf16.mxu0 %v7657_v37  ;;  %v1403_v37 = vld [vmem:[#allocation2 + $0x44] sm:$0x1]  ;;  %v1362_v19 = vsel %vm8000_vm2, %v11276_v29, %v1361_v57  ;;  %v1368_v36 = vsel %vm8000_vm2, %v11278_v54, %v1367_v24  ;;  %v1313_v29 = vrot.slane %v9229_v46, 4  ;;  %v7662_v24 = vld [vmem:[%s11107_s3 + $0xb8] sm:$0xff]   ;;  %v1406_v5 = vld [vmem:[#allocation2 + $0x50] sm:$0xf]  ;;  %v1377_v40 = vsel %vm8660_vm5, %v9106_v28, %v1376_v2  ;;  %7124 = vmatprep.subr.bf16.mxu1 %v7660_v18 }
 0x1a6   :  { %1363 = vst [vmem:[#allocation2 + $0xc] sm:$0x1] %v1362_v19  ;;  %1369 = vst [vmem:[#allocation2 + $0x14] sm:$0x1] %v1368_v36  ;;  %v1427_v57 = vld [vmem:[#allocation2 + $0x6c] sm:$0x1]  ;;  %v1383_v16 = vsel %vm8660_vm5, %v9127_v38, %v1382_v61 }
 0x1a7   :  { %v1415_v43 = vld [vmem:[#allocation2 + $0x5c] sm:$0x1]  ;;  %v9258_v27 = vrot.slane %v1315_v49, 7  ;;  %v11279_v42 = vrot.slane %v9077_v25, 4  ;;  %v1412_v49 = vld [vmem:[#allocation2 + $0x58] sm:$0xf] }
 0x1a8   :  { %7059 = vmatpush3.bf16.msra.mxu0 %v7659_v0  ;;  %v7663_v13 = vld [vmem:[%s11107_s3 + $0x38] sm:$0xff]   ;;  %v1418_v0 = vld [vmem:[#allocation2 + $0x60] sm:$0xf]  ;;  %v1433_v19 = vld [vmem:[#allocation2 + $0x74] sm:$0x1]  ;;  %v11280_v4 = vrot.slane %v9085_v32, 4  ;;  %7125 = vmatpush3.bf16.msra.mxu1 %v7662_v24 }
 0x1a9   :  { %v1374_v36 = vsel %vm8000_vm2, %v11279_v42, %v1373_v17  ;;  %7060 = vmatprep.subr.bf16.mxu0 %v7661_v44  ;;  %1372 = vst [vmem:[#allocation2 + $0x18] sm:$0xf] %v1371_v6  ;;  %1378 = vst [vmem:[#allocation2 + $0x20] sm:$0xf] %v1377_v40  ;;  %v11281_v44 = vrot.slane %v9109_v39, 4  ;;  %v1389_v17 = vsel %vm8660_vm5, %v9139_v30, %v1388_v35  ;;  %v1321_v58 = vrot.slane %v9258_v27, 4 }
 0x1aa   :  { %1375 = vst [vmem:[#allocation2 + $0x1c] sm:$0x1] %v1374_v36  ;;  %v1380_v25 = vsel %vm8000_vm2, %v11280_v4, %v1379_v31  ;;  %v1424_v2 = vld [vmem:[#allocation2 + $0x68] sm:$0xf]  ;;  %v1430_v18 = vld [vmem:[#allocation2 + $0x70] sm:$0xf]  ;;  %v1320_v32 = vor.u32 %v1318_v52, %v9258_v27 }
 0x1ab   :  { %v1386_v28 = vsel %vm8000_vm2, %v11281_v44, %v1385_v9  ;;  %1381 = vst [vmem:[#allocation2 + $0x24] sm:$0x1] %v1380_v25  ;;  %1384 = vst [vmem:[#allocation2 + $0x28] sm:$0xf] %v1383_v16  ;;  %v11282_v31 = vrot.slane %v9111_v45, 4  ;;  %v1395_v9 = vsel %vm8660_vm5, %v9157_v22, %v1394_v53  ;;  %v11283_v52 = vrot.slane %v9141_v34, 4 }
 0x1ac   :  { %1387 = vst [vmem:[#allocation2 + $0x2c] sm:$0x1] %v1386_v28  ;;  %1390 = vst [vmem:[#allocation2 + $0x30] sm:$0xf] %v1389_v17  ;;  %v1442_v35 = vld [vmem:[#allocation2 + $0x80] sm:$0xf]  ;;  %v1401_v45 = vsel %vm8660_vm5, %v9161_v12, %v1400_v63  ;;  %v1407_v53 = vsel %vm8660_vm5, %v9188_v60, %v1406_v5  ;;  %7061 = vmatpush3.bf16.msra.mxu0 %v7663_v13 }
 0x1ad   :  { %v1392_v39 = vsel %vm8000_vm2, %v11282_v31, %v1391_v23  ;;  %v1436_v30 = vld [vmem:[#allocation2 + $0x78] sm:$0xf]  ;;  %v1439_v38 = vld [vmem:[#allocation2 + $0x7c] sm:$0x1]  ;;  %1396 = vst [vmem:[#allocation2 + $0x38] sm:$0xf] %v1395_v9  ;;  %v1398_v61 = vsel %vm8000_vm2, %v11283_v52, %v1397_v21 }
 0x1ae   :  { %1393 = vst [vmem:[#allocation2 + $0x34] sm:$0x1] %v1392_v39  ;;  %v11284_v23 = vrot.slane %v9143_v8, 4  ;;  %v1445_v22 = vld [vmem:[#allocation2 + $0x84] sm:$0x1]  ;;  %v11285_v21 = vrot.slane %v9164_v62, 4  ;;  %v1413_v8 = vsel %vm8660_vm5, %v9192_v7, %v1412_v49 }
 0x1af   :  { %v1448_v27 = vld [vmem:[#allocation2 + $0x88] sm:$0xf]  ;;  %v1451_v34 = vld [vmem:[#allocation2 + $0x8c] sm:$0x1]  ;;  %1399 = vst [vmem:[#allocation2 + $0x3c] sm:$0x1] %v1398_v61 }
 0x1b0   :  { %v1404_v54 = vsel %vm8000_vm2, %v11284_v23, %v1403_v37  ;;  %1402 = vst [vmem:[#allocation2 + $0x40] sm:$0xf] %v1401_v45  ;;  %1408 = vst [vmem:[#allocation2 + $0x50] sm:$0xf] %v1407_v53  ;;  %v1410_v63 = vsel %vm8000_vm2, %v11285_v21, %v1409_v48  ;;  %v11286_v12 = vrot.slane %v9166_v20, 4  ;;  %v1419_v37 = vsel %vm8660_vm5, %v9196_v56, %v1418_v0  ;;  %v11290_v5 = vld [vmem:[#allocation20_spill] sm:$0xff] }
 0x1b1   :  { %1405 = vst [vmem:[#allocation2 + $0x44] sm:$0x1] %v1404_v54  ;;  %1411 = vst [vmem:[#allocation2 + $0x54] sm:$0x1] %v1410_v63  ;;  %v11287_v48 = vrot.slane %v9168_v26, 4  ;;  %v1425_v20 = vsel %vm8660_vm5, %v9214_v50, %v1424_v2  ;;  %v11288_v7 = vrot.slane %v9199_v51, 4  ;;  %v1431_v56 = vsel %vm8660_vm5, %v9218_v11, %v1430_v18 }
 0x1b2   :  { %v1416_v60 = vsel %vm8000_vm2, %v11286_v12, %v1415_v43  ;;  %1414 = vst [vmem:[#allocation2 + $0x58] sm:$0xf] %v1413_v8  ;;  %1420 = vst [vmem:[#allocation2 + $0x60] sm:$0xf] %v1419_v37  ;;  %v11289_v26 = vrot.slane %v9201_v15, 4  ;;  %v1437_v50 = vsel %vm8660_vm5, %v9248_v14, %v1436_v30  ;;  %v1440_v51 = vsel %vm8000_vm2, %v1305_v47, %v1439_v38  ;;  %v11291_v43 = vld [vmem:[#allocation26_spill] sm:$0xff] }
 0x1b3   :  { %1417 = vst [vmem:[#allocation2 + $0x5c] sm:$0x1] %v1416_v60  ;;  %v1422_v62 = vsel %vm8000_vm2, %v11287_v48, %v1421_v10  ;;  %v1428_v24 = vsel %vm8000_vm2, %v11288_v7, %v1427_v57  ;;  %1426 = vst [vmem:[#allocation2 + $0x68] sm:$0xf] %v1425_v20  ;;  %v1443_v11 = vsel %vm8660_vm5, %v9252_v33, %v1442_v35  ;;  %v1548_v47 = vmax.f32 %v8814_v1, 0.0  ;;  %v11292_v6 = vld [vmem:[#allocation24_spill] sm:$0xff] }
 0x1b4   :  { %1423 = vst [vmem:[#allocation2 + $0x64] sm:$0x1] %v1422_v62  ;;  %1429 = vst [vmem:[#allocation2 + $0x6c] sm:$0x1] %v1428_v24  ;;  %v1434_v10 = vsel %vm8000_vm2, %v11289_v26, %v1433_v19  ;;  %v1446_v15 = vsel %vm8000_vm2, %v1313_v29, %v1445_v22  ;;  %v1449_v14 = vsel %vm8660_vm5, %v1320_v32, %v1448_v27  ;;  %v1549_v33 = vmax.f32 %v8818_v3, 0.0  ;;  %v11293_v29 = vld [vmem:[#allocation28_spill] sm:$0xff] }
 0x1b5   :  { %1432 = vst [vmem:[#allocation2 + $0x70] sm:$0xf] %v1431_v56  ;;  %1435 = vst [vmem:[#allocation2 + $0x74] sm:$0x1] %v1434_v10  ;;  %v1452_v41 = vsel %vm8000_vm2, %v1321_v58, %v1451_v34  ;;  %v1550_v57 = vmax.f32 %v11290_v5, 0.0  ;;  %v1551_v46 = vmax.f32 %v11291_v43, 0.0  ;;  %v6934_v35 = vpack.c.bf16 %v1548_v47, %v1548_v47 }
 0x1b6   :  { %1438 = vst [vmem:[#allocation2 + $0x78] sm:$0xf] %v1437_v50  ;;  %1441 = vst [vmem:[#allocation2 + $0x7c] sm:$0x1] %v1440_v51  ;;  %v1552_v42 = vmax.f32 %v11292_v6, 0.0  ;;  %v1553_v36 = vmax.f32 %v11293_v29, 0.0  ;;  %v6935_v30 = vpack.c.bf16 %v1549_v33, %v1549_v33 }
 0x1b7   :  { %1444 = vst [vmem:[#allocation2 + $0x80] sm:$0xf] %v1443_v11  ;;  %1447 = vst [vmem:[#allocation2 + $0x84] sm:$0x1] %v1446_v15  ;;  %v11294_v40 = vld [vmem:[#allocation33_spill] sm:$0xff]  ;;  %v11295_v0 = vld [vmem:[#allocation36_spill] sm:$0xff]  ;;  %v6936_v38 = vpack.c.bf16 %v1550_v57, %v1550_v57  ;;  %v6937_v52 = vpack.c.bf16 %v1551_v46, %v1551_v46 }
 0x1b8   :  { %1450 = vst [vmem:[#allocation2 + $0x88] sm:$0xf] %v1449_v14  ;;  %1453 = vst [vmem:[#allocation2 + $0x8c] sm:$0x1] %v1452_v41  ;;  %v1554_v13 = vmax.f32 %v11294_v40, 0.0  ;;  %v1555_v49 = vmax.f32 %v11295_v0, 0.0  ;;  %v6938_v61 = vpack.c.bf16 %v1552_v42, %v1552_v42  ;;  %v6939_v45 = vpack.c.bf16 %v1553_v36, %v1553_v36 }
 0x1b9   :  { %v11296_v19 = vld [vmem:[#allocation31_spill] sm:$0xff]  ;;  %v11298_v16 = vld [vmem:[#allocation14_spill] sm:$0xff]  ;;  %v11300_v17 = vld [vmem:[#allocation12_spill] sm:$0xff]  ;;  %v1629_v60 = vshrl.u32 %v6934_v35, 16  ;;  %v1632_v37 = vshll.u32 %v6934_v35, 16  ;;  %v1637_v48 = vshrl.u32 %v6935_v30, 16 }
 0x1ba   :  { %v1556_v4 = vmax.f32 %v11296_v19, 0.0  ;;  %v11297_v1 = vld [vmem:[#allocation35_spill] sm:$0xff]  ;;  %v1558_v44 = vmax.f32 %v11298_v16, 0.0  ;;  %v11299_v28 = vld [vmem:[#allocation18_spill] sm:$0xff]  ;;  %v1560_v2 = vmax.f32 %v11300_v17, 0.0  ;;  %v11301_v18 = vld [vmem:[#allocation16_spill] sm:$0xff]  ;;  %v6940_v23 = vpack.c.bf16 %v1554_v13, %v1554_v13 }
 0x1bb   :  { %v1557_v25 = vmax.f32 %v11297_v1, 0.0  ;;  %v1559_v3 = vmax.f32 %v11299_v28, 0.0  ;;  %v1561_v32 = vmax.f32 %v11301_v18, 0.0  ;;  %v11302_v58 = vld [vmem:[#allocation21_spill] sm:$0xff]  ;;  %v11303_v39 = vld [vmem:[#allocation23_spill] sm:$0xff]  ;;  %v6941_v54 = vpack.c.bf16 %v1555_v49, %v1555_v49 }
 0x1bc   :  { %v1562_v31 = vmax.f32 %v11302_v58, 0.0  ;;  %v1563_v9 = vmax.f32 %v11303_v39, 0.0  ;;  %v9376_v53 = vpack.c.bf16 %v1556_v4, %v1556_v4  ;;  %v9380_v27 = vpack.c.bf16 %v1558_v44, %v1558_v44  ;;  %v7666_v15 = vld [vmem:[%s11107_s3 + $0x140] sm:$0xff]  }
 0x1bd   :  { %v9378_v22 = vpack.c.bf16 %v1557_v25, %v1557_v25  ;;  %v9382_v34 = vpack.c.bf16 %v1559_v3, %v1559_v3  ;;  %v9384_v21 = vpack.c.bf16 %v1560_v2, %v1560_v2  ;;  %v9386_v63 = vpack.c.bf16 %v1561_v32, %v1561_v32  ;;  %7174 = vmatprep.subr.bf16.mxu0 %v7666_v15 }
 0x1be   :  { %v9388_v8 = vpack.c.bf16 %v1562_v31, %v1562_v31  ;;  %v9390_v12 = vpack.c.bf16 %v1563_v9, %v1563_v9  ;;  %v1640_v62 = vshll.u32 %v6935_v30, 16  ;;  %v1645_v20 = vshrl.u32 %v6936_v38, 16 }
 0x1bf   :  { %v9392_v7 = vrot.slane %v1629_v60, 7  ;;  %v1648_v24 = vshll.u32 %v6936_v38, 16  ;;  %v1653_v56 = vshrl.u32 %v6937_v52, 16  ;;  %v1656_v26 = vshll.u32 %v6937_v52, 16 }
 0x1c0   :  { %v9394_v10 = vrot.slane %v1637_v48, 7  ;;  %v9396_v50 = vrot.slane %v1645_v20, 7  ;;  %v1661_v51 = vshrl.u32 %v6938_v61, 16  ;;  %v1664_v11 = vshll.u32 %v6938_v61, 16 }
 0x1c1   :  { %v9402_v14 = vor.u32 %v1632_v37, %v9392_v7  ;;  %v1635_v41 = vrot.slane %v9392_v7, 4  ;;  %v9405_v47 = vrot.slane %v1653_v56, 7  ;;  %v1669_v33 = vshrl.u32 %v6939_v45, 16  ;;  %v1801_v56 = vld [vmem:[#allocation3 + $0x18] sm:$0xf] }
 0x1c2   :  { %v9408_v5 = vor.u32 %v1640_v62, %v9394_v10  ;;  %v1643_v57 = vrot.slane %v9394_v10, 4  ;;  %v9412_v43 = vor.u32 %v1648_v24, %v9396_v50  ;;  %v1651_v46 = vrot.slane %v9396_v50, 4  ;;  %v1789_v62 = vld [vmem:[#allocation3 + $0x8] sm:$0xf]  ;;  %v1852_v10 = vld [vmem:[#allocation3 + $0x64] sm:$0x1] }
 0x1c3   :  { %v9416_v6 = vor.u32 %v1656_v26, %v9405_v47  ;;  %v1659_v42 = vrot.slane %v9405_v47, 4  ;;  %v9419_v29 = vrot.slane %v1661_v51, 7  ;;  %v9421_v36 = vrot.slane %v1669_v33, 7  ;;  %v1804_v26 = vld [vmem:[#allocation3 + $0x1c] sm:$0x1] }
 0x1c4   :  { %v1672_v40 = vshll.u32 %v6939_v45, 16  ;;  %v1677_v13 = vshrl.u32 %v6940_v23, 16  ;;  %v1680_v0 = vshll.u32 %v6940_v23, 16  ;;  %v1685_v49 = vshrl.u32 %v6941_v54, 16  ;;  %v1795_v51 = vld [vmem:[#allocation3 + $0x10] sm:$0xf] }
 0x1c5   :  { %v9424_v19 = vor.u32 %v1664_v11, %v9419_v29  ;;  %v1667_v4 = vrot.slane %v9419_v29, 4  ;;  %v1675_v1 = vrot.slane %v9421_v36, 4  ;;  %v1688_v25 = vshll.u32 %v6941_v54, 16 }
 0x1c6   :  { %v9429_v16 = vor.u32 %v1672_v40, %v9421_v36  ;;  %v9431_v44 = vrot.slane %v1677_v13, 7  ;;  %v9433_v28 = vrot.slane %v1685_v49, 7  ;;  %v1693_v3 = vshrl.u32 %v9376_v53, 16  ;;  %v1807_v13 = vld [vmem:[#allocation3 + $0x20] sm:$0xf] }
 0x1c7   :  { %v1696_v17 = vshll.u32 %v9376_v53, 16  ;;  %v1701_v2 = vshrl.u32 %v9378_v22, 16  ;;  %v1704_v18 = vshll.u32 %v9378_v22, 16  ;;  %v1709_v32 = vshrl.u32 %v9380_v27, 16  ;;  %v1792_v53 = vld [vmem:[#allocation3 + $0xc] sm:$0x1] }
 0x1c8   :  { %v9441_v58 = vor.u32 %v1680_v0, %v9431_v44  ;;  %v1683_v31 = vrot.slane %v9431_v44, 4  ;;  %v9445_v39 = vor.u32 %v1688_v25, %v9433_v28  ;;  %v1691_v9 = vrot.slane %v9433_v28, 4  ;;  %v1798_v22 = vld [vmem:[#allocation3 + $0x14] sm:$0x1]  ;;  %v1810_v0 = vld [vmem:[#allocation3 + $0x24] sm:$0x1] }
 0x1c9   :  { %v9448_v35 = vrot.slane %v1693_v3, 7  ;;  %v9450_v30 = vrot.slane %v1701_v2, 7  ;;  %v9452_v38 = vrot.slane %v1709_v32, 7  ;;  %v1712_v52 = vshll.u32 %v9380_v27, 16  ;;  %v1816_v49 = vld [vmem:[#allocation3 + $0x2c] sm:$0x1] }
 0x1ca   :  { %v1717_v61 = vshrl.u32 %v9382_v34, 16  ;;  %v1720_v45 = vshll.u32 %v9382_v34, 16  ;;  %v1725_v23 = vshrl.u32 %v9384_v21, 16  ;;  %v1728_v54 = vshll.u32 %v9384_v21, 16  ;;  %v1819_v34 = vld [vmem:[#allocation3 + $0x30] sm:$0xf] }
 0x1cb   :  { %v9460_v60 = vor.u32 %v1696_v17, %v9448_v35  ;;  %v9464_v48 = vor.u32 %v1704_v18, %v9450_v30  ;;  %v9468_v20 = vor.u32 %v1712_v52, %v9452_v38  ;;  %v1733_v11 = vshrl.u32 %v9386_v63, 16  ;;  %v1825_v18 = vld [vmem:[#allocation3 + $0x38] sm:$0xf]  ;;  %v1822_v27 = vld [vmem:[#allocation3 + $0x34] sm:$0x1] }
 0x1cc   :  { %v9471_v24 = vrot.slane %v1717_v61, 7  ;;  %v9473_v21 = vrot.slane %v1725_v23, 7  ;;  %v1736_v15 = vshll.u32 %v9386_v63, 16  ;;  %v1741_v33 = vshrl.u32 %v9388_v8, 16  ;;  %v1828_v61 = vld [vmem:[#allocation3 + $0x3c] sm:$0x1] }
 0x1cd   :  { %v1744_v40 = vshll.u32 %v9388_v8, 16  ;;  %v9487_v32 = vrot.slane %v1733_v11, 7  ;;  %v1749_v8 = vshrl.u32 %v9390_v12, 16  ;;  %v1752_v52 = vshll.u32 %v9390_v12, 16  ;;  %v1813_v23 = vld [vmem:[#allocation3 + $0x28] sm:$0xf] }
 0x1ce   :  { %v9480_v25 = vor.u32 %v1720_v45, %v9471_v24  ;;  %v9484_v17 = vor.u32 %v1728_v54, %v9473_v21  ;;  %v9489_v63 = vrot.slane %v1741_v33, 7  ;;  %v1834_v45 = vld [vmem:[#allocation3 + $0x44] sm:$0x1]  ;;  %v1790_v54 = vsel %vm8660_vm5, %v9402_v14, %v1789_v62  ;;  %v1831_v2 = vld [vmem:[#allocation3 + $0x40] sm:$0xf] }
 0x1cf   :  { %v1793_v11 = vsel %vm8000_vm2, %v1635_v41, %v1792_v53  ;;  %v1796_v33 = vsel %vm8660_vm5, %v9408_v5, %v1795_v51  ;;  %v1799_v12 = vsel %vm8000_vm2, %v1643_v57, %v1798_v22  ;;  %v1840_v3 = vld [vmem:[#allocation3 + $0x54] sm:$0x1]  ;;  %v9508_v37 = vor.u32 %v1736_v15, %v9487_v32  ;;  %1791 = vst [vmem:[#allocation3 + $0x8] sm:$0xf] %v1790_v54  ;;  %v1837_v5 = vld [vmem:[#allocation3 + $0x50] sm:$0xf] }
 0x1d0   :  { %v1739_v14 = vrot.slane %v9487_v32, 4  ;;  %v9512_v7 = vor.u32 %v1744_v40, %v9489_v63  ;;  %v1747_v41 = vrot.slane %v9489_v63, 4  ;;  %1794 = vst [vmem:[#allocation3 + $0xc] sm:$0x1] %v1793_v11  ;;  %1797 = vst [vmem:[#allocation3 + $0x10] sm:$0xf] %v1796_v33  ;;  %v1802_v62 = vsel %vm8660_vm5, %v9412_v43, %v1801_v56 }
 0x1d1   :  { %1800 = vst [vmem:[#allocation3 + $0x14] sm:$0x1] %v1799_v12  ;;  %v1858_v53 = vld [vmem:[#allocation3 + $0x6c] sm:$0x1]  ;;  %v1846_v57 = vld [vmem:[#allocation3 + $0x5c] sm:$0x1]  ;;  %v1805_v51 = vsel %vm8000_vm2, %v1651_v46, %v1804_v26  ;;  %v1808_v15 = vsel %vm8660_vm5, %v9416_v6, %v1807_v13  ;;  %v1811_v43 = vsel %vm8000_vm2, %v1659_v42, %v1810_v0  ;;  %v1814_v50 = vsel %vm8660_vm5, %v9424_v19, %v1813_v23 }
 0x1d2   :  { %v9515_v22 = vrot.slane %v1749_v8, 7  ;;  %v1849_v40 = vld [vmem:[#allocation3 + $0x60] sm:$0xf]  ;;  %v1843_v54 = vld [vmem:[#allocation3 + $0x58] sm:$0xf]  ;;  %v1817_v46 = vsel %vm8000_vm2, %v1667_v4, %v1816_v49  ;;  %v1820_v6 = vsel %vm8660_vm5, %v9429_v16, %v1819_v34  ;;  %v1823_v42 = vsel %vm8000_vm2, %v1675_v1, %v1822_v27  ;;  %v11310_v23 = vld [vmem:[#allocation22_spill] sm:$0xff] }
 0x1d3   :  { %v1864_v11 = vld [vmem:[#allocation3 + $0x74] sm:$0x1]  ;;  %1803 = vst [vmem:[#allocation3 + $0x18] sm:$0xf] %v1802_v62  ;;  %1806 = vst [vmem:[#allocation3 + $0x1c] sm:$0x1] %v1805_v51  ;;  %v1826_v29 = vsel %vm8660_vm5, %v9441_v58, %v1825_v18  ;;  %v1829_v34 = vsel %vm8000_vm2, %v1683_v31, %v1828_v61  ;;  %v1832_v36 = vsel %vm8660_vm5, %v9445_v39, %v1831_v2 }
 0x1d4   :  { %1809 = vst [vmem:[#allocation3 + $0x20] sm:$0xf] %v1808_v15  ;;  %v1855_v56 = vld [vmem:[#allocation3 + $0x68] sm:$0xf]  ;;  %v1861_v26 = vld [vmem:[#allocation3 + $0x70] sm:$0xf]  ;;  %v1754_v47 = vor.u32 %v1752_v52, %v9515_v22  ;;  %v1835_v1 = vsel %vm8000_vm2, %v1691_v9, %v1834_v45  ;;  %v1838_v58 = vsel %vm8660_vm5, %v9460_v60, %v1837_v5  ;;  %v1844_v28 = vsel %vm8660_vm5, %v9464_v48, %v1843_v54 }
 0x1d5   :  { %v1755_v13 = vrot.slane %v9515_v22, 4  ;;  %1812 = vst [vmem:[#allocation3 + $0x24] sm:$0x1] %v1811_v43  ;;  %1815 = vst [vmem:[#allocation3 + $0x28] sm:$0xf] %v1814_v50  ;;  %v11304_v44 = vrot.slane %v9448_v35, 4  ;;  %v1850_v60 = vsel %vm8660_vm5, %v9468_v20, %v1849_v40  ;;  %v1862_v20 = vsel %vm8660_vm5, %v9484_v17, %v1861_v26 }
 0x1d6   :  { %1818 = vst [vmem:[#allocation3 + $0x2c] sm:$0x1] %v1817_v46  ;;  %1821 = vst [vmem:[#allocation3 + $0x30] sm:$0xf] %v1820_v6  ;;  %v1873_v19 = vld [vmem:[#allocation3 + $0x80] sm:$0xf] }
 0x1d7   :  { %v1867_v4 = vld [vmem:[#allocation3 + $0x78] sm:$0xf]  ;;  %v1870_v16 = vld [vmem:[#allocation3 + $0x7c] sm:$0x1]  ;;  %1824 = vst [vmem:[#allocation3 + $0x34] sm:$0x1] %v1823_v42  ;;  %v1841_v31 = vsel %vm8000_vm2, %v11304_v44, %v1840_v3  ;;  %v1874_v17 = vsel %vm8660_vm5, %v9512_v7, %v1873_v19 }
 0x1d8   :  { %1827 = vst [vmem:[#allocation3 + $0x38] sm:$0xf] %v1826_v29  ;;  %v1876_v27 = vld [vmem:[#allocation3 + $0x84] sm:$0x1]  ;;  %v1879_v0 = vld [vmem:[#allocation3 + $0x88] sm:$0xf] }
 0x1d9   :  { %v1882_v49 = vld [vmem:[#allocation3 + $0x8c] sm:$0x1]  ;;  %1830 = vst [vmem:[#allocation3 + $0x3c] sm:$0x1] %v1829_v34  ;;  %1833 = vst [vmem:[#allocation3 + $0x40] sm:$0xf] %v1832_v36 }
 0x1da   :  { %1836 = vst [vmem:[#allocation3 + $0x44] sm:$0x1] %v1835_v1  ;;  %1839 = vst [vmem:[#allocation3 + $0x50] sm:$0xf] %v1838_v58  ;;  %v11305_v39 = vrot.slane %v9450_v30, 4  ;;  %v11306_v35 = vrot.slane %v9452_v38, 4  ;;  %v1856_v30 = vsel %vm8660_vm5, %v9480_v25, %v1855_v56  ;;  %v1871_v25 = vsel %vm8000_vm2, %v1739_v14, %v1870_v16 }
 0x1db   :  { %1842 = vst [vmem:[#allocation3 + $0x54] sm:$0x1] %v1841_v31  ;;  %1845 = vst [vmem:[#allocation3 + $0x58] sm:$0xf] %v1844_v28  ;;  %v11307_v48 = vrot.slane %v9471_v24, 4  ;;  %v11308_v38 = vrot.slane %v9473_v21, 4  ;;  %v1868_v24 = vsel %vm8660_vm5, %v9508_v37, %v1867_v4  ;;  %v1877_v21 = vsel %vm8000_vm2, %v1747_v41, %v1876_v27 }
 0x1dc   :  { %v1847_v9 = vsel %vm8000_vm2, %v11305_v39, %v1846_v57  ;;  %1851 = vst [vmem:[#allocation3 + $0x60] sm:$0xf] %v1850_v60  ;;  %v1853_v3 = vsel %vm8000_vm2, %v11306_v35, %v1852_v10  ;;  %1857 = vst [vmem:[#allocation3 + $0x68] sm:$0xf] %v1856_v30  ;;  %v7655_v8 = vld [vmem:[#allocation3 + $0x8] ss:$8 sps:$4 sm:$0xff]   ;;  %v1880_v37 = vsel %vm8660_vm5, %v1754_v47, %v1879_v0 }
 0x1dd   :  { %1848 = vst [vmem:[#allocation3 + $0x5c] sm:$0x1] %v1847_v9  ;;  %v1859_v2 = vsel %vm8000_vm2, %v11307_v48, %v1858_v53  ;;  %1854 = vst [vmem:[#allocation3 + $0x64] sm:$0x1] %v1853_v3  ;;  %v1865_v18 = vsel %vm8000_vm2, %v11308_v38, %v1864_v11  ;;  %v1883_v32 = vsel %vm8000_vm2, %v1755_v13, %v1882_v49  ;;  %v11309_v52 = vld [vmem:[#allocation19_spill] sm:$0xff]  ;;  %v1980_v45 = vmax.f32 %v11310_v23, 0.0 }
 0x1de   :  { %1860 = vst [vmem:[#allocation3 + $0x6c] sm:$0x1] %v1859_v2  ;;  %1863 = vst [vmem:[#allocation3 + $0x70] sm:$0xf] %v1862_v20  ;;  %v1979_v61 = vmax.f32 %v11309_v52, 0.0  ;;  %v11311_v33 = vld [vmem:[#allocation27_spill] sm:$0xff]  ;;  %5519 = vmatprep.mubr.bf16.mxu1 %v7655_v8 }
 0x1df   :  { %1866 = vst [vmem:[#allocation3 + $0x74] sm:$0x1] %v1865_v18  ;;  %1869 = vst [vmem:[#allocation3 + $0x78] sm:$0xf] %v1868_v24  ;;  %v1981_v12 = vmax.f32 %v11311_v33, 0.0  ;;  %v11312_v14 = vld [vmem:[#allocation30_spill] sm:$0xff]  ;;  %v6951_v16 = vpack.c.bf16 %v1980_v45, %v1980_v45 }
 0x1e0   :  { %1872 = vst [vmem:[#allocation3 + $0x7c] sm:$0x1] %v1871_v25  ;;  %1875 = vst [vmem:[#allocation3 + $0x80] sm:$0xf] %v1874_v17  ;;  %v1982_v63 = vmax.f32 %v11312_v14, 0.0  ;;  %v11313_v7 = vld [vmem:[#allocation25_spill] sm:$0xff]  ;;  %v6950_v4 = vpack.c.bf16 %v1979_v61, %v1979_v61 }
 0x1e1   :  { %1878 = vst [vmem:[#allocation3 + $0x84] sm:$0x1] %v1877_v21  ;;  %1881 = vst [vmem:[#allocation3 + $0x88] sm:$0xf] %v1880_v37  ;;  %v1983_v10 = vmax.f32 %v11313_v7, 0.0  ;;  %v11314_v41 = vld [vmem:[#allocation29_spill] sm:$0xff]  ;;  %v6952_v34 = vpack.c.bf16 %v1981_v12, %v1981_v12 }
 0x1e2   :  { %1884 = vst [vmem:[#allocation3 + $0x8c] sm:$0x1] %v1883_v32  ;;  %v1984_v5 = vmax.f32 %v11314_v41, 0.0  ;;  %v11315_v53 = vld [vmem:[#allocation34_spill] sm:$0xff]  ;;  %v11316_v22 = vld [vmem:[#allocation32_spill] sm:$0xff]  ;;  %v11318_v40 = vld [vmem:[#allocation39_spill] sm:$0xff]  ;;  %v6953_v36 = vpack.c.bf16 %v1982_v63, %v1982_v63 }
 0x1e3   :  { %v1985_v57 = vmax.f32 %v11315_v53, 0.0  ;;  %v1986_v62 = vmax.f32 %v11316_v22, 0.0  ;;  %v11317_v51 = vld [vmem:[#allocation38_spill] sm:$0xff]  ;;  %v1988_v54 = vmax.f32 %v11318_v40, 0.0  ;;  %v11319_v11 = vld [vmem:[#allocation40_spill] sm:$0xff]  ;;  %v11320_v50 = vld [vmem:[#allocation41_spill] sm:$0xff]  ;;  %v6954_v1 = vpack.c.bf16 %v1983_v10, %v1983_v10 }
 0x1e4   :  { %v1987_v15 = vmax.f32 %v11317_v51, 0.0  ;;  %v1989_v43 = vmax.f32 %v11319_v11, 0.0  ;;  %v1990_v46 = vmax.f32 %v11320_v50, 0.0  ;;  %v11321_v6 = vld [vmem:[#allocation10_spill] sm:$0xff]  ;;  %v11322_v26 = vld [vmem:[#allocation8_spill] sm:$0xff]  ;;  %v11324_v29 = vld [vmem:[#allocation9_spill] sm:$0xff]  ;;  %v6955_v58 = vpack.c.bf16 %v1984_v5, %v1984_v5 }
 0x1e5   :  { %v1991_v56 = vmax.f32 %v11321_v6, 0.0  ;;  %v1992_v47 = vmax.f32 %v11322_v26, 0.0  ;;  %v11323_v13 = vld [vmem:[#allocation42_spill] sm:$0xff]  ;;  %v1994_v19 = vmax.f32 %v11324_v29, 0.0  ;;  %v6956_v27 = vpack.c.bf16 %v1985_v57, %v1985_v57  ;;  %v7680_v9 = vld [vmem:[%s11107_s3 + $0x1c0] sm:$0xff]  }
 0x1e6   :  { %v1993_v42 = vmax.f32 %v11323_v13, 0.0  ;;  %v6957_v0 = vpack.c.bf16 %v1986_v62, %v1986_v62  ;;  %v9630_v49 = vpack.c.bf16 %v1987_v15, %v1987_v15  ;;  %v9632_v44 = vpack.c.bf16 %v1988_v54, %v1988_v54  ;;  %7238 = vmatprep.subr.bf16.mxu1 %v7680_v9 }
 0x1e7   :  { %v9634_v31 = vpack.c.bf16 %v1989_v43, %v1989_v43  ;;  %v9636_v28 = vpack.c.bf16 %v1990_v46, %v1990_v46  ;;  %v9638_v39 = vpack.c.bf16 %v1991_v56, %v1991_v56  ;;  %v9643_v60 = vpack.c.bf16 %v1992_v47, %v1992_v47 }
 0x1e8   :  { %v9645_v35 = vpack.c.bf16 %v1993_v42, %v1993_v42  ;;  %v9647_v3 = vpack.c.bf16 %v1994_v19, %v1994_v19  ;;  %v2060_v30 = vshrl.u32 %v6950_v4, 16  ;;  %v2063_v48 = vshll.u32 %v6950_v4, 16 }
 0x1e9   :  { %v2068_v2 = vshrl.u32 %v6951_v16, 16  ;;  %v2071_v20 = vshll.u32 %v6951_v16, 16  ;;  %v2076_v38 = vshrl.u32 %v6952_v34, 16  ;;  %v2079_v24 = vshll.u32 %v6952_v34, 16 }
 0x1ea   :  { %v9649_v18 = vrot.slane %v2060_v30, 7  ;;  %v2084_v25 = vshrl.u32 %v6953_v36, 16  ;;  %v2087_v17 = vshll.u32 %v6953_v36, 16  ;;  %v2092_v37 = vshrl.u32 %v6954_v1, 16 }
 0x1eb   :  { %v9651_v8 = vrot.slane %v2068_v2, 7  ;;  %v9653_v21 = vrot.slane %v2076_v38, 7  ;;  %v2095_v32 = vshll.u32 %v6954_v1, 16  ;;  %v2100_v45 = vshrl.u32 %v6955_v58, 16  ;;  %v2220_v2 = vld [vmem:[#allocation4 + $0x8] sm:$0xf] }
 0x1ec   :  { %v9656_v52 = vor.u32 %v2063_v48, %v9649_v18  ;;  %v2066_v61 = vrot.slane %v9649_v18, 4  ;;  %v9659_v23 = vrot.slane %v2084_v25, 7  ;;  %v9673_v41 = vrot.slane %v2092_v37, 7  ;;  %v2235_v25 = vld [vmem:[#allocation4 + $0x1c] sm:$0x1] }
 0x1ed   :  { %v9662_v33 = vor.u32 %v2071_v20, %v9651_v8  ;;  %v2074_v12 = vrot.slane %v9651_v8, 4  ;;  %v9666_v14 = vor.u32 %v2079_v24, %v9653_v21  ;;  %v2082_v63 = vrot.slane %v9653_v21, 4  ;;  %v2232_v24 = vld [vmem:[#allocation4 + $0x18] sm:$0xf]  ;;  %v2283_v8 = vld [vmem:[#allocation4 + $0x64] sm:$0x1] }
 0x1ee   :  { %v9670_v7 = vor.u32 %v2087_v17, %v9659_v23  ;;  %v2090_v10 = vrot.slane %v9659_v23, 4  ;;  %v9675_v5 = vrot.slane %v2100_v45, 7  ;;  %v2103_v53 = vshll.u32 %v6955_v58, 16  ;;  %v2226_v17 = vld [vmem:[#allocation4 + $0x10] sm:$0xf] }
 0x1ef   :  { %v2108_v57 = vshrl.u32 %v6956_v27, 16  ;;  %v2111_v22 = vshll.u32 %v6956_v27, 16  ;;  %v2116_v62 = vshrl.u32 %v6957_v0, 16  ;;  %v9678_v51 = vor.u32 %v2095_v32, %v9673_v41 }
 0x1f0   :  { %v2098_v15 = vrot.slane %v9673_v41, 4  ;;  %v2106_v40 = vrot.slane %v9675_v5, 4  ;;  %v2119_v54 = vshll.u32 %v6957_v0, 16  ;;  %v9683_v11 = vor.u32 %v2103_v53, %v9675_v5 }
 0x1f1   :  { %v9685_v43 = vrot.slane %v2108_v57, 7  ;;  %v9687_v50 = vrot.slane %v2116_v62, 7  ;;  %v2124_v46 = vshrl.u32 %v9630_v49, 16  ;;  %v2127_v6 = vshll.u32 %v9630_v49, 16  ;;  %v2223_v49 = vld [vmem:[#allocation4 + $0xc] sm:$0x1] }
 0x1f2   :  { %v2132_v56 = vshrl.u32 %v9632_v44, 16  ;;  %v2135_v26 = vshll.u32 %v9632_v44, 16  ;;  %v2140_v47 = vshrl.u32 %v9634_v31, 16  ;;  %v2143_v36 = vshll.u32 %v9634_v31, 16  ;;  %v2229_v44 = vld [vmem:[#allocation4 + $0x14] sm:$0x1] }
 0x1f3   :  { %v9695_v13 = vor.u32 %v2111_v22, %v9685_v43  ;;  %v2114_v42 = vrot.slane %v9685_v43, 4  ;;  %v9699_v29 = vor.u32 %v2119_v54, %v9687_v50  ;;  %v2122_v19 = vrot.slane %v9687_v50, 4  ;;  %v2238_v57 = vld [vmem:[#allocation4 + $0x20] sm:$0xf]  ;;  %v2241_v22 = vld [vmem:[#allocation4 + $0x24] sm:$0x1] }
 0x1f4   :  { %v9702_v4 = vrot.slane %v2124_v46, 7  ;;  %v9704_v16 = vrot.slane %v2132_v56, 7  ;;  %v9706_v34 = vrot.slane %v2140_v47, 7  ;;  %v2148_v1 = vshrl.u32 %v9636_v28, 16  ;;  %v2247_v62 = vld [vmem:[#allocation4 + $0x2c] sm:$0x1] }
 0x1f5   :  { %v2151_v58 = vshll.u32 %v9636_v28, 16  ;;  %v2156_v27 = vshrl.u32 %v9638_v39, 16  ;;  %v2159_v0 = vshll.u32 %v9638_v39, 16  ;;  %v2164_v37 = vshrl.u32 %v9643_v60, 16  ;;  %v2250_v28 = vld [vmem:[#allocation4 + $0x30] sm:$0xf] }
 0x1f6   :  { %v9714_v9 = vor.u32 %v2127_v6, %v9702_v4  ;;  %v9718_v48 = vor.u32 %v2135_v26, %v9704_v16  ;;  %v9722_v20 = vor.u32 %v2143_v36, %v9706_v34  ;;  %v9725_v38 = vrot.slane %v2148_v1, 7  ;;  %v2256_v26 = vld [vmem:[#allocation4 + $0x38] sm:$0xf]  ;;  %v2259_v1 = vld [vmem:[#allocation4 + $0x3c] sm:$0x1] }
 0x1f7   :  { %v9727_v39 = vrot.slane %v2156_v27, 7  ;;  %v2167_v32 = vshll.u32 %v9643_v60, 16  ;;  %v2172_v45 = vshrl.u32 %v9645_v35, 16  ;;  %v2175_v53 = vshll.u32 %v9645_v35, 16  ;;  %v2244_v27 = vld [vmem:[#allocation4 + $0x28] sm:$0xf] }
 0x1f8   :  { %v9734_v54 = vor.u32 %v2151_v58, %v9725_v38  ;;  %v9741_v47 = vrot.slane %v2164_v37, 7  ;;  %v2180_v35 = vshrl.u32 %v9647_v3, 16  ;;  %v2183_v36 = vshll.u32 %v9647_v3, 16  ;;  %v2265_v58 = vld [vmem:[#allocation4 + $0x44] sm:$0x1] }
 0x1f9   :  { %v9738_v6 = vor.u32 %v2159_v0, %v9727_v39  ;;  %v9743_v60 = vrot.slane %v2172_v45, 7  ;;  %v2253_v31 = vld [vmem:[#allocation4 + $0x34] sm:$0x1]  ;;  %v2221_v0 = vsel %vm8660_vm5, %v9656_v52, %v2220_v2  ;;  %v2224_v37 = vsel %vm8000_vm2, %v2066_v61, %v2223_v49  ;;  %v2262_v56 = vld [vmem:[#allocation4 + $0x40] sm:$0xf] }
 0x1fa   :  { %v2227_v45 = vsel %vm8660_vm5, %v9662_v33, %v2226_v17  ;;  %v2230_v3 = vsel %vm8000_vm2, %v2074_v12, %v2229_v44  ;;  %v2271_v46 = vld [vmem:[#allocation4 + $0x54] sm:$0x1]  ;;  %v9762_v30 = vor.u32 %v2167_v32, %v9741_v47  ;;  %v2170_v52 = vrot.slane %v9741_v47, 4  ;;  %2222 = vst [vmem:[#allocation4 + $0x8] sm:$0xf] %v2221_v0 }
 0x1fb   :  { %v9766_v18 = vor.u32 %v2175_v53, %v9743_v60  ;;  %v2178_v61 = vrot.slane %v9743_v60, 4  ;;  %2225 = vst [vmem:[#allocation4 + $0xc] sm:$0x1] %v2224_v37  ;;  %2228 = vst [vmem:[#allocation4 + $0x10] sm:$0xf] %v2227_v45  ;;  %v9769_v44 = vrot.slane %v2180_v35, 7  ;;  %v2233_v2 = vsel %vm8660_vm5, %v9666_v14, %v2232_v24 }
 0x1fc   :  { %2231 = vst [vmem:[#allocation4 + $0x14] sm:$0x1] %v2230_v3  ;;  %v2268_v33 = vld [vmem:[#allocation4 + $0x50] sm:$0xf]  ;;  %v2289_v49 = vld [vmem:[#allocation4 + $0x6c] sm:$0x1]  ;;  %v2236_v17 = vsel %vm8000_vm2, %v2082_v63, %v2235_v25  ;;  %v2239_v32 = vsel %vm8660_vm5, %v9670_v7, %v2238_v57  ;;  %v2242_v14 = vsel %vm8000_vm2, %v2090_v10, %v2241_v22  ;;  %v2245_v21 = vsel %vm8660_vm5, %v9678_v51, %v2244_v27 }
 0x1fd   :  { %v2277_v12 = vld [vmem:[#allocation4 + $0x5c] sm:$0x1]  ;;  %v2280_v53 = vld [vmem:[#allocation4 + $0x60] sm:$0xf]  ;;  %v2274_v0 = vld [vmem:[#allocation4 + $0x58] sm:$0xf]  ;;  %v2248_v63 = vsel %vm8000_vm2, %v2098_v15, %v2247_v62  ;;  %v2251_v7 = vsel %vm8660_vm5, %v9683_v11, %v2250_v28  ;;  %v2185_v23 = vor.u32 %v2183_v36, %v9769_v44  ;;  %v2254_v10 = vsel %vm8000_vm2, %v2106_v40, %v2253_v31 }
 0x1fe   :  { %v2295_v37 = vld [vmem:[#allocation4 + $0x74] sm:$0x1]  ;;  %2234 = vst [vmem:[#allocation4 + $0x18] sm:$0xf] %v2233_v2  ;;  %2237 = vst [vmem:[#allocation4 + $0x1c] sm:$0x1] %v2236_v17  ;;  %v2257_v41 = vsel %vm8660_vm5, %v9695_v13, %v2256_v26  ;;  %v2260_v28 = vsel %vm8000_vm2, %v2114_v42, %v2259_v1  ;;  %v2263_v5 = vsel %vm8660_vm5, %v9699_v29, %v2262_v56 }
 0x1ff   :  { %2240 = vst [vmem:[#allocation4 + $0x20] sm:$0xf] %v2239_v32  ;;  %v2286_v24 = vld [vmem:[#allocation4 + $0x68] sm:$0xf]  ;;  %v2292_v25 = vld [vmem:[#allocation4 + $0x70] sm:$0xf]  ;;  %v2266_v40 = vsel %vm8000_vm2, %v2122_v19, %v2265_v58  ;;  %v2269_v13 = vsel %vm8660_vm5, %v9714_v9, %v2268_v33  ;;  %v2275_v50 = vsel %vm8660_vm5, %v9718_v48, %v2274_v0  ;;  %v2281_v9 = vsel %vm8660_vm5, %v9722_v20, %v2280_v53 }
 0x200   :  { %v2186_v57 = vrot.slane %v9769_v44, 4  ;;  %2243 = vst [vmem:[#allocation4 + $0x24] sm:$0x1] %v2242_v14  ;;  %2246 = vst [vmem:[#allocation4 + $0x28] sm:$0xf] %v2245_v21  ;;  %v11325_v43 = vrot.slane %v9702_v4, 4  ;;  %v2293_v20 = vsel %vm8660_vm5, %v9738_v6, %v2292_v25 }
 0x201   :  { %2249 = vst [vmem:[#allocation4 + $0x2c] sm:$0x1] %v2248_v63  ;;  %2252 = vst [vmem:[#allocation4 + $0x30] sm:$0xf] %v2251_v7  ;;  %v2304_v51 = vld [vmem:[#allocation4 + $0x80] sm:$0xf] }
 0x202   :  { %v2298_v15 = vld [vmem:[#allocation4 + $0x78] sm:$0xf]  ;;  %v2301_v11 = vld [vmem:[#allocation4 + $0x7c] sm:$0x1]  ;;  %2255 = vst [vmem:[#allocation4 + $0x34] sm:$0x1] %v2254_v10  ;;  %v2272_v42 = vsel %vm8000_vm2, %v11325_v43, %v2271_v46  ;;  %v2305_v6 = vsel %vm8660_vm5, %v9766_v18, %v2304_v51 }
 0x203   :  { %2258 = vst [vmem:[#allocation4 + $0x38] sm:$0xf] %v2257_v41  ;;  %v2307_v31 = vld [vmem:[#allocation4 + $0x84] sm:$0x1]  ;;  %v2310_v22 = vld [vmem:[#allocation4 + $0x88] sm:$0xf] }
 0x204   :  { %v2313_v62 = vld [vmem:[#allocation4 + $0x8c] sm:$0x1]  ;;  %2261 = vst [vmem:[#allocation4 + $0x3c] sm:$0x1] %v2260_v28  ;;  %2264 = vst [vmem:[#allocation4 + $0x40] sm:$0xf] %v2263_v5 }
 0x205   :  { %2267 = vst [vmem:[#allocation4 + $0x44] sm:$0x1] %v2266_v40  ;;  %2270 = vst [vmem:[#allocation4 + $0x50] sm:$0xf] %v2269_v13  ;;  %v11326_v29 = vrot.slane %v9704_v16, 4  ;;  %v11327_v4 = vrot.slane %v9706_v34, 4  ;;  %v2287_v16 = vsel %vm8660_vm5, %v9734_v54, %v2286_v24  ;;  %v2302_v54 = vsel %vm8000_vm2, %v2170_v52, %v2301_v11 }
 0x206   :  { %2273 = vst [vmem:[#allocation4 + $0x54] sm:$0x1] %v2272_v42  ;;  %2276 = vst [vmem:[#allocation4 + $0x58] sm:$0xf] %v2275_v50  ;;  %v11328_v48 = vrot.slane %v9725_v38, 4  ;;  %v11329_v34 = vrot.slane %v9727_v39, 4  ;;  %v2299_v38 = vsel %vm8660_vm5, %v9762_v30, %v2298_v15  ;;  %v2308_v39 = vsel %vm8000_vm2, %v2178_v61, %v2307_v31 }
 0x207   :  { %v2278_v19 = vsel %vm8000_vm2, %v11326_v29, %v2277_v12  ;;  %2282 = vst [vmem:[#allocation4 + $0x60] sm:$0xf] %v2281_v9  ;;  %v2284_v46 = vsel %vm8000_vm2, %v11327_v4, %v2283_v8  ;;  %2288 = vst [vmem:[#allocation4 + $0x68] sm:$0xf] %v2287_v16  ;;  %v2311_v30 = vsel %vm8660_vm5, %v2185_v23, %v2310_v22  ;;  %v11330_v35 = vld [vmem:[#allocation13_spill] sm:$0xff]  ;;  %v11332_v58 = vld [vmem:[#allocation11_spill] sm:$0xff] }
 0x208   :  { %2279 = vst [vmem:[#allocation4 + $0x5c] sm:$0x1] %v2278_v19  ;;  %v2290_v56 = vsel %vm8000_vm2, %v11328_v48, %v2289_v49  ;;  %2285 = vst [vmem:[#allocation4 + $0x64] sm:$0x1] %v2284_v46  ;;  %v2296_v26 = vsel %vm8000_vm2, %v11329_v34, %v2295_v37  ;;  %v2314_v47 = vsel %vm8000_vm2, %v2186_v57, %v2313_v62  ;;  %v2410_v36 = vmax.f32 %v11330_v35, 0.0  ;;  %v11331_v1 = vld [vmem:[#allocation17_spill] sm:$0xff] }
 0x209   :  { %2291 = vst [vmem:[#allocation4 + $0x6c] sm:$0x1] %v2290_v56  ;;  %2294 = vst [vmem:[#allocation4 + $0x70] sm:$0xf] %v2293_v20  ;;  %v2411_v27 = vmax.f32 %v11331_v1, 0.0  ;;  %v2412_v45 = vmax.f32 %v11332_v58, 0.0 }
 0x20a   :  { %2297 = vst [vmem:[#allocation4 + $0x74] sm:$0x1] %v2296_v26  ;;  %2300 = vst [vmem:[#allocation4 + $0x78] sm:$0xf] %v2299_v38  ;;  %v11333_v3 = vld [vmem:[#allocation43_spill] sm:$0xff]  ;;  %v11335_v61 = vld [vmem:[#allocation44_spill] sm:$0xff]  ;;  %v6966_v10 = vpack.c.bf16 %v2410_v36, %v2410_v36 }
 0x20b   :  { %2303 = vst [vmem:[#allocation4 + $0x7c] sm:$0x1] %v2302_v54  ;;  %2306 = vst [vmem:[#allocation4 + $0x80] sm:$0xf] %v2305_v6  ;;  %v2413_v60 = vmax.f32 %v11333_v3, 0.0  ;;  %v11334_v52 = vld [vmem:[#allocation15_spill] sm:$0xff]  ;;  %v6967_v41 = vpack.c.bf16 %v2411_v27, %v2411_v27  ;;  %v6968_v51 = vpack.c.bf16 %v2412_v45, %v2412_v45 }
 0x20c   :  { %2309 = vst [vmem:[#allocation4 + $0x84] sm:$0x1] %v2308_v39  ;;  %2312 = vst [vmem:[#allocation4 + $0x88] sm:$0xf] %v2311_v30  ;;  %v2414_v18 = vmax.f32 %v11334_v52, 0.0  ;;  %v2415_v8 = vmax.f32 %v11335_v61, 0.0 }
 0x20d   :  { %2315 = vst [vmem:[#allocation4 + $0x8c] sm:$0x1] %v2314_v47  ;;  %v11336_v33 = vld [vmem:[#allocation45_spill] sm:$0xff]  ;;  %v11337_v12 = vld [vmem:[#allocation46_spill] sm:$0xff]  ;;  %v11338_v2 = vld [vmem:[#allocation47_spill] sm:$0xff]  ;;  %v6969_v15 = vpack.c.bf16 %v2413_v60, %v2413_v60  ;;  %v2491_v29 = vshrl.u32 %v6966_v10, 16 }
 0x20e   :  { %v2416_v49 = vmax.f32 %v11336_v33, 0.0  ;;  %v2417_v44 = vmax.f32 %v11337_v12, 0.0  ;;  %v2418_v17 = vmax.f32 %v11338_v2, 0.0  ;;  %v11339_v32 = vld [vmem:[#allocation48_spill] sm:$0xff]  ;;  %v11340_v0 = vld [vmem:[#allocation49_spill] sm:$0xff]  ;;  %v11341_v14 = vld [vmem:[#allocation50_spill] sm:$0xff]  ;;  %v6970_v11 = vpack.c.bf16 %v2414_v18, %v2414_v18 }
 0x20f   :  { %v2419_v53 = vmax.f32 %v11339_v32, 0.0  ;;  %v2420_v37 = vmax.f32 %v11340_v0, 0.0  ;;  %v2421_v21 = vmax.f32 %v11341_v14, 0.0  ;;  %v11342_v63 = vld [vmem:[#allocation51_spill] sm:$0xff]  ;;  %v11343_v24 = vld [vmem:[#allocation52_spill] sm:$0xff]  ;;  %v11344_v23 = vld [vmem:[#allocation53_spill] sm:$0xff]  ;;  %v6971_v28 = vpack.c.bf16 %v2415_v8, %v2415_v8 }
 0x210   :  { %v2422_v7 = vmax.f32 %v11342_v63, 0.0  ;;  %v2424_v25 = vmax.f32 %v11343_v24, 0.0  ;;  %v2425_v57 = vmax.f32 %v11344_v23, 0.0  ;;  %v6972_v5 = vpack.c.bf16 %v2416_v49, %v2416_v49 }
 0x211   :  { %v6973_v40 = vpack.c.bf16 %v2417_v44, %v2417_v44  ;;  %v6974_v13 = vpack.c.bf16 %v2418_v17, %v2418_v17  ;;  %v9883_v31 = vpack.c.bf16 %v2419_v53, %v2419_v53  ;;  %v9885_v22 = vpack.c.bf16 %v2420_v37, %v2420_v37 }
 0x212   :  { %v9887_v62 = vpack.c.bf16 %v2421_v21, %v2421_v21  ;;  %v9889_v43 = vpack.c.bf16 %v2422_v7, %v2422_v7  ;;  %v9891_v42 = vpack.c.bf16 %v2424_v25, %v2424_v25  ;;  %v9893_v50 = vpack.c.bf16 %v2425_v57, %v2425_v57 }
 0x213   :  { %v2494_v19 = vshll.u32 %v6966_v10, 16  ;;  %v2499_v9 = vshrl.u32 %v6967_v41, 16  ;;  %v2502_v4 = vshll.u32 %v6967_v41, 16  ;;  %v2507_v46 = vshrl.u32 %v6968_v51, 16  ;;  %v2654_v10 = vld [vmem:[#allocation5 + $0xc] sm:$0x1] }
 0x214   :  { %v2510_v16 = vshll.u32 %v6968_v51, 16  ;;  %v2515_v48 = vshrl.u32 %v6969_v15, 16  ;;  %v9895_v56 = vrot.slane %v2491_v29, 7  ;;  %v2518_v34 = vshll.u32 %v6969_v15, 16  ;;  %v2666_v29 = vld [vmem:[#allocation5 + $0x1c] sm:$0x1] }
 0x215   :  { %v9897_v20 = vrot.slane %v2499_v9, 7  ;;  %v2523_v26 = vshrl.u32 %v6970_v11, 16  ;;  %v9899_v38 = vrot.slane %v2507_v46, 7  ;;  %v2526_v6 = vshll.u32 %v6970_v11, 16  ;;  %v2660_v9 = vld [vmem:[#allocation5 + $0x14] sm:$0x1] }
 0x216   :  { %v9901_v54 = vrot.slane %v2515_v48, 7  ;;  %v2531_v39 = vshrl.u32 %v6971_v28, 16  ;;  %v9904_v30 = vor.u32 %v2494_v19, %v9895_v56  ;;  %v2497_v47 = vrot.slane %v9895_v56, 4  ;;  %v2672_v19 = vld [vmem:[#allocation5 + $0x24] sm:$0x1] }
 0x217   :  { %v9908_v35 = vor.u32 %v2502_v4, %v9897_v20  ;;  %v2505_v36 = vrot.slane %v9897_v20, 4  ;;  %v9912_v1 = vor.u32 %v2510_v16, %v9899_v38  ;;  %v2513_v27 = vrot.slane %v9899_v38, 4  ;;  %v2657_v56 = vld [vmem:[#allocation5 + $0x10] sm:$0xf] }
 0x218   :  { %v9916_v58 = vor.u32 %v2518_v34, %v9901_v54  ;;  %v2521_v45 = vrot.slane %v9901_v54, 4  ;;  %v9919_v3 = vrot.slane %v2523_v26, 7  ;;  %v9921_v60 = vrot.slane %v2531_v39, 7  ;;  %v2678_v39 = vld [vmem:[#allocation5 + $0x2c] sm:$0x1] }
 0x219   :  { %v2534_v52 = vshll.u32 %v6971_v28, 16  ;;  %v2539_v18 = vshrl.u32 %v6972_v5, 16  ;;  %v2542_v61 = vshll.u32 %v6972_v5, 16  ;;  %v2547_v8 = vshrl.u32 %v6973_v40, 16  ;;  %v2651_v28 = vld [vmem:[#allocation5 + $0x8] sm:$0xf] }
 0x21a   :  { %v2550_v33 = vshll.u32 %v6973_v40, 16  ;;  %v2555_v49 = vshrl.u32 %v6974_v13, 16  ;;  %v9924_v12 = vor.u32 %v2526_v6, %v9919_v3  ;;  %v2529_v44 = vrot.slane %v9919_v3, 4  ;;  %v2669_v6 = vld [vmem:[#allocation5 + $0x20] sm:$0xf] }
 0x21b   :  { %v9928_v2 = vor.u32 %v2534_v52, %v9921_v60  ;;  %v2537_v17 = vrot.slane %v9921_v60, 4  ;;  %v9931_v32 = vrot.slane %v2539_v18, 7  ;;  %v9933_v53 = vrot.slane %v2547_v8, 7  ;;  %v2717_v54 = vld [vmem:[#allocation5 + $0x68] sm:$0xf] }
 0x21c   :  { %v9935_v0 = vrot.slane %v2555_v49, 7  ;;  %v2558_v37 = vshll.u32 %v6974_v13, 16  ;;  %v2563_v14 = vshrl.u32 %v9883_v31, 16  ;;  %v2566_v21 = vshll.u32 %v9883_v31, 16  ;;  %v2690_v49 = vld [vmem:[#allocation5 + $0x3c] sm:$0x1] }
 0x21d   :  { %v2571_v63 = vshrl.u32 %v9885_v22, 16  ;;  %v2574_v7 = vshll.u32 %v9885_v22, 16  ;;  %v9942_v24 = vor.u32 %v2542_v61, %v9931_v32  ;;  %v2545_v25 = vrot.slane %v9931_v32, 4  ;;  %v2663_v22 = vld [vmem:[#allocation5 + $0x18] sm:$0xf] }
 0x21e   :  { %v9946_v23 = vor.u32 %v2550_v33, %v9933_v53  ;;  %v2553_v57 = vrot.slane %v9933_v53, 4  ;;  %v9950_v41 = vor.u32 %v2558_v37, %v9935_v0  ;;  %v2561_v51 = vrot.slane %v9935_v0, 4  ;;  %v2687_v33 = vld [vmem:[#allocation5 + $0x38] sm:$0xf]  ;;  %v2675_v37 = vld [vmem:[#allocation5 + $0x28] sm:$0xf] }
 0x21f   :  { %v9953_v15 = vrot.slane %v2563_v14, 7  ;;  %v9955_v11 = vrot.slane %v2571_v63, 7  ;;  %v2579_v5 = vshrl.u32 %v9887_v62, 16  ;;  %v2582_v40 = vshll.u32 %v9887_v62, 16  ;;  %v2696_v14 = vld [vmem:[#allocation5 + $0x44] sm:$0x1] }
 0x220   :  { %v2587_v13 = vshrl.u32 %v9889_v43, 16  ;;  %v2590_v31 = vshll.u32 %v9889_v43, 16  ;;  %v2603_v43 = vshrl.u32 %v9891_v42, 16  ;;  %v2606_v26 = vshll.u32 %v9891_v42, 16 }
 0x221   :  { %v9962_v4 = vor.u32 %v2566_v21, %v9953_v15  ;;  %v2569_v46 = vrot.slane %v9953_v15, 4  ;;  %v9966_v16 = vor.u32 %v2574_v7, %v9955_v11  ;;  %v2577_v48 = vrot.slane %v9955_v11, 4  ;;  %v2684_v21 = vld [vmem:[#allocation5 + $0x34] sm:$0x1]  ;;  %v2821_v15 = vld [vmem:[#allocation4 + $0x8] sm:$0xf] }
 0x222   :  { %v9969_v62 = vrot.slane %v2579_v5, 7  ;;  %v9971_v34 = vrot.slane %v2587_v13, 7  ;;  %v2611_v52 = vshrl.u32 %v9893_v50, 16  ;;  %v2614_v18 = vshll.u32 %v9893_v50, 16  ;;  %v2693_v13 = vld [vmem:[#allocation5 + $0x40] sm:$0xf] }
 0x223   :  { %v2652_v61 = vsel %vm8660_vm5, %v9904_v30, %v2651_v28  ;;  %v2655_v8 = vsel %vm8000_vm2, %v2497_v47, %v2654_v10  ;;  %v2681_v30 = vld [vmem:[#allocation5 + $0x30] sm:$0xf]  ;;  %v2702_v28 = vld [vmem:[#allocation5 + $0x54] sm:$0x1]  ;;  %v9990_v47 = vrot.slane %v2603_v43, 7  ;;  %v2658_v5 = vsel %vm8660_vm5, %v9908_v35, %v2657_v56 }
 0x224   :  { %v9983_v42 = vor.u32 %v2582_v40, %v9969_v62  ;;  %v2585_v63 = vrot.slane %v9969_v62, 4  ;;  %v9987_v7 = vor.u32 %v2590_v31, %v9971_v34  ;;  %2653 = vst [vmem:[#allocation5 + $0x8] sm:$0xf] %v2652_v61  ;;  %2656 = vst [vmem:[#allocation5 + $0xc] sm:$0x1] %v2655_v8  ;;  %v9992_v10 = vrot.slane %v2611_v52, 7 }
 0x225   :  { %v2661_v40 = vsel %vm8000_vm2, %v2505_v36, %v2660_v9  ;;  %v2714_v31 = vld [vmem:[#allocation5 + $0x64] sm:$0x1]  ;;  %v2720_v50 = vld [vmem:[#allocation5 + $0x6c] sm:$0x1]  ;;  %v2708_v61 = vld [vmem:[#allocation5 + $0x5c] sm:$0x1]  ;;  %v2664_v43 = vsel %vm8660_vm5, %v9912_v1, %v2663_v22  ;;  %v2667_v35 = vsel %vm8000_vm2, %v2513_v27, %v2666_v29  ;;  %v2670_v20 = vsel %vm8660_vm5, %v9916_v58, %v2669_v6 }
 0x226   :  { %2659 = vst [vmem:[#allocation5 + $0x10] sm:$0xf] %v2658_v5  ;;  %2662 = vst [vmem:[#allocation5 + $0x14] sm:$0x1] %v2661_v40  ;;  %v2673_v36 = vsel %vm8000_vm2, %v2521_v45, %v2672_v19  ;;  %v2699_v9 = vld [vmem:[#allocation5 + $0x50] sm:$0xf]  ;;  %v2608_v52 = vor.u32 %v2606_v26, %v9990_v47  ;;  %v10018_v38 = vor.u32 %v2614_v18, %v9992_v10 }
 0x227   :  { %v2705_v56 = vld [vmem:[#allocation5 + $0x58] sm:$0xf]  ;;  %v2609_v1 = vrot.slane %v9990_v47, 4  ;;  %v2617_v27 = vrot.slane %v9992_v10, 4  ;;  %2665 = vst [vmem:[#allocation5 + $0x18] sm:$0xf] %v2664_v43  ;;  %v2676_v45 = vsel %vm8660_vm5, %v9924_v12, %v2675_v37  ;;  %v2679_v29 = vsel %vm8000_vm2, %v2529_v44, %v2678_v39 }
 0x228   :  { %2668 = vst [vmem:[#allocation5 + $0x1c] sm:$0x1] %v2667_v35  ;;  %2671 = vst [vmem:[#allocation5 + $0x20] sm:$0xf] %v2670_v20  ;;  %v2711_v58 = vld [vmem:[#allocation5 + $0x60] sm:$0xf]  ;;  %v2682_v19 = vsel %vm8660_vm5, %v9928_v2, %v2681_v30  ;;  %v2685_v26 = vsel %vm8000_vm2, %v2537_v17, %v2684_v21  ;;  %v2688_v3 = vsel %vm8660_vm5, %v9942_v24, %v2687_v33 }
 0x229   :  { %2674 = vst [vmem:[#allocation5 + $0x24] sm:$0x1] %v2673_v36  ;;  %v2738_v22 = vld [vmem:[#allocation5 + $0x84] sm:$0x1]  ;;  %v2735_v6 = vld [vmem:[#allocation5 + $0x80] sm:$0xf]  ;;  %v2691_v12 = vsel %vm8000_vm2, %v2545_v25, %v2690_v49  ;;  %v2694_v60 = vsel %vm8660_vm5, %v9946_v23, %v2693_v13  ;;  %v2697_v44 = vsel %vm8000_vm2, %v2553_v57, %v2696_v14  ;;  %v2700_v32 = vsel %vm8660_vm5, %v9950_v41, %v2699_v9 }
 0x22a   :  { %v2723_v18 = vld [vmem:[#allocation5 + $0x70] sm:$0xf]  ;;  %v2726_v8 = vld [vmem:[#allocation5 + $0x74] sm:$0x1]  ;;  %2677 = vst [vmem:[#allocation5 + $0x28] sm:$0xf] %v2676_v45  ;;  %v2703_v24 = vsel %vm8000_vm2, %v2561_v51, %v2702_v28  ;;  %v2706_v53 = vsel %vm8660_vm5, %v9962_v4, %v2705_v56  ;;  %v2709_v25 = vsel %vm8000_vm2, %v2569_v46, %v2708_v61  ;;  %v2712_v0 = vsel %vm8660_vm5, %v9966_v16, %v2711_v58 }
 0x22b   :  { %2680 = vst [vmem:[#allocation5 + $0x2c] sm:$0x1] %v2679_v29  ;;  %2683 = vst [vmem:[#allocation5 + $0x30] sm:$0xf] %v2682_v19  ;;  %v2741_v2 = vld [vmem:[#allocation5 + $0x88] sm:$0xf]  ;;  %v2715_v57 = vsel %vm8000_vm2, %v2577_v48, %v2714_v31  ;;  %v2718_v41 = vsel %vm8660_vm5, %v9983_v42, %v2717_v54  ;;  %v2721_v51 = vsel %vm8000_vm2, %v2585_v63, %v2720_v50 }
 0x22c   :  { %2686 = vst [vmem:[#allocation5 + $0x34] sm:$0x1] %v2685_v26  ;;  %v2744_v17 = vld [vmem:[#allocation5 + $0x8c] sm:$0x1]  ;;  %2689 = vst [vmem:[#allocation5 + $0x38] sm:$0xf] %v2688_v3  ;;  %v2724_v11 = vsel %vm8660_vm5, %v9987_v7, %v2723_v18  ;;  %v2736_v48 = vsel %vm8660_vm5, %v2608_v52, %v2735_v6  ;;  %v2739_v62 = vsel %vm8000_vm2, %v2609_v1, %v2738_v22 }
 0x22d   :  { %2692 = vst [vmem:[#allocation5 + $0x3c] sm:$0x1] %v2691_v12  ;;  %2695 = vst [vmem:[#allocation5 + $0x40] sm:$0xf] %v2694_v60  ;;  %v1886_v23 = vld [vmem:[#allocation4 + $0x4] sm:$0x1]  ;;  %v2742_v49 = vsel %vm8660_vm5, %v10018_v38, %v2741_v2 }
 0x22e   :  { %2698 = vst [vmem:[#allocation5 + $0x44] sm:$0x1] %v2697_v44  ;;  %2701 = vst [vmem:[#allocation5 + $0x50] sm:$0xf] %v2700_v32  ;;  %v2317_v4 = vld [vmem:[#allocation5 + $0x4] sm:$0x1] }
 0x22f   :  { %2704 = vst [vmem:[#allocation5 + $0x54] sm:$0x1] %v2703_v24  ;;  %2707 = vst [vmem:[#allocation5 + $0x58] sm:$0xf] %v2706_v53  ;;  %v11345_v46 = vrot.slane %v9971_v34, 4  ;;  %v2745_v34 = vsel %vm8000_vm2, %v2617_v27, %v2744_v17  ;;  %v1887_v37 = vsel %vm8000_vm2, 0, %v1886_v23 }
 0x230   :  { %2710 = vst [vmem:[#allocation5 + $0x5c] sm:$0x1] %v2709_v25  ;;  %2713 = vst [vmem:[#allocation5 + $0x60] sm:$0xf] %v2712_v0  ;;  %v2822_v39 = vld [vmem:[#allocation4 + $0xc] sm:$0x1] }
 0x231   :  { %2716 = vst [vmem:[#allocation5 + $0x64] sm:$0x1] %v2715_v57  ;;  %2719 = vst [vmem:[#allocation5 + $0x68] sm:$0xf] %v2718_v41  ;;  %v2727_v16 = vsel %vm8000_vm2, %v11345_v46, %v2726_v8  ;;  %v3120_v33 = vld [vmem:[#allocation5 + $0x8] sm:$0xf] }
 0x232   :  { %2722 = vst [vmem:[#allocation5 + $0x6c] sm:$0x1] %v2721_v51  ;;  %2725 = vst [vmem:[#allocation5 + $0x70] sm:$0xf] %v2724_v11  ;;  %v2823_v14 = vld [vmem:[#allocation4 + $0x10] sm:$0xf] }
 0x233   :  { %2728 = vst [vmem:[#allocation5 + $0x74] sm:$0x1] %v2727_v16  ;;  %2737 = vst [vmem:[#allocation5 + $0x80] sm:$0xf] %v2736_v48  ;;  %v7759_v21 = vmov 0   ;;  %v2869_v42 = vshrl.u32 %v2821_v15, 16 }
 0x234   :  { %2740 = vst [vmem:[#allocation5 + $0x84] sm:$0x1] %v2739_v62  ;;  %2743 = vst [vmem:[#allocation5 + $0x88] sm:$0xf] %v2742_v49  ;;  %v2872_v55 = vshll.u32 %v2821_v15, 16  ;;  %v2878_v30 = vshll.u32 %v2822_v39, 16 }
 0x235   :  { %2746 = vst [vmem:[#allocation5 + $0x8c] sm:$0x1] %v2745_v34  ;;  %1007 = vst [vmem:[#allocation2] sm:$0xf] %v7759_v21  ;;  %v3121_v63 = vld [vmem:[#allocation5 + $0xc] sm:$0x1] }
 0x236   :  { %1014 = vst [vmem:[#allocation2 + $0x48] sm:$0xf] %v7759_v21  ;;  %1454 = vst [vmem:[#allocation3] sm:$0xf] %v7759_v21  ;;  %v2824_v7 = vld [vmem:[#allocation4 + $0x14] sm:$0x1] }
 0x237   :  { %1458 = vst [vmem:[#allocation3 + $0x48] sm:$0xf] %v7759_v21  ;;  %1885 = vst [vmem:[#allocation4] sm:$0xf] %v7759_v21  ;;  %v2825_v50 = vld [vmem:[#allocation4 + $0x18] sm:$0xf] }
 0x238   :  { %1888 = vst [vmem:[#allocation4 + $0x4] sm:$0x1] %v1887_v37  ;;  %1889 = vst [vmem:[#allocation4 + $0x48] sm:$0xf] %v7759_v21  ;;  %v2318_v28 = vsel %vm8000_vm2, 0, %v2317_v4  ;;  %v3165_v47 = vshrl.u32 %v3120_v33, 16 }
 0x239   :  { %2316 = vst [vmem:[#allocation5] sm:$0xf] %v7759_v21  ;;  %2320 = vst [vmem:[#allocation5 + $0x48] sm:$0xf] %v7759_v21  ;;  %v3168_v10 = vshll.u32 %v3120_v33, 16  ;;  %v2871_v13 = vrot.slane %v2869_v42, 4 }
 0x23a   :  { %v2826_v5 = vld [vmem:[#allocation4 + $0x1c] sm:$0x1]  ;;  %v10097_v40 = vld [vmem:[#allocation5 + $0x10] sm:$0xf]  ;;  %v2874_v31 = vrot.slane %v2872_v55, 5  ;;  %v2883_v61 = vshrl.u32 %v2823_v14, 16 }
 0x23b   :  { %2319 = vst [vmem:[#allocation5 + $0x4] sm:$0x1] %v2318_v28  ;;  %v3167_v43 = vrot.slane %v3165_v47, 4  ;;  %v3170_v35 = vrot.slane %v3168_v10, 5  ;;  %v2886_v20 = vshll.u32 %v2823_v14, 16  ;;  %v10099_v9 = vrot.slane %v2878_v30, 5 }
 0x23c   :  { %v2875_v36 = vor.u32 %v2874_v31, %v2871_v13  ;;  %v3174_v56 = vshll.u32 %v3121_v63, 16  ;;  %v2885_v52 = vrot.slane %v2883_v61, 4  ;;  %v2892_v27 = vshll.u32 %v2824_v7, 16  ;;  %v1018_v19 = vld [vmem:[#allocation2] sm:$0x1] }
 0x23d   :  { %v3171_v1 = vor.u32 %v3170_v35, %v3167_v43  ;;  %v2888_v38 = vrot.slane %v2886_v20, 5  ;;  %v2897_v58 = vshrl.u32 %v2825_v50, 16  ;;  %v2900_v22 = vshll.u32 %v2825_v50, 16  ;;  %v1045_v26 = vld [vmem:[#allocation2 + $0x48] sm:$0x1] }
 0x23e   :  { %v10101_v54 = vrot.slane %v2875_v36, 4  ;;  %v2906_v45 = vshll.u32 %v2826_v5, 16  ;;  %v3179_v29 = vshrl.u32 %v10097_v40, 16  ;;  %v1462_v6 = vld [vmem:[#allocation3] sm:$0x1]  ;;  %v1019_v18 = vsel %vm8000_vm2, 0, %v1018_v19 }
 0x23f   :  { %v1046_v8 = vsel %vm8000_vm2, 0, %v1045_v26  ;;  %v1463_v3 = vsel %vm8000_vm2, 0, %v1462_v6  ;;  %v1489_v12 = vld [vmem:[#allocation3 + $0x48] sm:$0x1]  ;;  %v2889_v44 = vor.u32 %v2888_v38, %v2885_v52  ;;  %1020 = vst [vmem:[#allocation2] sm:$0x1] %v1019_v18 }
 0x240   :  { %1047 = vst [vmem:[#allocation2 + $0x48] sm:$0x1] %v1046_v8  ;;  %1464 = vst [vmem:[#allocation3] sm:$0x1] %v1463_v3  ;;  %v1490_v2 = vsel %vm8000_vm2, 0, %v1489_v12  ;;  %v10118_v24 = vrot.slane %v3171_v1, 4  ;;  %v2881_v15 = vsel %vm10112_vm8, %v10101_v54, %v10099_v9 }
 0x241   :  { %v1893_v17 = vld [vmem:[#allocation4] sm:$0x1]  ;;  %v2820_v32 = vld [vmem:[#allocation4 + $0x4] sm:$0x1]  ;;  %1491 = vst [vmem:[#allocation3 + $0x48] sm:$0x1] %v1490_v2 }
 0x242   :  { %v3123_v53 = vld [vmem:[#allocation5 + $0x14] sm:$0x1]  ;;  %v1894_v25 = vsel %vm8000_vm2, 0, %v1893_v17  ;;  %v2324_v23 = vld [vmem:[#allocation5] sm:$0x1]  ;;  %v10122_v57 = vrot.slane %v3174_v56, 5 }
 0x243   :  { %v3119_v0 = vld [vmem:[#allocation5 + $0x4] sm:$0x1]  ;;  %v2827_v41 = vld [vmem:[#allocation4 + $0x20] sm:$0xf]  ;;  %1895 = vst [vmem:[#allocation4] sm:$0x1] %v1894_v25 }
 0x244   :  { %v2864_v51 = vshll.u32 %v2820_v32, 16  ;;  %v2325_v4 = vsel %vm8000_vm2, 0, %v2324_v23  ;;  %v2894_v11 = vrot.slane %v2892_v27, 5  ;;  %v3124_v46 = vld [vmem:[#allocation5 + $0x18] sm:$0xf]  ;;  %v3160_v16 = vshll.u32 %v3119_v0, 16 }
 0x245   :  { %2326 = vst [vmem:[#allocation5] sm:$0x1] %v2325_v4  ;;  %v2890_v48 = vrot.slane %v2889_v44, 4  ;;  %v2899_v62 = vrot.slane %v2897_v58, 4  ;;  %v2902_v39 = vrot.slane %v2900_v22, 5  ;;  %v3177_v49 = vsel %vm10112_vm8, %v10118_v24, %v10122_v57  ;;  %v7686_v24 = vld [vmem:[%s11107_s3 + $0x1c8] sm:$0xff]  }
 0x246   :  { %v3125_v33 = vld [vmem:[#allocation5 + $0x1c] sm:$0x1]  ;;  %v2908_v34 = vrot.slane %v2906_v45, 5  ;;  %v3181_v37 = vrot.slane %v3179_v29, 4  ;;  %v3182_v14 = vshll.u32 %v10097_v40, 16  ;;  %v3188_v63 = vshll.u32 %v3123_v53, 16 }
 0x247   :  { %v2828_v21 = vld [vmem:[#allocation4 + $0x24] sm:$0x1]  ;;  %v2829_v42 = vld [vmem:[#allocation4 + $0x28] sm:$0xf]  ;;  %v2903_v55 = vor.u32 %v2902_v39, %v2899_v62  ;;  %v3193_v7 = vshrl.u32 %v3124_v46, 16  ;;  %v3196_v50 = vshll.u32 %v3124_v46, 16  ;;  %v2895_v5 = vsel %vm10112_vm8, %v2890_v48, %v2894_v11 }
 0x248   :  { %v3184_v30 = vrot.slane %v3182_v14, 5  ;;  %v3202_v28 = vshll.u32 %v3125_v33, 16  ;;  %v2911_v47 = vshrl.u32 %v2827_v41, 16  ;;  %v2914_v10 = vshll.u32 %v2827_v41, 16  ;;  %v3126_v2 = vld [vmem:[#allocation5 + $0x20] sm:$0xf] }
 0x249   :  { %v2904_v13 = vrot.slane %v2903_v55, 4  ;;  %v3195_v31 = vrot.slane %v3193_v7, 4  ;;  %v3198_v61 = vrot.slane %v3196_v50, 5  ;;  %v3190_v35 = vrot.slane %v3188_v63, 5  ;;  %v3128_v23 = vld [vmem:[#allocation5 + $0x28] sm:$0xf] }
 0x24a   :  { %v3185_v43 = vor.u32 %v3184_v30, %v3181_v37  ;;  %v2913_v20 = vrot.slane %v2911_v47, 4  ;;  %v2916_v40 = vrot.slane %v2914_v10, 5  ;;  %v2819_v36 = vld [vmem:[#allocation4] sm:$0xf]  ;;  %v3204_v52 = vrot.slane %v3202_v28, 5 }
 0x24b   :  { %v3199_v56 = vor.u32 %v3198_v61, %v3195_v31  ;;  %v2920_v1 = vshll.u32 %v2828_v21, 16  ;;  %v2925_v38 = vshrl.u32 %v2829_v42, 16  ;;  %v2855_v27 = vshrl.u32 %v2819_v36, 16  ;;  %v2830_v4 = vld [vmem:[#allocation4 + $0x2c] sm:$0x1] }
 0x24c   :  { %v2858_v58 = vshll.u32 %v2819_v36, 16  ;;  %v3118_v22 = vld [vmem:[#allocation5] sm:$0xf]  ;;  %v2909_v45 = vsel %vm10112_vm8, %v2904_v13, %v2908_v34  ;;  %v2917_v29 = vor.u32 %v2916_v40, %v2913_v20  ;;  %v3186_v6 = vrot.slane %v3185_v43, 4  ;;  %v3127_v62 = vld [vmem:[#allocation5 + $0x24] sm:$0x1] }
 0x24d   :  { %v3151_v19 = vshrl.u32 %v3118_v22, 16  ;;  %v3154_v26 = vshll.u32 %v3118_v22, 16  ;;  %v3200_v18 = vrot.slane %v3199_v56, 4  ;;  %v2857_v8 = vrot.slane %v2855_v27, 4  ;;  %v2831_v21 = vld [vmem:[#allocation4 + $0x30] sm:$0xf] }
 0x24e   :  { %v2860_v3 = vrot.slane %v2858_v58, 5  ;;  %v2866_v12 = vrot.slane %v2864_v51, 5  ;;  %v3162_v44 = vrot.slane %v3160_v16, 5  ;;  %v3191_v53 = vsel %vm10112_vm8, %v3186_v6, %v3190_v35  ;;  %v3129_v50 = vld [vmem:[#allocation5 + $0x2c] sm:$0x1]  ;;  %v7670_v35 = vld [vmem:[%s11107_s3 + $0x148] sm:$0xff]  }
 0x24f   :  { %v3153_v17 = vrot.slane %v3151_v19, 4  ;;  %v3156_v32 = vrot.slane %v3154_v26, 5  ;;  %v3205_v25 = vsel %vm10112_vm8, %v3200_v18, %v3204_v52  ;;  %v6767_v41 = vcombine.low %v2895_v5, %v2909_v45  ;;  %v2832_v13 = vld [vmem:[#allocation4 + $0x34] sm:$0x1]  ;;  %v7665_v43 = vld [vmem:[#allocation3 + $0x18] ss:$8 sps:$4 sm:$0xff]  }
 0x250   :  { %v2861_v0 = vor.u32 %v2860_v3, %v2857_v8  ;;  %v10143_v11 = vrot.slane %v2917_v29, 4  ;;  %v10145_v46 = vrot.slane %v2920_v1, 5  ;;  %v2927_v51 = vrot.slane %v2925_v38, 4  ;;  %v2833_v36 = vld [vmem:[#allocation4 + $0x38] sm:$0xf]  ;;  %v7684_v56 = vld [vmem:[%s11107_s3 + $0x180] sm:$0xff]  }
 0x251   :  { %v3157_v48 = vor.u32 %v3156_v32, %v3153_v17  ;;  %v2928_v16 = vshll.u32 %v2829_v42, 16  ;;  %v3207_v39 = vshrl.u32 %v3126_v2, 16  ;;  %v10147_v34 = vcombine.low %v3191_v53, %v3205_v25  ;;  %v7667_v42 = vld [vmem:[%s11107_s3 + $0x100] sm:$0xff]   ;;  %v7664_v54 = vld [vmem:[#allocation5] ss:$8 sps:$4 sm:$0xff]   ;;  %v7671_v18 = vld [vmem:[%s11107_s3 + $0x108] sm:$0xff]  }
 0x252   :  { %v2862_v33 = vrot.slane %v2861_v0, 4  ;;  %v3210_v37 = vshll.u32 %v3126_v2, 16  ;;  %v3221_v14 = vshrl.u32 %v3128_v23, 16  ;;  %v2934_v7 = vshll.u32 %v2830_v4, 16  ;;  %v10172_v1 = vld [vmem:[#allocation4 + $0x3c] sm:$0x1] }
 0x253   :  { %v3158_v55 = vrot.slane %v3157_v48, 4  ;;  %v2930_v63 = vrot.slane %v2928_v16, 5  ;;  %v3209_v30 = vrot.slane %v3207_v39, 4  ;;  %v3216_v10 = vshll.u32 %v3127_v62, 16  ;;  %v3130_v27 = vld [vmem:[#allocation5 + $0x30] sm:$0xf] }
 0x254   :  { %v2867_v28 = vsel %vm10112_vm8, %v2862_v33, %v2866_v12  ;;  %v3212_v47 = vrot.slane %v3210_v37, 5  ;;  %v3223_v5 = vrot.slane %v3221_v14, 4  ;;  %v3224_v40 = vshll.u32 %v3128_v23, 16  ;;  %v10178_v19 = vld [vmem:[#allocation5 + $0x38] sm:$0xf]  ;;  %v7675_v39 = vld [vmem:[%s11107_s3 + $0x110] sm:$0xff]  }
 0x255   :  { %v6766_v31 = vcombine.low %v2867_v28, %v2881_v15  ;;  %v3163_v61 = vsel %vm10112_vm8, %v3158_v55, %v3162_v44  ;;  %v2931_v20 = vor.u32 %v2930_v63, %v2927_v51  ;;  %v3230_v52 = vshll.u32 %v3129_v50, 16  ;;  %v10192_v25 = vld [vmem:[#allocation5 + $0x34] sm:$0x1]  ;;  %v7687_v23 = vld [vmem:[%s11107_s3 + $0x188] sm:$0xff]   ;;  %v7688_v51 = vld [vmem:[%s11107_s3 + $0x1d0] sm:$0xff]  }
 0x256   :  { %v6774_v9 = vcombine.low %v3163_v61, %v3177_v49  ;;  %v3213_v15 = vor.u32 %v3212_v47, %v3209_v30  ;;  %v2939_v38 = vshrl.u32 %v2831_v21, 16  ;;  %v2923_v58 = vsel %vm10112_vm8, %v10143_v11, %v10145_v46  ;;  %v1890_v48 = vld [vmem:[#allocation4 + $0x4c] sm:$0x1]  ;;  %v7692_v55 = vld [vmem:[%s11107_s3 + $0x190] sm:$0xff]   ;;  %v7669_v63 = vld [vmem:[#allocation3 + $0x28] ss:$8 sps:$4 sm:$0xff]  }
 0x257   :  { %5422 = vmatprep.mubr.bf16.mxu0 %v6766_v31  ;;  %v2932_v22 = vrot.slane %v2931_v20, 4  ;;  %v3226_v45 = vrot.slane %v3224_v40, 5  ;;  %v2942_v29 = vshll.u32 %v2831_v21, 16  ;;  %v2936_v57 = vrot.slane %v2934_v7, 5  ;;  %v3133_v33 = vld [vmem:[#allocation5 + $0x3c] sm:$0x1] }
 0x258   :  { %5520 = vmatmul.mubr.bf16.vlgmr.msra.gmra.mrb[32].mxu1 %v6774_v9  ;;  %5423 = vmatmul.mubr.bf16.vlgmr.msra.gmra.mrb[32].mxu0 %v7664_v54  ;;  %v2941_v49 = vrot.slane %v2939_v38, 4  ;;  %v2948_v26 = vshll.u32 %v2832_v13, 16  ;;  %v2953_v6 = vshrl.u32 %v2833_v36, 16  ;;  %v10186_v8 = vrot.slane %v3213_v15, 4  ;;  %v2837_v21 = vld [vmem:[#allocation4 + $0x50] sm:$0xf] }
 0x259   :  { %5527 = vmatprep.mubr.bf16.mxu1 %v7665_v43  ;;  %5430 = vmatprep.mubr.bf16.mxu0 %v6767_v41  ;;  %v10188_v3 = vrot.slane %v3216_v10, 5  ;;  %v3227_v12 = vor.u32 %v3226_v45, %v3223_v5  ;;  %v2944_v44 = vrot.slane %v2942_v29, 5  ;;  %v2937_v2 = vsel %vm10112_vm8, %v2932_v22, %v2936_v57  ;;  %v7674_v41 = vld [vmem:[%s11107_s3 + $0x150] sm:$0xff]   ;;  %v1920_v47 = vld [vmem:[#allocation4 + $0x48] sm:$0x1]  ;;  %v7694_v5 = vld [vmem:[%s11107_s3 + $0x1d8] sm:$0xff]  }
 0x25a   :  { %7175 = vmatpush3.bf16.msra.mxu0 %v7667_v42  ;;  %v3232_v17 = vrot.slane %v3230_v52, 5  ;;  %v2955_v32 = vrot.slane %v2953_v6, 4  ;;  %v2956_v53 = vshll.u32 %v2833_v36, 16  ;;  %7239 = vmatpush3.bf16.msra.mxu1 %v7684_v56  ;;  %v2962_v11 = vshll.u32 %v10172_v1, 16  ;;  %v7678_v42 = vld [vmem:[%s11107_s3 + $0x158] sm:$0xff]  }
 0x25b   :  { %7176 = vmatprep.subr.bf16.mxu0 %v7670_v35  ;;  %v3228_v0 = vrot.slane %v3227_v12, 4  ;;  %v2945_v4 = vor.u32 %v2944_v44, %v2941_v49  ;;  %v3235_v46 = vshrl.u32 %v3130_v27, 16  ;;  %7240 = vmatprep.subr.bf16.mxu1 %v7686_v24  ;;  %v10204_v16 = vrot.slane %v2948_v26, 5  ;;  %v2321_v10 = vld [vmem:[#allocation5 + $0x4c] sm:$0x1] }
 0x25c   :  { %v2958_v62 = vrot.slane %v2956_v53, 5  ;;  %v3238_v37 = vshll.u32 %v3130_v27, 16  ;;  %v3249_v14 = vshrl.u32 %v10178_v19, 16  ;;  %v6768_v7 = vcombine.low %v2923_v58, %v2937_v2  ;;  %v7668_v13 = vld [vmem:[#allocation5 + $0x10] ss:$8 sps:$4 sm:$0xff]   ;;  %v7679_v27 = vld [vmem:[%s11107_s3 + $0x118] sm:$0xff]  }
 0x25d   :  { %v3219_v50 = vsel %vm10112_vm8, %v10186_v8, %v10188_v3  ;;  %v3237_v30 = vrot.slane %v3235_v46, 4  ;;  %v3244_v28 = vshll.u32 %v10192_v25, 16  ;;  %v3233_v31 = vsel %vm10112_vm8, %v3228_v0, %v3232_v17  ;;  %v10228_v20 = vld [vmem:[#allocation4 + $0x54] sm:$0x1]  ;;  %v2351_v54 = vld [vmem:[#allocation5 + $0x48] sm:$0x1] }
 0x25e   :  { %7177 = vmatpush3.bf16.msra.mxu0 %v7671_v18  ;;  %v10226_v61 = vrot.slane %v2945_v4, 4  ;;  %v2959_v43 = vor.u32 %v2958_v62, %v2955_v32  ;;  %v3240_v35 = vrot.slane %v3238_v37, 5  ;;  %7241 = vmatpush3.bf16.msra.mxu1 %v7687_v23  ;;  %v10230_v40 = vrot.slane %v2962_v11, 5  ;;  %v3136_v58 = vld [vmem:[#allocation5 + $0x50] sm:$0xf]  ;;  %v7695_v3 = vld [vmem:[%s11107_s3 + $0x198] sm:$0xff]  }
 0x25f   :  { %7178 = vmatprep.subr.bf16.mxu0 %v7674_v41  ;;  %v3251_v36 = vrot.slane %v3249_v14, 4  ;;  %v3252_v56 = vshll.u32 %v10178_v19, 16  ;;  %v3258_v9 = vshll.u32 %v3133_v33, 16  ;;  %7242 = vmatprep.subr.bf16.mxu1 %v7688_v51  ;;  %v1891_v1 = vsel %vm8000_vm2, 0, %v1890_v48  ;;  %v7683_v19 = vld [vmem:[%s11107_s3 + $0x160] sm:$0xff]   ;;  %v7691_v62 = vld [vmem:[%s11107_s3 + $0x168] sm:$0xff]  }
 0x260   :  { %5528 = vmatmul.mubr.bf16.gmra.mrb[36].mxu1 %v10147_v34  ;;  %5431 = vmatmul.mubr.bf16.gmra.mrb[36].mxu0 %v7668_v13  ;;  %v2960_v15 = vrot.slane %v2959_v43, 4  ;;  %v3241_v52 = vor.u32 %v3240_v35, %v3237_v30  ;;  %v1921_v38 = vsel %vm8000_vm2, 0, %v1920_v47  ;;  %v6776_v22 = vcombine.low %v3219_v50, %v3233_v31  ;;  %1892 = vst [vmem:[#allocation4 + $0x4c] sm:$0x1] %v1891_v1  ;;  %v2839_v24 = vld [vmem:[#allocation4 + $0x58] sm:$0xf] }
 0x261   :  { %5535 = vmatprep.mubr.bf16.mxu1 %v7669_v63  ;;  %5438 = vmatprep.mubr.bf16.mxu0 %v6768_v7  ;;  %v3254_v45 = vrot.slane %v3252_v56, 5  ;;  %1922 = vst [vmem:[#allocation4 + $0x48] sm:$0x1] %v1921_v38  ;;  %v2981_v34 = vshrl.u32 %v2837_v21, 16  ;;  %v2984_v29 = vshll.u32 %v2837_v21, 16  ;;  %v2951_v49 = vsel %vm10112_vm8, %v10226_v61, %v10204_v16  ;;  %v7696_v32 = vld [vmem:[%s11107_s3 + $0x1e0] sm:$0xff]  }
 0x262   :  { %v10244_v57 = vld [vmem:[#allocation4 + $0x5c] sm:$0x1]  ;;  %7179 = vmatpush3.bf16.msra.mxu0 %v7675_v39  ;;  %v10250_v26 = vrot.slane %v3244_v28, 5  ;;  %v10252_v6 = vrot.slane %v3258_v9, 5  ;;  %v2322_v18 = vsel %vm8000_vm2, 0, %v2321_v10  ;;  %7243 = vmatpush3.bf16.msra.mxu1 %v7692_v55  ;;  %v2990_v17 = vshll.u32 %v10228_v20, 16 }
 0x263   :  { %v3137_v8 = vld [vmem:[#allocation5 + $0x54] sm:$0x1]  ;;  %v3255_v12 = vor.u32 %v3254_v45, %v3251_v36  ;;  %7180 = vmatprep.subr.bf16.mxu0 %v7678_v42  ;;  %v2983_v44 = vrot.slane %v2981_v34, 4  ;;  %v2986_v2 = vrot.slane %v2984_v29, 5  ;;  %2323 = vst [vmem:[#allocation5 + $0x4c] sm:$0x1] %v2322_v18  ;;  %7244 = vmatprep.subr.bf16.mxu1 %v7694_v5  ;;  %v2965_v53 = vsel %vm10112_vm8, %v2960_v15, %v10230_v40 }
 0x264   :  { %v3242_v25 = vrot.slane %v3241_v52, 4  ;;  %v2352_v23 = vsel %vm8000_vm2, 0, %v2351_v54  ;;  %v3277_v0 = vshrl.u32 %v3136_v58, 16  ;;  %v7685_v41 = vld [vmem:[%s11107_s3 + $0x120] sm:$0xff]   ;;  %v7673_v4 = vld [vmem:[#allocation3 + $0x38] ss:$8 sps:$4 sm:$0xff]   ;;  %v6769_v55 = vcombine.low %v2951_v49, %v2965_v53 }
 0x265   :  { %v3256_v11 = vrot.slane %v3255_v12, 4  ;;  %v2987_v46 = vor.u32 %v2986_v2, %v2983_v44  ;;  %2353 = vst [vmem:[#allocation5 + $0x48] sm:$0x1] %v2352_v23  ;;  %v3280_v48 = vshll.u32 %v3136_v58, 16  ;;  %v3286_v51 = vshll.u32 %v3137_v8, 16  ;;  %v7702_v30 = vld [vmem:[%s11107_s3 + $0x1e8] sm:$0xff]  }
 0x266   :  { %v10271_v16 = vld [vmem:[#allocation4 + $0x60] sm:$0xf]  ;;  %v7672_v39 = vld [vmem:[#allocation5 + $0x20] ss:$8 sps:$4 sm:$0xff]   ;;  %7181 = vmatpush3.bf16.msra.mxu0 %v7679_v27  ;;  %v3279_v33 = vrot.slane %v3277_v0, 4  ;;  %v2995_v37 = vshrl.u32 %v2839_v24, 16  ;;  %7245 = vmatpush3.bf16.msra.mxu1 %v7695_v3  ;;  %v3247_v28 = vsel %vm10112_vm8, %v3242_v25, %v10250_v26 }
 0x267   :  { %v2998_v14 = vshll.u32 %v2839_v24, 16  ;;  %v3004_v21 = vshll.u32 %v10244_v57, 16  ;;  %v10280_v63 = vrot.slane %v2987_v46, 4  ;;  %v10282_v7 = vrot.slane %v2990_v17, 5  ;;  %7182 = vmatprep.subr.bf16.mxu0 %v7683_v19  ;;  %7246 = vmatprep.subr.bf16.mxu1 %v7696_v32  ;;  %v2836_v10 = vld [vmem:[#allocation4 + $0x4c] sm:$0x1] }
 0x268   :  { %v3282_v50 = vrot.slane %v3280_v48, 5  ;;  %5536 = vmatmul.mubr.bf16.gmra.mrb[40].mxu1 %v6776_v22  ;;  %5439 = vmatmul.mubr.bf16.gmra.mrb[40].mxu0 %v7672_v39  ;;  %v3261_v42 = vsel %vm10112_vm8, %v3256_v11, %v10252_v6  ;;  %v2835_v47 = vld [vmem:[#allocation4 + $0x48] sm:$0xf]  ;;  %v2997_v5 = vrot.slane %v2995_v37, 4  ;;  %v2976_v20 = vshll.u32 %v2836_v10, 16  ;;  %v7699_v36 = vld [vmem:[%s11107_s3 + $0x170] sm:$0xff]  }
 0x269   :  { %v3000_v13 = vrot.slane %v2998_v14, 5  ;;  %v7693_v31 = vld [vmem:[%s11107_s3 + $0x128] sm:$0xff]   ;;  %5543 = vmatprep.mubr.bf16.mxu1 %v7673_v4  ;;  %5446 = vmatprep.mubr.bf16.mxu0 %v6769_v55  ;;  %v2967_v43 = vshrl.u32 %v2835_v47, 16  ;;  %v2970_v35 = vshll.u32 %v2835_v47, 16  ;;  %v10299_v40 = vrot.slane %v3286_v51, 5  ;;  %v7704_v56 = vld [vmem:[%s11107_s3 + $0x1f0] sm:$0xff]  }
 0x26a   :  { %v7703_v61 = vld [vmem:[%s11107_s3 + $0x1a8] sm:$0xff]   ;;  %v3135_v9 = vld [vmem:[#allocation5 + $0x4c] sm:$0x1]  ;;  %v3283_v54 = vor.u32 %v3282_v50, %v3279_v33  ;;  %v2842_v15 = vld [vmem:[#allocation4 + $0x64] sm:$0x1]  ;;  %v10307_v1 = vrot.slane %v3004_v21, 5  ;;  %7183 = vmatpush3.bf16.msra.mxu0 %v7685_v41  ;;  %7247 = vmatpush3.bf16.msra.mxu1 %v7700_v59  ;;  %v6777_v29 = vcombine.low %v3247_v28, %v3261_v42  ;;  %v2993_v19 = vsel %vm10112_vm8, %v10280_v63, %v10282_v7 }
 0x26b   :  { %v3001_v52 = vor.u32 %v3000_v13, %v2997_v5  ;;  %v3009_v38 = vshrl.u32 %v10271_v16, 16  ;;  %v2969_v27 = vrot.slane %v2967_v43, 4  ;;  %v2972_v58 = vrot.slane %v2970_v35, 5  ;;  %v3138_v34 = vld [vmem:[#allocation5 + $0x58] sm:$0xf]  ;;  %7184 = vmatprep.subr.bf16.mxu0 %v7691_v62  ;;  %7248 = vmatprep.subr.bf16.mxu1 %v7702_v30  ;;  %v7701_v26 = vld [vmem:[%s11107_s3 + $0x130] sm:$0xff]  }
 0x26c   :  { %v2978_v22 = vrot.slane %v2976_v20, 5  ;;  %v3272_v45 = vshll.u32 %v3135_v9, 16  ;;  %v3134_v24 = vld [vmem:[#allocation5 + $0x48] sm:$0xf]  ;;  %v10314_v57 = vrot.slane %v3283_v54, 4  ;;  %v7707_v2 = vld [vmem:[%s11107_s3 + $0x1b0] sm:$0xff]  }
 0x26d   :  { %v10316_v49 = vrot.slane %v3001_v52, 4  ;;  %v7677_v6 = vld [vmem:[#allocation3 + $0x50] ss:$8 sps:$4 sm:$0xff]   ;;  %v2973_v18 = vor.u32 %v2972_v58, %v2969_v27  ;;  %v3263_v8 = vshrl.u32 %v3134_v24, 16  ;;  %v3266_v3 = vshll.u32 %v3134_v24, 16  ;;  %v7706_v51 = vld [vmem:[%s11107_s3 + $0x178] sm:$0xff]  }
 0x26e   :  { %v3274_v12 = vrot.slane %v3272_v45, 5  ;;  %v3139_v44 = vld [vmem:[#allocation5 + $0x5c] sm:$0x1]  ;;  %v7676_v17 = vld [vmem:[#allocation5 + $0x30] ss:$8 sps:$4 sm:$0xff]   ;;  %v3289_v32 = vsel %vm10112_vm8, %v10314_v57, %v10299_v40  ;;  %v3011_v25 = vrot.slane %v3009_v38, 4  ;;  %7185 = vmatpush3.bf16.msra.mxu0 %v7693_v31  ;;  %7249 = vmatpush3.bf16.msra.mxu1 %v7703_v61 }
 0x26f   :  { %v3007_v53 = vsel %vm10112_vm8, %v10316_v49, %v10307_v1  ;;  %v3012_v23 = vshll.u32 %v10271_v16, 16  ;;  %v3140_v0 = vld [vmem:[#allocation5 + $0x60] sm:$0xf]  ;;  %v2974_v41 = vrot.slane %v2973_v18, 4  ;;  %v3265_v4 = vrot.slane %v3263_v8, 4  ;;  %7186 = vmatprep.subr.bf16.mxu0 %v7699_v36  ;;  %7250 = vmatprep.subr.bf16.mxu1 %v7704_v56  ;;  %v7709_v62 = vld [vmem:[%s11107_s3 + $0x1f8] sm:$0xff]  }
 0x270   :  { %v3268_v11 = vrot.slane %v3266_v3, 5  ;;  %v3018_v46 = vshll.u32 %v2842_v15, 16  ;;  %v2843_v48 = vld [vmem:[#allocation4 + $0x68] sm:$0xf]  ;;  %5544 = vmatmul.mubr.bf16.gmra.mrb[44].mxu1 %v6777_v29  ;;  %5447 = vmatmul.mubr.bf16.gmra.mrb[44].mxu0 %v7676_v17  ;;  %v3291_v59 = vshrl.u32 %v3138_v34, 16  ;;  %v3294_v39 = vshll.u32 %v3138_v34, 16 }
 0x271   :  { %v3014_v16 = vrot.slane %v3012_v23, 5  ;;  %v3300_v33 = vshll.u32 %v3139_v44, 16  ;;  %5551 = vmatprep.mubr.bf16.mxu1 %v7677_v6  ;;  %v2979_v37 = vsel %vm10112_vm8, %v2974_v41, %v2978_v22  ;;  %v3141_v55 = vld [vmem:[#allocation5 + $0x64] sm:$0x1]  ;;  %v3305_v63 = vshrl.u32 %v3140_v0, 16  ;;  %v7708_v47 = vld [vmem:[%s11107_s3 + $0x138] sm:$0xff]  }
 0x272   :  { %v3269_v14 = vor.u32 %v3268_v11, %v3265_v4  ;;  %v3020_v21 = vrot.slane %v3018_v46, 5  ;;  %v6770_v7 = vcombine.low %v2979_v37, %v2993_v19  ;;  %v3293_v30 = vrot.slane %v3291_v59, 4  ;;  %v2844_v42 = vld [vmem:[#allocation4 + $0x6c] sm:$0x1]  ;;  %7187 = vmatpush3.bf16.msra.mxu0 %v7701_v26  ;;  %7251 = vmatpush3.bf16.msra.mxu1 %v7707_v2  ;;  %v7710_v10 = vld [vmem:[%s11107_s3 + $0x1b8] sm:$0xff]   ;;  %v10350_v43 = vld [vmem:[%s11107_s3 + $0x200] sm:$0xff]  }
 0x273   :  { %v3015_v50 = vor.u32 %v3014_v16, %v3011_v25  ;;  %v3296_v28 = vrot.slane %v3294_v39, 5  ;;  %v3302_v13 = vrot.slane %v3300_v33, 5  ;;  %v3307_v31 = vrot.slane %v3305_v63, 4  ;;  %7188 = vmatprep.subr.bf16.mxu0 %v7706_v51  ;;  %7252 = vmatprep.subr.bf16.mxu1 %v7709_v62  ;;  %v2845_v36 = vld [vmem:[#allocation4 + $0x70] sm:$0xf] }
 0x274   :  { %v3270_v5 = vrot.slane %v3269_v14, 4  ;;  %v3308_v61 = vshll.u32 %v3140_v0, 16  ;;  %5454 = vmatprep.mubr.bf16.mxu0 %v6770_v7  ;;  %v3314_v40 = vshll.u32 %v3141_v55, 16  ;;  %v3023_v56 = vshrl.u32 %v2843_v48, 16  ;;  %v2846_v15 = vld [vmem:[#allocation4 + $0x74] sm:$0x1] }
 0x275   :  { %v3016_v35 = vrot.slane %v3015_v50, 4  ;;  %v3297_v20 = vor.u32 %v3296_v28, %v3293_v30  ;;  %v3026_v52 = vshll.u32 %v2843_v48, 16  ;;  %v3032_v38 = vshll.u32 %v2844_v42, 16  ;;  %v7681_v58 = vld [vmem:[#allocation5 + $0x48] ss:$8 sps:$4 sm:$0xff]  }
 0x276   :  { %v3275_v9 = vsel %vm10112_vm8, %v3270_v5, %v3274_v12  ;;  %v3310_v54 = vrot.slane %v3308_v61, 5  ;;  %v3316_v34 = vrot.slane %v3314_v40, 5  ;;  %v3142_v29 = vld [vmem:[#allocation5 + $0x68] sm:$0xf]  ;;  %7189 = vmatpush3.bf16.msra.mxu0 %v7708_v47  ;;  %7253 = vmatpush3.bf16.msra.mxu1 %v7710_v10  ;;  %v3025_v26 = vrot.slane %v3023_v56, 4 }
 0x277   :  { %v6778_v27 = vcombine.low %v3275_v9, %v3289_v32  ;;  %v3021_v22 = vsel %vm10112_vm8, %v3016_v35, %v3020_v21  ;;  %v3298_v45 = vrot.slane %v3297_v20, 4  ;;  %v7682_v19 = vld [vmem:[#allocation3 + $0x60] ss:$8 sps:$4 sm:$0xff]   ;;  %v3028_v6 = vrot.slane %v3026_v52, 5  ;;  %v3143_v18 = vld [vmem:[#allocation5 + $0x6c] sm:$0x1]  ;;  %7478 = vmatprep.subr.bf16.mxu0 %v10350_v43 }
 0x278   :  { %v6771_v24 = vcombine.low %v3007_v53, %v3021_v22  ;;  %v3311_v57 = vor.u32 %v3310_v54, %v3307_v31  ;;  %5455 = vmatmul.mubr.bf16.gmra.mrb[48].mxu0 %v7681_v58  ;;  %v3034_v3 = vrot.slane %v3032_v38, 5  ;;  %v3037_v12 = vshrl.u32 %v2845_v36, 16  ;;  %v3144_v49 = vld [vmem:[#allocation5 + $0x70] sm:$0xf]  ;;  %v2847_v53 = vld [vmem:[#allocation4 + $0x78] sm:$0xf] }
 0x279   :  { %5552 = vmatmul.mubr.bf16.gmra.mrb[48].mxu1 %v6778_v27  ;;  %v3303_v8 = vsel %vm10112_vm8, %v3298_v45, %v3302_v13  ;;  %v3040_v44 = vshll.u32 %v2845_v36, 16  ;;  %v3029_v17 = vor.u32 %v3028_v6, %v3025_v26  ;;  %v3046_v1 = vshll.u32 %v2846_v15, 16  ;;  %v3145_v0 = vld [vmem:[#allocation5 + $0x74] sm:$0x1]  ;;  %v2848_v33 = vld [vmem:[#allocation4 + $0x7c] sm:$0x1] }
 0x27a   :  { %5559 = vmatprep.mubr.bf16.mxu1 %v7682_v19  ;;  %5462 = vmatprep.mubr.bf16.mxu0 %v6771_v24  ;;  %v3312_v2 = vrot.slane %v3311_v57, 4  ;;  %v3319_v32 = vshrl.u32 %v3142_v29, 16  ;;  %v3039_v25 = vrot.slane %v3037_v12, 4  ;;  %v3322_v41 = vshll.u32 %v3142_v29, 16  ;;  %v7690_v37 = vld [vmem:[#allocation3 + $0x70] ss:$8 sps:$4 sm:$0xff]  }
 0x27b   :  { %v3042_v23 = vrot.slane %v3040_v44, 5  ;;  %v3328_v4 = vshll.u32 %v3143_v18, 16  ;;  %v3030_v46 = vrot.slane %v3029_v17, 4  ;;  %v3048_v48 = vrot.slane %v3046_v1, 5  ;;  %v2849_v7 = vld [vmem:[#allocation4 + $0x80] sm:$0xf] }
 0x27c   :  { %v3317_v11 = vsel %vm10112_vm8, %v3312_v2, %v3316_v34  ;;  %v3321_v51 = vrot.slane %v3319_v32, 4  ;;  %v3324_v59 = vrot.slane %v3322_v41, 5  ;;  %v3333_v21 = vshrl.u32 %v3144_v49, 16  ;;  %v7689_v50 = vld [vmem:[#allocation5 + $0x58] ss:$8 sps:$4 sm:$0xff]  }
 0x27d   :  { %v6779_v62 = vcombine.low %v3303_v8, %v3317_v11  ;;  %v3043_v16 = vor.u32 %v3042_v23, %v3039_v25  ;;  %v3330_v39 = vrot.slane %v3328_v4, 5  ;;  %v3035_v14 = vsel %vm10112_vm8, %v3030_v46, %v3034_v3  ;;  %v2850_v31 = vld [vmem:[#allocation4 + $0x84] sm:$0x1]  ;;  %v3146_v56 = vld [vmem:[#allocation5 + $0x78] sm:$0xf] }
 0x27e   :  { %v3336_v55 = vshll.u32 %v3144_v49, 16  ;;  %v3342_v63 = vshll.u32 %v3145_v0, 16  ;;  %v3325_v28 = vor.u32 %v3324_v59, %v3321_v51  ;;  %v3051_v42 = vshrl.u32 %v2847_v53, 16  ;;  %v3147_v38 = vld [vmem:[#allocation5 + $0x7c] sm:$0x1] }
 0x27f   :  { %v3044_v30 = vrot.slane %v3043_v16, 4  ;;  %v3054_v47 = vshll.u32 %v2847_v53, 16  ;;  %v3335_v10 = vrot.slane %v3333_v21, 4  ;;  %v3060_v61 = vshll.u32 %v2848_v33, 16  ;;  %v3148_v34 = vld [vmem:[#allocation5 + $0x80] sm:$0xf] }
 0x280   :  { %v3338_v5 = vrot.slane %v3336_v55, 5  ;;  %v3344_v13 = vrot.slane %v3342_v63, 5  ;;  %5463 = vmatmul.mubr.bf16.gmra.mrb[52].mxu0 %v7689_v50  ;;  %v3326_v20 = vrot.slane %v3325_v28, 4  ;;  %v3053_v40 = vrot.slane %v3051_v42, 4  ;;  %v4150_v26 = vld [vmem:[#allocation4 + $0x8] sm:$0xf] }
 0x281   :  { %5560 = vmatmul.mubr.bf16.gmra.mrb[52].mxu1 %v6779_v62  ;;  %v3049_v35 = vsel %vm10112_vm8, %v3044_v30, %v3048_v48  ;;  %v3056_v36 = vrot.slane %v3054_v47, 5  ;;  %v3062_v15 = vrot.slane %v3060_v61, 5  ;;  %v3065_v52 = vshrl.u32 %v2849_v7, 16  ;;  %v4151_v6 = vld [vmem:[#allocation4 + $0xc] sm:$0x1] }
 0x282   :  { %5567 = vmatprep.mubr.bf16.mxu1 %v7690_v37  ;;  %v6772_v9 = vcombine.low %v3035_v14, %v3049_v35  ;;  %v3339_v54 = vor.u32 %v3338_v5, %v3335_v10  ;;  %v3331_v27 = vsel %vm10112_vm8, %v3326_v20, %v3330_v39  ;;  %v3068_v22 = vshll.u32 %v2849_v7, 16  ;;  %v3149_v12 = vld [vmem:[#allocation5 + $0x84] sm:$0x1]  ;;  %v7698_v17 = vld [vmem:[#allocation3 + $0x80] ss:$8 sps:$4 sm:$0xff]  }
 0x283   :  { %v3057_v58 = vor.u32 %v3056_v36, %v3053_v40  ;;  %v3074_v45 = vshll.u32 %v2850_v31, 16  ;;  %v3067_v19 = vrot.slane %v3065_v52, 4  ;;  %v3347_v24 = vshrl.u32 %v3146_v56, 16  ;;  %v4152_v53 = vld [vmem:[#allocation4 + $0x10] sm:$0xf] }
 0x284   :  { %5470 = vmatprep.mubr.bf16.mxu0 %v6772_v9  ;;  %v3340_v29 = vrot.slane %v3339_v54, 4  ;;  %v3350_v57 = vshll.u32 %v3146_v56, 16  ;;  %v3070_v8 = vrot.slane %v3068_v22, 5  ;;  %v3356_v44 = vshll.u32 %v3147_v38, 16  ;;  %v7697_v23 = vld [vmem:[#allocation5 + $0x68] ss:$8 sps:$4 sm:$0xff]  }
 0x285   :  { %v3058_v18 = vrot.slane %v3057_v58, 4  ;;  %v3076_v3 = vrot.slane %v3074_v45, 5  ;;  %v3349_v1 = vrot.slane %v3347_v24, 4  ;;  %v3361_v32 = vshrl.u32 %v3148_v34, 16  ;;  %v3782_v62 = vld [vmem:[#allocation3 + $0x8] sm:$0xf] }
 0x286   :  { %v3345_v2 = vsel %vm10112_vm8, %v3340_v29, %v3344_v13  ;;  %v3352_v49 = vrot.slane %v3350_v57, 5  ;;  %v3071_v41 = vor.u32 %v3070_v8, %v3067_v19  ;;  %v3358_v4 = vrot.slane %v3356_v44, 5  ;;  %v3783_v37 = vld [vmem:[#allocation3 + $0xc] sm:$0x1]  ;;  %v4153_v63 = vld [vmem:[#allocation4 + $0x14] sm:$0x1] }
 0x287   :  { %v6780_v25 = vcombine.low %v3331_v27, %v3345_v2  ;;  %v3063_v0 = vsel %vm10112_vm8, %v3058_v18, %v3062_v15  ;;  %v3363_v46 = vrot.slane %v3361_v32, 4  ;;  %v3364_v48 = vshll.u32 %v3148_v34, 16  ;;  %v3784_v47 = vld [vmem:[#allocation3 + $0x10] sm:$0xf]  ;;  %v3785_v40 = vld [vmem:[#allocation3 + $0x14] sm:$0x1] }
 0x288   :  { %v3353_v11 = vor.u32 %v3352_v49, %v3349_v1  ;;  %v3370_v51 = vshll.u32 %v3149_v12, 16  ;;  %5471 = vmatmul.mubr.bf16.gmra.mrb[56].mxu0 %v7697_v23  ;;  %v3072_v16 = vrot.slane %v3071_v41, 4  ;;  %v4183_v59 = vshrl.u32 %v4150_v26, 16  ;;  %v3486_v56 = vld [vmem:[#allocation2 + $0x8] sm:$0xf] }
 0x289   :  { %5568 = vmatmul.mubr.bf16.gmra.mrb[56].mxu1 %v6780_v25  ;;  %v4186_v39 = vshll.u32 %v4150_v26, 16  ;;  %v4192_v33 = vshll.u32 %v4151_v6, 16  ;;  %v3366_v21 = vrot.slane %v3364_v48, 5  ;;  %v4197_v7 = vshrl.u32 %v4152_v53, 16  ;;  %v3487_v38 = vld [vmem:[#allocation2 + $0xc] sm:$0x1] }
 0x28a   :  { %5575 = vmatprep.mubr.bf16.mxu1 %v7698_v17  ;;  %v3354_v14 = vrot.slane %v3353_v11, 4  ;;  %v3372_v55 = vrot.slane %v3370_v51, 5  ;;  %v3077_v50 = vsel %vm10112_vm8, %v3072_v16, %v3076_v3  ;;  %v4185_v30 = vrot.slane %v4183_v59, 4  ;;  %v7705_v27 = vld [vmem:[#allocation5 + $0x78] ss:$8 sps:$4 sm:$0xff]  }
 0x28b   :  { %v4188_v28 = vrot.slane %v4186_v39, 5  ;;  %v4194_v42 = vrot.slane %v4192_v33, 5  ;;  %v6773_v10 = vcombine.low %v3063_v0, %v3077_v50  ;;  %v3367_v13 = vor.u32 %v3366_v21, %v3363_v46  ;;  %v3488_v26 = vld [vmem:[#allocation2 + $0x10] sm:$0xf]  ;;  %v3489_v2 = vld [vmem:[#allocation2 + $0x14] sm:$0x1] }
 0x28c   :  { %v3359_v5 = vsel %vm10112_vm8, %v3354_v14, %v3358_v4  ;;  %v4199_v31 = vrot.slane %v4197_v7, 4  ;;  %v4200_v35 = vshll.u32 %v4152_v53, 16  ;;  %v4206_v20 = vshll.u32 %v4153_v63, 16  ;;  %v4154_v23 = vld [vmem:[#allocation4 + $0x18] sm:$0xf] }
 0x28d   :  { %v4189_v61 = vor.u32 %v4188_v28, %v4185_v30  ;;  %v3815_v36 = vshrl.u32 %v3782_v62, 16  ;;  %5478 = vmatprep.mubr.bf16.mxu0 %v6773_v10  ;;  %v3368_v9 = vrot.slane %v3367_v13, 4  ;;  %v3818_v54 = vshll.u32 %v3782_v62, 16  ;;  %v4155_v16 = vld [vmem:[#allocation4 + $0x1c] sm:$0x1] }
 0x28e   :  { %v3824_v15 = vshll.u32 %v3783_v37, 16  ;;  %v3829_v52 = vshrl.u32 %v3784_v47, 16  ;;  %v4202_v22 = vrot.slane %v4200_v35, 5  ;;  %v4208_v45 = vrot.slane %v4206_v20, 5  ;;  %v4156_v59 = vld [vmem:[#allocation4 + $0x20] sm:$0xf] }
 0x28f   :  { %v4190_v58 = vrot.slane %v4189_v61, 4  ;;  %v3817_v34 = vrot.slane %v3815_v36, 4  ;;  %v3373_v29 = vsel %vm10112_vm8, %v3368_v9, %v3372_v55  ;;  %v3820_v19 = vrot.slane %v3818_v54, 5  ;;  %v4157_v21 = vld [vmem:[#allocation4 + $0x24] sm:$0x1] }
 0x290   :  { %v3826_v24 = vrot.slane %v3824_v15, 5  ;;  %v3831_v57 = vrot.slane %v3829_v52, 4  ;;  %v6781_v6 = vcombine.low %v3359_v5, %v3373_v29  ;;  %5479 = vmatmul.mubr.bf16.gmra.mrb[60].mxu0 %v7705_v27  ;;  %v4203_v8 = vor.u32 %v4202_v22, %v4199_v31  ;;  %v3786_v30 = vld [vmem:[#allocation3 + $0x18] sm:$0xf]  ;;  %v3787_v5 = vld [vmem:[#allocation3 + $0x1c] sm:$0x1] }
 0x291   :  { %v4195_v18 = vsel %vm10112_vm8, %v4190_v58, %v4194_v42  ;;  %v3832_v3 = vshll.u32 %v3784_v47, 16  ;;  %v3821_v12 = vor.u32 %v3820_v19, %v3817_v34  ;;  %v3838_v44 = vshll.u32 %v3785_v40, 16  ;;  %v7711_v31 = vld [vmem:[#allocation5 + $0x8] ss:$8 sps:$4 sm:$0xff]   ;;  %v3788_v54 = vld [vmem:[#allocation3 + $0x20] sm:$0xf] }
 0x292   :  { %v3519_v17 = vshrl.u32 %v3486_v56, 16  ;;  %v3522_v1 = vshll.u32 %v3486_v56, 16  ;;  %5576 = vmatmul.mubr.bf16.gmra.mrb[60].mxu1 %v6781_v6  ;;  %v4204_v49 = vrot.slane %v4203_v8, 4  ;;  %v3528_v53 = vshll.u32 %v3487_v38, 16  ;;  %v3789_v58 = vld [vmem:[#allocation3 + $0x24] sm:$0x1] }
 0x293   :  { %v3834_v32 = vrot.slane %v3832_v3, 5  ;;  %v3533_v25 = vshrl.u32 %v3488_v26, 16  ;;  %v3822_v0 = vrot.slane %v3821_v12, 4  ;;  %v3840_v41 = vrot.slane %v3838_v44, 5  ;;  %v3490_v19 = vld [vmem:[#allocation2 + $0x18] sm:$0xf] }
 0x294   :  { %v3521_v4 = vrot.slane %v3519_v17, 4  ;;  %v3524_v11 = vrot.slane %v3522_v1, 5  ;;  %v4209_v46 = vsel %vm10112_vm8, %v4204_v49, %v4208_v45  ;;  %v3530_v51 = vrot.slane %v3528_v53, 5  ;;  %v7714_v53 = vld [vmem:[%s11107_s3 + $0x208] sm:$0xff]  }
 0x295   :  { %v3835_v48 = vor.u32 %v3834_v32, %v3831_v57  ;;  %v3535_v62 = vrot.slane %v3533_v25, 4  ;;  %v6814_v39 = vcombine.low %v4195_v18, %v4209_v46  ;;  %v3827_v33 = vsel %vm10112_vm8, %v3822_v0, %v3826_v24  ;;  %v3491_v18 = vld [vmem:[#allocation2 + $0x1c] sm:$0x1] }
 0x296   :  { %v3525_v37 = vor.u32 %v3524_v11, %v3521_v4  ;;  %v3536_v14 = vshll.u32 %v3488_v26, 16  ;;  %v3542_v63 = vshll.u32 %v3489_v2, 16  ;;  %v4211_v7 = vshrl.u32 %v4154_v23, 16  ;;  %v3492_v2 = vld [vmem:[#allocation2 + $0x20] sm:$0xf] }
 0x297   :  { %v3836_v55 = vrot.slane %v3835_v48, 4  ;;  %v4214_v50 = vshll.u32 %v4154_v23, 16  ;;  %5713 = vmatprep.mubr.bf16.mxu1 %v6814_v39  ;;  %v4220_v47 = vshll.u32 %v4155_v16, 16  ;;  %v4225_v10 = vshrl.u32 %v4156_v59, 16 }
 0x298   :  { %v3526_v28 = vrot.slane %v3525_v37, 4  ;;  %v3538_v42 = vrot.slane %v3536_v14, 5  ;;  %v3544_v61 = vrot.slane %v3542_v63, 5  ;;  %v4213_v35 = vrot.slane %v4211_v7, 4  ;;  %v4159_v37 = vld [vmem:[#allocation4 + $0x2c] sm:$0x1] }
 0x299   :  { %v3841_v13 = vsel %vm10112_vm8, %v3836_v55, %v3840_v41  ;;  %v4216_v20 = vrot.slane %v4214_v50, 5  ;;  %v4222_v9 = vrot.slane %v4220_v47, 5  ;;  %v4227_v52 = vrot.slane %v4225_v10, 4  ;;  %v3493_v41 = vld [vmem:[#allocation2 + $0x24] sm:$0x1]  ;;  %v7716_v50 = vld [vmem:[%s11107_s3 + $0x210] sm:$0xff]  }
 0x29a   :  { %v6798_v40 = vcombine.low %v3827_v33, %v3841_v13  ;;  %v3531_v36 = vsel %vm10112_vm8, %v3526_v28, %v3530_v51  ;;  %v3539_v56 = vor.u32 %v3538_v42, %v3535_v62  ;;  %5714 = vmatmul.mubr.bf16.vlgmr.msra.gmra.mrb[64].mxu1 %v7711_v31  ;;  %v4228_v38 = vshll.u32 %v4156_v59, 16  ;;  %v4158_v62 = vld [vmem:[#allocation4 + $0x28] sm:$0xf]  ;;  %v4160_v7 = vld [vmem:[#allocation4 + $0x30] sm:$0xf] }
 0x29b   :  { %v4217_v15 = vor.u32 %v4216_v20, %v4213_v35  ;;  %v4234_v27 = vshll.u32 %v4157_v21, 16  ;;  %v3843_v45 = vshrl.u32 %v3786_v30, 16  ;;  %v3846_v34 = vshll.u32 %v3786_v30, 16  ;;  %v7713_v47 = vld [vmem:[#allocation5 + $0x18] ss:$8 sps:$4 sm:$0xff]  }
 0x29c   :  { %5616 = vmatprep.mubr.bf16.mxu0 %v6798_v40  ;;  %v3540_v22 = vrot.slane %v3539_v56, 4  ;;  %v3852_v29 = vshll.u32 %v3787_v5, 16  ;;  %v4230_v57 = vrot.slane %v4228_v38, 5  ;;  %v3857_v6 = vshrl.u32 %v3788_v54, 16  ;;  %v4161_v13 = vld [vmem:[#allocation4 + $0x34] sm:$0x1] }
 0x29d   :  { %v4218_v24 = vrot.slane %v4217_v15, 4  ;;  %v4236_v26 = vrot.slane %v4234_v27, 5  ;;  %v3845_v3 = vrot.slane %v3843_v45, 4  ;;  %v3848_v12 = vrot.slane %v3846_v34, 5  ;;  %v3790_v56 = vld [vmem:[#allocation3 + $0x28] sm:$0xf] }
 0x29e   :  { %v3545_v8 = vsel %vm10112_vm8, %v3540_v22, %v3544_v61  ;;  %v3854_v44 = vrot.slane %v3852_v29, 5  ;;  %v4231_v49 = vor.u32 %v4230_v57, %v4227_v52  ;;  %v3859_v32 = vrot.slane %v3857_v6, 4  ;;  %v7718_v38 = vld [vmem:[%s11107_s3 + $0x218] sm:$0xff]   ;;  %v3792_v29 = vld [vmem:[#allocation3 + $0x30] sm:$0xf] }
 0x29f   :  { %v6790_v17 = vcombine.low %v3531_v36, %v3545_v8  ;;  %v4223_v1 = vsel %vm10112_vm8, %v4218_v24, %v4222_v9  ;;  %v3849_v25 = vor.u32 %v3848_v12, %v3845_v3  ;;  %v3860_v23 = vshll.u32 %v3788_v54, 16  ;;  %v3791_v34 = vld [vmem:[#allocation3 + $0x2c] sm:$0x1]  ;;  %v3793_v6 = vld [vmem:[#allocation3 + $0x34] sm:$0x1] }
 0x2a0   :  { %v3866_v0 = vshll.u32 %v3789_v58, 16  ;;  %v3547_v4 = vshrl.u32 %v3490_v19, 16  ;;  %v4232_v11 = vrot.slane %v4231_v49, 4  ;;  %v3550_v46 = vshll.u32 %v3490_v19, 16 }
 0x2a1   :  { %5617 = vmatmul.mubr.bf16.vlgmr.msra.gmra.mrb[64].mxu0 %v6790_v17  ;;  %v3556_v48 = vshll.u32 %v3491_v18, 16  ;;  %v3561_v51 = vshrl.u32 %v3492_v2, 16  ;;  %v3850_v16 = vrot.slane %v3849_v25, 4  ;;  %v3862_v59 = vrot.slane %v3860_v23, 5 }
 0x2a2   :  { %v3868_v39 = vrot.slane %v3866_v0, 5  ;;  %7479 = vmatpush3.bf16.msra.mxu0 %v10350_v43  ;;  %v3549_v33 = vrot.slane %v3547_v4, 4  ;;  %v4237_v14 = vsel %vm10112_vm8, %v4232_v11, %v4236_v26  ;;  %v3552_v21 = vrot.slane %v3550_v46, 5 }
 0x2a3   :  { %v3558_v55 = vrot.slane %v3556_v48, 5  ;;  %v3563_v63 = vrot.slane %v3561_v51, 4  ;;  %7480 = vmatprep.subr.bf16.mxu0 %v7714_v53  ;;  %v6815_v30 = vcombine.low %v4223_v1, %v4237_v14  ;;  %v3855_v28 = vsel %vm10112_vm8, %v3850_v16, %v3854_v44  ;;  %v3494_v44 = vld [vmem:[#allocation2 + $0x28] sm:$0xf]  ;;  %v3496_v51 = vld [vmem:[#allocation2 + $0x30] sm:$0xf] }
 0x2a4   :  { %v3863_v42 = vor.u32 %v3862_v59, %v3859_v32  ;;  %v3564_v43 = vshll.u32 %v3492_v2, 16  ;;  %v3553_v10 = vor.u32 %v3552_v21, %v3549_v33  ;;  %v3570_v5 = vshll.u32 %v3493_v41, 16  ;;  %v7720_v32 = vld [vmem:[%s11107_s3 + $0x220] sm:$0xff]   ;;  %v3495_v41 = vld [vmem:[#allocation2 + $0x2c] sm:$0x1] }
 0x2a5   :  { %v4239_v31 = vshrl.u32 %v4158_v62, 16  ;;  %v4242_v61 = vshll.u32 %v4158_v62, 16  ;;  %5721 = vmatprep.mubr.bf16.mxu1 %v6815_v30  ;;  %v4248_v40 = vshll.u32 %v4159_v37, 16  ;;  %v4253_v36 = vshrl.u32 %v4160_v7, 16  ;;  %v3497_v33 = vld [vmem:[#allocation2 + $0x34] sm:$0x1] }
 0x2a6   :  { %v3864_v35 = vrot.slane %v3863_v42, 4  ;;  %v3566_v20 = vrot.slane %v3564_v43, 5  ;;  %7481 = vmatpush3.bf16.msra.mxu0 %v7714_v53  ;;  %5722 = vmatmul.mubr.bf16.gmra.mrb[68].mxu1 %v7713_v47  ;;  %v3554_v9 = vrot.slane %v3553_v10, 4  ;;  %v3572_v54 = vrot.slane %v3570_v5, 5  ;;  %v4162_v37 = vld [vmem:[#allocation4 + $0x38] sm:$0xf] }
 0x2a7   :  { %v4241_v15 = vrot.slane %v4239_v31, 4  ;;  %v4244_v52 = vrot.slane %v4242_v61, 5  ;;  %7482 = vmatprep.subr.bf16.mxu0 %v7716_v50  ;;  %v4250_v22 = vrot.slane %v4248_v40, 5  ;;  %v4255_v45 = vrot.slane %v4253_v36, 4  ;;  %v4163_v43 = vld [vmem:[#allocation4 + $0x3c] sm:$0x1] }
 0x2a8   :  { %v3869_v27 = vsel %vm10112_vm8, %v3864_v35, %v3868_v39  ;;  %v3567_v58 = vor.u32 %v3566_v20, %v3563_v63  ;;  %v3559_v24 = vsel %vm10112_vm8, %v3554_v9, %v3558_v55  ;;  %v4256_v26 = vshll.u32 %v4160_v7, 16  ;;  %v7722_v7 = vld [vmem:[%s11107_s3 + $0x228] sm:$0xff]   ;;  %v4164_v31 = vld [vmem:[#allocation4 + $0x40] sm:$0xf] }
 0x2a9   :  { %v6799_v19 = vcombine.low %v3855_v28, %v3869_v27  ;;  %v4245_v57 = vor.u32 %v4244_v52, %v4241_v15  ;;  %v4262_v8 = vshll.u32 %v4161_v13, 16  ;;  %v3871_v3 = vshrl.u32 %v3790_v56, 16  ;;  %v7715_v36 = vld [vmem:[#allocation5 + $0x28] ss:$8 sps:$4 sm:$0xff]   ;;  %v4165_v15 = vld [vmem:[#allocation4 + $0x44] sm:$0x1] }
 0x2aa   :  { %v3568_v18 = vrot.slane %v3567_v58, 4  ;;  %v3874_v12 = vshll.u32 %v3790_v56, 16  ;;  %7483 = vmatpush3.bf16.msra.mxu0 %v7716_v50  ;;  %v4258_v17 = vrot.slane %v4256_v26, 5  ;;  %v3880_v1 = vshll.u32 %v3791_v34, 16  ;;  %v3794_v34 = vld [vmem:[#allocation3 + $0x38] sm:$0xf] }
 0x2ab   :  { %5624 = vmatprep.mubr.bf16.mxu0 %v6799_v19  ;;  %v4246_v2 = vrot.slane %v4245_v57, 4  ;;  %v3885_v49 = vshrl.u32 %v3792_v29, 16  ;;  %7484 = vmatprep.subr.bf16.mxu0 %v7718_v38  ;;  %v4264_v25 = vrot.slane %v4262_v8, 5  ;;  %v3873_v23 = vrot.slane %v3871_v3, 4  ;;  %v3795_v26 = vld [vmem:[#allocation3 + $0x3c] sm:$0x1] }
 0x2ac   :  { %v3573_v53 = vsel %vm10112_vm8, %v3568_v18, %v3572_v54  ;;  %v3876_v0 = vrot.slane %v3874_v12, 5  ;;  %v4259_v46 = vor.u32 %v4258_v17, %v4255_v45  ;;  %v3882_v48 = vrot.slane %v3880_v1, 5  ;;  %v3796_v12 = vld [vmem:[#allocation3 + $0x40] sm:$0xf] }
 0x2ad   :  { %v6791_v4 = vcombine.low %v3559_v24, %v3573_v53  ;;  %v4251_v11 = vsel %vm10112_vm8, %v4246_v2, %v4250_v22  ;;  %v3887_v16 = vrot.slane %v3885_v49, 4  ;;  %v3888_v59 = vshll.u32 %v3792_v29, 16  ;;  %v7726_v49 = vld [vmem:[%s11107_s3 + $0x238] sm:$0xff]  }
 0x2ae   :  { %v3877_v62 = vor.u32 %v3876_v0, %v3873_v23  ;;  %v3894_v39 = vshll.u32 %v3793_v6, 16  ;;  %7485 = vmatpush3.bf16.msra.mxu0 %v7718_v38  ;;  %v4260_v14 = vrot.slane %v4259_v46, 4  ;;  %v3575_v21 = vshrl.u32 %v3494_v44, 16  ;;  %v7724_v38 = vld [vmem:[%s11107_s3 + $0x230] sm:$0xff]  }
 0x2af   :  { %5625 = vmatmul.mubr.bf16.gmra.mrb[68].mxu0 %v6791_v4  ;;  %v3578_v55 = vshll.u32 %v3494_v44, 16  ;;  %v3584_v63 = vshll.u32 %v3495_v41, 16  ;;  %7486 = vmatprep.subr.bf16.mxu0 %v7720_v32  ;;  %v3890_v30 = vrot.slane %v3888_v59, 5  ;;  %v3589_v42 = vshrl.u32 %v3496_v51, 16  ;;  %v3797_v4 = vld [vmem:[#allocation3 + $0x44] sm:$0x1] }
 0x2b0   :  { %v3878_v50 = vrot.slane %v3877_v62, 4  ;;  %v3896_v28 = vrot.slane %v3894_v39, 5  ;;  %v4265_v47 = vsel %vm10112_vm8, %v4260_v14, %v4264_v25  ;;  %v3577_v10 = vrot.slane %v3575_v21, 4  ;;  %v3498_v59 = vld [vmem:[#allocation2 + $0x38] sm:$0xf] }
 0x2b1   :  { %v3580_v5 = vrot.slane %v3578_v55, 5  ;;  %v10426_v13 = vrot.slane %v3584_v63, 5  ;;  %v6816_v61 = vcombine.low %v4251_v11, %v4265_v47  ;;  %v3891_v20 = vor.u32 %v3890_v30, %v3887_v16  ;;  %v3499_v21 = vld [vmem:[#allocation2 + $0x3c] sm:$0x1]  ;;  %v3500_v55 = vld [vmem:[#allocation2 + $0x40] sm:$0xf] }
 0x2b2   :  { %v3883_v35 = vsel %vm10112_vm8, %v3878_v50, %v3882_v48  ;;  %v3591_v40 = vrot.slane %v3589_v42, 4  ;;  %7487 = vmatpush3.bf16.msra.mxu0 %v7720_v32  ;;  %v3592_v9 = vshll.u32 %v3496_v51, 16  ;;  %v3598_v54 = vshll.u32 %v3497_v33, 16 }
 0x2b3   :  { %v3581_v56 = vor.u32 %v3580_v5, %v3577_v10  ;;  %v4267_v52 = vshrl.u32 %v4162_v37, 16  ;;  %7488 = vmatprep.subr.bf16.mxu0 %v7722_v7  ;;  %5729 = vmatprep.mubr.bf16.mxu1 %v6816_v61  ;;  %v3892_v27 = vrot.slane %v3891_v20, 4  ;;  %v4270_v58 = vshll.u32 %v4162_v37, 16 }
 0x2b4   :  { %v4276_v22 = vshll.u32 %v4163_v43, 16  ;;  %v4281_v45 = vshrl.u32 %v4164_v31, 16  ;;  %5730 = vmatmul.mubr.bf16.gmra.mrb[72].mxu1 %v7715_v36  ;;  %v3594_v19 = vrot.slane %v3592_v9, 5  ;;  %v3600_v24 = vrot.slane %v3598_v54, 5  ;;  %v3501_v43 = vld [vmem:[#allocation2 + $0x44] sm:$0x1] }
 0x2b5   :  { %v3582_v29 = vrot.slane %v3581_v56, 4  ;;  %v4269_v57 = vrot.slane %v4267_v52, 4  ;;  %v3897_v6 = vsel %vm10112_vm8, %v3892_v27, %v3896_v28  ;;  %v4272_v18 = vrot.slane %v4270_v58, 5  ;;  %v4167_v9 = vld [vmem:[#allocation4 + $0x54] sm:$0x1] }
 0x2b6   :  { %v4278_v8 = vrot.slane %v4276_v22, 5  ;;  %v4283_v3 = vrot.slane %v4281_v45, 4  ;;  %7489 = vmatpush3.bf16.msra.mxu0 %v7722_v7  ;;  %v6800_v44 = vcombine.low %v3883_v35, %v3897_v6  ;;  %v3595_v17 = vor.u32 %v3594_v19, %v3591_v40  ;;  %v4166_v35 = vld [vmem:[#allocation4 + $0x50] sm:$0xf]  ;;  %v4168_v58 = vld [vmem:[#allocation4 + $0x58] sm:$0xf] }
 0x2b7   :  { %v3587_v2 = vsel %vm10112_vm8, %v3582_v29, %v10426_v13  ;;  %v4284_v1 = vshll.u32 %v4164_v31, 16  ;;  %7490 = vmatprep.subr.bf16.mxu0 %v7724_v38  ;;  %v4273_v32 = vor.u32 %v4272_v18, %v4269_v57  ;;  %v4290_v53 = vshll.u32 %v4165_v15, 16  ;;  %v4169_v19 = vld [vmem:[#allocation4 + $0x5c] sm:$0x1]  ;;  %v3798_v18 = vld [vmem:[#allocation3 + $0x50] sm:$0xf] }
 0x2b8   :  { %v3899_v25 = vshrl.u32 %v3794_v34, 16  ;;  %v3902_v23 = vshll.u32 %v3794_v34, 16  ;;  %5632 = vmatprep.mubr.bf16.mxu0 %v6800_v44  ;;  %v3596_v0 = vrot.slane %v3595_v17, 4  ;;  %v3908_v11 = vshll.u32 %v3795_v26, 16 }
 0x2b9   :  { %v4286_v41 = vrot.slane %v4284_v1, 5  ;;  %v3913_v46 = vshrl.u32 %v3796_v12, 16  ;;  %v4274_v48 = vrot.slane %v4273_v32, 4  ;;  %v4292_v51 = vrot.slane %v4290_v53, 5  ;;  %v3800_v53 = vld [vmem:[#allocation3 + $0x58] sm:$0xf] }
 0x2ba   :  { %v3901_v62 = vrot.slane %v3899_v25, 4  ;;  %v3904_v16 = vrot.slane %v3902_v23, 5  ;;  %7491 = vmatpush3.bf16.msra.mxu0 %v7724_v38  ;;  %v3601_v39 = vsel %vm10112_vm8, %v3596_v0, %v3600_v24  ;;  %v3910_v37 = vrot.slane %v3908_v11, 5  ;;  %v7717_v38 = vld [vmem:[#allocation5 + $0x38] ss:$8 sps:$4 sm:$0xff]  }
 0x2bb   :  { %v4287_v33 = vor.u32 %v4286_v41, %v4283_v3  ;;  %v3915_v14 = vrot.slane %v3913_v46, 4  ;;  %7492 = vmatprep.subr.bf16.mxu0 %v7726_v49  ;;  %v6792_v63 = vcombine.low %v3587_v2, %v3601_v39  ;;  %v4279_v7 = vsel %vm10112_vm8, %v4274_v48, %v4278_v8  ;;  %v3799_v2 = vld [vmem:[#allocation3 + $0x54] sm:$0x1]  ;;  %v3801_v48 = vld [vmem:[#allocation3 + $0x5c] sm:$0x1] }
 0x2bc   :  { %v3905_v50 = vor.u32 %v3904_v16, %v3901_v62  ;;  %v3916_v30 = vshll.u32 %v3796_v12, 16  ;;  %v3922_v42 = vshll.u32 %v3797_v4, 16  ;;  %v3603_v47 = vshrl.u32 %v3498_v59, 16 }
 0x2bd   :  { %v4288_v28 = vrot.slane %v4287_v33, 4  ;;  %v3606_v10 = vshll.u32 %v3498_v59, 16  ;;  %5633 = vmatmul.mubr.bf16.gmra.mrb[72].mxu0 %v6792_v63  ;;  %v3612_v31 = vshll.u32 %v3499_v21, 16  ;;  %v3617_v61 = vshrl.u32 %v3500_v55, 16  ;;  %v3502_v33 = vld [vmem:[#allocation2 + $0x50] sm:$0xf] }
 0x2be   :  { %v3906_v5 = vrot.slane %v3905_v50, 4  ;;  %v3918_v13 = vrot.slane %v3916_v30, 5  ;;  %v3924_v40 = vrot.slane %v3922_v42, 5  ;;  %v3605_v36 = vrot.slane %v3603_v47, 4  ;;  %7493 = vmatpush3.bf16.msra.mxu0 %v7726_v49  ;;  %v3503_v63 = vld [vmem:[#allocation2 + $0x54] sm:$0x1] }
 0x2bf   :  { %v4293_v20 = vsel %vm10112_vm8, %v4288_v28, %v4292_v51  ;;  %v3608_v56 = vrot.slane %v3606_v10, 5  ;;  %v3614_v27 = vrot.slane %v3612_v31, 5  ;;  %v3619_v45 = vrot.slane %v3617_v61, 4  ;;  %v3504_v42 = vld [vmem:[#allocation2 + $0x58] sm:$0xf] }
 0x2c0   :  { %v6817_v54 = vcombine.low %v4279_v7, %v4293_v20  ;;  %v3911_v15 = vsel %vm10112_vm8, %v3906_v5, %v3910_v37  ;;  %v3919_v52 = vor.u32 %v3918_v13, %v3915_v14  ;;  %v3620_v34 = vshll.u32 %v3500_v55, 16 }
 0x2c1   :  { %v3609_v22 = vor.u32 %v3608_v56, %v3605_v36  ;;  %v3626_v29 = vshll.u32 %v3501_v43, 16  ;;  %v4295_v57 = vshrl.u32 %v4166_v35, 16  ;;  %v4298_v26 = vshll.u32 %v4166_v35, 16  ;;  %v3505_v36 = vld [vmem:[#allocation2 + $0x5c] sm:$0x1] }
 0x2c2   :  { %5737 = vmatprep.mubr.bf16.mxu1 %v6817_v54  ;;  %v3920_v24 = vrot.slane %v3919_v52, 4  ;;  %v4304_v6 = vshll.u32 %v4167_v9, 16  ;;  %v3622_v3 = vrot.slane %v3620_v34, 5  ;;  %v4309_v44 = vshrl.u32 %v4168_v58, 16 }
 0x2c3   :  { %5738 = vmatmul.mubr.bf16.gmra.mrb[76].mxu1 %v7717_v38  ;;  %v3610_v8 = vrot.slane %v3609_v22, 4  ;;  %v3628_v12 = vrot.slane %v3626_v29, 5  ;;  %v4297_v1 = vrot.slane %v4295_v57, 4  ;;  %v4300_v49 = vrot.slane %v4298_v26, 5  ;;  %v4171_v29 = vld [vmem:[#allocation4 + $0x64] sm:$0x1] }
 0x2c4   :  { %v3925_v17 = vsel %vm10112_vm8, %v3920_v24, %v3924_v40  ;;  %v4306_v32 = vrot.slane %v4304_v6, 5  ;;  %v3623_v0 = vor.u32 %v3622_v3, %v3619_v45  ;;  %v4311_v41 = vrot.slane %v4309_v44, 4  ;;  %v7719_v26 = vld [vmem:[#allocation5 + $0x50] ss:$8 sps:$4 sm:$0xff]  }
 0x2c5   :  { %v6801_v25 = vcombine.low %v3911_v15, %v3925_v17  ;;  %v3615_v23 = vsel %vm10112_vm8, %v3610_v8, %v3614_v27  ;;  %v4301_v4 = vor.u32 %v4300_v49, %v4297_v1  ;;  %v4312_v11 = vshll.u32 %v4168_v58, 16  ;;  %v4170_v27 = vld [vmem:[#allocation4 + $0x60] sm:$0xf] }
 0x2c6   :  { %v4318_v46 = vshll.u32 %v4169_v19, 16  ;;  %v3927_v51 = vshrl.u32 %v3798_v18, 16  ;;  %v3624_v62 = vrot.slane %v3623_v0, 4  ;;  %v3930_v16 = vshll.u32 %v3798_v18, 16  ;;  %v4172_v19 = vld [vmem:[#allocation4 + $0x68] sm:$0xf] }
 0x2c7   :  { %5640 = vmatprep.mubr.bf16.mxu0 %v6801_v25  ;;  %v3936_v59 = vshll.u32 %v3799_v2, 16  ;;  %v3941_v39 = vshrl.u32 %v3800_v53, 16  ;;  %v4302_v37 = vrot.slane %v4301_v4, 4  ;;  %v4314_v14 = vrot.slane %v4312_v11, 5  ;;  %v3803_v4 = vld [vmem:[#allocation3 + $0x64] sm:$0x1] }
 0x2c8   :  { %v4320_v21 = vrot.slane %v4318_v46, 5  ;;  %v3929_v55 = vrot.slane %v3927_v51, 4  ;;  %v3629_v7 = vsel %vm10112_vm8, %v3624_v62, %v3628_v12  ;;  %v3932_v50 = vrot.slane %v3930_v16, 5  ;;  %v4173_v12 = vld [vmem:[#allocation4 + $0x6c] sm:$0x1] }
 0x2c9   :  { %v3938_v30 = vrot.slane %v3936_v59, 5  ;;  %v3943_v28 = vrot.slane %v3941_v39, 4  ;;  %v6793_v43 = vcombine.low %v3615_v23, %v3629_v7  ;;  %v4307_v47 = vsel %vm10112_vm8, %v4302_v37, %v4306_v32  ;;  %v3804_v62 = vld [vmem:[#allocation3 + $0x68] sm:$0xf]  ;;  %v3805_v37 = vld [vmem:[#allocation3 + $0x6c] sm:$0x1] }
 0x2ca   :  { %v4315_v10 = vor.u32 %v4314_v14, %v4311_v41  ;;  %v3944_v5 = vshll.u32 %v3800_v53, 16  ;;  %v3933_v13 = vor.u32 %v3932_v50, %v3929_v55  ;;  %v3950_v31 = vshll.u32 %v3801_v48, 16  ;;  %v3802_v53 = vld [vmem:[#allocation3 + $0x60] sm:$0xf]  ;;  %v3506_v7 = vld [vmem:[#allocation2 + $0x60] sm:$0xf] }
 0x2cb   :  { %v3631_v61 = vshrl.u32 %v3502_v33, 16  ;;  %v3634_v35 = vshll.u32 %v3502_v33, 16  ;;  %5641 = vmatmul.mubr.bf16.gmra.mrb[76].mxu0 %v6793_v43  ;;  %v3640_v56 = vshll.u32 %v3503_v63, 16  ;;  %v3645_v9 = vshrl.u32 %v3504_v42, 16  ;;  %v3507_v43 = vld [vmem:[#allocation2 + $0x64] sm:$0x1] }
 0x2cc   :  { %v4316_v20 = vrot.slane %v4315_v10, 4  ;;  %v3946_v40 = vrot.slane %v3944_v5, 5  ;;  %v3934_v54 = vrot.slane %v3933_v13, 4  ;;  %v3952_v15 = vrot.slane %v3950_v31, 5  ;;  %v3508_v31 = vld [vmem:[#allocation2 + $0x68] sm:$0xf] }
 0x2cd   :  { %v3633_v52 = vrot.slane %v3631_v61, 4  ;;  %v3636_v38 = vrot.slane %v3634_v35, 5  ;;  %v3642_v45 = vrot.slane %v3640_v56, 5  ;;  %v3647_v34 = vrot.slane %v3645_v9, 4 }
 0x2ce   :  { %v4321_v58 = vsel %vm10112_vm8, %v4316_v20, %v4320_v21  ;;  %v3947_v22 = vor.u32 %v3946_v40, %v3943_v28  ;;  %v3939_v57 = vsel %vm10112_vm8, %v3934_v54, %v3938_v30  ;;  %v3648_v18 = vshll.u32 %v3504_v42, 16  ;;  %v3509_v54 = vld [vmem:[#allocation2 + $0x6c] sm:$0x1] }
 0x2cf   :  { %v6818_v24 = vcombine.low %v4307_v47, %v4321_v58  ;;  %v3637_v6 = vor.u32 %v3636_v38, %v3633_v52  ;;  %v3654_v3 = vshll.u32 %v3505_v36, 16  ;;  %v4323_v44 = vshrl.u32 %v4170_v27, 16 }
 0x2d0   :  { %v3948_v8 = vrot.slane %v3947_v22, 4  ;;  %v4326_v2 = vshll.u32 %v4170_v27, 16  ;;  %v3650_v1 = vrot.slane %v3648_v18, 5  ;;  %v4332_v49 = vshll.u32 %v4171_v29, 16  ;;  %v4174_v22 = vld [vmem:[#allocation4 + $0x70] sm:$0xf] }
 0x2d1   :  { %5745 = vmatprep.mubr.bf16.mxu1 %v6818_v24  ;;  %v3638_v17 = vrot.slane %v3637_v6, 4  ;;  %v4337_v32 = vshrl.u32 %v4172_v19, 16  ;;  %v3656_v23 = vrot.slane %v3654_v3, 5  ;;  %v4325_v0 = vrot.slane %v4323_v44, 4  ;;  %v4175_v24 = vld [vmem:[#allocation4 + $0x74] sm:$0x1] }
 0x2d2   :  { %v3953_v25 = vsel %vm10112_vm8, %v3948_v8, %v3952_v15  ;;  %5746 = vmatmul.mubr.bf16.gmra.mrb[80].mxu1 %v7719_v26  ;;  %v4328_v41 = vrot.slane %v4326_v2, 5  ;;  %v3651_v48 = vor.u32 %v3650_v1, %v3647_v34  ;;  %v4334_v51 = vrot.slane %v4332_v49, 5  ;;  %v4176_v8 = vld [vmem:[#allocation4 + $0x78] sm:$0xf] }
 0x2d3   :  { %v6802_v11 = vcombine.low %v3939_v57, %v3953_v25  ;;  %v3643_v46 = vsel %vm10112_vm8, %v3638_v17, %v3642_v45  ;;  %v4339_v59 = vrot.slane %v4337_v32, 4  ;;  %v4340_v39 = vshll.u32 %v4172_v19, 16  ;;  %v7721_v17 = vld [vmem:[#allocation5 + $0x60] ss:$8 sps:$4 sm:$0xff]  }
 0x2d4   :  { %v4329_v16 = vor.u32 %v4328_v41, %v4325_v0  ;;  %v4346_v33 = vshll.u32 %v4173_v12, 16  ;;  %v3652_v14 = vrot.slane %v3651_v48, 4  ;;  %v3955_v21 = vshrl.u32 %v3802_v53, 16  ;;  %v4177_v0 = vld [vmem:[#allocation4 + $0x7c] sm:$0x1] }
 0x2d5   :  { %5648 = vmatprep.mubr.bf16.mxu0 %v6802_v11  ;;  %v3958_v55 = vshll.u32 %v3802_v53, 16  ;;  %v3964_v63 = vshll.u32 %v3803_v4, 16  ;;  %v4342_v30 = vrot.slane %v4340_v39, 5  ;;  %v3969_v42 = vshrl.u32 %v3804_v62, 16 }
 0x2d6   :  { %v4330_v50 = vrot.slane %v4329_v16, 4  ;;  %v4348_v28 = vrot.slane %v4346_v33, 5  ;;  %v3657_v47 = vsel %vm10112_vm8, %v3652_v14, %v3656_v23  ;;  %v3957_v10 = vrot.slane %v3955_v21, 4  ;;  %v3808_v14 = vld [vmem:[#allocation3 + $0x78] sm:$0xf] }
 0x2d7   :  { %v3960_v5 = vrot.slane %v3958_v55, 5  ;;  %v3966_v13 = vrot.slane %v3964_v63, 5  ;;  %v6794_v61 = vcombine.low %v3643_v46, %v3657_v47  ;;  %v4343_v20 = vor.u32 %v4342_v30, %v4339_v59 }
 0x2d8   :  { %v4335_v35 = vsel %vm10112_vm8, %v4330_v50, %v4334_v51  ;;  %v3971_v40 = vrot.slane %v3969_v42, 4  ;;  %v3972_v56 = vshll.u32 %v3804_v62, 16  ;;  %v3978_v9 = vshll.u32 %v3805_v37, 16  ;;  %v3806_v62 = vld [vmem:[#allocation3 + $0x70] sm:$0xf] }
 0x2d9   :  { %v3961_v36 = vor.u32 %v3960_v5, %v3957_v10  ;;  %v3659_v15 = vshrl.u32 %v3506_v7, 16  ;;  %5649 = vmatmul.mubr.bf16.gmra.mrb[80].mxu0 %v6794_v61  ;;  %v4344_v52 = vrot.slane %v4343_v20, 4  ;;  %v3662_v38 = vshll.u32 %v3506_v7, 16  ;;  %v3807_v37 = vld [vmem:[#allocation3 + $0x74] sm:$0x1] }
 0x2da   :  { %v3668_v27 = vshll.u32 %v3507_v43, 16  ;;  %v3673_v58 = vshrl.u32 %v3508_v31, 16  ;;  %v3974_v34 = vrot.slane %v3972_v56, 5  ;;  %v3980_v29 = vrot.slane %v3978_v9, 5 }
 0x2db   :  { %v3962_v45 = vrot.slane %v3961_v36, 4  ;;  %v3661_v19 = vrot.slane %v3659_v15, 4  ;;  %v4349_v57 = vsel %vm10112_vm8, %v4344_v52, %v4348_v28  ;;  %v3664_v26 = vrot.slane %v3662_v38, 5  ;;  %v3809_v28 = vld [vmem:[#allocation3 + $0x7c] sm:$0x1] }
 0x2dc   :  { %v3670_v6 = vrot.slane %v3668_v27, 5  ;;  %v3675_v18 = vrot.slane %v3673_v58, 4  ;;  %v6819_v3 = vcombine.low %v4335_v35, %v4349_v57  ;;  %v3975_v44 = vor.u32 %v3974_v34, %v3971_v40  ;;  %v3511_v36 = vld [vmem:[#allocation2 + $0x74] sm:$0x1]  ;;  %v3512_v52 = vld [vmem:[#allocation2 + $0x78] sm:$0xf] }
 0x2dd   :  { %v3967_v12 = vsel %vm10112_vm8, %v3962_v45, %v3966_v13  ;;  %v3676_v2 = vshll.u32 %v3508_v31, 16  ;;  %v3665_v1 = vor.u32 %v3664_v26, %v3661_v19  ;;  %v3682_v49 = vshll.u32 %v3509_v54, 16  ;;  %v3510_v31 = vld [vmem:[#allocation2 + $0x70] sm:$0xf]  ;;  %v3513_v45 = vld [vmem:[#allocation2 + $0x7c] sm:$0x1] }
 0x2de   :  { %v4351_v32 = vshrl.u32 %v4174_v22, 16  ;;  %v4354_v53 = vshll.u32 %v4174_v22, 16  ;;  %5753 = vmatprep.mubr.bf16.mxu1 %v6819_v3  ;;  %v3976_v25 = vrot.slane %v3975_v44, 4  ;;  %v4360_v41 = vshll.u32 %v4175_v24, 16  ;;  %v4178_v57 = vld [vmem:[#allocation4 + $0x80] sm:$0xf] }
 0x2df   :  { %v3678_v23 = vrot.slane %v3676_v2, 5  ;;  %v4365_v4 = vshrl.u32 %v4176_v8, 16  ;;  %5754 = vmatmul.mubr.bf16.gmra.mrb[84].mxu1 %v7721_v17  ;;  %v3666_v11 = vrot.slane %v3665_v1, 4  ;;  %v3684_v46 = vrot.slane %v3682_v49, 5  ;;  %v4179_v3 = vld [vmem:[#allocation4 + $0x84] sm:$0x1] }
 0x2e0   :  { %v4353_v48 = vrot.slane %v4351_v32, 4  ;;  %v4356_v51 = vrot.slane %v4354_v53, 5  ;;  %v3981_v16 = vsel %vm10112_vm8, %v3976_v25, %v3980_v29  ;;  %v4362_v39 = vrot.slane %v4360_v41, 5  ;;  %v4180_v1 = vld [vmem:[#allocation4 + $0x88] sm:$0xf] }
 0x2e1   :  { %v3679_v59 = vor.u32 %v3678_v23, %v3675_v18  ;;  %v4367_v33 = vrot.slane %v4365_v4, 4  ;;  %v6803_v21 = vcombine.low %v3967_v12, %v3981_v16  ;;  %v3671_v55 = vsel %vm10112_vm8, %v3666_v11, %v3670_v6  ;;  %v7723_v25 = vld [vmem:[#allocation5 + $0x70] ss:$8 sps:$4 sm:$0xff]   ;;  %v4181_v11 = vld [vmem:[#allocation4 + $0x8c] sm:$0x1] }
 0x2e2   :  { %v4357_v63 = vor.u32 %v4356_v51, %v4353_v48  ;;  %v4368_v7 = vshll.u32 %v4176_v8, 16  ;;  %v4374_v30 = vshll.u32 %v4177_v0, 16  ;;  %v3983_v42 = vshrl.u32 %v3806_v62, 16 }
 0x2e3   :  { %v3680_v50 = vrot.slane %v3679_v59, 4  ;;  %v3986_v43 = vshll.u32 %v3806_v62, 16  ;;  %5656 = vmatprep.mubr.bf16.mxu0 %v6803_v21  ;;  %v3992_v5 = vshll.u32 %v3807_v37, 16  ;;  %v3997_v13 = vshrl.u32 %v3808_v14, 16  ;;  %v3810_v59 = vld [vmem:[#allocation3 + $0x80] sm:$0xf] }
 0x2e4   :  { %v4358_v47 = vrot.slane %v4357_v63, 4  ;;  %v4370_v10 = vrot.slane %v4368_v7, 5  ;;  %v4376_v35 = vrot.slane %v4374_v30, 5  ;;  %v3985_v20 = vrot.slane %v3983_v42, 4  ;;  %v3811_v21 = vld [vmem:[#allocation3 + $0x84] sm:$0x1] }
 0x2e5   :  { %v3685_v61 = vsel %vm10112_vm8, %v3680_v50, %v3684_v46  ;;  %v3988_v40 = vrot.slane %v3986_v43, 5  ;;  %v3994_v15 = vrot.slane %v3992_v5, 5  ;;  %v3999_v27 = vrot.slane %v3997_v13, 4  ;;  %v3812_v30 = vld [vmem:[#allocation3 + $0x88] sm:$0xf] }
 0x2e6   :  { %v6795_v56 = vcombine.low %v3671_v55, %v3685_v61  ;;  %v4363_v9 = vsel %vm10112_vm8, %v4358_v47, %v4362_v39  ;;  %v4371_v54 = vor.u32 %v4370_v10, %v4367_v33  ;;  %v4000_v58 = vshll.u32 %v3808_v14, 16 }
 0x2e7   :  { %v3989_v38 = vor.u32 %v3988_v40, %v3985_v20  ;;  %v4006_v22 = vshll.u32 %v3809_v28, 16  ;;  %v3687_v29 = vshrl.u32 %v3510_v31, 16  ;;  %v3690_v19 = vshll.u32 %v3510_v31, 16  ;;  %v3813_v20 = vld [vmem:[#allocation3 + $0x8c] sm:$0x1] }
 0x2e8   :  { %5657 = vmatmul.mubr.bf16.gmra.mrb[84].mxu0 %v6795_v56  ;;  %v4372_v34 = vrot.slane %v4371_v54, 4  ;;  %v3696_v24 = vshll.u32 %v3511_v36, 16  ;;  %v4002_v6 = vrot.slane %v4000_v58, 5  ;;  %v3701_v8 = vshrl.u32 %v3512_v52, 16 }
 0x2e9   :  { %v3990_v26 = vrot.slane %v3989_v38, 4  ;;  %v4008_v18 = vrot.slane %v4006_v22, 5  ;;  %v3689_v44 = vrot.slane %v3687_v29, 4  ;;  %v3692_v2 = vrot.slane %v3690_v19, 5 }
 0x2ea   :  { %v4377_v12 = vsel %vm10112_vm8, %v4372_v34, %v4376_v35  ;;  %v3698_v17 = vrot.slane %v3696_v24, 5  ;;  %v4003_v53 = vor.u32 %v4002_v6, %v3999_v27  ;;  %v3703_v23 = vrot.slane %v3701_v8, 4  ;;  %v3516_v34 = vld [vmem:[#allocation2 + $0x88] sm:$0xf] }
 0x2eb   :  { %v6820_v49 = vcombine.low %v4363_v9, %v4377_v12  ;;  %v3995_v32 = vsel %vm10112_vm8, %v3990_v26, %v3994_v15  ;;  %v3693_v0 = vor.u32 %v3692_v2, %v3689_v44  ;;  %v3704_v41 = vshll.u32 %v3512_v52, 16  ;;  %v3514_v52 = vld [vmem:[#allocation2 + $0x80] sm:$0xf]  ;;  %v3517_v44 = vld [vmem:[#allocation2 + $0x8c] sm:$0x1] }
 0x2ec   :  { %v3710_v4 = vshll.u32 %v3513_v45, 16  ;;  %v4379_v46 = vshrl.u32 %v4178_v57, 16  ;;  %v4004_v48 = vrot.slane %v4003_v53, 4  ;;  %v4382_v51 = vshll.u32 %v4178_v57, 16  ;;  %v3515_v45 = vld [vmem:[#allocation2 + $0x84] sm:$0x1] }
 0x2ed   :  { %5761 = vmatprep.mubr.bf16.mxu1 %v6820_v49  ;;  %v4388_v62 = vshll.u32 %v4179_v3, 16  ;;  %v4393_v16 = vshrl.u32 %v4180_v1, 16  ;;  %v3694_v39 = vrot.slane %v3693_v0, 4  ;;  %v3706_v33 = vrot.slane %v3704_v41, 5  ;;  %v7725_v49 = vld [vmem:[#allocation5 + $0x80] ss:$8 sps:$4 sm:$0xff]  }
 0x2ee   :  { %5762 = vmatmul.mubr.bf16.gmra.mrb[88].mxu1 %v7723_v25  ;;  %v3712_v37 = vrot.slane %v3710_v4, 5  ;;  %v4381_v14 = vrot.slane %v4379_v46, 4  ;;  %v4009_v55 = vsel %vm10112_vm8, %v4004_v48, %v4008_v18  ;;  %v4384_v63 = vrot.slane %v4382_v51, 5  ;;  %v4446_v25 = vld [vmem:[#allocation5 + $0x8] sm:$0xf] }
 0x2ef   :  { %v4390_v7 = vrot.slane %v4388_v62, 5  ;;  %v4395_v50 = vrot.slane %v4393_v16, 4  ;;  %v6804_v28 = vcombine.low %v3995_v32, %v4009_v55  ;;  %v3699_v42 = vsel %vm10112_vm8, %v3694_v39, %v3698_v17  ;;  %v4448_v46 = vld [vmem:[#allocation5 + $0x10] sm:$0xf] }
 0x2f0   :  { %v3707_v43 = vor.u32 %v3706_v33, %v3703_v23  ;;  %v4396_v47 = vshll.u32 %v4180_v1, 16  ;;  %v4385_v10 = vor.u32 %v4384_v63, %v4381_v14  ;;  %v4402_v5 = vshll.u32 %v4181_v11, 16  ;;  %v4447_v11 = vld [vmem:[#allocation5 + $0xc] sm:$0x1] }
 0x2f1   :  { %v4011_v13 = vshrl.u32 %v3810_v59, 16  ;;  %v4014_v31 = vshll.u32 %v3810_v59, 16  ;;  %5664 = vmatprep.mubr.bf16.mxu0 %v6804_v28  ;;  %v4020_v40 = vshll.u32 %v3811_v21, 16  ;;  %v4025_v36 = vshrl.u32 %v3812_v30, 16  ;;  %v4449_v59 = vld [vmem:[#allocation5 + $0x14] sm:$0x1] }
 0x2f2   :  { %v3708_v61 = vrot.slane %v3707_v43, 4  ;;  %v4398_v35 = vrot.slane %v4396_v47, 5  ;;  %v4386_v56 = vrot.slane %v4385_v10, 4  ;;  %v4404_v9 = vrot.slane %v4402_v5, 5  ;;  %v4450_v21 = vld [vmem:[#allocation5 + $0x18] sm:$0xf] }
 0x2f3   :  { %v4013_v54 = vrot.slane %v4011_v13, 4  ;;  %v4016_v15 = vrot.slane %v4014_v31, 5  ;;  %v4022_v58 = vrot.slane %v4020_v40, 5  ;;  %v4027_v22 = vrot.slane %v4025_v36, 4  ;;  %v4452_v10 = vld [vmem:[#allocation5 + $0x20] sm:$0xf] }
 0x2f4   :  { %v3713_v38 = vsel %vm10112_vm8, %v3708_v61, %v3712_v37  ;;  %v4399_v27 = vor.u32 %v4398_v35, %v4395_v50  ;;  %v4391_v19 = vsel %vm10112_vm8, %v4386_v56, %v4390_v7  ;;  %v4028_v57 = vshll.u32 %v3812_v30, 16  ;;  %v4451_v30 = vld [vmem:[#allocation5 + $0x1c] sm:$0x1] }
 0x2f5   :  { %v6796_v29 = vcombine.low %v3699_v42, %v3713_v38  ;;  %v4017_v24 = vor.u32 %v4016_v15, %v4013_v54  ;;  %v4034_v6 = vshll.u32 %v3813_v20, 16  ;;  %v3715_v18 = vshrl.u32 %v3514_v52, 16 }
 0x2f6   :  { %v4400_v26 = vrot.slane %v4399_v27, 4  ;;  %v3718_v8 = vshll.u32 %v3514_v52, 16  ;;  %v4030_v12 = vrot.slane %v4028_v57, 5  ;;  %v3724_v2 = vshll.u32 %v3515_v45, 16  ;;  %v4454_v45 = vld [vmem:[#allocation5 + $0x28] sm:$0xf] }
 0x2f7   :  { %5665 = vmatmul.mubr.bf16.gmra.mrb[88].mxu0 %v6796_v29  ;;  %v4018_v3 = vrot.slane %v4017_v24, 4  ;;  %v3729_v17 = vshrl.u32 %v3516_v34, 16  ;;  %v3717_v32 = vrot.slane %v3715_v18, 4  ;;  %v4036_v4 = vrot.slane %v4034_v6, 5  ;;  %v4456_v57 = vld [vmem:[#allocation5 + $0x30] sm:$0xf] }
 0x2f8   :  { %v4405_v1 = vsel %vm10112_vm8, %v4400_v26, %v4404_v9  ;;  %v3720_v53 = vrot.slane %v3718_v8, 5  ;;  %v4031_v41 = vor.u32 %v4030_v12, %v4027_v22  ;;  %v3732_v62 = vshll.u32 %v3516_v34, 16  ;;  %v4453_v9 = vld [vmem:[#allocation5 + $0x24] sm:$0x1] }
 0x2f9   :  { %v6821_v23 = vcombine.low %v4391_v19, %v4405_v1  ;;  %v4023_v0 = vsel %vm10112_vm8, %v4018_v3, %v4022_v58  ;;  %v3731_v51 = vrot.slane %v3729_v17, 4  ;;  %v3738_v16 = vshll.u32 %v3517_v44, 16  ;;  %v4455_v3 = vld [vmem:[#allocation5 + $0x2c] sm:$0x1] }
 0x2fa   :  { %v3721_v48 = vor.u32 %v3720_v53, %v3717_v32  ;;  %v4032_v39 = vrot.slane %v4031_v41, 4  ;;  %v3726_v33 = vrot.slane %v3724_v2, 5  ;;  %v4479_v37 = vshrl.u32 %v4446_v25, 16  ;;  %v4457_v53 = vld [vmem:[#allocation5 + $0x34] sm:$0x1] }
 0x2fb   :  { %5769 = vmatprep.mubr.bf16.mxu1 %v6821_v23  ;;  %v4482_v14 = vshll.u32 %v4446_v25, 16  ;;  %v3734_v63 = vrot.slane %v3732_v62, 5  ;;  %v4488_v7 = vshll.u32 %v4447_v11, 16  ;;  %v4493_v50 = vshrl.u32 %v4448_v46, 16  ;;  %v4458_v11 = vld [vmem:[#allocation5 + $0x38] sm:$0xf] }
 0x2fc   :  { %5770 = vmatmul.mubr.bf16.gmra.mrb[92].mxu1 %v7725_v49  ;;  %v3722_v55 = vrot.slane %v3721_v48, 4  ;;  %v4037_v28 = vsel %vm10112_vm8, %v4032_v39, %v4036_v4  ;;  %v3740_v42 = vrot.slane %v3738_v16, 5  ;;  %v4481_v43 = vrot.slane %v4479_v37, 4  ;;  %v4460_v16 = vld [vmem:[#allocation5 + $0x40] sm:$0xf] }
 0x2fd   :  { %v4484_v47 = vrot.slane %v4482_v14, 5  ;;  %v6805_v5 = vcombine.low %v4023_v0, %v4037_v28  ;;  %v3735_v31 = vor.u32 %v3734_v63, %v3731_v51  ;;  %v4495_v61 = vrot.slane %v4493_v50, 4  ;;  %v4459_v14 = vld [vmem:[#allocation5 + $0x3c] sm:$0x1]  ;;  %v4461_v28 = vld [vmem:[#allocation5 + $0x44] sm:$0x1] }
 0x2fe   :  { %v3727_v13 = vsel %vm10112_vm8, %v3722_v55, %v3726_v33  ;;  %v4496_v20 = vshll.u32 %v4448_v46, 16  ;;  %v4502_v40 = vshll.u32 %v4449_v59, 16  ;;  %v4507_v36 = vshrl.u32 %v4450_v21, 16 }
 0x2ff   :  { %v4485_v35 = vor.u32 %v4484_v47, %v4481_v43  ;;  %5672 = vmatprep.mubr.bf16.mxu0 %v6805_v5  ;;  %v3736_v56 = vrot.slane %v3735_v31, 4  ;;  %v4510_v54 = vshll.u32 %v4450_v21, 16  ;;  %v4516_v15 = vshll.u32 %v4451_v30, 16 }
 0x300   :  { %v4521_v52 = vshrl.u32 %v4452_v10, 16  ;;  %v4490_v27 = vrot.slane %v4488_v7, 5  ;;  %v4498_v58 = vrot.slane %v4496_v20, 5  ;;  %v4509_v22 = vrot.slane %v4507_v36, 4 }
 0x301   :  { %v4486_v38 = vrot.slane %v4485_v35, 4  ;;  %v3741_v34 = vsel %vm10112_vm8, %v3736_v56, %v3740_v42  ;;  %v4504_v29 = vrot.slane %v4502_v40, 5  ;;  %v4512_v19 = vrot.slane %v4510_v54, 5  ;;  %v4464_v40 = vld [vmem:[#allocation5 + $0x58] sm:$0xf] }
 0x302   :  { %v4518_v24 = vrot.slane %v4516_v15, 5  ;;  %v6797_v26 = vcombine.low %v3727_v13, %v3741_v34  ;;  %v4499_v6 = vor.u32 %v4498_v58, %v4495_v61  ;;  %v4523_v18 = vrot.slane %v4521_v52, 4  ;;  %v4462_v13 = vld [vmem:[#allocation5 + $0x50] sm:$0xf]  ;;  %v4463_v15 = vld [vmem:[#allocation5 + $0x54] sm:$0x1] }
 0x303   :  { %v4524_v8 = vshll.u32 %v4452_v10, 16  ;;  %v4513_v12 = vor.u32 %v4512_v19, %v4509_v22  ;;  %v4530_v44 = vshll.u32 %v4453_v9, 16  ;;  %v4535_v2 = vshrl.u32 %v4454_v45, 16 }
 0x304   :  { %v4538_v17 = vshll.u32 %v4454_v45, 16  ;;  %5673 = vmatmul.mubr.bf16.gmra.mrb[92].mxu0 %v6797_v26  ;;  %v4491_v1 = vsel %vm10112_vm8, %v4486_v38, %v4490_v27  ;;  %v4500_v49 = vrot.slane %v4499_v6, 4  ;;  %v4549_v25 = vshrl.u32 %v4456_v57, 16  ;;  %v4465_v27 = vld [vmem:[#allocation5 + $0x5c] sm:$0x1] }
 0x305   :  { %v4526_v32 = vrot.slane %v4524_v8, 5  ;;  %v4514_v23 = vrot.slane %v4513_v12, 4  ;;  %v4537_v0 = vrot.slane %v4535_v2, 4  ;;  %v4544_v4 = vshll.u32 %v4455_v3, 16  ;;  %v4468_v8 = vld [vmem:[#allocation5 + $0x68] sm:$0xf] }
 0x306   :  { %v4540_v41 = vrot.slane %v4538_v17, 5  ;;  %v4505_v46 = vsel %vm10112_vm8, %v4500_v49, %v4504_v29  ;;  %v4532_v51 = vrot.slane %v4530_v44, 5  ;;  %v4551_v62 = vrot.slane %v4549_v25, 4 }
 0x307   :  { %v4527_v48 = vor.u32 %v4526_v32, %v4523_v18  ;;  %v6822_v59 = vcombine.low %v4491_v1, %v4505_v46  ;;  %v4519_v39 = vsel %vm10112_vm8, %v4514_v23, %v4518_v24  ;;  %v4552_v37 = vshll.u32 %v4456_v57, 16  ;;  %v4466_v24 = vld [vmem:[#allocation5 + $0x60] sm:$0xf]  ;;  %v4467_v32 = vld [vmem:[#allocation5 + $0x64] sm:$0x1] }
 0x308   :  { %v4541_v33 = vor.u32 %v4540_v41, %v4537_v0  ;;  %v4558_v55 = vshll.u32 %v4457_v53, 16  ;;  %v4563_v63 = vshrl.u32 %v4458_v11, 16  ;;  %v4566_v7 = vshll.u32 %v4458_v11, 16  ;;  %v4469_v0 = vld [vmem:[#allocation5 + $0x6c] sm:$0x1] }
 0x309   :  { %v4528_v21 = vrot.slane %v4527_v48, 4  ;;  %7494 = vmatprep.mubr.bf16.mxu0 %v6822_v59  ;;  %v4554_v30 = vrot.slane %v4552_v37, 5  ;;  %v4577_v42 = vshrl.u32 %v4460_v16, 16  ;;  %v4572_v5 = vshll.u32 %v4459_v14, 16  ;;  %v4472_v37 = vld [vmem:[#allocation5 + $0x78] sm:$0xf] }
 0x30a   :  { %v4542_v50 = vrot.slane %v4541_v33, 4  ;;  %v4565_v47 = vrot.slane %v4563_v63, 4  ;;  %v4568_v10 = vrot.slane %v4566_v7, 5  ;;  %v4546_v61 = vrot.slane %v4544_v4, 5 }
 0x30b   :  { %v4533_v43 = vsel %vm10112_vm8, %v4528_v21, %v4532_v51  ;;  %v4555_v35 = vor.u32 %v4554_v30, %v4551_v62  ;;  %v4560_v20 = vrot.slane %v4558_v55, 5  ;;  %v4579_v56 = vrot.slane %v4577_v42, 4  ;;  %v4470_v62 = vld [vmem:[#allocation5 + $0x70] sm:$0xf]  ;;  %v4471_v30 = vld [vmem:[#allocation5 + $0x74] sm:$0x1] }
 0x30c   :  { %v6823_v31 = vcombine.low %v4519_v39, %v4533_v43  ;;  %v4569_v36 = vor.u32 %v4568_v10, %v4565_v47  ;;  %v4580_v9 = vshll.u32 %v4460_v16, 16  ;;  %v4586_v54 = vshll.u32 %v4461_v28, 16 }
 0x30d   :  { %v4547_v52 = vsel %vm10112_vm8, %v4542_v50, %v4546_v61  ;;  %v4556_v38 = vrot.slane %v4555_v35, 4  ;;  %v4591_v58 = vshrl.u32 %v4462_v13, 16  ;;  %v4594_v22 = vshll.u32 %v4462_v13, 16 }
 0x30e   :  { %7495 = vmatmul.mubr.bf16.vlgmr.msra.gmra.mrb[96].mxu0 %v6823_v31  ;;  %v4570_v45 = vrot.slane %v4569_v36, 4  ;;  %v4574_v34 = vrot.slane %v4572_v5, 5  ;;  %v4582_v29 = vrot.slane %v4580_v9, 5  ;;  %v4605_v19 = vshrl.u32 %v4464_v40, 16  ;;  %v4473_v9 = vld [vmem:[#allocation5 + $0x7c] sm:$0x1] }
 0x30f   :  { %v4561_v57 = vsel %vm10112_vm8, %v4556_v38, %v4560_v20  ;;  %v4593_v26 = vrot.slane %v4591_v58, 4  ;;  %v4596_v6 = vrot.slane %v4594_v22, 5  ;;  %v4600_v18 = vshll.u32 %v4463_v15, 16  ;;  %v4474_v20 = vld [vmem:[#allocation5 + $0x80] sm:$0xf] }
 0x310   :  { %v6824_v3 = vcombine.low %v4547_v52, %v4561_v57  ;;  %v4583_v12 = vor.u32 %v4582_v29, %v4579_v56  ;;  %v4588_v44 = vrot.slane %v4586_v54, 5  ;;  %v4607_v2 = vrot.slane %v4605_v19, 4  ;;  %v4476_v15 = vld [vmem:[#allocation5 + $0x88] sm:$0xf] }
 0x311   :  { %v4597_v17 = vor.u32 %v4596_v6, %v4593_v26  ;;  %v4608_v1 = vshll.u32 %v4464_v40, 16  ;;  %v4614_v49 = vshll.u32 %v4465_v27, 16  ;;  %v4619_v53 = vshrl.u32 %v4466_v24, 16  ;;  %v4475_v26 = vld [vmem:[#allocation5 + $0x84] sm:$0x1] }
 0x312   :  { %7498 = vmatprep.mubr.bf16.mxu0 %v6824_v3  ;;  %v4575_v25 = vsel %vm10112_vm8, %v4570_v45, %v4574_v34  ;;  %v4584_v23 = vrot.slane %v4583_v12, 4  ;;  %v4622_v41 = vshll.u32 %v4466_v24, 16  ;;  %v4633_v4 = vshrl.u32 %v4468_v8, 16 }
 0x313   :  { %v4598_v11 = vrot.slane %v4597_v17, 4  ;;  %v4602_v46 = vrot.slane %v4600_v18, 5  ;;  %v4610_v48 = vrot.slane %v4608_v1, 5  ;;  %v4621_v51 = vrot.slane %v4619_v53, 4  ;;  %v4477_v17 = vld [vmem:[#allocation5 + $0x8c] sm:$0x1] }
 0x314   :  { %v4589_v16 = vsel %vm10112_vm8, %v4584_v23, %v4588_v44  ;;  %v4616_v59 = vrot.slane %v4614_v49, 5  ;;  %v4624_v39 = vrot.slane %v4622_v41, 5  ;;  %v4628_v33 = vshll.u32 %v4467_v32, 16 }
 0x315   :  { %v6825_v14 = vcombine.low %v4575_v25, %v4589_v16  ;;  %v4611_v21 = vor.u32 %v4610_v48, %v4607_v2  ;;  %v4635_v55 = vrot.slane %v4633_v4, 4  ;;  %v4636_v63 = vshll.u32 %v4468_v8, 16 }
 0x316   :  { %v4625_v7 = vor.u32 %v4624_v39, %v4621_v51  ;;  %v4642_v50 = vshll.u32 %v4469_v0, 16  ;;  %v4647_v28 = vshrl.u32 %v4470_v62, 16  ;;  %v4650_v42 = vshll.u32 %v4470_v62, 16 }
 0x317   :  { %7499 = vmatmul.mubr.bf16.gmra.mrb[100].mxu0 %v6825_v14  ;;  %v4603_v43 = vsel %vm10112_vm8, %v4598_v11, %v4602_v46  ;;  %v4612_v47 = vrot.slane %v4611_v21, 4  ;;  %v4638_v10 = vrot.slane %v4636_v63, 5  ;;  %v4661_v5 = vshrl.u32 %v4472_v37, 16 }
 0x318   :  { %v4626_v13 = vrot.slane %v4625_v7, 4  ;;  %v4630_v31 = vrot.slane %v4628_v33, 5  ;;  %v4649_v61 = vrot.slane %v4647_v28, 4  ;;  %v4652_v35 = vrot.slane %v4650_v42, 5 }
 0x319   :  { %v4617_v40 = vsel %vm10112_vm8, %v4612_v47, %v4616_v59  ;;  %v4639_v36 = vor.u32 %v4638_v10, %v4635_v55  ;;  %v4644_v56 = vrot.slane %v4642_v50, 5  ;;  %v4656_v54 = vshll.u32 %v4471_v30, 16  ;;  %v7751_v55 = vld [vmem:[%s11106_s0] sm:$0xff]  }
 0x31a   :  { %v6826_v52 = vcombine.low %v4603_v43, %v4617_v40  ;;  %v4653_v38 = vor.u32 %v4652_v35, %v4649_v61  ;;  %v4663_v27 = vrot.slane %v4661_v5, 4  ;;  %v4664_v58 = vshll.u32 %v4472_v37, 16 }
 0x31b   :  { %v4631_v22 = vsel %vm10112_vm8, %v4626_v13, %v4630_v31  ;;  %v4640_v45 = vrot.slane %v4639_v36, 4  ;;  %v4675_v34 = vshrl.u32 %v4474_v20, 16  ;;  %v4678_v29 = vshll.u32 %v4474_v20, 16 }
 0x31c   :  { %7502 = vmatprep.mubr.bf16.mxu0 %v6826_v52  ;;  %v4654_v19 = vrot.slane %v4653_v38, 4  ;;  %v4666_v24 = vrot.slane %v4664_v58, 5  ;;  %v4670_v57 = vshll.u32 %v4473_v9, 16  ;;  %v4689_v6 = vshrl.u32 %v4476_v15, 16 }
 0x31d   :  { %v4645_v18 = vsel %vm10112_vm8, %v4640_v45, %v4644_v56  ;;  %v4677_v8 = vrot.slane %v4675_v34, 4  ;;  %v4680_v3 = vrot.slane %v4678_v29, 5  ;;  %v4658_v44 = vrot.slane %v4656_v54, 5 }
 0x31e   :  { %v6827_v12 = vcombine.low %v4631_v22, %v4645_v18  ;;  %v4667_v2 = vor.u32 %v4666_v24, %v4663_v27  ;;  %v4684_v49 = vshll.u32 %v4475_v26, 16  ;;  %v4691_v32 = vrot.slane %v4689_v6, 4 }
 0x31f   :  { %v4681_v1 = vor.u32 %v4680_v3, %v4677_v8  ;;  %v4692_v53 = vshll.u32 %v4476_v15, 16  ;;  %v4659_v25 = vsel %vm10112_vm8, %v4654_v19, %v4658_v44  ;;  %v4672_v0 = vrot.slane %v4670_v57, 5 }
 0x320   :  { %7503 = vmatmul.mubr.bf16.gmra.mrb[104].mxu0 %v6827_v12  ;;  %v4668_v23 = vrot.slane %v4667_v2, 4  ;;  %v4698_v11 = vshll.u32 %v4477_v17, 16  ;;  %v4686_v51 = vrot.slane %v4684_v49, 5 }
 0x321   :  { %v4682_v41 = vrot.slane %v4681_v1, 4  ;;  %v4694_v4 = vrot.slane %v4692_v53, 5 }
 0x322   :  { %v4673_v46 = vsel %vm10112_vm8, %v4668_v23, %v4672_v0  ;;  %v4700_v39 = vrot.slane %v4698_v11, 5 }
 0x323   :  { %v6828_v48 = vcombine.low %v4659_v25, %v4673_v46  ;;  %v4695_v62 = vor.u32 %v4694_v4, %v4691_v32  ;;  %v4687_v16 = vsel %vm10112_vm8, %v4682_v41, %v4686_v51 }
 0x325   :  { %7506 = vmatprep.mubr.bf16.mxu0 %v6828_v48  ;;  %v4696_v59 = vrot.slane %v4695_v62, 4 }
 0x327   :  { %v4701_v33 = vsel %vm10112_vm8, %v4696_v59, %v4700_v39 }
 0x328   :  { %v6829_v37 = vcombine.low %v4687_v16, %v4701_v33 }
 0x32a   :  { %7507 = vmatmul.mubr.bf16.gmra.mrb[108].mxu0 %v6829_v37 }
 0x32b   :  { %v7126_v14 = vpop.f32.mrb[32].mxu1  ;;  %v7062_v21 = vpop.f32.mrb[32].mxu0  ;;  %7558 = vmatprep.mubr.bf16.mxu0 %v7751_v55 }
 0x32c   :  { %v7127_v63 = vpop.f32.mrb[33].mxu1  ;;  %v7063_v7 = vpop.f32.mrb[33].mxu0 }
 0x32d   :  { %v7128_v50 = vadd.f32 %v7127_v63, %v7126_v14  ;;  %v7064_v30 = vadd.f32 %v7063_v7, %v7062_v21  ;;  %v7129_v28 = vpop.f32.mrb[34].mxu1  ;;  %v7065_v42 = vpop.f32.mrb[34].mxu0 }
 0x32e   :  { %v7130_v43 = vpop.f32.mrb[35].mxu1  ;;  %v7066_v47 = vpop.f32.mrb[35].mxu0 }
 0x32f   :  { %v10538_v10 = vadd.f32 %v7128_v50, %v7064_v30  ;;  %v7131_v60 = vadd.f32 %v7130_v43, %v7129_v28  ;;  %v7067_v5 = vadd.f32 %v7066_v47, %v7065_v42 }
 0x331   :  { %v10540_v13 = vadd.f32 %v7131_v60, %v7067_v5 }
 0x333   :  { %v7132_v31 = vpop.f32.mrb[36].mxu1  ;;  %v7068_v61 = vpop.f32.mrb[36].mxu0 }
 0x334   :  { %v7133_v35 = vpop.f32.mrb[37].mxu1  ;;  %v7069_v20 = vpop.f32.mrb[37].mxu0 }
 0x335   :  { %v7134_v40 = vadd.f32 %v7133_v35, %v7132_v31  ;;  %v7070_v36 = vadd.f32 %v7069_v20, %v7068_v61  ;;  %v7135_v56 = vpop.f32.mrb[38].mxu1  ;;  %v7071_v9 = vpop.f32.mrb[38].mxu0 }
 0x336   :  { %v7136_v54 = vpop.f32.mrb[39].mxu1  ;;  %v7072_v15 = vpop.f32.mrb[39].mxu0 }
 0x337   :  { %v10542_v52 = vadd.f32 %v7134_v40, %v7070_v36  ;;  %v7137_v38 = vadd.f32 %v7136_v54, %v7135_v56  ;;  %v7073_v27 = vadd.f32 %v7072_v15, %v7071_v9 }
 0x339   :  { %v10544_v58 = vadd.f32 %v7137_v38, %v7073_v27 }
 0x33b   :  { %v7138_v22 = vpop.f32.mrb[40].mxu1  ;;  %v7074_v45 = vpop.f32.mrb[40].mxu0 }
 0x33c   :  { %v7139_v34 = vpop.f32.mrb[41].mxu1  ;;  %v7075_v29 = vpop.f32.mrb[41].mxu0 }
 0x33d   :  { %v7140_v19 = vadd.f32 %v7139_v34, %v7138_v22  ;;  %v7076_v24 = vadd.f32 %v7075_v29, %v7074_v45  ;;  %v7141_v57 = vpop.f32.mrb[42].mxu1  ;;  %v7077_v26 = vpop.f32.mrb[42].mxu0 }
 0x33e   :  { %v7142_v6 = vpop.f32.mrb[43].mxu1  ;;  %v7078_v18 = vpop.f32.mrb[43].mxu0 }
 0x33f   :  { %v10546_v8 = vadd.f32 %v7140_v19, %v7076_v24  ;;  %v7143_v3 = vadd.f32 %v7142_v6, %v7141_v57  ;;  %v7079_v12 = vadd.f32 %v7078_v18, %v7077_v26 }
 0x341   :  { %v10548_v44 = vadd.f32 %v7143_v3, %v7079_v12 }
 0x343   :  { %v7144_v2 = vpop.f32.mrb[44].mxu1  ;;  %v7080_v17 = vpop.f32.mrb[44].mxu0 }
 0x344   :  { %v7145_v1 = vpop.f32.mrb[45].mxu1  ;;  %v7081_v49 = vpop.f32.mrb[45].mxu0 }
 0x345   :  { %v7146_v32 = vadd.f32 %v7145_v1, %v7144_v2  ;;  %v7082_v53 = vadd.f32 %v7081_v49, %v7080_v17  ;;  %v7147_v25 = vpop.f32.mrb[46].mxu1  ;;  %v7083_v23 = vpop.f32.mrb[46].mxu0 }
 0x346   :  { %v7148_v0 = vpop.f32.mrb[47].mxu1  ;;  %v7084_v41 = vpop.f32.mrb[47].mxu0 }
 0x347   :  { %v10550_v4 = vadd.f32 %v7146_v32, %v7082_v53  ;;  %v7149_v11 = vadd.f32 %v7148_v0, %v7147_v25  ;;  %v7085_v46 = vadd.f32 %v7084_v41, %v7083_v23 }
 0x349   :  { %v10552_v48 = vadd.f32 %v7149_v11, %v7085_v46 }
 0x34b   :  { %v7086_v62 = vpop.f32.mrb[48].mxu0 }
 0x34c   :  { %v7150_v51 = vpop.f32.mrb[48].mxu1  ;;  %v7087_v59 = vpop.f32.mrb[49].mxu0 }
 0x34d   :  { %v7151_v16 = vpop.f32.mrb[49].mxu1  ;;  %v7088_v33 = vadd.f32 %v7087_v59, %v7086_v62  ;;  %v7089_v14 = vpop.f32.mrb[50].mxu0 }
 0x34e   :  { %v7152_v39 = vadd.f32 %v7151_v16, %v7150_v51  ;;  %v7153_v37 = vpop.f32.mrb[50].mxu1  ;;  %v7090_v55 = vpop.f32.mrb[51].mxu0 }
 0x34f   :  { %v7154_v21 = vpop.f32.mrb[51].mxu1  ;;  %v7091_v50 = vadd.f32 %v7090_v55, %v7089_v14 }
 0x350   :  { %v10554_v63 = vadd.f32 %v7152_v39, %v7088_v33  ;;  %v7155_v7 = vadd.f32 %v7154_v21, %v7153_v37 }
 0x352   :  { %v10556_v30 = vadd.f32 %v7155_v7, %v7091_v50 }
 0x353   :  { %v7092_v42 = vpop.f32.mrb[52].mxu0 }
 0x354   :  { %v7156_v28 = vpop.f32.mrb[52].mxu1  ;;  %v7093_v47 = vpop.f32.mrb[53].mxu0 }
 0x355   :  { %v7157_v43 = vpop.f32.mrb[53].mxu1  ;;  %v7094_v5 = vadd.f32 %v7093_v47, %v7092_v42  ;;  %v7095_v61 = vpop.f32.mrb[54].mxu0 }
 0x356   :  { %v7158_v60 = vadd.f32 %v7157_v43, %v7156_v28  ;;  %v7159_v31 = vpop.f32.mrb[54].mxu1  ;;  %v7096_v20 = vpop.f32.mrb[55].mxu0 }
 0x357   :  { %v7160_v35 = vpop.f32.mrb[55].mxu1  ;;  %v7097_v56 = vadd.f32 %v7096_v20, %v7095_v61 }
 0x358   :  { %v10558_v40 = vadd.f32 %v7158_v60, %v7094_v5  ;;  %v7161_v36 = vadd.f32 %v7160_v35, %v7159_v31  ;;  %v7727_v5 = vld [vmem:[%s11110_s4] sm:$0xff]  }
 0x359   :  { %7510 = vmatprep.subr.bf16.mxu1 %v7727_v5 }
 0x35a   :  { %v10560_v9 = vadd.f32 %v7161_v36, %v7097_v56  ;;  %7511 = vmatpush3.bf16.msra.mxu1 %v7727_v5 }
 0x35b   :  { %v7098_v15 = vpop.f32.mrb[56].mxu0 }
 0x35c   :  { %v7162_v54 = vpop.f32.mrb[56].mxu1  ;;  %v7099_v27 = vpop.f32.mrb[57].mxu0 }
 0x35d   :  { %v7163_v38 = vpop.f32.mrb[57].mxu1  ;;  %v7100_v45 = vadd.f32 %v7099_v27, %v7098_v15  ;;  %v7101_v29 = vpop.f32.mrb[58].mxu0  ;;  %v7728_v15 = vld [vmem:[%s11110_s4 + $0x8] sm:$0xff]  }
 0x35e   :  { %v7164_v22 = vadd.f32 %v7163_v38, %v7162_v54  ;;  %v7165_v34 = vpop.f32.mrb[58].mxu1  ;;  %v7102_v24 = vpop.f32.mrb[59].mxu0  ;;  %7512 = vmatprep.subr.bf16.mxu1 %v7728_v15 }
 0x35f   :  { %v7166_v19 = vpop.f32.mrb[59].mxu1  ;;  %v7103_v6 = vadd.f32 %v7102_v24, %v7101_v29  ;;  %7513 = vmatpush3.bf16.msra.mxu1 %v7728_v15  ;;  %v10610_v15 = vld [vmem:[%s11111_s2] sm:$0xff]  }
 0x360   :  { %v10562_v57 = vadd.f32 %v7164_v22, %v7100_v45  ;;  %v7167_v26 = vadd.f32 %v7166_v19, %v7165_v34  ;;  %7542 = vmatprep.subr.bf16.mxu0 %v10610_v15 }
 0x361   :  { %7543 = vmatpush3.bf16.msra.mxu0 %v10610_v15 }
 0x362   :  { %v10564_v18 = vadd.f32 %v7167_v26, %v7103_v6 }
 0x363   :  { %v7104_v3 = vpop.f32.mrb[60].mxu0 }
 0x364   :  { %v7105_v12 = vpop.f32.mrb[61].mxu0 }
 0x365   :  { %v7168_v2 = vpop.f32.mrb[60].mxu1  ;;  %v7106_v17 = vadd.f32 %v7105_v12, %v7104_v3  ;;  %v7107_v1 = vpop.f32.mrb[62].mxu0 }
 0x366   :  { %v7169_v49 = vpop.f32.mrb[61].mxu1  ;;  %v7108_v32 = vpop.f32.mrb[63].mxu0 }
 0x367   :  { %v7170_v53 = vadd.f32 %v7169_v49, %v7168_v2  ;;  %v7171_v25 = vpop.f32.mrb[62].mxu1  ;;  %v7109_v23 = vadd.f32 %v7108_v32, %v7107_v1 }
 0x368   :  { %v7172_v0 = vpop.f32.mrb[63].mxu1 }
 0x369   :  { %v10566_v41 = vadd.f32 %v7170_v53, %v7106_v17  ;;  %v7173_v11 = vadd.f32 %v7172_v0, %v7171_v25 }
 0x36b   :  { %v10568_v46 = vadd.f32 %v7173_v11, %v7109_v23 }
 0x36d   :  { %v7254_v51 = vpop.f32.mrb[64].mxu1 }
 0x36e   :  { %v7255_v62 = vpop.f32.mrb[65].mxu1 }
 0x36f   :  { %v7256_v16 = vadd.f32 %v7255_v62, %v7254_v51  ;;  %v7257_v59 = vpop.f32.mrb[66].mxu1 }
 0x370   :  { %v7258_v39 = vpop.f32.mrb[67].mxu1 }
 0x371   :  { %v7259_v33 = vadd.f32 %v7258_v39, %v7257_v59 }
 0x374   :  { %v7190_v37 = vpop.f32.mrb[64].mxu0 }
 0x375   :  { %v7191_v14 = vpop.f32.mrb[65].mxu0 }
 0x376   :  { %v7192_v21 = vadd.f32 %v7191_v14, %v7190_v37  ;;  %v7193_v55 = vpop.f32.mrb[66].mxu0 }
 0x377   :  { %v7194_v7 = vpop.f32.mrb[67].mxu0 }
 0x378   :  { %v5619_v50 = vadd.f32 %v7192_v21, %v10538_v10  ;;  %v7195_v28 = vadd.f32 %v7194_v7, %v7193_v55 }
 0x379   :  { %v7260_v43 = vpop.f32.mrb[68].mxu1 }
 0x37a   :  { %v5622_v42 = vadd.f32 %v7195_v28, %v10540_v13  ;;  %v10572_v47 = vadd.f32 %v7256_v16, %v5619_v50  ;;  %v7261_v60 = vpop.f32.mrb[69].mxu1 }
 0x37b   :  { %v7262_v31 = vadd.f32 %v7261_v60, %v7260_v43  ;;  %v7263_v61 = vpop.f32.mrb[70].mxu1 }
 0x37c   :  { %v10577_v35 = vadd.f32 %v7259_v33, %v5622_v42  ;;  %v7264_v20 = vpop.f32.mrb[71].mxu1 }
 0x37d   :  { %v7265_v36 = vadd.f32 %v7264_v20, %v7263_v61 }
 0x382   :  { %v7196_v10 = vpop.f32.mrb[68].mxu0 }
 0x383   :  { %v7197_v56 = vpop.f32.mrb[69].mxu0 }
 0x384   :  { %v7198_v54 = vadd.f32 %v7197_v56, %v7196_v10  ;;  %v7199_v13 = vpop.f32.mrb[70].mxu0 }
 0x385   :  { %v7200_v38 = vpop.f32.mrb[71].mxu0 }
 0x386   :  { %v5627_v27 = vadd.f32 %v7198_v54, %v10542_v52  ;;  %v7201_v22 = vadd.f32 %v7200_v38, %v7199_v13  ;;  %v10615_v38 = vld [vmem:[%s11111_s2 + $0x8] sm:$0xff]  }
 0x387   :  { %v7266_v34 = vpop.f32.mrb[72].mxu1  ;;  %7544 = vmatprep.subr.bf16.mxu0 %v10615_v38 }
 0x388   :  { %v5630_v45 = vadd.f32 %v7201_v22, %v10544_v58  ;;  %v10584_v29 = vadd.f32 %v7262_v31, %v5627_v27  ;;  %v7267_v19 = vpop.f32.mrb[73].mxu1  ;;  %7545 = vmatpush3.bf16.msra.mxu0 %v10615_v38 }
 0x389   :  { %v7268_v24 = vadd.f32 %v7267_v19, %v7266_v34  ;;  %v7269_v26 = vpop.f32.mrb[74].mxu1 }
 0x38a   :  { %v10586_v6 = vadd.f32 %v7265_v36, %v5630_v45  ;;  %v7270_v3 = vpop.f32.mrb[75].mxu1 }
 0x38b   :  { %v7271_v12 = vadd.f32 %v7270_v3, %v7269_v26 }
 0x390   :  { %v7202_v2 = vpop.f32.mrb[72].mxu0 }
 0x391   :  { %v7203_v17 = vpop.f32.mrb[73].mxu0 }
 0x392   :  { %v7204_v1 = vadd.f32 %v7203_v17, %v7202_v2  ;;  %v7205_v49 = vpop.f32.mrb[74].mxu0  ;;  %v10641_v17 = vld [vmem:[%s11111_s2 + $0x18] sm:$0xff]  }
 0x393   :  { %v7206_v52 = vpop.f32.mrb[75].mxu0 }
 0x394   :  { %v5635_v32 = vadd.f32 %v7204_v1, %v10546_v8  ;;  %v7207_v53 = vadd.f32 %v7206_v52, %v7205_v49  ;;  %v7735_v49 = vld [vmem:[%s11110_s4 + $0x30] sm:$0xff]  }
 0x396   :  { %v7272_v25 = vpop.f32.mrb[76].mxu1  ;;  %v5638_v58 = vadd.f32 %v7207_v53, %v10548_v44  ;;  %v10590_v0 = vadd.f32 %v7268_v24, %v5635_v32 }
 0x397   :  { %v7273_v23 = vpop.f32.mrb[77].mxu1 }
 0x398   :  { %v7274_v11 = vadd.f32 %v7273_v23, %v7272_v25  ;;  %v7275_v51 = vpop.f32.mrb[78].mxu1  ;;  %v10592_v16 = vadd.f32 %v7271_v12, %v5638_v58  ;;  %v7732_v12 = vld [vmem:[%s11110_s4 + $0x28] sm:$0xff]   ;;  %v10651_v25 = vld [vmem:[%s11111_s2 + $0x20] sm:$0xff]  }
 0x399   :  { %v7276_v62 = vpop.f32.mrb[79].mxu1 }
 0x39a   :  { %v7277_v59 = vadd.f32 %v7276_v62, %v7275_v51  ;;  %v7738_v51 = vld [vmem:[%s11110_s4 + $0x38] sm:$0xff]  }
 0x39e   :  { %v7208_v39 = vpop.f32.mrb[76].mxu0 }
 0x39f   :  { %v7209_v33 = vpop.f32.mrb[77].mxu0 }
 0x3a0   :  { %v7210_v37 = vadd.f32 %v7209_v33, %v7208_v39  ;;  %v7211_v14 = vpop.f32.mrb[78].mxu0  ;;  %v10665_v33 = vld [vmem:[%s11111_s2 + $0x28] sm:$0xff]  }
 0x3a1   :  { %v7212_v21 = vpop.f32.mrb[79].mxu0 }
 0x3a2   :  { %v5643_v8 = vadd.f32 %v7210_v37, %v10550_v4  ;;  %v7213_v55 = vadd.f32 %v7212_v21, %v7211_v14  ;;  %v7729_v4 = vld [vmem:[%s11110_s4 + $0x10] sm:$0xff]  }
 0x3a3   :  { %7514 = vmatprep.subr.bf16.mxu1 %v7729_v4 }
 0x3a4   :  { %v5646_v7 = vadd.f32 %v7213_v55, %v10552_v48  ;;  %v10596_v50 = vadd.f32 %v7274_v11, %v5643_v8  ;;  %v7730_v48 = vld [vmem:[%s11110_s4 + $0x18] sm:$0xff]   ;;  %7515 = vmatpush3.bf16.msra.mxu1 %v7729_v4  ;;  %v10674_v55 = vld [vmem:[%s11111_s2 + $0x30] sm:$0xff]  }
 0x3a5   :  { %v7278_v44 = vpop.f32.mrb[80].mxu1  ;;  %7516 = vmatprep.subr.bf16.mxu1 %v7730_v48 }
 0x3a6   :  { %v7279_v28 = vpop.f32.mrb[81].mxu1  ;;  %v10598_v60 = vadd.f32 %v7277_v59, %v5646_v7  ;;  %v10682_v7 = vld [vmem:[%s11111_s2 + $0x38] sm:$0xff]  }
 0x3a7   :  { %v7280_v42 = vadd.f32 %v7279_v28, %v7278_v44  ;;  %v7281_v43 = vpop.f32.mrb[82].mxu1 }
 0x3a8   :  { %v7282_v5 = vpop.f32.mrb[83].mxu1  ;;  %7517 = vmatpush3.bf16.msra.mxu1 %v7730_v48 }
 0x3a9   :  { %v7283_v31 = vadd.f32 %v7282_v5, %v7281_v43 }
 0x3ac   :  { %v7214_v61 = vpop.f32.mrb[80].mxu0 }
 0x3ad   :  { %v7215_v20 = vpop.f32.mrb[81].mxu0 }
 0x3ae   :  { %v7216_v36 = vadd.f32 %v7215_v20, %v7214_v61  ;;  %v7217_v10 = vpop.f32.mrb[82].mxu0 }
 0x3af   :  { %v7218_v56 = vpop.f32.mrb[83].mxu0 }
 0x3b0   :  { %v5651_v54 = vadd.f32 %v7216_v36, %v10554_v63  ;;  %v7219_v13 = vadd.f32 %v7218_v56, %v7217_v10  ;;  %v7731_v63 = vld [vmem:[%s11110_s4 + $0x20] sm:$0xff]  }
 0x3b1   :  { %7518 = vmatprep.subr.bf16.mxu1 %v7731_v63 }
 0x3b2   :  { %v5654_v27 = vadd.f32 %v7219_v13, %v10556_v30  ;;  %v7284_v22 = vpop.f32.mrb[84].mxu1  ;;  %v10618_v45 = vadd.f32 %v7280_v42, %v5651_v54  ;;  %v10631_v30 = vld [vmem:[%s11111_s2 + $0x10] sm:$0xff]   ;;  %7519 = vmatpush3.bf16.msra.mxu1 %v7731_v63 }
 0x3b3   :  { %v7285_v34 = vpop.f32.mrb[85].mxu1  ;;  %7546 = vmatprep.subr.bf16.mxu0 %v10631_v30  ;;  %7520 = vmatprep.subr.bf16.mxu1 %v7732_v12 }
 0x3b4   :  { %v7286_v19 = vadd.f32 %v7285_v34, %v7284_v22  ;;  %v7287_v24 = vpop.f32.mrb[86].mxu1  ;;  %v10625_v26 = vadd.f32 %v7283_v31, %v5654_v27  ;;  %7547 = vmatpush3.bf16.msra.mxu0 %v10631_v30  ;;  %v7752_v22 = vld [vmem:[%s11106_s0 + $0x8] sm:$0xff]  }
 0x3b5   :  { %v7288_v3 = vpop.f32.mrb[87].mxu1  ;;  %7548 = vmatprep.subr.bf16.mxu0 %v10641_v17 }
 0x3b6   :  { %v7289_v2 = vadd.f32 %v7288_v3, %v7287_v24  ;;  %7521 = vmatpush3.bf16.msra.mxu1 %v7732_v12  ;;  %v7754_v3 = vld [vmem:[%s11106_s0 + $0x18] sm:$0xff]  }
 0x3b7   :  { %7522 = vmatprep.subr.bf16.mxu1 %v7735_v49 }
 0x3b8   :  { %7549 = vmatpush3.bf16.msra.mxu0 %v10641_v17 }
 0x3b9   :  { %7550 = vmatprep.subr.bf16.mxu0 %v10651_v25 }
 0x3ba   :  { %7523 = vmatpush3.bf16.msra.mxu1 %v7735_v49 }
 0x3bb   :  { %v7220_v1 = vpop.f32.mrb[84].mxu0  ;;  %7524 = vmatprep.subr.bf16.mxu1 %v7738_v51 }
 0x3bc   :  { %v7221_v52 = vpop.f32.mrb[85].mxu0  ;;  %7551 = vmatpush3.bf16.msra.mxu0 %v10651_v25 }
 0x3bd   :  { %v7222_v32 = vadd.f32 %v7221_v52, %v7220_v1  ;;  %v7223_v53 = vpop.f32.mrb[86].mxu0  ;;  %7552 = vmatprep.subr.bf16.mxu0 %v10665_v33 }
 0x3be   :  { %v7224_v58 = vpop.f32.mrb[87].mxu0  ;;  %7525 = vmatpush3.bf16.msra.mxu1 %v7738_v51 }
 0x3bf   :  { %v5659_v23 = vadd.f32 %v7222_v32, %v10558_v40  ;;  %v7225_v11 = vadd.f32 %v7224_v58, %v7223_v53  ;;  %7574 = vmatprep.subr.bf16.mxu1 %v10610_v15 }
 0x3c0   :  { %7553 = vmatpush3.bf16.msra.mxu0 %v10665_v33 }
 0x3c1   :  { %v5662_v62 = vadd.f32 %v7225_v11, %v10560_v9  ;;  %v7290_v59 = vpop.f32.mrb[88].mxu1  ;;  %v10659_v39 = vadd.f32 %v7286_v19, %v5659_v23  ;;  %7554 = vmatprep.subr.bf16.mxu0 %v10674_v55 }
 0x3c2   :  { %v7291_v40 = vpop.f32.mrb[89].mxu1 }
 0x3c3   :  { %v7292_v37 = vadd.f32 %v7291_v40, %v7290_v59  ;;  %v7293_v14 = vpop.f32.mrb[90].mxu1  ;;  %v10667_v21 = vadd.f32 %v7289_v2, %v5662_v62 }
 0x3c4   :  { %v7294_v8 = vpop.f32.mrb[91].mxu1  ;;  %7555 = vmatpush3.bf16.msra.mxu0 %v10674_v55 }
 0x3c5   :  { %v7295_v9 = vadd.f32 %v7294_v8, %v7293_v14  ;;  %7556 = vmatprep.subr.bf16.mxu0 %v10682_v7 }
 0x3c8   :  { %7557 = vmatpush3.bf16.msra.mxu0 %v10682_v7 }
 0x3ca   :  { %v7226_v44 = vpop.f32.mrb[88].mxu0 }
 0x3cb   :  { %v7227_v28 = vpop.f32.mrb[89].mxu0  ;;  %7559 = vmatmul.mubr.bf16.vlgmr.msra.gmra.mrb[112].mxu0 %v7752_v22 }
 0x3cc   :  { %v7228_v42 = vadd.f32 %v7227_v28, %v7226_v44  ;;  %v7229_v43 = vpop.f32.mrb[90].mxu0 }
 0x3cd   :  { %v7230_v5 = vpop.f32.mrb[91].mxu0 }
 0x3ce   :  { %v5667_v31 = vadd.f32 %v7228_v42, %v10562_v57  ;;  %v7231_v61 = vadd.f32 %v7230_v5, %v7229_v43  ;;  %v7753_v57 = vld [vmem:[%s11106_s0 + $0x10] sm:$0xff]  }
 0x3cf   :  { %v7296_v20 = vpop.f32.mrb[92].mxu1  ;;  %7562 = vmatprep.mubr.bf16.mxu0 %v7753_v57 }
 0x3d0   :  { %v5670_v36 = vadd.f32 %v7231_v61, %v10564_v18  ;;  %v7297_v10 = vpop.f32.mrb[93].mxu1  ;;  %v10688_v4 = vadd.f32 %v7292_v37, %v5667_v31 }
 0x3d1   :  { %v7298_v48 = vadd.f32 %v7297_v10, %v7296_v20  ;;  %v7299_v56 = vpop.f32.mrb[94].mxu1 }
 0x3d2   :  { %v7300_v54 = vpop.f32.mrb[95].mxu1  ;;  %v10691_v13 = vadd.f32 %v7295_v9, %v5670_v36 }
 0x3d3   :  { %v7301_v27 = vadd.f32 %v7300_v54, %v7299_v56  ;;  %7563 = vmatmul.mubr.bf16.gmra.mrb[116].mxu0 %v7754_v3 }
 0x3d7   :  { %v7232_v18 = vpop.f32.mrb[92].mxu0 }
 0x3d8   :  { %v7233_v63 = vpop.f32.mrb[93].mxu0 }
 0x3d9   :  { %v7234_v34 = vadd.f32 %v7233_v63, %v7232_v18  ;;  %v7235_v19 = vpop.f32.mrb[94].mxu0 }
 0x3da   :  { %v7236_v24 = vpop.f32.mrb[95].mxu0 }
 0x3db   :  { %v5675_v12 = vadd.f32 %v7234_v34, %v10566_v41  ;;  %v7237_v2 = vadd.f32 %v7236_v24, %v7235_v19 }
 0x3dd   :  { %v5678_v1 = vadd.f32 %v7237_v2, %v10568_v46  ;;  %v5772_v49 = vadd.f32 %v7298_v48, %v5675_v12 }
 0x3df   :  { %v10704_v52 = vadd.f32 %v7301_v27, %v5678_v1 }
 0x3e1   :  { %v7496_v32 = vpop.f32.mrb[96].mxu0 }
 0x3e2   :  { %v10707_v53 = vadd.f32 %v7496_v32, %v10584_v29  ;;  %v5812_v58 = vpop.f32.mrb[97].mxu0 }
 0x3e3   :  { %v10710_v23 = vadd.f32 %v5812_v58, %v10572_v47  ;;  %v7497_v11 = vpop.f32.mrb[98].mxu0 }
 0x3e4   :  { %v10713_v51 = vadd.f32 %v7497_v11, %v10586_v6  ;;  %v5815_v62 = vpop.f32.mrb[99].mxu0  ;;  %v5900_v47 = vmul.f32 %v10707_v53, %v10707_v53 }
 0x3e5   :  { %v10716_v41 = vadd.f32 %v5815_v62, %v10577_v35  ;;  %v5898_v46 = vmul.f32 %v10710_v23, %v10710_v23 }
 0x3e6   :  { %v5901_v37 = vmul.f32 %v10713_v51, %v10713_v51 }
 0x3e7   :  { %v5877_v59 = vadd.f32 %v10716_v41, %v10710_v23  ;;  %v5899_v29 = vmul.f32 %v10716_v41, %v10716_v41 }
 0x3e9   :  { %v5878_v40 = vadd.f32 %v5877_v59, %v10707_v53  ;;  %v5914_v6 = vadd.f32 %v5899_v29, %v5898_v46 }
 0x3ea   :  { %v7500_v14 = vpop.f32.mrb[100].mxu0 }
 0x3eb   :  { %v5915_v35 = vadd.f32 %v5914_v6, %v5900_v47  ;;  %v5879_v8 = vadd.f32 %v5878_v40, %v10713_v51  ;;  %v10731_v9 = vadd.f32 %v7500_v14, %v10596_v50  ;;  %v5828_v44 = vpop.f32.mrb[101].mxu0 }
 0x3ec   :  { %v10734_v28 = vadd.f32 %v5828_v44, %v10590_v0  ;;  %v7501_v43 = vpop.f32.mrb[102].mxu0 }
 0x3ed   :  { %v5916_v42 = vadd.f32 %v5915_v35, %v5901_v37  ;;  %v10737_v5 = vadd.f32 %v7501_v43, %v10598_v60  ;;  %v5831_v31 = vpop.f32.mrb[103].mxu0  ;;  %v5904_v48 = vmul.f32 %v10731_v9, %v10731_v9 }
 0x3ee   :  { %v5880_v61 = vadd.f32 %v5879_v8, %v10734_v28  ;;  %v5902_v20 = vmul.f32 %v10734_v28, %v10734_v28  ;;  %v10743_v36 = vadd.f32 %v5831_v31, %v10592_v16 }
 0x3ef   :  { %v5905_v27 = vmul.f32 %v10737_v5, %v10737_v5 }
 0x3f0   :  { %v5917_v50 = vadd.f32 %v5916_v42, %v5902_v20  ;;  %v5881_v10 = vadd.f32 %v5880_v61, %v10743_v36  ;;  %v5903_v0 = vmul.f32 %v10743_v36, %v10743_v36 }
 0x3f2   :  { %v5882_v60 = vadd.f32 %v5881_v10, %v10731_v9  ;;  %v5918_v56 = vadd.f32 %v5917_v50, %v5903_v0 }
 0x3f3   :  { %v7504_v54 = vpop.f32.mrb[104].mxu0 }
 0x3f4   :  { %v5919_v22 = vadd.f32 %v5918_v56, %v5904_v48  ;;  %v10754_v16 = vadd.f32 %v7504_v54, %v10659_v39  ;;  %v5844_v57 = vpop.f32.mrb[105].mxu0  ;;  %v5883_v18 = vadd.f32 %v5882_v60, %v10737_v5 }
 0x3f5   :  { %v10758_v63 = vadd.f32 %v5844_v57, %v10618_v45  ;;  %v7505_v34 = vpop.f32.mrb[106].mxu0 }
 0x3f6   :  { %v5920_v19 = vadd.f32 %v5919_v22, %v5905_v27  ;;  %v10761_v24 = vadd.f32 %v7505_v34, %v10667_v21  ;;  %v5847_v3 = vpop.f32.mrb[107].mxu0  ;;  %v5908_v58 = vmul.f32 %v10754_v16, %v10754_v16 }
 0x3f7   :  { %v5884_v12 = vadd.f32 %v5883_v18, %v10758_v63  ;;  %v5906_v2 = vmul.f32 %v10758_v63, %v10758_v63  ;;  %v10767_v39 = vadd.f32 %v5847_v3, %v10625_v26 }
 0x3f8   :  { %v5909_v62 = vmul.f32 %v10761_v24, %v10761_v24 }
 0x3f9   :  { %v5921_v1 = vadd.f32 %v5920_v19, %v5906_v2  ;;  %v5885_v32 = vadd.f32 %v5884_v12, %v10767_v39  ;;  %v5907_v45 = vmul.f32 %v10767_v39, %v10767_v39 }
 0x3fb   :  { %v5886_v21 = vadd.f32 %v5885_v32, %v10754_v16  ;;  %v5922_v11 = vadd.f32 %v5921_v1, %v5907_v45 }
 0x3fd   :  { %v5923_v46 = vadd.f32 %v5922_v11, %v5908_v58  ;;  %v7508_v59 = vpop.f32.mrb[108].mxu0  ;;  %v5887_v26 = vadd.f32 %v5886_v21, %v10761_v24  ;;  %v5875_v58 = vld [vmem:[%s11112_s7] sm:$0x1] }
 0x3fe   :  { %v10778_v29 = vadd.f32 %v7508_v59, %v5772_v49  ;;  %v5860_v47 = vpop.f32.mrb[109].mxu0 }
 0x3ff   :  { %v5861_v40 = vadd.f32 %v5860_v47, %v10688_v4  ;;  %v5924_v6 = vadd.f32 %v5923_v46, %v5909_v62  ;;  %v7509_v37 = vpop.f32.mrb[110].mxu0  ;;  %v5876_v62 = vld [vmem:[%s11113_s8] sm:$0x1]  ;;  %v11348_v46 = vld [vmem:[#allocation37_spill] sm:$0xff] }
 0x400   :  { %v10782_v35 = vadd.f32 %v7509_v37, %v10704_v52  ;;  %v5863_v14 = vpop.f32.mrb[111].mxu0  ;;  %v5912_v49 = vmul.f32 %v10778_v29, %v10778_v29 }
 0x401   :  { %v5888_v8 = vadd.f32 %v5887_v26, %v5861_v40  ;;  %v5910_v44 = vmul.f32 %v5861_v40, %v5861_v40  ;;  %v5864_v42 = vadd.f32 %v5863_v14, %v10691_v13 }
 0x402   :  { %v5913_v4 = vmul.f32 %v10782_v35, %v10782_v35 }
 0x403   :  { %v5925_v43 = vadd.f32 %v5924_v6, %v5910_v44  ;;  %v5889_v31 = vadd.f32 %v5888_v8, %v5864_v42  ;;  %v5911_v61 = vmul.f32 %v5864_v42, %v5864_v42 }
 0x405   :  { %v5890_v20 = vadd.f32 %v5889_v31, %v10778_v29  ;;  %v5926_v50 = vadd.f32 %v5925_v43, %v5911_v61 }
 0x407   :  { %v5891_v52 = vadd.f32 %v5890_v20, %v10782_v35  ;;  %v5927_v10 = vadd.f32 %v5926_v50, %v5912_v49 }
 0x409   :  { %v5892_v0 = vrot.slane %v5891_v52, 4  ;;  %v5928_v48 = vadd.f32 %v5927_v10, %v5913_v4 }
 0x40b   :  { %v5893_v60 = vadd.f32 %v5892_v0, %v5891_v52  ;;  %v5929_v56 = vrot.slane %v5928_v48, 4 }
 0x40d   :  { %v5894_v13 = vrot.slane %v5893_v60, 2  ;;  %v5930_v54 = vadd.f32 %v5929_v56, %v5928_v48 }
 0x40f   :  { %v5895_v27 = vadd.f32 %v5894_v13, %v5893_v60  ;;  %v5931_v22 = vrot.slane %v5930_v54, 2 }
 0x411   :  { %v5896_v57 = vrot.slane %v5895_v27, 1  ;;  %v5932_v18 = vadd.f32 %v5931_v22, %v5930_v54 }
 0x413   :  { %v5897_v34 = vadd.f32 %v5896_v57, %v5895_v27  ;;  %v5933_v19 = vrot.slane %v5932_v18, 1 }
 0x415   :  { %v5934_v3 = vadd.f32 %v5933_v19, %v5932_v18  ;;  %v5935_v12 = vmul.f32 0.0078125, %v5897_v34 }
 0x417   :  { %v5936_v2 = vmul.f32 0.0078125, %v5934_v3  ;;  %v5937_v1 = vmul.f32 %v5935_v12, %v5935_v12 }
 0x419   :  { %v5938_v32 = vsub.f32 %v5936_v2, %v5937_v1 }
 0x41b   :  { %v5939_v45 = vadd.f32 1e-05, %v5938_v32 }
 0x41d   :  { %7745 = vrsqrt.f32 %v5939_v45 }
 0x427   :  { %v7746_v21 = vpop.eup %7745 }
 0x428   :  { %v5941_v11 = vmul.f32 %v7746_v21, %v5875_v58 }
 0x42a   :  { %v5945_v59 = vrot.slane %v5941_v11, %v11348_v46  ;;  %v5962_v26 = vmul.f32 %v5941_v11, %v5935_v12 }
 0x42c   :  { %v5959_v47 = vmul.f32 %v5945_v59, %v5864_v42  ;;  %v5963_v6 = vsub.f32 %v5876_v62, %v5962_v26  ;;  %v5946_v37 = vmul.f32 %v5945_v59, %v10710_v23  ;;  %v5947_v14 = vmul.f32 %v5945_v59, %v10716_v41 }
 0x42d   :  { %v5948_v8 = vmul.f32 %v5945_v59, %v10707_v53  ;;  %v5949_v44 = vmul.f32 %v5945_v59, %v10713_v51  ;;  %v5950_v43 = vmul.f32 %v5945_v59, %v10734_v28  ;;  %v5951_v31 = vmul.f32 %v5945_v59, %v10743_v36 }
 0x42e   :  { %v5968_v61 = vrot.slane %v5963_v6, %v11348_v46  ;;  %v5952_v49 = vmul.f32 %v5945_v59, %v10731_v9  ;;  %v5953_v20 = vmul.f32 %v5945_v59, %v10737_v5  ;;  %v5954_v42 = vmul.f32 %v5945_v59, %v10758_v63 }
 0x42f   :  { %v5955_v23 = vmul.f32 %v5945_v59, %v10767_v39  ;;  %v5956_v41 = vmul.f32 %v5945_v59, %v10754_v16  ;;  %v5957_v53 = vmul.f32 %v5945_v59, %v10761_v24  ;;  %v5958_v50 = vmul.f32 %v5945_v59, %v5861_v40 }
 0x430   :  { %v5970_v51 = vadd.f32 %v5968_v61, %v5946_v37  ;;  %v5971_v4 = vadd.f32 %v5968_v61, %v5947_v14  ;;  %v5972_v28 = vadd.f32 %v5968_v61, %v5948_v8  ;;  %v5973_v52 = vadd.f32 %v5968_v61, %v5949_v44 }
 0x431   :  { %v5974_v36 = vadd.f32 %v5968_v61, %v5950_v43  ;;  %v5975_v10 = vadd.f32 %v5968_v61, %v5951_v31  ;;  %v5976_v0 = vadd.f32 %v5968_v61, %v5952_v49  ;;  %v5977_v48 = vadd.f32 %v5968_v61, %v5953_v20 }
 0x432   :  { %v5986_v9 = vmax.f32 %v5970_v51, 0.0  ;;  %v5987_v60 = vmax.f32 %v5971_v4, 0.0  ;;  %v5988_v5 = vmax.f32 %v5972_v28, 0.0  ;;  %v5989_v56 = vmax.f32 %v5973_v52, 0.0 }
 0x433   :  { %v5990_v63 = vmax.f32 %v5974_v36, 0.0  ;;  %v5991_v13 = vmax.f32 %v5975_v10, 0.0  ;;  %v5992_v39 = vmax.f32 %v5976_v0, 0.0  ;;  %v5993_v54 = vmax.f32 %v5977_v48, 0.0 }
 0x434   :  { %v6002_v16 = vpack.c.bf16 %v5987_v60, %v5986_v9  ;;  %v6003_v27 = vpack.c.bf16 %v5989_v56, %v5988_v5  ;;  %v5978_v24 = vadd.f32 %v5968_v61, %v5954_v42  ;;  %v5979_v40 = vadd.f32 %v5968_v61, %v5955_v23 }
 0x435   :  { %v6004_v22 = vpack.c.bf16 %v5991_v13, %v5990_v63  ;;  %v6005_v57 = vpack.c.bf16 %v5993_v54, %v5992_v39  ;;  %v5980_v18 = vadd.f32 %v5968_v61, %v5956_v41  ;;  %v5981_v34 = vadd.f32 %v5968_v61, %v5957_v53 }
 0x436   :  { %7526 = vmatprep.mubr.bf16.mxu1 %v6002_v16  ;;  %v5994_v19 = vmax.f32 %v5978_v24, 0.0  ;;  %v5995_v3 = vmax.f32 %v5979_v40, 0.0  ;;  %v5982_v12 = vadd.f32 %v5968_v61, %v5958_v50  ;;  %v5983_v2 = vadd.f32 %v5968_v61, %v5959_v47 }
 0x437   :  { %7527 = vmatmul.mubr.bf16.vlgmr.msra.gmra.mrb[96].mxu1 %v6003_v27  ;;  %v5996_v1 = vmax.f32 %v5980_v18, 0.0  ;;  %v5997_v32 = vmax.f32 %v5981_v34, 0.0  ;;  %v5960_v45 = vmul.f32 %v5945_v59, %v10778_v29  ;;  %v5961_v58 = vmul.f32 %v5945_v59, %v10782_v35 }
 0x438   :  { %7530 = vmatprep.mubr.bf16.mxu1 %v6004_v22  ;;  %7582 = vmatpush3.bf16.msra.mxu1 %v10610_v15  ;;  %v6006_v21 = vpack.c.bf16 %v5995_v3, %v5994_v19  ;;  %v5998_v11 = vmax.f32 %v5982_v12, 0.0  ;;  %v5999_v62 = vmax.f32 %v5983_v2, 0.0  ;;  %v7755_v15 = vld [vmem:[%s11106_s0 + $0x20] sm:$0xff]  }
 0x439   :  { %7575 = vmatprep.subr.bf16.mxu1 %v10615_v38  ;;  %v6007_v26 = vpack.c.bf16 %v5997_v32, %v5996_v1  ;;  %v5984_v6 = vadd.f32 %v5968_v61, %v5960_v45  ;;  %v5985_v37 = vadd.f32 %v5968_v61, %v5961_v58 }
 0x43a   :  { %v6008_v14 = vpack.c.bf16 %v5999_v62, %v5998_v11 }
 0x43b   :  { %v6000_v47 = vmax.f32 %v5984_v6, 0.0  ;;  %v6001_v8 = vmax.f32 %v5985_v37, 0.0 }
 0x43c   :  { %7583 = vmatpush3.bf16.msra.mxu1 %v10615_v38  ;;  %v7756_v38 = vld [vmem:[%s11106_s0 + $0x28] sm:$0xff]  }
 0x43d   :  { %7576 = vmatprep.subr.bf16.mxu1 %v10631_v30  ;;  %v6009_v29 = vpack.c.bf16 %v6001_v8, %v6000_v47 }
 0x43f   :  { %7531 = vmatmul.mubr.bf16.gmra.mrb[100].mxu1 %v6005_v57 }
 0x440   :  { %7534 = vmatprep.mubr.bf16.mxu1 %v6006_v21  ;;  %7584 = vmatpush3.bf16.msra.mxu1 %v10631_v30  ;;  %v7757_v30 = vld [vmem:[%s11106_s0 + $0x30] sm:$0xff]  }
 0x441   :  { %7577 = vmatprep.subr.bf16.mxu1 %v10641_v17 }
 0x444   :  { %7585 = vmatpush3.bf16.msra.mxu1 %v10641_v17  ;;  %v7758_v17 = vld [vmem:[%s11106_s0 + $0x38] sm:$0xff]  }
 0x445   :  { %7578 = vmatprep.subr.bf16.mxu1 %v10651_v25 }
 0x447   :  { %7535 = vmatmul.mubr.bf16.gmra.mrb[104].mxu1 %v6007_v26 }
 0x448   :  { %7538 = vmatprep.mubr.bf16.mxu1 %v6008_v14  ;;  %7586 = vmatpush3.bf16.msra.mxu1 %v10651_v25 }
 0x449   :  { %7579 = vmatprep.subr.bf16.mxu1 %v10665_v33 }
 0x44c   :  { %7587 = vmatpush3.bf16.msra.mxu1 %v10665_v33 }
 0x44d   :  { %7580 = vmatprep.subr.bf16.mxu1 %v10674_v55 }
 0x44f   :  { %7539 = vmatmul.mubr.bf16.gmra.mrb[108].mxu1 %v6009_v29 }
 0x450   :  { %7588 = vmatpush3.bf16.msra.mxu1 %v10674_v55  ;;  %7566 = vmatprep.mubr.bf16.mxu1 %v7755_v15 }
 0x451   :  { %7581 = vmatprep.subr.bf16.mxu1 %v10682_v7 }
 0x454   :  { %7589 = vmatpush3.bf16.msra.mxu1 %v10682_v7 }
 0x457   :  { %7567 = vmatmul.mubr.bf16.vlgmr.msra.gmra.mrb[112].mxu1 %v7756_v38 }
 0x458   :  { %7570 = vmatprep.mubr.bf16.mxu1 %v7757_v30 }
 0x45f   :  { %7571 = vmatmul.mubr.bf16.gmra.mrb[116].mxu1 %v7758_v17 }
 0x49e   :  { %v10840_v25 = vpop.f32.mrb[112].mxu0 }
 0x49f   :  { %v10842_v33 = vpop.f32.mrb[113].mxu0  ;;  %v6468_v59 = vmul.f32 %v10840_v25, %v10840_v25 }
 0x4a0   :  { %v6466_v55 = vmul.f32 %v10842_v33, %v10842_v33  ;;  %v10846_v7 = vpop.f32.mrb[114].mxu0 }
 0x4a1   :  { %v10848_v35 = vpop.f32.mrb[115].mxu0  ;;  %v6469_v31 = vmul.f32 %v10846_v7, %v10846_v7 }
 0x4a2   :  { %v6445_v44 = vadd.f32 %v10848_v35, %v10842_v33  ;;  %v6467_v43 = vmul.f32 %v10848_v35, %v10848_v35 }
 0x4a4   :  { %v6446_v61 = vadd.f32 %v10840_v25, %v6445_v44  ;;  %v6482_v49 = vadd.f32 %v6467_v43, %v6466_v55 }
 0x4a6   :  { %v6483_v20 = vadd.f32 %v6482_v49, %v6468_v59  ;;  %v10859_v42 = vpop.f32.mrb[116].mxu0  ;;  %v6447_v23 = vadd.f32 %v10846_v7, %v6446_v61 }
 0x4a7   :  { %v10862_v41 = vpop.f32.mrb[117].mxu0  ;;  %v6472_v52 = vmul.f32 %v10859_v42, %v10859_v42 }
 0x4a8   :  { %v6448_v53 = vadd.f32 %v6447_v23, %v10862_v41  ;;  %v6470_v50 = vmul.f32 %v10862_v41, %v10862_v41  ;;  %v6484_v51 = vadd.f32 %v6483_v20, %v6469_v31  ;;  %v10867_v4 = vpop.f32.mrb[118].mxu0 }
 0x4a9   :  { %v10869_v28 = vpop.f32.mrb[119].mxu0  ;;  %v6473_v5 = vmul.f32 %v10867_v4, %v10867_v4 }
 0x4aa   :  { %v6485_v36 = vadd.f32 %v6484_v51, %v6470_v50  ;;  %v6449_v10 = vadd.f32 %v6448_v53, %v10869_v28  ;;  %v6471_v0 = vmul.f32 %v10869_v28, %v10869_v28 }
 0x4ac   :  { %v6450_v48 = vadd.f32 %v10859_v42, %v6449_v10  ;;  %v6486_v9 = vadd.f32 %v6485_v36, %v6471_v0 }
 0x4ae   :  { %v6487_v60 = vadd.f32 %v6486_v9, %v6472_v52  ;;  %v10880_v56 = vadd.f32 %v10867_v4, %v6450_v48 }
 0x4b0   :  { %v10882_v63 = vadd.f32 %v6487_v60, %v6473_v5 }
 0x50a   :  { %v10884_v13 = vpop.f32.mrb[96].mxu1 }
 0x50b   :  { %v10886_v39 = vpop.f32.mrb[97].mxu1  ;;  %v6196_v22 = vmul.f32 %v10884_v13, %v10884_v13 }
 0x50c   :  { %v10888_v54 = vpop.f32.mrb[98].mxu1  ;;  %v6194_v27 = vmul.f32 %v10886_v39, %v10886_v39 }
 0x50d   :  { %v10890_v16 = vpop.f32.mrb[99].mxu1  ;;  %v6197_v34 = vmul.f32 %v10888_v54, %v10888_v54 }
 0x50e   :  { %v6173_v24 = vadd.f32 %v10890_v16, %v10886_v39  ;;  %v6195_v40 = vmul.f32 %v10890_v16, %v10890_v16 }
 0x510   :  { %v6174_v57 = vadd.f32 %v10884_v13, %v6173_v24  ;;  %v6210_v18 = vadd.f32 %v6195_v40, %v6194_v27 }
 0x512   :  { %v6211_v19 = vadd.f32 %v6210_v18, %v6196_v22  ;;  %v10903_v3 = vpop.f32.mrb[100].mxu1  ;;  %v6175_v12 = vadd.f32 %v10888_v54, %v6174_v57 }
 0x513   :  { %v10906_v2 = vpop.f32.mrb[101].mxu1  ;;  %v6200_v6 = vmul.f32 %v10903_v3, %v10903_v3 }
 0x514   :  { %v6176_v1 = vadd.f32 %v6175_v12, %v10906_v2  ;;  %v6198_v32 = vmul.f32 %v10906_v2, %v10906_v2  ;;  %v6212_v45 = vadd.f32 %v6211_v19, %v6197_v34  ;;  %v10911_v58 = vpop.f32.mrb[102].mxu1 }
 0x515   :  { %v10913_v21 = vpop.f32.mrb[103].mxu1  ;;  %v6201_v47 = vmul.f32 %v10911_v58, %v10911_v58 }
 0x516   :  { %v6213_v11 = vadd.f32 %v6212_v45, %v6198_v32  ;;  %v6177_v62 = vadd.f32 %v6176_v1, %v10913_v21  ;;  %v6199_v26 = vmul.f32 %v10913_v21, %v10913_v21 }
 0x518   :  { %v6178_v37 = vadd.f32 %v10903_v3, %v6177_v62  ;;  %v6214_v14 = vadd.f32 %v6213_v11, %v6199_v26 }
 0x51a   :  { %v6215_v8 = vadd.f32 %v6214_v14, %v6200_v6  ;;  %v10923_v29 = vpop.f32.mrb[104].mxu1  ;;  %v6179_v15 = vadd.f32 %v10911_v58, %v6178_v37 }
 0x51b   :  { %v10926_v38 = vpop.f32.mrb[105].mxu1  ;;  %v6204_v49 = vmul.f32 %v10923_v29, %v10923_v29 }
 0x51c   :  { %v6180_v30 = vadd.f32 %v6179_v15, %v10926_v38  ;;  %v6202_v17 = vmul.f32 %v10926_v38, %v10926_v38  ;;  %v6216_v55 = vadd.f32 %v6215_v8, %v6201_v47  ;;  %v10931_v59 = vpop.f32.mrb[106].mxu1 }
 0x51d   :  { %v10933_v44 = vpop.f32.mrb[107].mxu1  ;;  %v6205_v53 = vmul.f32 %v10931_v59, %v10931_v59 }
 0x51e   :  { %v6217_v43 = vadd.f32 %v6216_v55, %v6202_v17  ;;  %v6181_v31 = vadd.f32 %v6180_v30, %v10933_v44  ;;  %v6203_v61 = vmul.f32 %v10933_v44, %v10933_v44 }
 0x520   :  { %v6182_v20 = vadd.f32 %v10923_v29, %v6181_v31  ;;  %v6218_v23 = vadd.f32 %v6217_v43, %v6203_v61 }
 0x522   :  { %v6219_v50 = vadd.f32 %v6218_v23, %v6204_v49  ;;  %v10943_v51 = vpop.f32.mrb[108].mxu1  ;;  %v6183_v52 = vadd.f32 %v10931_v59, %v6182_v20 }
 0x523   :  { %v10946_v36 = vpop.f32.mrb[109].mxu1  ;;  %v6208_v40 = vmul.f32 %v10943_v51, %v10943_v51 }
 0x524   :  { %v6184_v10 = vadd.f32 %v6183_v52, %v10946_v36  ;;  %v6206_v0 = vmul.f32 %v10946_v36, %v10946_v36  ;;  %v6220_v48 = vadd.f32 %v6219_v50, %v6205_v53  ;;  %v10951_v9 = vpop.f32.mrb[110].mxu1 }
 0x525   :  { %v10953_v60 = vpop.f32.mrb[111].mxu1  ;;  %v6209_v18 = vmul.f32 %v10951_v9, %v10951_v9 }
 0x526   :  { %v6221_v5 = vadd.f32 %v6220_v48, %v6206_v0  ;;  %v6185_v27 = vadd.f32 %v6184_v10, %v10953_v60  ;;  %v6207_v24 = vmul.f32 %v10953_v60, %v10953_v60 }
 0x528   :  { %v6186_v22 = vadd.f32 %v10943_v51, %v6185_v27  ;;  %v6222_v57 = vadd.f32 %v6221_v5, %v6207_v24 }
 0x52a   :  { %v6187_v34 = vadd.f32 %v10951_v9, %v6186_v22  ;;  %v6223_v19 = vadd.f32 %v6222_v57, %v6208_v40  ;;  %v10964_v12 = vpop.f32.mrb[112].mxu1 }
 0x52b   :  { %v10966_v1 = vpop.f32.mrb[113].mxu1  ;;  %v6476_v55 = vmul.f32 %v10964_v12, %v10964_v12 }
 0x52c   :  { %v6188_v32 = vrot.slane %v6187_v34, 4  ;;  %v6224_v45 = vadd.f32 %v6223_v19, %v6209_v18  ;;  %v6452_v11 = vadd.f32 %v10880_v56, %v10966_v1  ;;  %v6474_v62 = vmul.f32 %v10966_v1, %v10966_v1  ;;  %v10972_v26 = vpop.f32.mrb[114].mxu1 }
 0x52d   :  { %v10974_v6 = vpop.f32.mrb[115].mxu1 }
 0x52e   :  { %v6189_v37 = vadd.f32 %v6188_v32, %v6187_v34  ;;  %v6225_v14 = vrot.slane %v6224_v45, 4  ;;  %v6489_v47 = vadd.f32 %v10882_v63, %v6474_v62  ;;  %v6453_v8 = vadd.f32 %v6452_v11, %v10974_v6 }
 0x52f   :  { %v6475_v15 = vmul.f32 %v10974_v6, %v10974_v6  ;;  %v6477_v63 = vmul.f32 %v10972_v26, %v10972_v26 }
 0x530   :  { %v6190_v30 = vrot.slane %v6189_v37, 2  ;;  %v6226_v17 = vadd.f32 %v6225_v14, %v6224_v45  ;;  %v6454_v56 = vadd.f32 %v10964_v12, %v6453_v8 }
 0x531   :  { %v6490_v43 = vadd.f32 %v6489_v47, %v6475_v15 }
 0x532   :  { %v6191_v31 = vadd.f32 %v6190_v30, %v6189_v37  ;;  %v6227_v61 = vrot.slane %v6226_v17, 2  ;;  %v10983_v49 = vpop.f32.mrb[116].mxu1  ;;  %v6455_v20 = vadd.f32 %v10972_v26, %v6454_v56 }
 0x533   :  { %v6491_v23 = vadd.f32 %v6490_v43, %v6476_v55  ;;  %v10988_v53 = vpop.f32.mrb[117].mxu1  ;;  %v6480_v45 = vmul.f32 %v10983_v49, %v10983_v49 }
 0x534   :  { %v6192_v50 = vrot.slane %v6191_v31, 1  ;;  %v6228_v52 = vadd.f32 %v6227_v61, %v6226_v17  ;;  %v6456_v10 = vadd.f32 %v6455_v20, %v10988_v53  ;;  %v6478_v0 = vmul.f32 %v10988_v53, %v10988_v53  ;;  %v10993_v48 = vpop.f32.mrb[118].mxu1 }
 0x535   :  { %v6492_v5 = vadd.f32 %v6491_v23, %v6477_v63  ;;  %v10995_v27 = vpop.f32.mrb[119].mxu1  ;;  %v6481_v47 = vmul.f32 %v10993_v48, %v10993_v48 }
 0x536   :  { %v6193_v24 = vadd.f32 %v6192_v50, %v6191_v31  ;;  %v6229_v40 = vrot.slane %v6228_v52, 1  ;;  %v6457_v22 = vadd.f32 %v6456_v10, %v10995_v27  ;;  %v6479_v57 = vmul.f32 %v10995_v27, %v10995_v27 }
 0x537   :  { %v6493_v18 = vadd.f32 %v6492_v5, %v6478_v0  ;;  %v6171_v0 = vld [vmem:[%s11114_s9] sm:$0x1] }
 0x538   :  { %v6230_v34 = vadd.f32 %v6229_v40, %v6228_v52  ;;  %v6231_v19 = vmul.f32 0.0078125, %v6193_v24  ;;  %v6458_v32 = vadd.f32 %v10983_v49, %v6457_v22 }
 0x539   :  { %v6494_v11 = vadd.f32 %v6493_v18, %v6479_v57 }
 0x53a   :  { %v6232_v62 = vmul.f32 0.0078125, %v6230_v34  ;;  %v6233_v37 = vmul.f32 %v6231_v19, %v6231_v19  ;;  %v6459_v14 = vadd.f32 %v10993_v48, %v6458_v32  ;;  %v6172_v34 = vld [vmem:[%s11115_s10] sm:$0x1] }
 0x53b   :  { %v6495_v8 = vadd.f32 %v6494_v11, %v6480_v45 }
 0x53c   :  { %v6234_v15 = vsub.f32 %v6232_v62, %v6233_v37  ;;  %v6460_v30 = vrot.slane %v6459_v14, 4 }
 0x53d   :  { %v6496_v17 = vadd.f32 %v6495_v8, %v6481_v47 }
 0x53e   :  { %v6235_v56 = vadd.f32 1e-05, %v6234_v15  ;;  %v6461_v55 = vadd.f32 %v6460_v30, %v6459_v14 }
 0x53f   :  { %v6497_v43 = vrot.slane %v6496_v17, 4 }
 0x540   :  { %7747 = vrsqrt.f32 %v6235_v56  ;;  %v6462_v31 = vrot.slane %v6461_v55, 2 }
 0x541   :  { %v6498_v61 = vadd.f32 %v6497_v43, %v6496_v17 }
 0x542   :  { %v6463_v20 = vadd.f32 %v6462_v31, %v6461_v55 }
 0x543   :  { %v6499_v63 = vrot.slane %v6498_v61, 2 }
 0x544   :  { %v6464_v23 = vrot.slane %v6463_v20, 1 }
 0x545   :  { %v6500_v50 = vadd.f32 %v6499_v63, %v6498_v61 }
 0x546   :  { %v6465_v52 = vadd.f32 %v6464_v23, %v6463_v20 }
 0x547   :  { %v6501_v10 = vrot.slane %v6500_v50, 1 }
 0x548   :  { %v6503_v5 = vmul.f32 0.0078125, %v6465_v52 }
 0x549   :  { %v6502_v24 = vadd.f32 %v6501_v10, %v6500_v50 }
 0x54a   :  { %v7748_v40 = vpop.eup %7747  ;;  %v6505_v22 = vmul.f32 %v6503_v5, %v6503_v5 }
 0x54b   :  { %v6237_v57 = vmul.f32 %v7748_v40, %v6171_v0  ;;  %v6504_v18 = vmul.f32 0.0078125, %v6502_v24 }
 0x54d   :  { %v6241_v32 = vrot.slane %v6237_v57, %v11348_v46  ;;  %v6258_v45 = vmul.f32 %v6237_v57, %v6231_v19  ;;  %v6506_v11 = vsub.f32 %v6504_v18, %v6505_v22 }
 0x54f   :  { %v6255_v62 = vmul.f32 %v6241_v32, %v10953_v60  ;;  %v6259_v37 = vsub.f32 %v6172_v34, %v6258_v45  ;;  %v6242_v14 = vmul.f32 %v6241_v32, %v10886_v39  ;;  %v6243_v47 = vmul.f32 %v6241_v32, %v10890_v16  ;;  %v6444_v45 = vld [vmem:[%s11117_s12] sm:$0x1] }
 0x550   :  { %v6244_v8 = vmul.f32 %v10884_v13, %v6241_v32  ;;  %v6245_v15 = vmul.f32 %v10888_v54, %v6241_v32  ;;  %v6246_v30 = vmul.f32 %v6241_v32, %v10906_v2  ;;  %v6247_v17 = vmul.f32 %v6241_v32, %v10913_v21 }
 0x551   :  { %v6264_v56 = vrot.slane %v6259_v37, %v11348_v46  ;;  %v6248_v19 = vmul.f32 %v10903_v3, %v6241_v32  ;;  %v6249_v55 = vmul.f32 %v10911_v58, %v6241_v32  ;;  %v6250_v60 = vmul.f32 %v6241_v32, %v10926_v38 }
 0x552   :  { %v6251_v39 = vmul.f32 %v6241_v32, %v10933_v44  ;;  %v6252_v16 = vmul.f32 %v10923_v29, %v6241_v32  ;;  %v6253_v13 = vmul.f32 %v10931_v59, %v6241_v32  ;;  %v6254_v54 = vmul.f32 %v6241_v32, %v10946_v36 }
 0x553   :  { %v11028_v43 = vadd.f32 %v6264_v56, %v6255_v62  ;;  %v6256_v2 = vmul.f32 %v10943_v51, %v6241_v32  ;;  %v6257_v21 = vmul.f32 %v10951_v9, %v6241_v32  ;;  %v6266_v31 = vadd.f32 %v6264_v56, %v6242_v14  ;;  %v6443_v51 = vld [vmem:[%s11116_s11] sm:$0x1] }
 0x554   :  { %v6267_v3 = vadd.f32 %v6264_v56, %v6243_v47  ;;  %v6268_v61 = vadd.f32 %v6264_v56, %v6244_v8  ;;  %v6269_v58 = vadd.f32 %v6264_v56, %v6245_v15  ;;  %v6270_v20 = vadd.f32 %v6264_v56, %v6246_v30 }
 0x555   :  { %v6271_v38 = vadd.f32 %v6264_v56, %v6247_v17  ;;  %v6272_v63 = vadd.f32 %v6264_v56, %v6248_v19  ;;  %v6273_v44 = vadd.f32 %v6264_v56, %v6249_v55  ;;  %v6274_v23 = vadd.f32 %v6264_v56, %v6250_v60 }
 0x556   :  { %v6275_v29 = vadd.f32 %v6264_v56, %v6251_v39  ;;  %v6276_v50 = vadd.f32 %v6264_v56, %v6252_v16  ;;  %v6277_v59 = vadd.f32 %v6264_v56, %v6253_v13  ;;  %v6278_v52 = vadd.f32 %v6264_v56, %v6254_v54 }
 0x557   :  { %v6280_v36 = vadd.f32 %v6264_v56, %v6256_v2  ;;  %v6281_v10 = vadd.f32 %v6264_v56, %v6257_v21  ;;  %v6507_v0 = vadd.f32 1e-05, %v6506_v11 }
 0x559   :  { %7749 = vrsqrt.f32 %v6507_v0 }
 0x563   :  { %v7750_v9 = vpop.eup %7749 }
 0x564   :  { %v6509_v24 = vmul.f32 %v7750_v9, %v6443_v51 }
 0x566   :  { %v6513_v40 = vrot.slane %v6509_v24, %v11348_v46  ;;  %v6530_v22 = vmul.f32 %v6509_v24, %v6503_v5 }
 0x568   :  { %v6514_v57 = vmul.f32 %v6513_v40, %v10842_v33  ;;  %v6515_v18 = vmul.f32 %v6513_v40, %v10848_v35  ;;  %v6516_v34 = vmul.f32 %v10840_v25, %v6513_v40  ;;  %v6517_v32 = vmul.f32 %v10846_v7, %v6513_v40 }
 0x569   :  { %v6518_v11 = vmul.f32 %v6513_v40, %v10862_v41  ;;  %v6519_v62 = vmul.f32 %v6513_v40, %v10869_v28  ;;  %v6520_v37 = vmul.f32 %v10859_v42, %v6513_v40  ;;  %v6521_v5 = vmul.f32 %v10867_v4, %v6513_v40 }
 0x56a   :  { %v6522_v33 = vmul.f32 %v6513_v40, %v10966_v1  ;;  %v6523_v35 = vmul.f32 %v6513_v40, %v10974_v6  ;;  %v6524_v25 = vmul.f32 %v10964_v12, %v6513_v40  ;;  %v6525_v7 = vmul.f32 %v10972_v26, %v6513_v40 }
 0x56b   :  { %v6526_v14 = vmul.f32 %v6513_v40, %v10988_v53  ;;  %v6527_v47 = vmul.f32 %v6513_v40, %v10995_v27  ;;  %v6528_v41 = vmul.f32 %v10983_v49, %v6513_v40  ;;  %v6529_v28 = vmul.f32 %v10993_v48, %v6513_v40 }
 0x56c   :  { %v6531_v8 = vsub.f32 %v6444_v45, %v6530_v22 }
 0x56e   :  { %v6536_v42 = vrot.slane %v6531_v8, %v11348_v46 }
 0x570   :  { %v6538_v4 = vadd.f32 %v6536_v42, %v6514_v57  ;;  %v6539_v15 = vadd.f32 %v6536_v42, %v6515_v18  ;;  %v6540_v1 = vadd.f32 %v6536_v42, %v6516_v34  ;;  %v6541_v30 = vadd.f32 %v6536_v42, %v6517_v32 }
 0x571   :  { %v6542_v6 = vadd.f32 %v6536_v42, %v6518_v11  ;;  %v6543_v17 = vadd.f32 %v6536_v42, %v6519_v62  ;;  %v6544_v12 = vadd.f32 %v6536_v42, %v6520_v37  ;;  %v6545_v56 = vadd.f32 %v6536_v42, %v6521_v5 }
 0x572   :  { %v6546_v26 = vadd.f32 %v6536_v42, %v6522_v33  ;;  %v6547_v19 = vadd.f32 %v6536_v42, %v6523_v35  ;;  %v6548_v53 = vadd.f32 %v6536_v42, %v6524_v25  ;;  %v6549_v55 = vadd.f32 %v6536_v42, %v6525_v7 }
 0x573   :  { %v6550_v27 = vadd.f32 %v6536_v42, %v6526_v14  ;;  %v6551_v60 = vadd.f32 %v6536_v42, %v6527_v47  ;;  %v6552_v49 = vadd.f32 %v6536_v42, %v6528_v41  ;;  %v6553_v39 = vadd.f32 %v6536_v42, %v6529_v28 }
 0x574   :  { %v6554_v48 = vadd.f32 %v6538_v4, %v6266_v31  ;;  %v6555_v16 = vadd.f32 %v6539_v15, %v6267_v3  ;;  %v6556_v13 = vadd.f32 %v6540_v1, %v6268_v61  ;;  %v6557_v46 = vadd.f32 %v6541_v30, %v6269_v58 }
 0x575   :  { %v6558_v54 = vadd.f32 %v6542_v6, %v6270_v20  ;;  %v6559_v2 = vadd.f32 %v6543_v17, %v6271_v38  ;;  %v6560_v21 = vadd.f32 %v6544_v12, %v6272_v63  ;;  %v6561_v0 = vadd.f32 %v6545_v56, %v6273_v44 }
 0x576   :  { %v6562_v51 = vadd.f32 %v6546_v26, %v6274_v23  ;;  %v6563_v9 = vadd.f32 %v6547_v19, %v6275_v29  ;;  %v6564_v24 = vadd.f32 %v6548_v53, %v6276_v50  ;;  %v6565_v40 = vadd.f32 %v6549_v55, %v6277_v59 }
 0x577   :  { %v6566_v22 = vadd.f32 %v6550_v27, %v6278_v52  ;;  %v6567_v57 = vadd.f32 %v6551_v60, %v11028_v43  ;;  %v6568_v18 = vadd.f32 %v6552_v49, %v6280_v36  ;;  %v6569_v34 = vadd.f32 %v6553_v39, %v6281_v10 }
 0x578   :  { %v6570_v32 = vmax.f32 %v6554_v48, 0.0  ;;  %v6571_v45 = vmax.f32 %v6555_v16, 0.0  ;;  %v6572_v11 = vmax.f32 %v6556_v13, 0.0  ;;  %v6573_v31 = vmax.f32 %v6557_v46, 0.0 }
 0x579   :  { %v6574_v3 = vmax.f32 %v6558_v54, 0.0  ;;  %v6575_v61 = vmax.f32 %v6559_v2, 0.0  ;;  %v6576_v58 = vmax.f32 %v6560_v21, 0.0  ;;  %v6577_v20 = vmax.f32 %v6561_v0, 0.0 }
 0x57a   :  { %v6578_v38 = vmax.f32 %v6562_v51, 0.0  ;;  %v6579_v63 = vmax.f32 %v6563_v9, 0.0  ;;  %v6580_v44 = vmax.f32 %v6564_v24, 0.0  ;;  %v6581_v23 = vmax.f32 %v6565_v40, 0.0  ;;  %6586 = vst [vmem:[%s11118_s13] sm:$0xff] %v6570_v32  ;;  %6587 = vst [vmem:[%s11118_s13 + $0x8] sm:$0xff] %v6571_v45 }
 0x57b   :  { %6588 = vst [vmem:[%s11118_s13 + $0x10] sm:$0xff] %v6572_v11  ;;  %6589 = vst [vmem:[%s11118_s13 + $0x18] sm:$0xff] %v6573_v31  ;;  %v6582_v43 = vmax.f32 %v6566_v22, 0.0  ;;  %v6583_v29 = vmax.f32 %v6567_v57, 0.0  ;;  %v6584_v50 = vmax.f32 %v6568_v18, 0.0  ;;  %v6585_v59 = vmax.f32 %v6569_v34, 0.0 }
 0x57c   :  { %6590 = vst [vmem:[%s11118_s13 + $0x20] sm:$0xff] %v6574_v3  ;;  %6591 = vst [vmem:[%s11118_s13 + $0x28] sm:$0xff] %v6575_v61 }
 0x57d   :  { %6592 = vst [vmem:[%s11118_s13 + $0x30] sm:$0xff] %v6576_v58  ;;  %6593 = vst [vmem:[%s11118_s13 + $0x38] sm:$0xff] %v6577_v20 }
 0x57e   :  { %6594 = vst [vmem:[%s11118_s13 + $0x40] sm:$0xff] %v6578_v38  ;;  %6595 = vst [vmem:[%s11118_s13 + $0x48] sm:$0xff] %v6579_v63 }
 0x57f   :  { %6596 = vst [vmem:[%s11118_s13 + $0x50] sm:$0xff] %v6580_v44  ;;  %6597 = vst [vmem:[%s11118_s13 + $0x58] sm:$0xff] %v6581_v23 }
 0x580   :  { %6598 = vst [vmem:[%s11118_s13 + $0x60] sm:$0xff] %v6582_v43  ;;  %6599 = vst [vmem:[%s11118_s13 + $0x68] sm:$0xff] %v6583_v29 }
 0x581   :  { %6600 = vst [vmem:[%s11118_s13 + $0x70] sm:$0xff] %v6584_v50  ;;  %6601 = vst [vmem:[%s11118_s13 + $0x78] sm:$0xff] %v6585_v59 }

</bundles_post_ra>
